<compile_context>
chip_gen: v6e
topology: v6e:2x2x1
jax: 0.10.0
libtpu: 0.0.40
codegen_flags: <defaults>
</compile_context>

<pallas_src>
import jax
import jax.numpy as jnp
from jax.experimental import pallas as pl
from jax.experimental.pallas import tpu as pltpu

IN_DIM = 96 * 96 * 3      # 27648
HID = 512
OUT_DIM = 4
TK = 6912                 # reduction tile: 27648 / 6912 = 4 grid steps
NK = IN_DIM // TK


def fused_mlp_kernel(x_ref, w1_ref, b1_ref, w2_ref, b2_ref, w3_ref, b3_ref,
                     o_ref, acc_ref):
    """K-tiled layer-1 matmul with layers 2+3 fused into the finalize step."""
    k = pl.program_id(0)

    @pl.when(k == 0)
    def _():
        acc_ref[...] = jnp.zeros_like(acc_ref)

    # (B, TK) bf16 @ (TK, HID) bf16 -> f32 accumulation on the MXU.
    acc_ref[...] += jnp.dot(x_ref[...], w1_ref[...],
                            preferred_element_type=jnp.float32)

    @pl.when(k == pl.num_programs(0) - 1)
    def _():
        h1 = jnp.maximum(acc_ref[...] + b1_ref[...], 0.0)
        h2 = jnp.dot(h1, w2_ref[...], preferred_element_type=jnp.float32)
        h2 = jnp.maximum(h2 + b2_ref[...], 0.0)
        out = jnp.dot(h2, w3_ref[...], preferred_element_type=jnp.float32)
        o_ref[...] = (out + b3_ref[...]).astype(o_ref.dtype)


def prepare_params(w1, b1, w2, b2, w3, b3):
    """One-time parameter prep: persist W1 in bf16 (done OUTSIDE the forward
    path so the dominant weight stream is 27 MiB/call, not 108 MiB/call)."""
    return (w1.astype(jnp.bfloat16), b1, w2, b2, w3, b3)


def neural_network_forward(x, w1_bf, b1, w2, b2, w3, b3):
    # Flatten exactly like nn.Flatten(): (B, C, H, W) -> (B, C*H*W)
    B = x.shape[0]
    xf = x.reshape(B, -1)
    assert xf.shape[1] == IN_DIM
    # x cast is negligible (~108 KiB); bf16 layer-1 operands with f32 MXU
    # accumulation is an intentional precision tradeoff (layers 2/3 stay f32).
    x_bf = xf.astype(jnp.bfloat16)

    cost = pl.CostEstimate(
        flops=2 * B * (IN_DIM * HID + HID * HID + HID * OUT_DIM),
        transcendentals=0,
        bytes_accessed=(x_bf.size * 2 + w1_bf.size * 2 + b1.size * 4
                        + w2.size * 4 + b2.size * 4 + w3.size * 4
                        + b3.size * 4 + B * OUT_DIM * 4),
    )

    out = pl.pallas_call(
        fused_mlp_kernel,
        out_shape=jax.ShapeDtypeStruct((B, OUT_DIM), jnp.float32),
        grid_spec=pltpu.PrefetchScalarGridSpec(
            num_scalar_prefetch=0,
            grid=(NK,),                                          # reduction only
            in_specs=[
                pl.BlockSpec((B, TK), lambda k: (0, k)),         # x K-tile
                pl.BlockSpec((TK, HID), lambda k: (k, 0)),       # W1 K-tile (contiguous, full width)
                pl.BlockSpec((1, HID), lambda k: (0, 0)),        # b1 (resident)
                pl.BlockSpec((HID, HID), lambda k: (0, 0)),      # W2 (resident)
                pl.BlockSpec((1, HID), lambda k: (0, 0)),        # b2 (resident)
                pl.BlockSpec((HID, OUT_DIM), lambda k: (0, 0)),  # W3 (resident)
                pl.BlockSpec((1, OUT_DIM), lambda k: (0, 0)),    # b3 (resident)
            ],
            out_specs=pl.BlockSpec((B, OUT_DIM), lambda k: (0, 0)),
            scratch_shapes=[pltpu.VMEM((B, HID), jnp.float32)],  # h1 accumulator
        ),
        compiler_params=pltpu.CompilerParams(
            dimension_semantics=("arbitrary",),
            vmem_limit_bytes=40 * 1024 * 1024,
        ),
        cost_estimate=cost,
    )(x_bf, w1_bf, b1, w2, b2, w3, b3)
    return out


if __name__ == "__main__":
    key = jax.random.PRNGKey(0)
    kx, k1, k2, k3, kb1, kb2, kb3 = jax.random.split(key, 7)

    B = 2
    x = jax.random.normal(kx, (B, 3, 96, 96), dtype=jnp.float32)

    # Deterministic parameter init (stored as (in, out); forward is x @ W + b,
    # equivalent to PyTorch's x @ weight.T + bias with weight = W.T).
    scale1 = 1.0 / jnp.sqrt(IN_DIM)
    scale2 = 1.0 / jnp.sqrt(HID)
    w1 = jax.random.uniform(k1, (IN_DIM, HID), jnp.float32, -scale1, scale1)
    b1 = jax.random.uniform(kb1, (1, HID), jnp.float32, -scale1, scale1)
    w2 = jax.random.uniform(k2, (HID, HID), jnp.float32, -scale2, scale2)
    b2 = jax.random.uniform(kb2, (1, HID), jnp.float32, -scale2, scale2)
    w3 = jax.random.uniform(k3, (HID, OUT_DIM), jnp.float32, -scale2, scale2)
    b3 = jax.random.uniform(kb3, (1, OUT_DIM), jnp.float32, -scale2, scale2)

    # One-time prep (bf16 W1 persisted outside the forward path).
    params = prepare_params(w1, b1, w2, b2, w3, b3)

    out = neural_network_forward(x, *params)
    out = jax.block_until_ready(out)

    # Pure-JAX reference at matching precision (bf16 layer-1 inputs, f32 acc).
    xf = x.reshape(B, -1)
    h1 = jnp.maximum(
        jnp.dot(xf.astype(jnp.bfloat16), w1.astype(jnp.bfloat16),
                preferred_element_type=jnp.float32) + b1, 0.0)
    h2 = jnp.maximum(
        jnp.dot(h1, w2, preferred_element_type=jnp.float32) + b2, 0.0)
    ref = jnp.dot(h2, w3, preferred_element_type=jnp.float32) + b3

    assert out.shape == (B, OUT_DIM)
    assert jnp.allclose(out, ref, rtol=1e-3, atol=1e-3), "mismatch vs reference"

    print("KERNEL_OK")
</pallas_src>

<mosaic_0001>
module attributes {stable_mosaic.version = 11 : i64} {
  func.func @fused_mlp_kernel(%arg0: i32, %arg1: memref<2x6912xbf16, #tpu.memory_space<vmem>>, %arg2: memref<6912x512xbf16, #tpu.memory_space<vmem>>, %arg3: memref<1x512xf32, #tpu.memory_space<vmem>>, %arg4: memref<512x512xf32, #tpu.memory_space<vmem>>, %arg5: memref<1x512xf32, #tpu.memory_space<vmem>>, %arg6: memref<512x4xf32, #tpu.memory_space<vmem>>, %arg7: memref<1x4xf32, #tpu.memory_space<vmem>>, %arg8: memref<2x4xf32, #tpu.memory_space<vmem>>, %arg9: memref<2x512xf32, #tpu.memory_space<vmem>>) attributes {dimension_semantics = [#tpu.dimension_semantics<arbitrary>], iteration_bounds = array<i64: 4>, scalar_prefetch = 0 : i64, scratch_operands = 1 : i64, tpu.core_type = #tpu.core_type<tc>, window_params = [{transform_indices = @transform_0, window_bounds = array<i64: 2, 6912>}, {transform_indices = @transform_1, window_bounds = array<i64: 6912, 512>}, {pipeline_mode = #tpu.pipeline_mode<synchronous>, transform_indices = @transform_2, window_bounds = array<i64: 1, 512>}, {pipeline_mode = #tpu.pipeline_mode<synchronous>, transform_indices = @transform_3, window_bounds = array<i64: 512, 512>}, {pipeline_mode = #tpu.pipeline_mode<synchronous>, transform_indices = @transform_4, window_bounds = array<i64: 1, 512>}, {pipeline_mode = #tpu.pipeline_mode<synchronous>, transform_indices = @transform_5, window_bounds = array<i64: 512, 4>}, {pipeline_mode = #tpu.pipeline_mode<synchronous>, transform_indices = @transform_6, window_bounds = array<i64: 1, 4>}, {pipeline_mode = #tpu.pipeline_mode<synchronous>, transform_indices = @transform_7, window_bounds = array<i64: 2, 4>}]} {
    %c0_i32 = arith.constant 0 : i32
    %0 = arith.cmpi eq, %arg0, %c0_i32 : i32
    %1 = arith.extui %0 : i1 to i32
    %c0_i32_0 = arith.constant 0 : i32
    %2 = arith.cmpi ne, %1, %c0_i32_0 : i32
    scf.if %2 {
      %cst_9 = arith.constant 0.000000e+00 : f32
      %12 = vector.broadcast %cst_9 : f32 to vector<2x512xf32>
      %c0_10 = arith.constant 0 : index
      %c0_11 = arith.constant 0 : index
      %13 = vector.load %arg9[%c0_10, %c0_11] : memref<2x512xf32, #tpu.memory_space<vmem>>, vector<2x512xf32>
      tpu.vector_store %arg9[%c0_10, %c0_11], %12 {strides = array<i32>} : memref<2x512xf32, #tpu.memory_space<vmem>>, vector<2x512xf32>,
    } else {
    }
    %c0 = arith.constant 0 : index
    %c0_1 = arith.constant 0 : index
    %3 = vector.load %arg9[%c0, %c0_1] : memref<2x512xf32, #tpu.memory_space<vmem>>, vector<2x512xf32>
    %c0_2 = arith.constant 0 : index
    %c0_3 = arith.constant 0 : index
    %4 = vector.load %arg1[%c0_2, %c0_3] : memref<2x6912xbf16, #tpu.memory_space<vmem>>, vector<2x6912xbf16>
    %c0_4 = arith.constant 0 : index
    %c0_5 = arith.constant 0 : index
    %5 = vector.load %arg2[%c0_4, %c0_5] : memref<6912x512xbf16, #tpu.memory_space<vmem>>, vector<6912x512xbf16>
    %cst = arith.constant dense<0.000000e+00> : vector<2x512xf32>
    %6 = tpu.matmul %4, %5, %cst {dimension_numbers = #tpu.dot_dimension_numbers<[1], [0], [0], [1], [0, 0, 1, 1], [], []>} : vector<2x6912xbf16>, vector<6912x512xbf16>, vector<2x512xf32> -> vector<2x512xf32>
    %7 = arith.addf %3, %6 : vector<2x512xf32>
    %c0_6 = arith.constant 0 : index
    %c0_7 = arith.constant 0 : index
    %8 = vector.load %arg9[%c0_6, %c0_7] : memref<2x512xf32, #tpu.memory_space<vmem>>, vector<2x512xf32>
    tpu.vector_store %arg9[%c0_6, %c0_7], %7 {strides = array<i32>} : memref<2x512xf32, #tpu.memory_space<vmem>>, vector<2x512xf32>,
    %c3_i32 = arith.constant 3 : i32
    %9 = arith.cmpi eq, %arg0, %c3_i32 : i32
    %10 = arith.extui %9 : i1 to i32
    %c0_i32_8 = arith.constant 0 : i32
    %11 = arith.cmpi ne, %10, %c0_i32_8 : i32
    scf.if %11 {
      %c0_9 = arith.constant 0 : index
      %c0_10 = arith.constant 0 : index
      %12 = vector.load %arg9[%c0_9, %c0_10] : memref<2x512xf32, #tpu.memory_space<vmem>>, vector<2x512xf32>
      %c0_11 = arith.constant 0 : index
      %c0_12 = arith.constant 0 : index
      %13 = vector.load %arg3[%c0_11, %c0_12] : memref<1x512xf32, #tpu.memory_space<vmem>>, vector<1x512xf32>
      %14 = vector.broadcast %13 : vector<1x512xf32> to vector<2x512xf32>
      %15 = arith.addf %12, %14 : vector<2x512xf32>
      %cst_13 = arith.constant 0.000000e+00 : f32
      %16 = vector.broadcast %cst_13 : f32 to vector<2x512xf32>
      %17 = arith.maximumf %15, %16 : vector<2x512xf32>
      %c0_14 = arith.constant 0 : index
      %c0_15 = arith.constant 0 : index
      %18 = vector.load %arg4[%c0_14, %c0_15] : memref<512x512xf32, #tpu.memory_space<vmem>>, vector<512x512xf32>
      %cst_16 = arith.constant dense<0.000000e+00> : vector<2x512xf32>
      %19 = tpu.matmul %17, %18, %cst_16 {dimension_numbers = #tpu.dot_dimension_numbers<[1], [0], [0], [1], [0, 0, 1, 1], [], []>} : vector<2x512xf32>, vector<512x512xf32>, vector<2x512xf32> -> vector<2x512xf32>
      %c0_17 = arith.constant 0 : index
      %c0_18 = arith.constant 0 : index
      %20 = vector.load %arg5[%c0_17, %c0_18] : memref<1x512xf32, #tpu.memory_space<vmem>>, vector<1x512xf32>
      %21 = vector.broadcast %20 : vector<1x512xf32> to vector<2x512xf32>
      %22 = arith.addf %19, %21 : vector<2x512xf32>
      %cst_19 = arith.constant 0.000000e+00 : f32
      %23 = vector.broadcast %cst_19 : f32 to vector<2x512xf32>
      %24 = arith.maximumf %22, %23 : vector<2x512xf32>
      %c0_20 = arith.constant 0 : index
      %c0_21 = arith.constant 0 : index
      %25 = vector.load %arg6[%c0_20, %c0_21] : memref<512x4xf32, #tpu.memory_space<vmem>>, vector<512x4xf32>
      %cst_22 = arith.constant dense<0.000000e+00> : vector<2x4xf32>
      %26 = tpu.matmul %24, %25, %cst_22 {dimension_numbers = #tpu.dot_dimension_numbers<[1], [0], [0], [1], [0, 0, 1, 1], [], []>} : vector<2x512xf32>, vector<512x4xf32>, vector<2x4xf32> -> vector<2x4xf32>
      %c0_23 = arith.constant 0 : index
      %c0_24 = arith.constant 0 : index
      %27 = vector.load %arg7[%c0_23, %c0_24] : memref<1x4xf32, #tpu.memory_space<vmem>>, vector<1x4xf32>
      %28 = vector.broadcast %27 : vector<1x4xf32> to vector<2x4xf32>
      %29 = arith.addf %26, %28 : vector<2x4xf32>
      %c0_25 = arith.constant 0 : index
      %c0_26 = arith.constant 0 : index
      %30 = vector.load %arg8[%c0_25, %c0_26] : memref<2x4xf32, #tpu.memory_space<vmem>>, vector<2x4xf32>
      tpu.vector_store %arg8[%c0_25, %c0_26], %29 {strides = array<i32>} : memref<2x4xf32, #tpu.memory_space<vmem>>, vector<2x4xf32>,
    } else {
    }
    return
  }
  func.func @transform_0(%arg0: i32) -> (i32, i32) {
    %c0_i32 = arith.constant 0 : i32
    %c0_i32_0 = arith.constant 0 : i32
    return %c0_i32, %arg0 : i32, i32
  }
  func.func @transform_1(%arg0: i32) -> (i32, i32) {
    %c0_i32 = arith.constant 0 : i32
    %c0_i32_0 = arith.constant 0 : i32
    return %arg0, %c0_i32 : i32, i32
  }
  func.func @transform_2(%arg0: i32) -> (i32, i32) {
    %c0_i32 = arith.constant 0 : i32
    %c0_i32_0 = arith.constant 0 : i32
    %c0_i32_1 = arith.constant 0 : i32
    return %c0_i32, %c0_i32_0 : i32, i32
  }
  func.func @transform_3(%arg0: i32) -> (i32, i32) {
    %c0_i32 = arith.constant 0 : i32
    %c0_i32_0 = arith.constant 0 : i32
    %c0_i32_1 = arith.constant 0 : i32
    return %c0_i32, %c0_i32_0 : i32, i32
  }
  func.func @transform_4(%arg0: i32) -> (i32, i32) {
    %c0_i32 = arith.constant 0 : i32
    %c0_i32_0 = arith.constant 0 : i32
    %c0_i32_1 = arith.constant 0 : i32
    return %c0_i32, %c0_i32_0 : i32, i32
  }
  func.func @transform_5(%arg0: i32) -> (i32, i32) {
    %c0_i32 = arith.constant 0 : i32
    %c0_i32_0 = arith.constant 0 : i32
    %c0_i32_1 = arith.constant 0 : i32
    return %c0_i32, %c0_i32_0 : i32, i32
  }
  func.func @transform_6(%arg0: i32) -> (i32, i32) {
    %c0_i32 = arith.constant 0 : i32
    %c0_i32_0 = arith.constant 0 : i32
    %c0_i32_1 = arith.constant 0 : i32
    return %c0_i32, %c0_i32_0 : i32, i32
  }
  func.func @transform_7(%arg0: i32) -> (i32, i32) {
    %c0_i32 = arith.constant 0 : i32
    %c0_i32_0 = arith.constant 0 : i32
    %c0_i32_1 = arith.constant 0 : i32
    return %c0_i32, %c0_i32_0 : i32, i32
  }
}

</mosaic_0001>

<bundles_post_ra>
// kernel: tpu_custom_call.1
= control target key start
LH: loop header
LB: loop body
LE: loop exit
PB: predicated region body
PF: predicated region fallthrough
CT: control target
= control target key end

     0   :  { %12 = vsyncpa [#allocation4], 0  ;;  %s21950_s0 = inlined_call_operand.hbm [shape: bf16[2,27648], index: 0, kind: input, shape index: {}]   ;;  %s21951_s1 = inlined_call_operand.hbm [shape: bf16[27648,512], index: 1, kind: input, shape index: {}]   ;;  %s21952_s2 = inlined_call_operand.hbm [shape: f32[1,512], index: 2, kind: input, shape index: {}]   ;;  %s21953_s3 = inlined_call_operand.hbm [shape: f32[512,512], index: 3, kind: input, shape index: {}]   ;;  %s21954_s4 = inlined_call_operand.hbm [shape: f32[1,512], index: 4, kind: input, shape index: {}]   ;;  %s21955_s5 = inlined_call_operand.vmem [shape: f32[512,4], index: 5, kind: input, shape index: {}]   ;;  %s21956_s6 = inlined_call_operand.hbm [shape: f32[1,4], index: 6, kind: input, shape index: {}]   ;;  %s21957_s7 = inlined_call_operand.hbm [shape: f32[2,4], index: 7, kind: output, shape index: {}]  }
   0x1   :  { %14 = vsyncpa [#allocation4 + $0x1], 0 }
   0x2   :  { %15 = vsyncpa [#allocation7], 0 }
   0x3   :  { %17 = vsyncpa [#allocation7 + $0x1], 0 }
   0x4   :  { %18 = vsyncpa [#allocation10], 0 }
   0x5   :  { %19 = vsyncpa [#allocation13], 0 }
   0x6   :  { %20 = vsyncpa [#allocation5], 0  ;;  %s19181_s24 = smov 0   ;;  %s19183_s25 = smov 0  }
   0x7   :  { %s19185_s26 = smov 0   ;;  %s19187_s27 = smov 0  }
   0x8 LB: > { %s19127_s28 = smov [#allocation8]   ;;  %s19202_s30 = sadd.s32 4294967295, %s19125_s27   ;;  %s19125_s27 = sphi %s19187_s27, %s22012_s27   ;;  %s19121_s26 = sphi %s19185_s26, %s22011_s26   ;;  %s19117_s25 = sphi %s19183_s25, %s22010_s25   ;;  %s19113_s24 = sphi %s19181_s24, %s22009_s24  }
   0x9   : > { %s222_s29 = sshll.u32 %s19127_s28, 4  ;;  %p14362_p0 = scmp.ge.s32.totalorder %s19125_s27, 1  ;;  %s223_s29 = int_to_ptr.vmem [resolvable:$true] %s222_s29 }
   0xa   : > { %p21958_p1 = scmp.eq.s32.totalorder %s19202_s30, 0  ;;  %p209_p2 = scmp.lt.s32.totalorder %s19125_s27, 5 }
   0xb   : > { %s19128_s9 = smov [#allocation9]   ;;  %s19129_s12 = smov [#allocation11]  }
   0xc   : > { %p19208_p4 = pnand %p14362_p0, %p209_p2  ;;  %s232_s10 = sshll.u32 %s19128_s9, 4  ;;  %s19214_s10 = int_to_ptr.vmem [resolvable:$true] %s232_s10 }
   0xd   : > { %s246_s13 = sshll.u32 %s19129_s12, 4  ;;  %s18898_s14 = scalar_lea.vmem %s223_s29, 64  ;;  %s19222_s13 = int_to_ptr.vmem [resolvable:$true] %s246_s13 }
   0xe   : > { %s21973_s8 = scalar_select %p19208_p4, 1, 0 }
   0xf   : > { %p16213_p5 = pneg %p19208_p4  ;;  %p18899_p8 = scmp.ne.s32.totalorder %s223_s29, %s18898_s14 }
  0x10   : > { %p18906_p11 = scmp.lt.s32.totalorder %s223_s29, %s223_s29  ;;  %p18907_p12 = scmp.lt.s32.totalorder %s18898_s14, %s18898_s14 }
  0x11   : > { %p19218_p6 = pnand %p16213_p5, %p21958_p1 }
  0x12   : > { %p18908_p13 = por %p18907_p12, %p18906_p11 }
  0x13   : > { %p18889_p7 = pneg %p19218_p6 }
  0x15   : > { %p18901_p9 = pnand %p18899_p8, %p18889_p7 }
  0x17   : > { %p18902_p10 = pneg %p18901_p9 }
  0x19   : > { %p18909_p0 = pnand %p18908_p13, %p18902_p10 }
  0x1b   : > { %18912 = shalt.err (!%p18909_p0)
}
  0x1c   : > { %16216 = dma.hbm_to_vmem [thread:$0]  (!%p19218_p6), %s21952_s2, 64, %s223_s29, [#allocation7]  }
  0x1d   : > { %s18924_s17 = scalar_lea.vmem %s19214_s10, 32768  ;;  %p18932_p9 = scmp.lt.s32.totalorder %s19214_s10, %s19214_s10 }
  0x1e   : > { %p18925_p2 = scmp.ne.s32.totalorder %s19214_s10, %s18924_s17  ;;  %p18933_p10 = scmp.lt.s32.totalorder %s18924_s17, %s18924_s17 }
  0x20   : > { %p18927_p5 = pnand %p18925_p2, %p18889_p7  ;;  %p18934_p11 = por %p18933_p10, %p18932_p9 }
  0x22   : > { %p18928_p8 = pneg %p18927_p5 }
  0x24   : > { %p18935_p12 = pnand %p18934_p11, %p18928_p8 }
  0x26   : > { %18938 = shalt.err (!%p18935_p12)
}
  0x27   : > { %s19130_s18 = smov 512   ;;  %s19131_s19 = smov 32  }
  0x28   : > { %16219 = dma.hbm_to_vmem [thread:$0]  (!%p19218_p6), %s21953_s3, 32768, %s19214_s10, [#allocation10], %s19130_s18, %s19130_s18, %s19131_s19  }
  0x29   : > { %s18950_s22 = scalar_lea.vmem %s19222_s13, 64  ;;  %p18958_p5 = scmp.lt.s32.totalorder %s19222_s13, %s19222_s13 }
  0x2a   : > { %p18951_p13 = scmp.ne.s32.totalorder %s19222_s13, %s18950_s22  ;;  %p18959_p8 = scmp.lt.s32.totalorder %s18950_s22, %s18950_s22 }
  0x2c   : > { %p18953_p0 = pnand %p18951_p13, %p18889_p7  ;;  %p18960_p9 = por %p18959_p8, %p18958_p5 }
  0x2e   : > { %p18954_p2 = pneg %p18953_p0 }
  0x30   : > { %p18961_p10 = pnand %p18960_p9, %p18954_p2 }
  0x32   : > { %18964 = shalt.err (!%p18961_p10)
}
  0x33   : > { %16222 = dma.hbm_to_vmem [thread:$0]  (!%p19218_p6), %s21954_s4, 64, %s19222_s13, [#allocation10]  }
  0x34   : > { %s19132_s29 = smov [#allocation12]  }
  0x35   : > { %s260_s9 = sshll.u32 %s19132_s29, 4  ;;  %s261_s9 = int_to_ptr.vmem [resolvable:$true] %s260_s9 }
  0x36   : > { %s18976_s10 = scalar_lea.vmem %s261_s9, 16  ;;  %s18983_s12 = scalar_lea.vmem %s261_s9, 32 }
  0x37   : > { %p18977_p11 = scmp.ne.s32.totalorder %s261_s9, %s18976_s10  ;;  %p18984_p0 = scmp.lt.s32.totalorder %s261_s9, %s261_s9 }
  0x38   : > { %p18985_p2 = scmp.lt.s32.totalorder %s18983_s12, %s18976_s10 }
  0x39   : > { %p18979_p12 = pnand %p18977_p11, %p18889_p7 }
  0x3a   : > { %p18986_p5 = por %p18985_p2, %p18984_p0 }
  0x3b   : > { %p18980_p13 = pneg %p18979_p12 }
  0x3d   : > { %p18987_p8 = pnand %p18986_p5, %p18980_p13 }
  0x3f   : > { %18990 = shalt.err (!%p18987_p8)
}
  0x40   : > { %16225 = dma.hbm_to_vmem [thread:$0]  (!%p19218_p6), %s21956_s6, 16, %s261_s9, [#allocation13]  }
  0x41   : > { %s19269_s13 = sadd.s32 1, %s19125_s27   ;;  %s33_s11 = sadd.s32 1, %s19121_s26 }
  0x42   : > { %s30_s16 = ssub.s32 %s19125_s27, %s19269_s13  ;;  %p40_p7 = scmp.ne.s32.totalorder %s19121_s26, %s19117_s25 }
  0x43   : > { %p31_p9 = scmp.eq.s32.totalorder %s30_s16, 0  ;;  %p41_p10 = scmp.eq.s32.totalorder %s19125_s27, 0 }
  0x44   : > { %p46_p11 = scmp.ne.s32.totalorder %s19117_s25, %s19113_s24  ;;  %p16237_p12 = scmp.lt.s32.totalorder %s19125_s27, 4 }
  0x45   : > { %s19281_s17 = scalar_select %p31_p9, %s19121_s26, %s33_s11  }
  0x46   : > { %p42_p13 = por %p41_p10, %p40_p7  ;;  %p19285_p0 = por %p21958_p1, %p46_p11 }
  0x47   : > { %s19290_s19 = sand.u32 1, %s19121_s26   ;;  %s16111_s20 = smul.u32 864, %s19125_s27 }
  0x48   : > { %s21975_s18 = scalar_select %p19285_p0, 1, 0 }
  0x49   : > { %s16185_s21 = smul.u32 54, %s19290_s19  ;;  %s19297_s24 = scalar_lea.hbm %s21950_s0, %s16111_s20 }
  0x4a   : > { %p19299_p6 = pnand %p16237_p12, %p42_p13  ;;  %s16186_s29 = smul.u32 13824, %s19290_s19 }
  0x4b   : > { %s275_s9 = scalar_lea.vmem [#allocation3], %s16185_s21  ;;  %s272_s12 = scalar_lea.sflag [#allocation4], %s19290_s19 }
  0x4c   : > { %s283_s10 = sshll.u32 %s275_s9, 4  ;;  %s18991_s14 = scalar_lea.hbm %s19297_s24, 864  ;;  %s284_s10 = int_to_ptr.vmem [resolvable:$true] %s283_s10 }
  0x4d   : > { %p18992_p2 = scmp.ne.s32.totalorder %s19297_s24, %s18991_s14  ;;  %p18993_p5 = pneg %p19299_p6 }
  0x4e   : > { %s18996_s16 = scalar_lea.hbm %s21950_s0, 3456  ;;  %p18997_p9 = scmp.lt.s32.totalorder %s19297_s24, %s21950_s0 }
  0x4f   : > { %p18994_p8 = pnand %p18993_p5, %p18992_p2  ;;  %p18998_p10 = scmp.lt.s32.totalorder %s18996_s16, %s18991_s14 }
  0x51   : > { %p18995_p7 = pneg %p18994_p8  ;;  %p18999_p11 = por %p18998_p10, %p18997_p9 }
  0x53   : > { %p19000_p12 = pnand %p18999_p11, %p18995_p7 }
  0x55   : > { %19003 = shalt.err (!%p19000_p12)
}
  0x56   : > { %s19004_s21 = scalar_lea.vmem %s284_s10, 864  ;;  %s19133_s23 = smov [#allocation3]  }
  0x57   : > { %p19005_p13 = scmp.ne.s32.totalorder %s284_s10, %s19004_s21  ;;  %s19009_s9 = sshll.u32 %s19133_s23, 4  ;;  %s19010_s9 = int_to_ptr.vmem [resolvable:$false] %s19009_s9 }
  0x58   : > { %s19011_s15 = scalar_lea.vmem %s19010_s9, 1728  ;;  %p19012_p8 = scmp.lt.s32.totalorder %s284_s10, %s19010_s9 }
  0x59   : > { %p19007_p3 = pnand %p19005_p13, %p18993_p5  ;;  %p19013_p1 = scmp.lt.s32.totalorder %s19011_s15, %s19004_s21 }
  0x5b   : > { %p19008_p2 = pneg %p19007_p3  ;;  %p19014_p0 = por %p19013_p1, %p19012_p8 }
  0x5d   : > { %p19015_p4 = pnand %p19014_p0, %p19008_p2 }
  0x5f   : > { %19018 = shalt.err (!%p19015_p4)
}
  0x60   : > { %16229 = dma.hbm_to_vmem [thread:$0]  (!%p19299_p6), %s19297_s24, 864, %s284_s10, %s272_s12  }
  0x61   : > { %s294_s14 = scalar_lea.vmem [#allocation6], %s16186_s29  ;;  %s290_s16 = sand.u32 1, %s19125_s27  }
  0x62   : > { %s302_s11 = sshll.u32 %s294_s14, 4  ;;  %s16114_s20 = smul.u32 221184, %s19125_s27  ;;  %s19328_s11 = int_to_ptr.vmem [resolvable:$true] %s302_s11 }
  0x63   : > { %s19336_s9 = scalar_lea.sflag [#allocation7], %s290_s16  ;;  %s19024_s27 = scalar_lea.hbm %s21951_s1, 884736 }
  0x64   : > { %s19334_s23 = scalar_lea.hbm %s21951_s1, %s16114_s20 }
  0x65   : > { %s19019_s15 = scalar_lea.hbm %s19334_s23, 221184  ;;  %p19025_p0 = scmp.lt.s32.totalorder %s19334_s23, %s21951_s1 }
  0x66   : > { %p19020_p1 = scmp.ne.s32.totalorder %s19334_s23, %s19019_s15  ;;  %p19026_p7 = scmp.lt.s32.totalorder %s19024_s27, %s19019_s15 }
  0x68   : > { %p19022_p3 = pnand %p19020_p1, %p18993_p5  ;;  %p19027_p9 = por %p19026_p7, %p19025_p0 }
  0x6a   : > { %p19023_p4 = pneg %p19022_p3 }
  0x6c   : > { %p19028_p10 = pnand %p19027_p9, %p19023_p4 }
  0x6e   : > { %19031 = shalt.err (!%p19028_p10)
}
  0x6f   : > { %s19032_s12 = scalar_lea.vmem %s19328_s11, 221184  ;;  %s19134_s14 = smov [#allocation6]  }
  0x70   : > { %p19033_p11 = scmp.ne.s32.totalorder %s19328_s11, %s19032_s12  ;;  %s19037_s16 = sshll.u32 %s19134_s14, 4  ;;  %s19038_s16 = int_to_ptr.vmem [resolvable:$false] %s19037_s16 }
  0x71   : > { %s19039_s20 = scalar_lea.vmem %s19038_s16, 442368  ;;  %p19040_p2 = scmp.lt.s32.totalorder %s19328_s11, %s19038_s16 }
  0x72   : > { %p19035_p12 = pnand %p19033_p11, %p18993_p5  ;;  %p19041_p8 = scmp.lt.s32.totalorder %s19039_s20, %s19032_s12 }
  0x74   : > { %p19036_p13 = pneg %p19035_p12  ;;  %p19042_p1 = por %p19041_p8, %p19040_p2 }
  0x76   : > { %p19043_p3 = pnand %p19042_p1, %p19036_p13 }
  0x78   : > { %19046 = shalt.err (!%p19043_p3)
}
  0x79   : > { %s19135_s22 = smov 256   ;;  %s19136_s21 = smov 16  }
  0x7a   : > { %16232 = dma.hbm_to_vmem [thread:$0]  (!%p19299_p6), %s19334_s23, 221184, %s19328_s11, %s19336_s9, %s19135_s22, %s19135_s22, %s19136_s21  }
  0x7b   : > { %p21977_p5 = scmp.ne.s32.totalorder %s21973_s8, 0 }
  0x7d   : > { %314 = sbr.rel (%p21977_p5) target bundleno = 2646 (0xa56), region = 48 }
  0x82   : > { %s316_s15 = sand.u32 1, %s19117_s25   ;;  %p21978_p4 = scmp.ne.s32.totalorder %s21975_s18, 0 }
  0x83   : > { %s16187_s19 = smul.u32 54, %s316_s15  ;;  %s317_s24 = scalar_lea.sflag [#allocation4], %s316_s15 }
  0x85   : > { %s19364_s27 = scalar_lea.vmem [#allocation3], %s16187_s19 }
  0x86   : > { %19088 = dma.done.wait (%p21978_p4), %s317_s24, 864  }
  0x87   : > { %19090 = vsyncadd (%p21978_p4), %s317_s24, 4294966432  ;;  %s325_s29 = sand.u32 1, %s19202_s30   ;;  %s16188_s28 = smul.u32 13824, %s316_s15 }
  0x88   : > { %s326_s11 = scalar_lea.sflag [#allocation7], %s325_s29 }
  0x89   : > { %s19371_s23 = scalar_lea.vmem [#allocation6], %s16188_s28 }
  0x8a   : > { %19092 = dma.done.wait (%p21978_p4), %s326_s11, 221184  }
  0x8b   : > { %19094 = vsyncadd (%p21978_p4), %s326_s11, 4294746112  ;;  %p21979_p6 = scmp.eq.s32.totalorder %s19202_s30, 0 }
  0x8d   : > { %19096 = dma.done.wait (%p21979_p6), [#allocation7], 64   ;;  %p21980_p0 = pmov %p21979_p6 }
  0x8f   : > { %19098 = vsyncadd (%p21980_p0), [#allocation7], 4294967232  ;;  %p21981_p7 = pmov %p21980_p0 }
  0x90   : > { %p21982_p9 = pmov %p21980_p0 }
  0x91   : > { %19100 = dma.done.wait (%p21981_p7), [#allocation10], 32832  }
  0x92   : > { %19102 = vsyncadd (%p21982_p9), [#allocation10], 4294934464  ;;  %p21983_p10 = pmov %p21980_p0 }
  0x93   : > { %p21984_p11 = pmov %p21980_p0 }
  0x94   : > { %19104 = dma.done.wait (%p21983_p10), [#allocation13], 16  }
  0x95   : > { %19106 = vsyncadd (%p21984_p11), [#allocation13], 4294967280  ;;  %p21985_p12 = scmp.ne.s32.totalorder %s19202_s30, 0 }
  0x97   : > { %381 = sbr.rel (%p21985_p12) target bundleno = 158 (0x9e), region = 76 }
  0x9c   : > { %v19137_v0 = vmov 0.0  }
  0x9d   : > { %382 = vst [vmem:[#allocation2] sm:$0xff] %v19137_v0 }
  0x9e PF: > { %v16288_v1 = vld [vmem:[%s19371_s23 + $0xe4] ss:$16 sps:$4 sm:$0xff]   ;;  %v16292_v3 = vld [vmem:[%s19371_s23 + $0xe0] ss:$16 sps:$4 sm:$0xff]   ;;  %v19138_v37 = vmov 1966171168   ;;  %v2130_v39 = vlaneseq }
  0x9f   : > { %v16290_v2 = vld [vmem:[%s19371_s23 + $0x2e4] ss:$16 sps:$4 sm:$0xff]   ;;  %11161 = vmatprep.subr.bf16.mxu0 %v16288_v1  ;;  %v16293_v4 = vld [vmem:[%s19371_s23 + $0x2e0] ss:$16 sps:$4 sm:$0xff]   ;;  %v2128_v38 = vunpack.c.l.s4 %v19138_v37  ;;  %p16105_p13 = scmp.ne.s32.totalorder %s19202_s30, 3 }
  0xa0   : > { %11202 = vmatprep.subr.bf16.mxu1 %v16290_v2  ;;  %v16294_v5 = vld [vmem:[%s19371_s23 + $0xc4] ss:$16 sps:$4 sm:$0xff]   ;;  %11162 = vmatpush1.bf16.msra.mxu0 %v16292_v3  ;;  %v16298_v7 = vld [vmem:[%s19371_s23 + $0xc0] ss:$16 sps:$4 sm:$0xff]   ;;  %v19430_v44 = vshrl.u32 %v2130_v39, 7 }
  0xa1   : > { %11203 = vmatpush1.bf16.msra.mxu1 %v16293_v4  ;;  %v16296_v6 = vld [vmem:[%s19371_s23 + $0x2c4] ss:$16 sps:$4 sm:$0xff]   ;;  %11163 = vmatprep.subr.bf16.mxu0 %v16294_v5  ;;  %v16299_v8 = vld [vmem:[%s19371_s23 + $0x2c0] ss:$16 sps:$4 sm:$0xff]   ;;  %v2129_v43 = vunpack.c.0.s8 %v2128_v38 }
  0xa2   : > { %11204 = vmatprep.subr.bf16.mxu1 %v16296_v6  ;;  %v16300_v9 = vld [vmem:[%s19371_s23 + $0xa4] ss:$16 sps:$4 sm:$0xff]   ;;  %v16304_v11 = vld [vmem:[%s19371_s23 + $0xa0] ss:$16 sps:$4 sm:$0xff]   ;;  %21986 = vst [vmem:[#allocation21_spill] sm:$0xff] %v19430_v44 }
  0xa3   : > { %v16302_v10 = vld [vmem:[%s19371_s23 + $0x2a4] ss:$16 sps:$4 sm:$0xff]   ;;  %v16305_v12 = vld [vmem:[%s19371_s23 + $0x2a0] ss:$16 sps:$4 sm:$0xff]   ;;  %v19438_v50 = vsub.s32 %v2129_v43, %v19430_v44 }
  0xa4   : > { %11164 = vmatpush1.bf16.msra.mxu0 %v16298_v7  ;;  %v16306_v13 = vld [vmem:[%s19371_s23 + $0x84] ss:$16 sps:$4 sm:$0xff]   ;;  %v16310_v15 = vld [vmem:[%s19371_s23 + $0x80] ss:$16 sps:$4 sm:$0xff]  }
  0xa5   : > { %11205 = vmatpush1.bf16.msra.mxu1 %v16299_v8  ;;  %11165 = vmatprep.subr.bf16.mxu0 %v16300_v9  ;;  %v16308_v14 = vld [vmem:[%s19371_s23 + $0x284] ss:$16 sps:$4 sm:$0xff]   ;;  %v16311_v16 = vld [vmem:[%s19371_s23 + $0x280] ss:$16 sps:$4 sm:$0xff]  }
  0xa6   : > { %11206 = vmatprep.subr.bf16.mxu1 %v16302_v10  ;;  %v16312_v17 = vld [vmem:[%s19371_s23 + $0x64] ss:$16 sps:$4 sm:$0xff]   ;;  %v16316_v19 = vld [vmem:[%s19371_s23 + $0x60] ss:$16 sps:$4 sm:$0xff]  }
  0xa7   : > { %v16314_v18 = vld [vmem:[%s19371_s23 + $0x264] ss:$16 sps:$4 sm:$0xff]   ;;  %v16317_v20 = vld [vmem:[%s19371_s23 + $0x260] ss:$16 sps:$4 sm:$0xff]  }
  0xa8   : > { %11166 = vmatpush1.bf16.msra.mxu0 %v16304_v11  ;;  %v16318_v21 = vld [vmem:[%s19371_s23 + $0x44] ss:$16 sps:$4 sm:$0xff]   ;;  %v16322_v23 = vld [vmem:[%s19371_s23 + $0x40] ss:$16 sps:$4 sm:$0xff]  }
  0xa9   : > { %11207 = vmatpush1.bf16.msra.mxu1 %v16305_v12  ;;  %11167 = vmatprep.subr.bf16.mxu0 %v16306_v13  ;;  %v16320_v22 = vld [vmem:[%s19371_s23 + $0x244] ss:$16 sps:$4 sm:$0xff]   ;;  %v16323_v24 = vld [vmem:[%s19371_s23 + $0x240] ss:$16 sps:$4 sm:$0xff]  }
  0xaa   : > { %11208 = vmatprep.subr.bf16.mxu1 %v16308_v14  ;;  %v16324_v25 = vld [vmem:[%s19371_s23 + $0x24] ss:$16 sps:$4 sm:$0xff]   ;;  %v16328_v27 = vld [vmem:[%s19371_s23 + $0x20] ss:$16 sps:$4 sm:$0xff]  }
  0xab   : > { %v16326_v26 = vld [vmem:[%s19371_s23 + $0x224] ss:$16 sps:$4 sm:$0xff]   ;;  %v16329_v28 = vld [vmem:[%s19371_s23 + $0x220] ss:$16 sps:$4 sm:$0xff]  }
  0xac   : > { %11168 = vmatpush1.bf16.msra.mxu0 %v16310_v15  ;;  %v16330_v29 = vld [vmem:[%s19371_s23 + $0x4] ss:$16 sps:$4 sm:$0xff]   ;;  %v16334_v31 = vld [vmem:[%s19371_s23] ss:$16 sps:$4 sm:$0xff]  }
  0xad   : > { %11209 = vmatpush1.bf16.msra.mxu1 %v16311_v16  ;;  %11169 = vmatprep.subr.bf16.mxu0 %v16312_v17  ;;  %v16332_v30 = vld [vmem:[%s19371_s23 + $0x204] ss:$16 sps:$4 sm:$0xff]   ;;  %v16335_v32 = vld [vmem:[%s19371_s23 + $0x200] ss:$16 sps:$4 sm:$0xff]  }
  0xae   : > { %11210 = vmatprep.subr.bf16.mxu1 %v16314_v18  ;;  %v16336_v33 = vld [vmem:[%s19371_s23 + $0x1e4] ss:$16 sps:$4 sm:$0xff]   ;;  %v16340_v35 = vld [vmem:[%s19371_s23 + $0x1e0] ss:$16 sps:$4 sm:$0xff]  }
  0xaf   : > { %v16338_v34 = vld [vmem:[%s19371_s23 + $0x3e4] ss:$16 sps:$4 sm:$0xff]   ;;  %v16341_v36 = vld [vmem:[%s19371_s23 + $0x3e0] ss:$16 sps:$4 sm:$0xff]  }
  0xb0   : > { %11170 = vmatpush1.bf16.msra.mxu0 %v16316_v19  ;;  %v16342_v40 = vld [vmem:[%s19371_s23 + $0x1c4] ss:$16 sps:$4 sm:$0xff]   ;;  %v16346_v42 = vld [vmem:[%s19371_s23 + $0x1c0] ss:$16 sps:$4 sm:$0xff]  }
  0xb1   : > { %11211 = vmatpush1.bf16.msra.mxu1 %v16317_v20  ;;  %11171 = vmatprep.subr.bf16.mxu0 %v16318_v21  ;;  %v16344_v41 = vld [vmem:[%s19371_s23 + $0x3c4] ss:$16 sps:$4 sm:$0xff]   ;;  %v16347_v45 = vld [vmem:[%s19371_s23 + $0x3c0] ss:$16 sps:$4 sm:$0xff]  }
  0xb2   : > { %11212 = vmatprep.subr.bf16.mxu1 %v16320_v22  ;;  %v16348_v46 = vld [vmem:[%s19371_s23 + $0x1a4] ss:$16 sps:$4 sm:$0xff]   ;;  %v16352_v48 = vld [vmem:[%s19371_s23 + $0x1a0] ss:$16 sps:$4 sm:$0xff]  }
  0xb3   : > { %v16350_v47 = vld [vmem:[%s19371_s23 + $0x3a4] ss:$16 sps:$4 sm:$0xff]   ;;  %v16353_v49 = vld [vmem:[%s19371_s23 + $0x3a0] ss:$16 sps:$4 sm:$0xff]  }
  0xb4   : > { %11172 = vmatpush1.bf16.msra.mxu0 %v16322_v23  ;;  %v16354_v51 = vld [vmem:[%s19371_s23 + $0x184] ss:$16 sps:$4 sm:$0xff]   ;;  %v16358_v54 = vld [vmem:[%s19371_s23 + $0x180] ss:$16 sps:$4 sm:$0xff]  }
  0xb5   : > { %11213 = vmatpush1.bf16.msra.mxu1 %v16323_v24  ;;  %11173 = vmatprep.subr.bf16.mxu0 %v16324_v25  ;;  %v16356_v52 = vld [vmem:[%s19371_s23 + $0x384] ss:$16 sps:$4 sm:$0xff]   ;;  %v16359_v56 = vld [vmem:[%s19371_s23 + $0x380] ss:$16 sps:$4 sm:$0xff]  }
  0xb6   : > { %11214 = vmatprep.subr.bf16.mxu1 %v16326_v26  ;;  %v384_v53 = vld [vmem:[%s19364_s27] sm:$0xff] }
  0xb7   : > { %v2133_v55 = vrot.slane %v384_v53, %v19438_v50  ;;  %v16360_v57 = vld [vmem:[%s19371_s23 + $0x164] ss:$16 sps:$4 sm:$0xff]   ;;  %v16364_v60 = vld [vmem:[%s19371_s23 + $0x160] ss:$16 sps:$4 sm:$0xff]   ;;  %v2126_v2 = vcombine.high %v384_v53, %v384_v53 }
  0xb8   : > { %11174 = vmatpush1.bf16.msra.mxu0 %v16328_v27  ;;  %v16362_v58 = vld [vmem:[%s19371_s23 + $0x364] ss:$16 sps:$4 sm:$0xff]   ;;  %v16365_v62 = vld [vmem:[%s19371_s23 + $0x360] ss:$16 sps:$4 sm:$0xff]  }
  0xb9   : > { %11215 = vmatpush1.bf16.msra.mxu1 %v16329_v28  ;;  %11175 = vmatprep.subr.bf16.mxu0 %v16330_v29  ;;  %v2141_v59 = vcombine.high %v2133_v55, %v2133_v55  ;;  %v16366_v63 = vld [vmem:[%s19371_s23 + $0x144] ss:$16 sps:$4 sm:$0xff]   ;;  %v16370_v3 = vld [vmem:[%s19371_s23 + $0x140] ss:$16 sps:$4 sm:$0xff]   ;;  %v19466_v7 = vrot.slane %v2126_v2, %v19438_v50  ;;  %v19476_v14 = vrot.slane %v2133_v55, %v19438_v50 }
  0xba   : > { %11216 = vmatprep.subr.bf16.mxu1 %v16332_v30  ;;  %v16368_v0 = vld [vmem:[%s19371_s23 + $0x344] ss:$16 sps:$4 sm:$0xff]   ;;  %v16371_v4 = vld [vmem:[%s19371_s23 + $0x340] ss:$16 sps:$4 sm:$0xff]  }
  0xbb   : > { %v19450_v61 = vrot.slane %v2141_v59, %v19438_v50  ;;  %v16372_v5 = vld [vmem:[%s19371_s23 + $0x124] ss:$16 sps:$4 sm:$0xff]   ;;  %v16376_v8 = vld [vmem:[%s19371_s23 + $0x120] ss:$16 sps:$4 sm:$0xff]   ;;  %v2142_v12 = vcombine.high %v19466_v7, %v19466_v7  ;;  %v19486_v19 = vcombine.high %v19476_v14, %v19476_v14 }
  0xbc   : > { %11176 = vmatpush1.bf16.msra.mxu0 %v16334_v31  ;;  %v16374_v6 = vld [vmem:[%s19371_s23 + $0x324] ss:$16 sps:$4 sm:$0xff]   ;;  %v16377_v9 = vld [vmem:[%s19371_s23 + $0x320] ss:$16 sps:$4 sm:$0xff]  }
  0xbd   : > { %11217 = vmatpush1.bf16.msra.mxu1 %v16335_v32  ;;  %11177 = vmatprep.subr.bf16.mxu0 %v16336_v33  ;;  %v19457_v1 = vcombine.high %v19450_v61, %v19450_v61  ;;  %v16378_v10 = vld [vmem:[%s19371_s23 + $0x104] ss:$16 sps:$4 sm:$0xff]   ;;  %v16382_v13 = vld [vmem:[%s19371_s23 + $0x100] ss:$16 sps:$4 sm:$0xff]   ;;  %v19482_v18 = vrot.slane %v2142_v12, %v19438_v50 }
  0xbe   : > { %11218 = vmatprep.subr.bf16.mxu1 %v16338_v34  ;;  %11193 = vmatprep.mubr.bf16.mxu0 %v19450_v61  ;;  %v16380_v11 = vld [vmem:[%s19371_s23 + $0x304] ss:$16 sps:$4 sm:$0xff]   ;;  %v16383_v15 = vld [vmem:[%s19371_s23 + $0x300] ss:$16 sps:$4 sm:$0xff]  }
  0xbf   : > { %11234 = vmatprep.mubr.bf16.mxu1 %v19457_v1  ;;  %v16386_v16 = vld [vmem:[%s19371_s23 + $0x4e4] ss:$16 sps:$4 sm:$0xff]   ;;  %v16384_v20 = vld [vmem:[%s19371_s23 + $0x4e0] ss:$16 sps:$4 sm:$0xff]   ;;  %v19494_v24 = vcombine.high %v19482_v18, %v19482_v18 }
  0xc0   : > { %11178 = vmatpush2.bf16.msra.mxu0 %v16340_v35  ;;  %v16389_v17 = vld [vmem:[%s19371_s23 + $0x6e4] ss:$16 sps:$4 sm:$0xff]   ;;  %v16387_v21 = vld [vmem:[%s19371_s23 + $0x6e0] ss:$16 sps:$4 sm:$0xff]  }
  0xc1   : > { %11219 = vmatpush2.bf16.msra.mxu1 %v16341_v36  ;;  %11179 = vmatprep.subr.bf16.mxu0 %v16342_v40  ;;  %v16392_v22 = vld [vmem:[%s19371_s23 + $0x4c4] ss:$16 sps:$4 sm:$0xff]   ;;  %v16390_v25 = vld [vmem:[%s19371_s23 + $0x4c0] ss:$16 sps:$4 sm:$0xff]  }
  0xc2   : > { %11220 = vmatprep.subr.bf16.mxu1 %v16344_v41  ;;  %v16395_v23 = vld [vmem:[%s19371_s23 + $0x6c4] ss:$16 sps:$4 sm:$0xff]   ;;  %v16393_v26 = vld [vmem:[%s19371_s23 + $0x6c0] ss:$16 sps:$4 sm:$0xff]  }
  0xc3   : > { %v16398_v27 = vld [vmem:[%s19371_s23 + $0x4a4] ss:$16 sps:$4 sm:$0xff]   ;;  %v16396_v29 = vld [vmem:[%s19371_s23 + $0x4a0] ss:$16 sps:$4 sm:$0xff]  }
  0xc4   : > { %11180 = vmatpush2.bf16.msra.mxu0 %v16346_v42  ;;  %v16401_v28 = vld [vmem:[%s19371_s23 + $0x6a4] ss:$16 sps:$4 sm:$0xff]   ;;  %v16399_v30 = vld [vmem:[%s19371_s23 + $0x6a0] ss:$16 sps:$4 sm:$0xff]  }
  0xc5   : > { %11221 = vmatpush2.bf16.msra.mxu1 %v16347_v45  ;;  %11181 = vmatprep.subr.bf16.mxu0 %v16348_v46  ;;  %v16404_v31 = vld [vmem:[%s19371_s23 + $0x484] ss:$16 sps:$4 sm:$0xff]   ;;  %v16402_v33 = vld [vmem:[%s19371_s23 + $0x480] ss:$16 sps:$4 sm:$0xff]  }
  0xc6   : > { %11222 = vmatprep.subr.bf16.mxu1 %v16350_v47  ;;  %v16407_v32 = vld [vmem:[%s19371_s23 + $0x684] ss:$16 sps:$4 sm:$0xff]   ;;  %v16405_v34 = vld [vmem:[%s19371_s23 + $0x680] ss:$16 sps:$4 sm:$0xff]  }
  0xc7   : > { %v16410_v35 = vld [vmem:[%s19371_s23 + $0x464] ss:$16 sps:$4 sm:$0xff]   ;;  %v16408_v37 = vld [vmem:[%s19371_s23 + $0x460] ss:$16 sps:$4 sm:$0xff]  }
  0xc8   : > { %11182 = vmatpush2.bf16.msra.mxu0 %v16352_v48  ;;  %v16413_v36 = vld [vmem:[%s19371_s23 + $0x664] ss:$16 sps:$4 sm:$0xff]   ;;  %v16411_v38 = vld [vmem:[%s19371_s23 + $0x660] ss:$16 sps:$4 sm:$0xff]  }
  0xc9   : > { %11223 = vmatpush2.bf16.msra.mxu1 %v16353_v49  ;;  %11183 = vmatprep.subr.bf16.mxu0 %v16354_v51  ;;  %v16416_v39 = vld [vmem:[%s19371_s23 + $0x444] ss:$16 sps:$4 sm:$0xff]   ;;  %v16414_v41 = vld [vmem:[%s19371_s23 + $0x440] ss:$16 sps:$4 sm:$0xff]  }
  0xca   : > { %11224 = vmatprep.subr.bf16.mxu1 %v16356_v52  ;;  %v16419_v40 = vld [vmem:[%s19371_s23 + $0x644] ss:$16 sps:$4 sm:$0xff]   ;;  %v16417_v42 = vld [vmem:[%s19371_s23 + $0x640] ss:$16 sps:$4 sm:$0xff]  }
  0xcb   : > { %v16422_v43 = vld [vmem:[%s19371_s23 + $0x424] ss:$16 sps:$4 sm:$0xff]   ;;  %v16420_v46 = vld [vmem:[%s19371_s23 + $0x420] ss:$16 sps:$4 sm:$0xff]  }
  0xcc   : > { %11184 = vmatpush2.bf16.msra.mxu0 %v16358_v54  ;;  %v16425_v45 = vld [vmem:[%s19371_s23 + $0x624] ss:$16 sps:$4 sm:$0xff]   ;;  %v16423_v47 = vld [vmem:[%s19371_s23 + $0x620] ss:$16 sps:$4 sm:$0xff]  }
  0xcd   : > { %11225 = vmatpush2.bf16.msra.mxu1 %v16359_v56  ;;  %11185 = vmatprep.subr.bf16.mxu0 %v16360_v57  ;;  %v16428_v48 = vld [vmem:[%s19371_s23 + $0x404] ss:$16 sps:$4 sm:$0xff]   ;;  %v16426_v51 = vld [vmem:[%s19371_s23 + $0x400] ss:$16 sps:$4 sm:$0xff]  }
  0xce   : > { %11226 = vmatprep.subr.bf16.mxu1 %v16362_v58  ;;  %v16431_v49 = vld [vmem:[%s19371_s23 + $0x604] ss:$16 sps:$4 sm:$0xff]   ;;  %v16429_v52 = vld [vmem:[%s19371_s23 + $0x600] ss:$16 sps:$4 sm:$0xff]  }
  0xcf   : > { %v16434_v53 = vld [vmem:[%s19371_s23 + $0x5e4] ss:$16 sps:$4 sm:$0xff]   ;;  %v16432_v55 = vld [vmem:[%s19371_s23 + $0x5e0] ss:$16 sps:$4 sm:$0xff]  }
  0xd0   : > { %11186 = vmatpush2.bf16.msra.mxu0 %v16364_v60  ;;  %v16437_v54 = vld [vmem:[%s19371_s23 + $0x7e4] ss:$16 sps:$4 sm:$0xff]   ;;  %v16435_v56 = vld [vmem:[%s19371_s23 + $0x7e0] ss:$16 sps:$4 sm:$0xff]  }
  0xd1   : > { %11227 = vmatpush2.bf16.msra.mxu1 %v16365_v62  ;;  %11187 = vmatprep.subr.bf16.mxu0 %v16366_v63  ;;  %v16440_v57 = vld [vmem:[%s19371_s23 + $0x5c4] ss:$16 sps:$4 sm:$0xff]   ;;  %v16438_v59 = vld [vmem:[%s19371_s23 + $0x5c0] ss:$16 sps:$4 sm:$0xff]  }
  0xd2   : > { %11228 = vmatprep.subr.bf16.mxu1 %v16368_v0  ;;  %v16443_v58 = vld [vmem:[%s19371_s23 + $0x7c4] ss:$16 sps:$4 sm:$0xff]   ;;  %v16441_v60 = vld [vmem:[%s19371_s23 + $0x7c0] ss:$16 sps:$4 sm:$0xff]  }
  0xd3   : > { %v16446_v62 = vld [vmem:[%s19371_s23 + $0x5a4] ss:$16 sps:$4 sm:$0xff]   ;;  %v16444_v0 = vld [vmem:[%s19371_s23 + $0x5a0] ss:$16 sps:$4 sm:$0xff]  }
  0xd4   : > { %11188 = vmatpush2.bf16.msra.mxu0 %v16370_v3  ;;  %v16449_v63 = vld [vmem:[%s19371_s23 + $0x7a4] ss:$16 sps:$4 sm:$0xff]   ;;  %v16447_v2 = vld [vmem:[%s19371_s23 + $0x7a0] ss:$16 sps:$4 sm:$0xff]  }
  0xd5   : > { %11229 = vmatpush2.bf16.msra.mxu1 %v16371_v4  ;;  %11189 = vmatprep.subr.bf16.mxu0 %v16372_v5  ;;  %v16452_v3 = vld [vmem:[%s19371_s23 + $0x584] ss:$16 sps:$4 sm:$0xff]   ;;  %v16450_v5 = vld [vmem:[%s19371_s23 + $0x580] ss:$16 sps:$4 sm:$0xff]  }
  0xd6   : > { %11230 = vmatprep.subr.bf16.mxu1 %v16374_v6  ;;  %v16455_v4 = vld [vmem:[%s19371_s23 + $0x784] ss:$16 sps:$4 sm:$0xff]   ;;  %v16453_v6 = vld [vmem:[%s19371_s23 + $0x780] ss:$16 sps:$4 sm:$0xff]  }
  0xd7   : > { %v16464_v12 = vld [vmem:[%s19371_s23 + $0x544] ss:$16 sps:$4 sm:$0xff]   ;;  %v17268_v44 = vld [vmem:[%s19371_s23 + $0x2aa0] ss:$16 sps:$4 sm:$0xff]  }
  0xd8   : > { %11190 = vmatpush2.bf16.msra.mxu0 %v16376_v8  ;;  %v16458_v8 = vld [vmem:[%s19371_s23 + $0x564] ss:$16 sps:$4 sm:$0xff]  }
  0xd9   : > { %11231 = vmatpush2.bf16.msra.mxu1 %v16377_v9  ;;  %11191 = vmatprep.subr.bf16.mxu0 %v16378_v10  ;;  %v16461_v9 = vld [vmem:[%s19371_s23 + $0x764] ss:$16 sps:$4 sm:$0xff]   ;;  %v16456_v10 = vld [vmem:[%s19371_s23 + $0x560] ss:$16 sps:$4 sm:$0xff]  }
  0xda   : > { %11232 = vmatprep.subr.bf16.mxu1 %v16380_v11  ;;  %v16459_v11 = vld [vmem:[%s19371_s23 + $0x760] ss:$16 sps:$4 sm:$0xff]  }
  0xdc   : > { %11192 = vmatpush2.bf16.msra.mxu0 %v16382_v13  ;;  %v16467_v13 = vld [vmem:[%s19371_s23 + $0x744] ss:$16 sps:$4 sm:$0xff]  }
  0xdd   : > { %11233 = vmatpush2.bf16.msra.mxu1 %v16383_v15  ;;  %11243 = vmatprep.subr.bf16.mxu0 %v16386_v16  ;;  %v16462_v15 = vld [vmem:[%s19371_s23 + $0x540] ss:$16 sps:$4 sm:$0xff]  }
  0xde   : > { %11284 = vmatprep.subr.bf16.mxu1 %v16389_v17  ;;  %v16465_v16 = vld [vmem:[%s19371_s23 + $0x740] ss:$16 sps:$4 sm:$0xff]   ;;  %v16470_v17 = vld [vmem:[%s19371_s23 + $0x524] ss:$16 sps:$4 sm:$0xff]  }
  0xdf   : > { %11194 = vmatmul.mubr.bf16.vlgmr.msra.gmra.mxu0 %v19476_v14 }
  0xe0   : > { %11235 = vmatmul.mubr.bf16.vlgmr.msra.gmra.mxu1 %v19486_v19  ;;  %11244 = vmatpush1.bf16.msra.mxu0 %v16384_v20  ;;  %v16473_v20 = vld [vmem:[%s19371_s23 + $0x724] ss:$16 sps:$4 sm:$0xff]  }
  0xe1   : > { %11285 = vmatpush1.bf16.msra.mxu1 %v16387_v21  ;;  %11245 = vmatprep.subr.bf16.mxu0 %v16392_v22  ;;  %v16468_v21 = vld [vmem:[%s19371_s23 + $0x520] ss:$16 sps:$4 sm:$0xff]  }
  0xe2   : > { %11286 = vmatprep.subr.bf16.mxu1 %v16395_v23  ;;  %11275 = vmatprep.mubr.bf16.mxu0 %v19482_v18  ;;  %v16471_v22 = vld [vmem:[%s19371_s23 + $0x720] ss:$16 sps:$4 sm:$0xff]   ;;  %v16476_v23 = vld [vmem:[%s19371_s23 + $0x504] ss:$16 sps:$4 sm:$0xff]  }
  0xe3   : > { %11316 = vmatprep.mubr.bf16.mxu1 %v19494_v24 }
  0xe4   : > { %11246 = vmatpush1.bf16.msra.mxu0 %v16390_v25  ;;  %v16479_v25 = vld [vmem:[%s19371_s23 + $0x704] ss:$16 sps:$4 sm:$0xff]  }
  0xe5   : > { %11287 = vmatpush1.bf16.msra.mxu1 %v16393_v26  ;;  %11247 = vmatprep.subr.bf16.mxu0 %v16398_v27  ;;  %v16474_v26 = vld [vmem:[%s19371_s23 + $0x500] ss:$16 sps:$4 sm:$0xff]   ;;  %v19559_v27 = vrot.slane %v19466_v7, %v19438_v50 }
  0xe6   : > { %11288 = vmatprep.subr.bf16.mxu1 %v16401_v28  ;;  %v16477_v28 = vld [vmem:[%s19371_s23 + $0x700] ss:$16 sps:$4 sm:$0xff]  }
  0xe7   : > { %v16484_v7 = vld [vmem:[%s19371_s23 + $0xae0] ss:$16 sps:$4 sm:$0xff]  }
  0xe8   : > { %11248 = vmatpush1.bf16.msra.mxu0 %v16396_v29  ;;  %v16483_v29 = vld [vmem:[%s19371_s23 + $0x8e4] ss:$16 sps:$4 sm:$0xff]  }
  0xe9   : > { %11289 = vmatpush1.bf16.msra.mxu1 %v16399_v30  ;;  %11249 = vmatprep.subr.bf16.mxu0 %v16404_v31  ;;  %v16486_v30 = vld [vmem:[%s19371_s23 + $0xae4] ss:$16 sps:$4 sm:$0xff]   ;;  %v19566_v31 = vcombine.high %v19559_v27, %v19559_v27 }
  0xea   : > { %11290 = vmatprep.subr.bf16.mxu1 %v16407_v32  ;;  %v16481_v32 = vld [vmem:[%s19371_s23 + $0x8e0] ss:$16 sps:$4 sm:$0xff]  }
  0xec   : > { %11250 = vmatpush1.bf16.msra.mxu0 %v16402_v33  ;;  %v19571_v33 = vld [vmem:[%s19364_s27 + $0x8] sm:$0xff] }
  0xed   : > { %11291 = vmatpush1.bf16.msra.mxu1 %v16405_v34  ;;  %11251 = vmatprep.subr.bf16.mxu0 %v16410_v35  ;;  %v16489_v34 = vld [vmem:[%s19371_s23 + $0x8c4] ss:$16 sps:$4 sm:$0xff]  }
  0xee   : > { %11292 = vmatprep.subr.bf16.mxu1 %v16413_v36  ;;  %v16492_v35 = vld [vmem:[%s19371_s23 + $0xac4] ss:$16 sps:$4 sm:$0xff]   ;;  %v19577_v36 = vrot.slane %v19571_v33, %v19438_v50 }
  0xf0   : > { %11252 = vmatpush1.bf16.msra.mxu0 %v16408_v37  ;;  %v2190_v37 = vcombine.high %v19577_v36, %v19577_v36 }
  0xf1   : > { %11293 = vmatpush1.bf16.msra.mxu1 %v16411_v38  ;;  %11253 = vmatprep.subr.bf16.mxu0 %v16416_v39  ;;  %v16487_v38 = vld [vmem:[%s19371_s23 + $0x8c0] ss:$16 sps:$4 sm:$0xff]  }
  0xf2   : > { %11294 = vmatprep.subr.bf16.mxu1 %v16419_v40  ;;  %v16490_v39 = vld [vmem:[%s19371_s23 + $0xac0] ss:$16 sps:$4 sm:$0xff]   ;;  %v16495_v40 = vld [vmem:[%s19371_s23 + $0x8a4] ss:$16 sps:$4 sm:$0xff]  }
  0xf4   : > { %11254 = vmatpush1.bf16.msra.mxu0 %v16414_v41  ;;  %v16498_v41 = vld [vmem:[%s19371_s23 + $0xaa4] ss:$16 sps:$4 sm:$0xff]  }
  0xf5   : > { %11295 = vmatpush1.bf16.msra.mxu1 %v16417_v42  ;;  %11255 = vmatprep.subr.bf16.mxu0 %v16422_v43  ;;  %v19588_v42 = vrot.slane %v2190_v37, %v19438_v50  ;;  %v16559_v37 = vld [vmem:[%s19371_s23 + $0x940] ss:$16 sps:$4 sm:$0xff]  }
  0xf6   : > { %11296 = vmatprep.subr.bf16.mxu1 %v16425_v45  ;;  %v16493_v45 = vld [vmem:[%s19371_s23 + $0x8a0] ss:$16 sps:$4 sm:$0xff]  }
  0xf7   : > { %v19593_v43 = vcombine.high %v19588_v42, %v19588_v42 }
  0xf8   : > { %11256 = vmatpush1.bf16.msra.mxu0 %v16420_v46  ;;  %v16496_v46 = vld [vmem:[%s19371_s23 + $0xaa0] ss:$16 sps:$4 sm:$0xff]  }
  0xf9   : > { %11297 = vmatpush1.bf16.msra.mxu1 %v16423_v47  ;;  %11257 = vmatprep.subr.bf16.mxu0 %v16428_v48  ;;  %v16501_v47 = vld [vmem:[%s19371_s23 + $0x884] ss:$16 sps:$4 sm:$0xff]  }
  0xfa   : > { %11298 = vmatprep.subr.bf16.mxu1 %v16431_v49  ;;  %v16504_v48 = vld [vmem:[%s19371_s23 + $0xa84] ss:$16 sps:$4 sm:$0xff]   ;;  %v16499_v49 = vld [vmem:[%s19371_s23 + $0x880] ss:$16 sps:$4 sm:$0xff]  }
  0xfc   : > { %11258 = vmatpush1.bf16.msra.mxu0 %v16426_v51  ;;  %v16502_v51 = vld [vmem:[%s19371_s23 + $0xa80] ss:$16 sps:$4 sm:$0xff]  }
  0xfd   : > { %11299 = vmatpush1.bf16.msra.mxu1 %v16429_v52  ;;  %11259 = vmatprep.subr.bf16.mxu0 %v16434_v53  ;;  %v16507_v52 = vld [vmem:[%s19371_s23 + $0x864] ss:$16 sps:$4 sm:$0xff]  }
  0xfe   : > { %11300 = vmatprep.subr.bf16.mxu1 %v16437_v54  ;;  %v16510_v53 = vld [vmem:[%s19371_s23 + $0xa64] ss:$16 sps:$4 sm:$0xff]   ;;  %v16505_v54 = vld [vmem:[%s19371_s23 + $0x860] ss:$16 sps:$4 sm:$0xff]  }
 0x100   : > { %11260 = vmatpush2.bf16.msra.mxu0 %v16432_v55  ;;  %v16508_v55 = vld [vmem:[%s19371_s23 + $0xa60] ss:$16 sps:$4 sm:$0xff]  }
 0x101   : > { %11301 = vmatpush2.bf16.msra.mxu1 %v16435_v56  ;;  %11261 = vmatprep.subr.bf16.mxu0 %v16440_v57  ;;  %v16513_v56 = vld [vmem:[%s19371_s23 + $0x844] ss:$16 sps:$4 sm:$0xff]  }
 0x102   : > { %11302 = vmatprep.subr.bf16.mxu1 %v16443_v58  ;;  %v16516_v57 = vld [vmem:[%s19371_s23 + $0xa44] ss:$16 sps:$4 sm:$0xff]   ;;  %v16511_v58 = vld [vmem:[%s19371_s23 + $0x840] ss:$16 sps:$4 sm:$0xff]  }
 0x104   : > { %11262 = vmatpush2.bf16.msra.mxu0 %v16438_v59  ;;  %v16514_v59 = vld [vmem:[%s19371_s23 + $0xa40] ss:$16 sps:$4 sm:$0xff]  }
 0x105   : > { %11303 = vmatpush2.bf16.msra.mxu1 %v16441_v60  ;;  %11263 = vmatprep.subr.bf16.mxu0 %v16446_v62  ;;  %v16519_v60 = vld [vmem:[%s19371_s23 + $0x824] ss:$16 sps:$4 sm:$0xff]  }
 0x106   : > { %11304 = vmatprep.subr.bf16.mxu1 %v16449_v63  ;;  %v16522_v62 = vld [vmem:[%s19371_s23 + $0xa24] ss:$16 sps:$4 sm:$0xff]   ;;  %v16517_v63 = vld [vmem:[%s19371_s23 + $0x820] ss:$16 sps:$4 sm:$0xff]  }
 0x108   : > { %11264 = vmatpush2.bf16.msra.mxu0 %v16444_v0  ;;  %v16520_v0 = vld [vmem:[%s19371_s23 + $0xa20] ss:$16 sps:$4 sm:$0xff]  }
 0x109   : > { %11305 = vmatpush2.bf16.msra.mxu1 %v16447_v2  ;;  %11265 = vmatprep.subr.bf16.mxu0 %v16452_v3  ;;  %v16525_v2 = vld [vmem:[%s19371_s23 + $0x804] ss:$16 sps:$4 sm:$0xff]  }
 0x10a   : > { %11306 = vmatprep.subr.bf16.mxu1 %v16455_v4  ;;  %v16528_v3 = vld [vmem:[%s19371_s23 + $0xa04] ss:$16 sps:$4 sm:$0xff]   ;;  %v16523_v4 = vld [vmem:[%s19371_s23 + $0x800] ss:$16 sps:$4 sm:$0xff]  }
 0x10c   : > { %11266 = vmatpush2.bf16.msra.mxu0 %v16450_v5  ;;  %v16526_v5 = vld [vmem:[%s19371_s23 + $0xa00] ss:$16 sps:$4 sm:$0xff]  }
 0x10d   : > { %11307 = vmatpush2.bf16.msra.mxu1 %v16453_v6  ;;  %11267 = vmatprep.subr.bf16.mxu0 %v16458_v8  ;;  %v16531_v6 = vld [vmem:[%s19371_s23 + $0x9e4] ss:$16 sps:$4 sm:$0xff]  }
 0x10e   : > { %11308 = vmatprep.subr.bf16.mxu1 %v16461_v9  ;;  %v16534_v8 = vld [vmem:[%s19371_s23 + $0xbe4] ss:$16 sps:$4 sm:$0xff]   ;;  %v16529_v9 = vld [vmem:[%s19371_s23 + $0x9e0] ss:$16 sps:$4 sm:$0xff]  }
 0x110   : > { %11268 = vmatpush2.bf16.msra.mxu0 %v16456_v10  ;;  %v16532_v10 = vld [vmem:[%s19371_s23 + $0xbe0] ss:$16 sps:$4 sm:$0xff]  }
 0x111   : > { %11309 = vmatpush2.bf16.msra.mxu1 %v16459_v11  ;;  %11269 = vmatprep.subr.bf16.mxu0 %v16464_v12  ;;  %v16537_v11 = vld [vmem:[%s19371_s23 + $0x9c4] ss:$16 sps:$4 sm:$0xff]  }
 0x112   : > { %11310 = vmatprep.subr.bf16.mxu1 %v16467_v13  ;;  %v16540_v12 = vld [vmem:[%s19371_s23 + $0xbc4] ss:$16 sps:$4 sm:$0xff]   ;;  %v16535_v13 = vld [vmem:[%s19371_s23 + $0x9c0] ss:$16 sps:$4 sm:$0xff]  }
 0x114   : > { %11270 = vmatpush2.bf16.msra.mxu0 %v16462_v15  ;;  %v16538_v15 = vld [vmem:[%s19371_s23 + $0xbc0] ss:$16 sps:$4 sm:$0xff]  }
 0x115   : > { %11311 = vmatpush2.bf16.msra.mxu1 %v16465_v16  ;;  %11271 = vmatprep.subr.bf16.mxu0 %v16470_v17  ;;  %v16543_v16 = vld [vmem:[%s19371_s23 + $0x9a4] ss:$16 sps:$4 sm:$0xff]  }
 0x116   : > { %11312 = vmatprep.subr.bf16.mxu1 %v16473_v20  ;;  %v16546_v17 = vld [vmem:[%s19371_s23 + $0xba4] ss:$16 sps:$4 sm:$0xff]   ;;  %v16541_v20 = vld [vmem:[%s19371_s23 + $0x9a0] ss:$16 sps:$4 sm:$0xff]  }
 0x118   : > { %11272 = vmatpush2.bf16.msra.mxu0 %v16468_v21  ;;  %v16544_v21 = vld [vmem:[%s19371_s23 + $0xba0] ss:$16 sps:$4 sm:$0xff]  }
 0x119   : > { %11313 = vmatpush2.bf16.msra.mxu1 %v16471_v22  ;;  %11273 = vmatprep.subr.bf16.mxu0 %v16476_v23  ;;  %v16549_v22 = vld [vmem:[%s19371_s23 + $0x984] ss:$16 sps:$4 sm:$0xff]  }
 0x11a   : > { %11314 = vmatprep.subr.bf16.mxu1 %v16479_v25  ;;  %v16552_v23 = vld [vmem:[%s19371_s23 + $0xb84] ss:$16 sps:$4 sm:$0xff]   ;;  %v16547_v25 = vld [vmem:[%s19371_s23 + $0x980] ss:$16 sps:$4 sm:$0xff]  }
 0x11c   : > { %11274 = vmatpush2.bf16.msra.mxu0 %v16474_v26  ;;  %v16550_v26 = vld [vmem:[%s19371_s23 + $0xb80] ss:$16 sps:$4 sm:$0xff]  }
 0x11d   : > { %11315 = vmatpush2.bf16.msra.mxu1 %v16477_v28  ;;  %11325 = vmatprep.subr.bf16.mxu0 %v16483_v29  ;;  %v16555_v28 = vld [vmem:[%s19371_s23 + $0x964] ss:$16 sps:$4 sm:$0xff]  }
 0x11e   : > { %11366 = vmatprep.subr.bf16.mxu1 %v16486_v30  ;;  %v16558_v29 = vld [vmem:[%s19371_s23 + $0xb64] ss:$16 sps:$4 sm:$0xff]   ;;  %v16553_v30 = vld [vmem:[%s19371_s23 + $0x960] ss:$16 sps:$4 sm:$0xff]  }
 0x11f   : > { %11276 = vmatmul.mubr.bf16.vlgmr.msra.gmra.mxu0 %v19559_v27 }
 0x120   : > { %11317 = vmatmul.mubr.bf16.vlgmr.msra.gmra.mxu1 %v19566_v31  ;;  %11326 = vmatpush1.bf16.msra.mxu0 %v16481_v32  ;;  %v16556_v32 = vld [vmem:[%s19371_s23 + $0xb60] ss:$16 sps:$4 sm:$0xff]  }
 0x121   : > { %11367 = vmatpush1.bf16.msra.mxu1 %v16484_v7  ;;  %11327 = vmatprep.subr.bf16.mxu0 %v16489_v34  ;;  %v16561_v7 = vld [vmem:[%s19371_s23 + $0x944] ss:$16 sps:$4 sm:$0xff]  }
 0x122   : > { %11368 = vmatprep.subr.bf16.mxu1 %v16492_v35  ;;  %11357 = vmatprep.mubr.bf16.mxu0 %v19588_v42  ;;  %v16564_v34 = vld [vmem:[%s19371_s23 + $0xb44] ss:$16 sps:$4 sm:$0xff]   ;;  %v2175_v35 = vcombine.high %v19571_v33, %v19571_v33  ;;  %v16565_v33 = vld [vmem:[%s19371_s23 + $0x920] ss:$16 sps:$4 sm:$0xff]  }
 0x123   : > { %11398 = vmatprep.mubr.bf16.mxu1 %v19593_v43 }
 0x124   : > { %11328 = vmatpush1.bf16.msra.mxu0 %v16487_v38  ;;  %v16562_v38 = vld [vmem:[%s19371_s23 + $0xb40] ss:$16 sps:$4 sm:$0xff]  }
 0x125   : > { %11369 = vmatpush1.bf16.msra.mxu1 %v16490_v39  ;;  %11329 = vmatprep.subr.bf16.mxu0 %v16495_v40  ;;  %v16567_v39 = vld [vmem:[%s19371_s23 + $0x924] ss:$16 sps:$4 sm:$0xff]  }
 0x126   : > { %11370 = vmatprep.subr.bf16.mxu1 %v16498_v41  ;;  %v16570_v40 = vld [vmem:[%s19371_s23 + $0xb24] ss:$16 sps:$4 sm:$0xff]   ;;  %v19647_v41 = vrot.slane %v2175_v35, %v19438_v50  ;;  %v16628_v35 = vld [vmem:[%s19371_s23 + $0xfe0] ss:$16 sps:$4 sm:$0xff]  }
 0x128   : > { %11330 = vmatpush1.bf16.msra.mxu0 %v16493_v45  ;;  %v16568_v45 = vld [vmem:[%s19371_s23 + $0xb20] ss:$16 sps:$4 sm:$0xff]  }
 0x129   : > { %11371 = vmatpush1.bf16.msra.mxu1 %v16496_v46  ;;  %11331 = vmatprep.subr.bf16.mxu0 %v16501_v47  ;;  %v16573_v46 = vld [vmem:[%s19371_s23 + $0x904] ss:$16 sps:$4 sm:$0xff]  }
 0x12a   : > { %11372 = vmatprep.subr.bf16.mxu1 %v16504_v48  ;;  %v16576_v47 = vld [vmem:[%s19371_s23 + $0xb04] ss:$16 sps:$4 sm:$0xff]   ;;  %v2191_v48 = vcombine.high %v19647_v41, %v19647_v41 }
 0x12c   : > { %11332 = vmatpush1.bf16.msra.mxu0 %v16499_v49  ;;  %v19657_v49 = vrot.slane %v19577_v36, %v19438_v50  ;;  %v16577_v36 = vld [vmem:[%s19371_s23 + $0xce0] ss:$16 sps:$4 sm:$0xff]  }
 0x12d   : > { %11373 = vmatpush1.bf16.msra.mxu1 %v16502_v51  ;;  %11333 = vmatprep.subr.bf16.mxu0 %v16507_v52  ;;  %v16571_v51 = vld [vmem:[%s19371_s23 + $0x900] ss:$16 sps:$4 sm:$0xff]  }
 0x12e   : > { %11374 = vmatprep.subr.bf16.mxu1 %v16510_v53  ;;  %v16574_v52 = vld [vmem:[%s19371_s23 + $0xb00] ss:$16 sps:$4 sm:$0xff]   ;;  %v16579_v53 = vld [vmem:[%s19371_s23 + $0xce4] ss:$16 sps:$4 sm:$0xff]  }
 0x130   : > { %11334 = vmatpush1.bf16.msra.mxu0 %v16505_v54  ;;  %v16582_v54 = vld [vmem:[%s19371_s23 + $0xee4] ss:$16 sps:$4 sm:$0xff]  }
 0x131   : > { %11375 = vmatpush1.bf16.msra.mxu1 %v16508_v55  ;;  %11335 = vmatprep.subr.bf16.mxu0 %v16513_v56  ;;  %v19664_v55 = vrot.slane %v2191_v48, %v19438_v50  ;;  %v19668_v56 = vcombine.high %v19657_v49, %v19657_v49  ;;  %v16645_v48 = vld [vmem:[%s19371_s23 + $0xd84] ss:$16 sps:$4 sm:$0xff]  }
 0x132   : > { %11376 = vmatprep.subr.bf16.mxu1 %v16516_v57  ;;  %v16580_v57 = vld [vmem:[%s19371_s23 + $0xee0] ss:$16 sps:$4 sm:$0xff]  }
 0x134   : > { %11336 = vmatpush1.bf16.msra.mxu0 %v16511_v58  ;;  %v16585_v58 = vld [vmem:[%s19371_s23 + $0xcc4] ss:$16 sps:$4 sm:$0xff]  }
 0x135   : > { %11377 = vmatpush1.bf16.msra.mxu1 %v16514_v59  ;;  %11337 = vmatprep.subr.bf16.mxu0 %v16519_v60  ;;  %v16588_v59 = vld [vmem:[%s19371_s23 + $0xec4] ss:$16 sps:$4 sm:$0xff]   ;;  %v19676_v60 = vcombine.high %v19664_v55, %v19664_v55 }
 0x136   : > { %11378 = vmatprep.subr.bf16.mxu1 %v16522_v62  ;;  %v16583_v62 = vld [vmem:[%s19371_s23 + $0xcc0] ss:$16 sps:$4 sm:$0xff]  }
 0x138   : > { %11338 = vmatpush1.bf16.msra.mxu0 %v16517_v63  ;;  %v16586_v63 = vld [vmem:[%s19371_s23 + $0xec0] ss:$16 sps:$4 sm:$0xff]  }
 0x139   : > { %11379 = vmatpush1.bf16.msra.mxu1 %v16520_v0  ;;  %11339 = vmatprep.subr.bf16.mxu0 %v16525_v2  ;;  %v16591_v0 = vld [vmem:[%s19371_s23 + $0xca4] ss:$16 sps:$4 sm:$0xff]  }
 0x13a   : > { %11380 = vmatprep.subr.bf16.mxu1 %v16528_v3  ;;  %v16594_v2 = vld [vmem:[%s19371_s23 + $0xea4] ss:$16 sps:$4 sm:$0xff]   ;;  %v16589_v3 = vld [vmem:[%s19371_s23 + $0xca0] ss:$16 sps:$4 sm:$0xff]  }
 0x13c   : > { %11340 = vmatpush1.bf16.msra.mxu0 %v16523_v4  ;;  %v16592_v4 = vld [vmem:[%s19371_s23 + $0xea0] ss:$16 sps:$4 sm:$0xff]  }
 0x13d   : > { %11381 = vmatpush1.bf16.msra.mxu1 %v16526_v5  ;;  %11341 = vmatprep.subr.bf16.mxu0 %v16531_v6  ;;  %v16597_v5 = vld [vmem:[%s19371_s23 + $0xc84] ss:$16 sps:$4 sm:$0xff]  }
 0x13e   : > { %11382 = vmatprep.subr.bf16.mxu1 %v16534_v8  ;;  %v16600_v6 = vld [vmem:[%s19371_s23 + $0xe84] ss:$16 sps:$4 sm:$0xff]   ;;  %v16595_v8 = vld [vmem:[%s19371_s23 + $0xc80] ss:$16 sps:$4 sm:$0xff]  }
 0x140   : > { %11342 = vmatpush2.bf16.msra.mxu0 %v16529_v9  ;;  %v16598_v9 = vld [vmem:[%s19371_s23 + $0xe80] ss:$16 sps:$4 sm:$0xff]  }
 0x141   : > { %11383 = vmatpush2.bf16.msra.mxu1 %v16532_v10  ;;  %11343 = vmatprep.subr.bf16.mxu0 %v16537_v11  ;;  %v16603_v10 = vld [vmem:[%s19371_s23 + $0xc64] ss:$16 sps:$4 sm:$0xff]  }
 0x142   : > { %11384 = vmatprep.subr.bf16.mxu1 %v16540_v12  ;;  %v16606_v11 = vld [vmem:[%s19371_s23 + $0xe64] ss:$16 sps:$4 sm:$0xff]   ;;  %v16601_v12 = vld [vmem:[%s19371_s23 + $0xc60] ss:$16 sps:$4 sm:$0xff]  }
 0x144   : > { %11344 = vmatpush2.bf16.msra.mxu0 %v16535_v13  ;;  %v16604_v13 = vld [vmem:[%s19371_s23 + $0xe60] ss:$16 sps:$4 sm:$0xff]  }
 0x145   : > { %11385 = vmatpush2.bf16.msra.mxu1 %v16538_v15  ;;  %11345 = vmatprep.subr.bf16.mxu0 %v16543_v16  ;;  %v16609_v15 = vld [vmem:[%s19371_s23 + $0xc44] ss:$16 sps:$4 sm:$0xff]  }
 0x146   : > { %11386 = vmatprep.subr.bf16.mxu1 %v16546_v17  ;;  %v16612_v16 = vld [vmem:[%s19371_s23 + $0xe44] ss:$16 sps:$4 sm:$0xff]   ;;  %v16607_v17 = vld [vmem:[%s19371_s23 + $0xc40] ss:$16 sps:$4 sm:$0xff]  }
 0x148   : > { %11346 = vmatpush2.bf16.msra.mxu0 %v16541_v20  ;;  %v16610_v20 = vld [vmem:[%s19371_s23 + $0xe40] ss:$16 sps:$4 sm:$0xff]  }
 0x149   : > { %11387 = vmatpush2.bf16.msra.mxu1 %v16544_v21  ;;  %11347 = vmatprep.subr.bf16.mxu0 %v16549_v22  ;;  %v16615_v21 = vld [vmem:[%s19371_s23 + $0xc24] ss:$16 sps:$4 sm:$0xff]  }
 0x14a   : > { %11388 = vmatprep.subr.bf16.mxu1 %v16552_v23  ;;  %v16618_v22 = vld [vmem:[%s19371_s23 + $0xe24] ss:$16 sps:$4 sm:$0xff]   ;;  %v16613_v23 = vld [vmem:[%s19371_s23 + $0xc20] ss:$16 sps:$4 sm:$0xff]  }
 0x14c   : > { %11348 = vmatpush2.bf16.msra.mxu0 %v16547_v25  ;;  %v16616_v25 = vld [vmem:[%s19371_s23 + $0xe20] ss:$16 sps:$4 sm:$0xff]  }
 0x14d   : > { %11389 = vmatpush2.bf16.msra.mxu1 %v16550_v26  ;;  %11349 = vmatprep.subr.bf16.mxu0 %v16555_v28  ;;  %v16621_v26 = vld [vmem:[%s19371_s23 + $0xc04] ss:$16 sps:$4 sm:$0xff]  }
 0x14e   : > { %11390 = vmatprep.subr.bf16.mxu1 %v16558_v29  ;;  %v16624_v28 = vld [vmem:[%s19371_s23 + $0xe04] ss:$16 sps:$4 sm:$0xff]   ;;  %v16619_v29 = vld [vmem:[%s19371_s23 + $0xc00] ss:$16 sps:$4 sm:$0xff]  }
 0x150   : > { %11350 = vmatpush2.bf16.msra.mxu0 %v16553_v30  ;;  %v16622_v30 = vld [vmem:[%s19371_s23 + $0xe00] ss:$16 sps:$4 sm:$0xff]  }
 0x151   : > { %11391 = vmatpush2.bf16.msra.mxu1 %v16556_v32  ;;  %11351 = vmatprep.subr.bf16.mxu0 %v16561_v7  ;;  %v16627_v32 = vld [vmem:[%s19371_s23 + $0xde4] ss:$16 sps:$4 sm:$0xff]  }
 0x152   : > { %11392 = vmatprep.subr.bf16.mxu1 %v16564_v34  ;;  %v16630_v7 = vld [vmem:[%s19371_s23 + $0xfe4] ss:$16 sps:$4 sm:$0xff]   ;;  %v16625_v34 = vld [vmem:[%s19371_s23 + $0xde0] ss:$16 sps:$4 sm:$0xff]  }
 0x154   : > { %11352 = vmatpush2.bf16.msra.mxu0 %v16559_v37  ;;  %v16633_v37 = vld [vmem:[%s19371_s23 + $0xdc4] ss:$16 sps:$4 sm:$0xff]  }
 0x155   : > { %11393 = vmatpush2.bf16.msra.mxu1 %v16562_v38  ;;  %11353 = vmatprep.subr.bf16.mxu0 %v16567_v39  ;;  %v16636_v38 = vld [vmem:[%s19371_s23 + $0xfc4] ss:$16 sps:$4 sm:$0xff]   ;;  %v16631_v39 = vld [vmem:[%s19371_s23 + $0xdc0] ss:$16 sps:$4 sm:$0xff]  }
 0x156   : > { %11394 = vmatprep.subr.bf16.mxu1 %v16570_v40  ;;  %v16634_v40 = vld [vmem:[%s19371_s23 + $0xfc0] ss:$16 sps:$4 sm:$0xff]  }
 0x158   : > { %11354 = vmatpush2.bf16.msra.mxu0 %v16565_v33  ;;  %v16639_v33 = vld [vmem:[%s19371_s23 + $0xda4] ss:$16 sps:$4 sm:$0xff]  }
 0x159   : > { %11395 = vmatpush2.bf16.msra.mxu1 %v16568_v45  ;;  %11355 = vmatprep.subr.bf16.mxu0 %v16573_v46  ;;  %v16642_v45 = vld [vmem:[%s19371_s23 + $0xfa4] ss:$16 sps:$4 sm:$0xff]   ;;  %v16637_v46 = vld [vmem:[%s19371_s23 + $0xda0] ss:$16 sps:$4 sm:$0xff]  }
 0x15a   : > { %11396 = vmatprep.subr.bf16.mxu1 %v16576_v47  ;;  %v16640_v47 = vld [vmem:[%s19371_s23 + $0xfa0] ss:$16 sps:$4 sm:$0xff]  }
 0x15c   : > { %11356 = vmatpush2.bf16.msra.mxu0 %v16571_v51  ;;  %v16648_v51 = vld [vmem:[%s19371_s23 + $0xf84] ss:$16 sps:$4 sm:$0xff]  }
 0x15d   : > { %11397 = vmatpush2.bf16.msra.mxu1 %v16574_v52  ;;  %11407 = vmatprep.subr.bf16.mxu0 %v16579_v53  ;;  %v16643_v52 = vld [vmem:[%s19371_s23 + $0xd80] ss:$16 sps:$4 sm:$0xff]  }
 0x15e   : > { %11448 = vmatprep.subr.bf16.mxu1 %v16582_v54  ;;  %v16646_v53 = vld [vmem:[%s19371_s23 + $0xf80] ss:$16 sps:$4 sm:$0xff]   ;;  %v16651_v54 = vld [vmem:[%s19371_s23 + $0xd64] ss:$16 sps:$4 sm:$0xff]  }
 0x15f   : > { %11358 = vmatmul.mubr.bf16.vlgmr.msra.gmra.mxu0 %v19657_v49 }
 0x160   : > { %11399 = vmatmul.mubr.bf16.vlgmr.msra.gmra.mxu1 %v19668_v56  ;;  %11408 = vmatpush1.bf16.msra.mxu0 %v16577_v36  ;;  %v16654_v36 = vld [vmem:[%s19371_s23 + $0xf64] ss:$16 sps:$4 sm:$0xff]  }
 0x161   : > { %11449 = vmatpush1.bf16.msra.mxu1 %v16580_v57  ;;  %11409 = vmatprep.subr.bf16.mxu0 %v16585_v58  ;;  %v16649_v57 = vld [vmem:[%s19371_s23 + $0xd60] ss:$16 sps:$4 sm:$0xff]  }
 0x162   : > { %11450 = vmatprep.subr.bf16.mxu1 %v16588_v59  ;;  %11439 = vmatprep.mubr.bf16.mxu0 %v19664_v55  ;;  %v16652_v58 = vld [vmem:[%s19371_s23 + $0xf60] ss:$16 sps:$4 sm:$0xff]   ;;  %v16657_v59 = vld [vmem:[%s19371_s23 + $0xd44] ss:$16 sps:$4 sm:$0xff]  }
 0x163   : > { %11480 = vmatprep.mubr.bf16.mxu1 %v19676_v60 }
 0x164   : > { %11410 = vmatpush1.bf16.msra.mxu0 %v16583_v62  ;;  %v16660_v62 = vld [vmem:[%s19371_s23 + $0xf44] ss:$16 sps:$4 sm:$0xff]  }
 0x165   : > { %11451 = vmatpush1.bf16.msra.mxu1 %v16586_v63  ;;  %11411 = vmatprep.subr.bf16.mxu0 %v16591_v0  ;;  %v16655_v63 = vld [vmem:[%s19371_s23 + $0xd40] ss:$16 sps:$4 sm:$0xff]  }
 0x166   : > { %11452 = vmatprep.subr.bf16.mxu1 %v16594_v2  ;;  %v19732_v0 = vld [vmem:[%s19364_s27 + $0x10] sm:$0xff] }
 0x167   : > { %v16658_v2 = vld [vmem:[%s19371_s23 + $0xf40] ss:$16 sps:$4 sm:$0xff]  }
 0x168   : > { %11412 = vmatpush1.bf16.msra.mxu0 %v16589_v3  ;;  %v16663_v3 = vld [vmem:[%s19371_s23 + $0xd24] ss:$16 sps:$4 sm:$0xff]  }
 0x169   : > { %11453 = vmatpush1.bf16.msra.mxu1 %v16592_v4  ;;  %11413 = vmatprep.subr.bf16.mxu0 %v16597_v5  ;;  %v16666_v4 = vld [vmem:[%s19371_s23 + $0xf24] ss:$16 sps:$4 sm:$0xff]   ;;  %v19739_v5 = vrot.slane %v19732_v0, %v19438_v50 }
 0x16a   : > { %11454 = vmatprep.subr.bf16.mxu1 %v16600_v6  ;;  %v16661_v6 = vld [vmem:[%s19371_s23 + $0xd20] ss:$16 sps:$4 sm:$0xff]  }
 0x16c   : > { %11414 = vmatpush1.bf16.msra.mxu0 %v16595_v8  ;;  %v16664_v8 = vld [vmem:[%s19371_s23 + $0xf20] ss:$16 sps:$4 sm:$0xff]  }
 0x16d   : > { %11455 = vmatpush1.bf16.msra.mxu1 %v16598_v9  ;;  %11415 = vmatprep.subr.bf16.mxu0 %v16603_v10  ;;  %v16669_v9 = vld [vmem:[%s19371_s23 + $0xd04] ss:$16 sps:$4 sm:$0xff]  }
 0x16e   : > { %11456 = vmatprep.subr.bf16.mxu1 %v16606_v11  ;;  %v16672_v10 = vld [vmem:[%s19371_s23 + $0xf04] ss:$16 sps:$4 sm:$0xff]   ;;  %v2239_v11 = vcombine.high %v19739_v5, %v19739_v5 }
 0x170   : > { %11416 = vmatpush1.bf16.msra.mxu0 %v16601_v12  ;;  %v16667_v12 = vld [vmem:[%s19371_s23 + $0xd00] ss:$16 sps:$4 sm:$0xff]  }
 0x171   : > { %11457 = vmatpush1.bf16.msra.mxu1 %v16604_v13  ;;  %11417 = vmatprep.subr.bf16.mxu0 %v16609_v15  ;;  %v19750_v13 = vrot.slane %v19647_v41, %v19438_v50  ;;  %v16670_v15 = vld [vmem:[%s19371_s23 + $0xf00] ss:$16 sps:$4 sm:$0xff]  }
 0x172   : > { %11458 = vmatprep.subr.bf16.mxu1 %v16612_v16  ;;  %v16676_v16 = vld [vmem:[%s19371_s23 + $0x10e4] ss:$16 sps:$4 sm:$0xff]   ;;  %v16677_v41 = vld [vmem:[%s19371_s23 + $0x12e0] ss:$16 sps:$4 sm:$0xff]  }
 0x174   : > { %11418 = vmatpush1.bf16.msra.mxu0 %v16607_v17  ;;  %v16679_v17 = vld [vmem:[%s19371_s23 + $0x12e4] ss:$16 sps:$4 sm:$0xff]  }
 0x175   : > { %11459 = vmatpush1.bf16.msra.mxu1 %v16610_v20  ;;  %11419 = vmatprep.subr.bf16.mxu0 %v16615_v21  ;;  %v19756_v20 = vrot.slane %v2239_v11, %v19438_v50  ;;  %v19760_v21 = vcombine.high %v19750_v13, %v19750_v13  ;;  %v16721_v11 = vld [vmem:[%s19371_s23 + $0x1204] ss:$16 sps:$4 sm:$0xff]  }
 0x176   : > { %11460 = vmatprep.subr.bf16.mxu1 %v16618_v22  ;;  %v16674_v22 = vld [vmem:[%s19371_s23 + $0x10e0] ss:$16 sps:$4 sm:$0xff]  }
 0x178   : > { %11420 = vmatpush1.bf16.msra.mxu0 %v16613_v23  ;;  %v16682_v23 = vld [vmem:[%s19371_s23 + $0x10c4] ss:$16 sps:$4 sm:$0xff]  }
 0x179   : > { %11461 = vmatpush1.bf16.msra.mxu1 %v16616_v25  ;;  %11421 = vmatprep.subr.bf16.mxu0 %v16621_v26  ;;  %v16685_v25 = vld [vmem:[%s19371_s23 + $0x12c4] ss:$16 sps:$4 sm:$0xff]   ;;  %v19768_v26 = vcombine.high %v19756_v20, %v19756_v20 }
 0x17a   : > { %11462 = vmatprep.subr.bf16.mxu1 %v16624_v28 }
 0x17c   : > { %11422 = vmatpush1.bf16.msra.mxu0 %v16619_v29 }
 0x17d   : > { %11463 = vmatpush1.bf16.msra.mxu1 %v16622_v30  ;;  %11423 = vmatprep.subr.bf16.mxu0 %v16627_v32  ;;  %v16680_v30 = vld [vmem:[%s19371_s23 + $0x10c0] ss:$16 sps:$4 sm:$0xff]  }
 0x17e   : > { %11464 = vmatprep.subr.bf16.mxu1 %v16630_v7  ;;  %v16683_v32 = vld [vmem:[%s19371_s23 + $0x12c0] ss:$16 sps:$4 sm:$0xff]  }
 0x180   : > { %11424 = vmatpush2.bf16.msra.mxu0 %v16625_v34 }
 0x181   : > { %11465 = vmatpush2.bf16.msra.mxu1 %v16628_v35  ;;  %11425 = vmatprep.subr.bf16.mxu0 %v16633_v37  ;;  %v16688_v37 = vld [vmem:[%s19371_s23 + $0x10a4] ss:$16 sps:$4 sm:$0xff]  }
 0x182   : > { %11466 = vmatprep.subr.bf16.mxu1 %v16636_v38  ;;  %v16691_v38 = vld [vmem:[%s19371_s23 + $0x12a4] ss:$16 sps:$4 sm:$0xff]  }
 0x184   : > { %11426 = vmatpush2.bf16.msra.mxu0 %v16631_v39 }
 0x185   : > { %11467 = vmatpush2.bf16.msra.mxu1 %v16634_v40  ;;  %11427 = vmatprep.subr.bf16.mxu0 %v16639_v33  ;;  %v16686_v40 = vld [vmem:[%s19371_s23 + $0x10a0] ss:$16 sps:$4 sm:$0xff]  }
 0x186   : > { %11468 = vmatprep.subr.bf16.mxu1 %v16642_v45  ;;  %v16689_v33 = vld [vmem:[%s19371_s23 + $0x12a0] ss:$16 sps:$4 sm:$0xff]  }
 0x188   : > { %11428 = vmatpush2.bf16.msra.mxu0 %v16637_v46 }
 0x189   : > { %11469 = vmatpush2.bf16.msra.mxu1 %v16640_v47  ;;  %11429 = vmatprep.subr.bf16.mxu0 %v16645_v48 }
 0x18a   : > { %11470 = vmatprep.subr.bf16.mxu1 %v16648_v51  ;;  %v16694_v51 = vld [vmem:[%s19371_s23 + $0x1084] ss:$16 sps:$4 sm:$0xff]  }
 0x18c   : > { %11430 = vmatpush2.bf16.msra.mxu0 %v16643_v52  ;;  %v16697_v52 = vld [vmem:[%s19371_s23 + $0x1284] ss:$16 sps:$4 sm:$0xff]  }
 0x18d   : > { %11471 = vmatpush2.bf16.msra.mxu1 %v16646_v53  ;;  %11431 = vmatprep.subr.bf16.mxu0 %v16651_v54  ;;  %v16692_v53 = vld [vmem:[%s19371_s23 + $0x1080] ss:$16 sps:$4 sm:$0xff]  }
 0x18e   : > { %11472 = vmatprep.subr.bf16.mxu1 %v16654_v36  ;;  %v16695_v54 = vld [vmem:[%s19371_s23 + $0x1280] ss:$16 sps:$4 sm:$0xff]   ;;  %v16700_v36 = vld [vmem:[%s19371_s23 + $0x1064] ss:$16 sps:$4 sm:$0xff]  }
 0x190   : > { %11432 = vmatpush2.bf16.msra.mxu0 %v16649_v57  ;;  %v16703_v57 = vld [vmem:[%s19371_s23 + $0x1264] ss:$16 sps:$4 sm:$0xff]  }
 0x191   : > { %11473 = vmatpush2.bf16.msra.mxu1 %v16652_v58  ;;  %11433 = vmatprep.subr.bf16.mxu0 %v16657_v59  ;;  %v16698_v58 = vld [vmem:[%s19371_s23 + $0x1060] ss:$16 sps:$4 sm:$0xff]  }
 0x192   : > { %11474 = vmatprep.subr.bf16.mxu1 %v16660_v62  ;;  %v16701_v59 = vld [vmem:[%s19371_s23 + $0x1260] ss:$16 sps:$4 sm:$0xff]   ;;  %v16706_v62 = vld [vmem:[%s19371_s23 + $0x1044] ss:$16 sps:$4 sm:$0xff]  }
 0x194   : > { %11434 = vmatpush2.bf16.msra.mxu0 %v16655_v63  ;;  %v16709_v63 = vld [vmem:[%s19371_s23 + $0x1244] ss:$16 sps:$4 sm:$0xff]  }
 0x195   : > { %11475 = vmatpush2.bf16.msra.mxu1 %v16658_v2  ;;  %11435 = vmatprep.subr.bf16.mxu0 %v16663_v3  ;;  %v16704_v2 = vld [vmem:[%s19371_s23 + $0x1040] ss:$16 sps:$4 sm:$0xff]  }
 0x196   : > { %11476 = vmatprep.subr.bf16.mxu1 %v16666_v4  ;;  %v16707_v3 = vld [vmem:[%s19371_s23 + $0x1240] ss:$16 sps:$4 sm:$0xff]   ;;  %v16712_v4 = vld [vmem:[%s19371_s23 + $0x1024] ss:$16 sps:$4 sm:$0xff]  }
 0x198   : > { %11436 = vmatpush2.bf16.msra.mxu0 %v16661_v6  ;;  %v16715_v6 = vld [vmem:[%s19371_s23 + $0x1224] ss:$16 sps:$4 sm:$0xff]  }
 0x199   : > { %11477 = vmatpush2.bf16.msra.mxu1 %v16664_v8  ;;  %11437 = vmatprep.subr.bf16.mxu0 %v16669_v9  ;;  %v16710_v8 = vld [vmem:[%s19371_s23 + $0x1020] ss:$16 sps:$4 sm:$0xff]  }
 0x19a   : > { %11478 = vmatprep.subr.bf16.mxu1 %v16672_v10  ;;  %v16713_v9 = vld [vmem:[%s19371_s23 + $0x1220] ss:$16 sps:$4 sm:$0xff]   ;;  %v16718_v10 = vld [vmem:[%s19371_s23 + $0x1004] ss:$16 sps:$4 sm:$0xff]  }
 0x19c   : > { %11438 = vmatpush2.bf16.msra.mxu0 %v16667_v12  ;;  %v16716_v12 = vld [vmem:[%s19371_s23 + $0x1000] ss:$16 sps:$4 sm:$0xff]  }
 0x19d   : > { %11479 = vmatpush2.bf16.msra.mxu1 %v16670_v15  ;;  %11489 = vmatprep.subr.bf16.mxu0 %v16676_v16  ;;  %v16719_v15 = vld [vmem:[%s19371_s23 + $0x1200] ss:$16 sps:$4 sm:$0xff]   ;;  %v16724_v16 = vld [vmem:[%s19371_s23 + $0x11e4] ss:$16 sps:$4 sm:$0xff]  }
 0x19e   : > { %11530 = vmatprep.subr.bf16.mxu1 %v16679_v17  ;;  %v16727_v17 = vld [vmem:[%s19371_s23 + $0x13e4] ss:$16 sps:$4 sm:$0xff]  }
 0x19f   : > { %v11195_v28 = vpop.f32.mrf.mxu0  ;;  %11440 = vmatmul.mubr.bf16.vlgmr.msra.gmra.mxu0 %v19750_v13 }
 0x1a0   : > { %v11236_v29 = vpop.f32.mrf.mxu1  ;;  %11481 = vmatmul.mubr.bf16.vlgmr.msra.gmra.mxu1 %v19760_v21  ;;  %11490 = vmatpush1.bf16.msra.mxu0 %v16674_v22  ;;  %v16722_v22 = vld [vmem:[%s19371_s23 + $0x11e0] ss:$16 sps:$4 sm:$0xff]  }
 0x1a1   : > { %v19774_v7 = vadd.f32 %v11236_v29, %v11195_v28  ;;  %11531 = vmatpush1.bf16.msra.mxu1 %v16677_v41  ;;  %v11197_v34 = vpop.f32.mrf.mxu0  ;;  %11491 = vmatprep.subr.bf16.mxu0 %v16682_v23  ;;  %v16725_v41 = vld [vmem:[%s19371_s23 + $0x13e0] ss:$16 sps:$4 sm:$0xff]   ;;  %v16730_v23 = vld [vmem:[%s19371_s23 + $0x11c4] ss:$16 sps:$4 sm:$0xff]  }
 0x1a2   : > { %v11238_v35 = vpop.f32.mrf.mxu1  ;;  %11532 = vmatprep.subr.bf16.mxu1 %v16685_v25  ;;  %11521 = vmatprep.mubr.bf16.mxu0 %v19756_v20  ;;  %v16733_v25 = vld [vmem:[%s19371_s23 + $0x13c4] ss:$16 sps:$4 sm:$0xff]   ;;  %v16728_v28 = vld [vmem:[%s19371_s23 + $0x11c0] ss:$16 sps:$4 sm:$0xff]  }
 0x1a3   : > { %v19778_v39 = vadd.f32 %v11238_v35, %v11197_v34  ;;  %11562 = vmatprep.mubr.bf16.mxu1 %v19768_v26  ;;  %v11199_v45 = vpop.f32.mrf.mxu0  ;;  %v16731_v29 = vld [vmem:[%s19371_s23 + $0x13c0] ss:$16 sps:$4 sm:$0xff]  }
 0x1a4   : > { %v11240_v46 = vpop.f32.mrf.mxu1  ;;  %11492 = vmatpush1.bf16.msra.mxu0 %v16680_v30  ;;  %v16736_v30 = vld [vmem:[%s19371_s23 + $0x11a4] ss:$16 sps:$4 sm:$0xff]   ;;  %v16734_v34 = vld [vmem:[%s19371_s23 + $0x11a0] ss:$16 sps:$4 sm:$0xff]  }
 0x1a5   : > { %11533 = vmatpush1.bf16.msra.mxu1 %v16683_v32  ;;  %v11200_v47 = vpop.f32.mrf.mxu0  ;;  %11493 = vmatprep.subr.bf16.mxu0 %v16688_v37  ;;  %v16739_v32 = vld [vmem:[%s19371_s23 + $0x13a4] ss:$16 sps:$4 sm:$0xff]   ;;  %v16737_v35 = vld [vmem:[%s19371_s23 + $0x13a0] ss:$16 sps:$4 sm:$0xff]  }
 0x1a6   : > { %v11241_v48 = vpop.f32.mrf.mxu1  ;;  %11534 = vmatprep.subr.bf16.mxu1 %v16691_v38  ;;  %v16742_v37 = vld [vmem:[%s19371_s23 + $0x1184] ss:$16 sps:$4 sm:$0xff]   ;;  %v16746_v47 = vld [vmem:[%s19371_s23 + $0x1160] ss:$16 sps:$4 sm:$0xff]  }
 0x1a7   : > { %v16745_v38 = vld [vmem:[%s19371_s23 + $0x1384] ss:$16 sps:$4 sm:$0xff]   ;;  %v16749_v48 = vld [vmem:[%s19371_s23 + $0x1360] ss:$16 sps:$4 sm:$0xff]  }
 0x1a8   : > { %11494 = vmatpush1.bf16.msra.mxu0 %v16686_v40  ;;  %v16740_v40 = vld [vmem:[%s19371_s23 + $0x1180] ss:$16 sps:$4 sm:$0xff]   ;;  %v16748_v45 = vld [vmem:[%s19371_s23 + $0x1164] ss:$16 sps:$4 sm:$0xff]  }
 0x1a9   : > { %11535 = vmatpush1.bf16.msra.mxu1 %v16689_v33  ;;  %11495 = vmatprep.subr.bf16.mxu0 %v16694_v51  ;;  %v16743_v33 = vld [vmem:[%s19371_s23 + $0x1380] ss:$16 sps:$4 sm:$0xff]   ;;  %v16751_v46 = vld [vmem:[%s19371_s23 + $0x1364] ss:$16 sps:$4 sm:$0xff]  }
 0x1aa   : > { %11536 = vmatprep.subr.bf16.mxu1 %v16697_v52  ;;  %v16754_v51 = vld [vmem:[%s19371_s23 + $0x1144] ss:$16 sps:$4 sm:$0xff]  }
 0x1ab   : > { %v16757_v52 = vld [vmem:[%s19371_s23 + $0x1344] ss:$16 sps:$4 sm:$0xff]  }
 0x1ac   : > { %11496 = vmatpush1.bf16.msra.mxu0 %v16692_v53  ;;  %v2224_v53 = vcombine.high %v19732_v0, %v19732_v0  ;;  %v16758_v0 = vld [vmem:[%s19371_s23 + $0x1120] ss:$16 sps:$4 sm:$0xff]  }
 0x1ad   : > { %11537 = vmatpush1.bf16.msra.mxu1 %v16695_v54  ;;  %11497 = vmatprep.subr.bf16.mxu0 %v16700_v36  ;;  %v16752_v54 = vld [vmem:[%s19371_s23 + $0x1140] ss:$16 sps:$4 sm:$0xff]  }
 0x1ae   : > { %11538 = vmatprep.subr.bf16.mxu1 %v16703_v57  ;;  %v16755_v36 = vld [vmem:[%s19371_s23 + $0x1340] ss:$16 sps:$4 sm:$0xff]   ;;  %v16760_v57 = vld [vmem:[%s19371_s23 + $0x1124] ss:$16 sps:$4 sm:$0xff]  }
 0x1b0   : > { %11498 = vmatpush1.bf16.msra.mxu0 %v16698_v58  ;;  %v16763_v58 = vld [vmem:[%s19371_s23 + $0x1324] ss:$16 sps:$4 sm:$0xff]  }
 0x1b1   : > { %11539 = vmatpush1.bf16.msra.mxu1 %v16701_v59  ;;  %11499 = vmatprep.subr.bf16.mxu0 %v16706_v62  ;;  %v19833_v59 = vrot.slane %v2224_v53, %v19438_v50  ;;  %v16761_v62 = vld [vmem:[%s19371_s23 + $0x1320] ss:$16 sps:$4 sm:$0xff]  }
 0x1b2   : > { %11540 = vmatprep.subr.bf16.mxu1 %v16709_v63  ;;  %v16766_v63 = vld [vmem:[%s19371_s23 + $0x1104] ss:$16 sps:$4 sm:$0xff]   ;;  %v16791_v53 = vld [vmem:[%s19371_s23 + $0x1680] ss:$16 sps:$4 sm:$0xff]  }
 0x1b4   : > { %11500 = vmatpush1.bf16.msra.mxu0 %v16704_v2  ;;  %v16769_v2 = vld [vmem:[%s19371_s23 + $0x1304] ss:$16 sps:$4 sm:$0xff]  }
 0x1b5   : > { %11541 = vmatpush1.bf16.msra.mxu1 %v16707_v3  ;;  %11501 = vmatprep.subr.bf16.mxu0 %v16712_v4  ;;  %v2240_v3 = vcombine.high %v19833_v59, %v19833_v59  ;;  %v19843_v4 = vrot.slane %v19739_v5, %v19438_v50 }
 0x1b6   : > { %11542 = vmatprep.subr.bf16.mxu1 %v16715_v6  ;;  %v16764_v6 = vld [vmem:[%s19371_s23 + $0x1100] ss:$16 sps:$4 sm:$0xff]  }
 0x1b7   : > { %v19856_v5 = vcombine.high %v19843_v4, %v19843_v4 }
 0x1b8   : > { %11502 = vmatpush1.bf16.msra.mxu0 %v16710_v8  ;;  %v16767_v8 = vld [vmem:[%s19371_s23 + $0x1300] ss:$16 sps:$4 sm:$0xff]  }
 0x1b9   : > { %11543 = vmatpush1.bf16.msra.mxu1 %v16713_v9  ;;  %11503 = vmatprep.subr.bf16.mxu0 %v16718_v10  ;;  %v16772_v9 = vld [vmem:[%s19371_s23 + $0x14e4] ss:$16 sps:$4 sm:$0xff]  }
 0x1ba   : > { %11544 = vmatprep.subr.bf16.mxu1 %v16721_v11  ;;  %v16775_v10 = vld [vmem:[%s19371_s23 + $0x16e4] ss:$16 sps:$4 sm:$0xff]   ;;  %v16770_v11 = vld [vmem:[%s19371_s23 + $0x14e0] ss:$16 sps:$4 sm:$0xff]  }
 0x1bc   : > { %11504 = vmatpush1.bf16.msra.mxu0 %v16716_v12  ;;  %v16773_v12 = vld [vmem:[%s19371_s23 + $0x16e0] ss:$16 sps:$4 sm:$0xff]  }
 0x1bd   : > { %11545 = vmatpush1.bf16.msra.mxu1 %v16719_v15  ;;  %11505 = vmatprep.subr.bf16.mxu0 %v16724_v16  ;;  %v19852_v15 = vrot.slane %v2240_v3, %v19438_v50  ;;  %v16778_v16 = vld [vmem:[%s19371_s23 + $0x14c4] ss:$16 sps:$4 sm:$0xff]  }
 0x1be   : > { %11546 = vmatprep.subr.bf16.mxu1 %v16727_v17  ;;  %v16781_v17 = vld [vmem:[%s19371_s23 + $0x16c4] ss:$16 sps:$4 sm:$0xff]  }
 0x1bf   : > { %v16808_v3 = vld [vmem:[%s19371_s23 + $0x1424] ss:$16 sps:$4 sm:$0xff]  }
 0x1c0   : > { %11506 = vmatpush2.bf16.msra.mxu0 %v16722_v22  ;;  %v16776_v22 = vld [vmem:[%s19371_s23 + $0x14c0] ss:$16 sps:$4 sm:$0xff]  }
 0x1c1   : > { %11547 = vmatpush2.bf16.msra.mxu1 %v16725_v41  ;;  %11507 = vmatprep.subr.bf16.mxu0 %v16730_v23  ;;  %v16779_v41 = vld [vmem:[%s19371_s23 + $0x16c0] ss:$16 sps:$4 sm:$0xff]   ;;  %v19864_v23 = vcombine.high %v19852_v15, %v19852_v15 }
 0x1c2   : > { %11548 = vmatprep.subr.bf16.mxu1 %v16733_v25 }
 0x1c4   : > { %11508 = vmatpush2.bf16.msra.mxu0 %v16728_v28 }
 0x1c5   : > { %11549 = vmatpush2.bf16.msra.mxu1 %v16731_v29  ;;  %11509 = vmatprep.subr.bf16.mxu0 %v16736_v30 }
 0x1c6   : > { %11550 = vmatprep.subr.bf16.mxu1 %v16739_v32 }
 0x1c8   : > { %11510 = vmatpush2.bf16.msra.mxu0 %v16734_v34  ;;  %v16784_v34 = vld [vmem:[%s19371_s23 + $0x14a4] ss:$16 sps:$4 sm:$0xff]  }
 0x1c9   : > { %11551 = vmatpush2.bf16.msra.mxu1 %v16737_v35  ;;  %11511 = vmatprep.subr.bf16.mxu0 %v16742_v37  ;;  %v16787_v35 = vld [vmem:[%s19371_s23 + $0x16a4] ss:$16 sps:$4 sm:$0xff]  }
 0x1ca   : > { %11552 = vmatprep.subr.bf16.mxu1 %v16745_v38 }
 0x1cc   : > { %11512 = vmatpush2.bf16.msra.mxu0 %v16740_v40  ;;  %v16782_v40 = vld [vmem:[%s19371_s23 + $0x14a0] ss:$16 sps:$4 sm:$0xff]  }
 0x1cd   : > { %11553 = vmatpush2.bf16.msra.mxu1 %v16743_v33  ;;  %11513 = vmatprep.subr.bf16.mxu0 %v16748_v45  ;;  %v16785_v33 = vld [vmem:[%s19371_s23 + $0x16a0] ss:$16 sps:$4 sm:$0xff]  }
 0x1ce   : > { %11554 = vmatprep.subr.bf16.mxu1 %v16751_v46 }
 0x1d0   : > { %11514 = vmatpush2.bf16.msra.mxu0 %v16746_v47 }
 0x1d1   : > { %11555 = vmatpush2.bf16.msra.mxu1 %v16749_v48  ;;  %11515 = vmatprep.subr.bf16.mxu0 %v16754_v51  ;;  %v16793_v51 = vld [vmem:[%s19371_s23 + $0x1684] ss:$16 sps:$4 sm:$0xff]  }
 0x1d2   : > { %11556 = vmatprep.subr.bf16.mxu1 %v16757_v52  ;;  %v16788_v52 = vld [vmem:[%s19371_s23 + $0x1480] ss:$16 sps:$4 sm:$0xff]  }
 0x1d4   : > { %11516 = vmatpush2.bf16.msra.mxu0 %v16752_v54  ;;  %v16796_v54 = vld [vmem:[%s19371_s23 + $0x1464] ss:$16 sps:$4 sm:$0xff]  }
 0x1d5   : > { %11557 = vmatpush2.bf16.msra.mxu1 %v16755_v36  ;;  %11517 = vmatprep.subr.bf16.mxu0 %v16760_v57  ;;  %v16799_v36 = vld [vmem:[%s19371_s23 + $0x1664] ss:$16 sps:$4 sm:$0xff]   ;;  %v16794_v57 = vld [vmem:[%s19371_s23 + $0x1460] ss:$16 sps:$4 sm:$0xff]  }
 0x1d6   : > { %11558 = vmatprep.subr.bf16.mxu1 %v16763_v58  ;;  %v16797_v58 = vld [vmem:[%s19371_s23 + $0x1660] ss:$16 sps:$4 sm:$0xff]  }
 0x1d8   : > { %11518 = vmatpush2.bf16.msra.mxu0 %v16758_v0  ;;  %v16802_v0 = vld [vmem:[%s19371_s23 + $0x1444] ss:$16 sps:$4 sm:$0xff]  }
 0x1d9   : > { %11559 = vmatpush2.bf16.msra.mxu1 %v16761_v62  ;;  %11519 = vmatprep.subr.bf16.mxu0 %v16766_v63  ;;  %v16805_v62 = vld [vmem:[%s19371_s23 + $0x1644] ss:$16 sps:$4 sm:$0xff]   ;;  %v16800_v63 = vld [vmem:[%s19371_s23 + $0x1440] ss:$16 sps:$4 sm:$0xff]  }
 0x1da   : > { %11560 = vmatprep.subr.bf16.mxu1 %v16769_v2  ;;  %v16803_v2 = vld [vmem:[%s19371_s23 + $0x1640] ss:$16 sps:$4 sm:$0xff]  }
 0x1dc   : > { %11520 = vmatpush2.bf16.msra.mxu0 %v16764_v6  ;;  %v16811_v6 = vld [vmem:[%s19371_s23 + $0x1624] ss:$16 sps:$4 sm:$0xff]  }
 0x1dd   : > { %11561 = vmatpush2.bf16.msra.mxu1 %v16767_v8  ;;  %11571 = vmatprep.subr.bf16.mxu0 %v16772_v9  ;;  %v16806_v8 = vld [vmem:[%s19371_s23 + $0x1420] ss:$16 sps:$4 sm:$0xff]  }
 0x1de   : > { %11612 = vmatprep.subr.bf16.mxu1 %v16775_v10  ;;  %v16809_v9 = vld [vmem:[%s19371_s23 + $0x1620] ss:$16 sps:$4 sm:$0xff]   ;;  %v16814_v10 = vld [vmem:[%s19371_s23 + $0x1404] ss:$16 sps:$4 sm:$0xff]  }
 0x1df   : > { %v11277_v25 = vpop.f32.mrf.mxu0  ;;  %11522 = vmatmul.mubr.bf16.vlgmr.msra.gmra.mxu0 %v19843_v4 }
 0x1e0   : > { %v11318_v28 = vpop.f32.mrf.mxu1  ;;  %11563 = vmatmul.mubr.bf16.vlgmr.msra.gmra.mxu1 %v19856_v5  ;;  %v11278_v29 = vadd.f32 %v11277_v25, %v19774_v7  ;;  %11572 = vmatpush1.bf16.msra.mxu0 %v16770_v11  ;;  %v16817_v11 = vld [vmem:[%s19371_s23 + $0x1604] ss:$16 sps:$4 sm:$0xff]   ;;  %v16821_v25 = vld [vmem:[%s19371_s23 + $0x17e0] ss:$16 sps:$4 sm:$0xff]  }
 0x1e1   : > { %11613 = vmatpush1.bf16.msra.mxu1 %v16773_v12  ;;  %v11279_v30 = vpop.f32.mrf.mxu0  ;;  %11573 = vmatprep.subr.bf16.mxu0 %v16778_v16  ;;  %v16812_v12 = vld [vmem:[%s19371_s23 + $0x1400] ss:$16 sps:$4 sm:$0xff]  }
 0x1e2   : > { %v11320_v32 = vpop.f32.mrf.mxu1  ;;  %11614 = vmatprep.subr.bf16.mxu1 %v16781_v17  ;;  %v19871_v37 = vadd.f32 %v11318_v28, %v11278_v29  ;;  %v11280_v38 = vadd.f32 %v11279_v30, %v19778_v39  ;;  %11603 = vmatprep.mubr.bf16.mxu0 %v19852_v15  ;;  %v16790_v39 = vld [vmem:[%s19371_s23 + $0x1484] ss:$16 sps:$4 sm:$0xff]   ;;  %v16815_v16 = vld [vmem:[%s19371_s23 + $0x1600] ss:$16 sps:$4 sm:$0xff]  }
 0x1e3   : > { %11644 = vmatprep.mubr.bf16.mxu1 %v19864_v23  ;;  %v11281_v7 = vpop.f32.mrf.mxu0  ;;  %v16820_v17 = vld [vmem:[%s19371_s23 + $0x15e4] ss:$16 sps:$4 sm:$0xff]   ;;  %v16824_v30 = vld [vmem:[%s19371_s23 + $0x15c0] ss:$16 sps:$4 sm:$0xff]  }
 0x1e4   : > { %v11322_v45 = vpop.f32.mrf.mxu1  ;;  %v19878_v46 = vadd.f32 %v11320_v32, %v11280_v38  ;;  %11574 = vmatpush1.bf16.msra.mxu0 %v16776_v22  ;;  %v16823_v22 = vld [vmem:[%s19371_s23 + $0x17e4] ss:$16 sps:$4 sm:$0xff]   ;;  %v16827_v32 = vld [vmem:[%s19371_s23 + $0x17c0] ss:$16 sps:$4 sm:$0xff]  }
 0x1e5   : > { %11615 = vmatpush1.bf16.msra.mxu1 %v16779_v41  ;;  %v11282_v47 = vpop.f32.mrf.mxu0  ;;  %11575 = vmatprep.subr.bf16.mxu0 %v16784_v34  ;;  %v16818_v41 = vld [vmem:[%s19371_s23 + $0x15e0] ss:$16 sps:$4 sm:$0xff]   ;;  %v16826_v28 = vld [vmem:[%s19371_s23 + $0x15c4] ss:$16 sps:$4 sm:$0xff]  }
 0x1e6   : > { %v11323_v48 = vpop.f32.mrf.mxu1  ;;  %11616 = vmatprep.subr.bf16.mxu1 %v16787_v35  ;;  %v16829_v29 = vld [vmem:[%s19371_s23 + $0x17c4] ss:$16 sps:$4 sm:$0xff]   ;;  %v16830_v38 = vld [vmem:[%s19371_s23 + $0x15a0] ss:$16 sps:$4 sm:$0xff]  }
 0x1e7   : > { %v16832_v34 = vld [vmem:[%s19371_s23 + $0x15a4] ss:$16 sps:$4 sm:$0xff]   ;;  %v16836_v45 = vld [vmem:[%s19371_s23 + $0x1580] ss:$16 sps:$4 sm:$0xff]  }
 0x1e8   : > { %11576 = vmatpush1.bf16.msra.mxu0 %v16782_v40  ;;  %v16835_v35 = vld [vmem:[%s19371_s23 + $0x17a4] ss:$16 sps:$4 sm:$0xff]   ;;  %v16833_v40 = vld [vmem:[%s19371_s23 + $0x17a0] ss:$16 sps:$4 sm:$0xff]  }
 0x1e9   : > { %11617 = vmatpush1.bf16.msra.mxu1 %v16785_v33  ;;  %11577 = vmatprep.subr.bf16.mxu0 %v16790_v39  ;;  %v16838_v33 = vld [vmem:[%s19371_s23 + $0x1584] ss:$16 sps:$4 sm:$0xff]   ;;  %v16839_v47 = vld [vmem:[%s19371_s23 + $0x1780] ss:$16 sps:$4 sm:$0xff]  }
 0x1ea   : > { %11618 = vmatprep.subr.bf16.mxu1 %v16793_v51  ;;  %v16841_v7 = vld [vmem:[%s19371_s23 + $0x1784] ss:$16 sps:$4 sm:$0xff]   ;;  %v16842_v51 = vld [vmem:[%s19371_s23 + $0x1560] ss:$16 sps:$4 sm:$0xff]  }
 0x1eb   : > { %v16844_v48 = vld [vmem:[%s19371_s23 + $0x1564] ss:$16 sps:$4 sm:$0xff]  }
 0x1ec   : > { %11578 = vmatpush1.bf16.msra.mxu0 %v16788_v52  ;;  %v16847_v39 = vld [vmem:[%s19371_s23 + $0x1764] ss:$16 sps:$4 sm:$0xff]   ;;  %v16845_v52 = vld [vmem:[%s19371_s23 + $0x1760] ss:$16 sps:$4 sm:$0xff]  }
 0x1ed   : > { %11619 = vmatpush1.bf16.msra.mxu1 %v16791_v53  ;;  %11579 = vmatprep.subr.bf16.mxu0 %v16796_v54  ;;  %v16850_v53 = vld [vmem:[%s19371_s23 + $0x1544] ss:$16 sps:$4 sm:$0xff]  }
 0x1ee   : > { %11620 = vmatprep.subr.bf16.mxu1 %v16799_v36  ;;  %v16853_v54 = vld [vmem:[%s19371_s23 + $0x1744] ss:$16 sps:$4 sm:$0xff]  }
 0x1ef   : > { %v19923_v36 = vld [vmem:[%s19364_s27 + $0x18] sm:$0xff] }
 0x1f0   : > { %11580 = vmatpush1.bf16.msra.mxu0 %v16794_v57  ;;  %v16848_v57 = vld [vmem:[%s19371_s23 + $0x1540] ss:$16 sps:$4 sm:$0xff]  }
 0x1f1   : > { %11621 = vmatpush1.bf16.msra.mxu1 %v16797_v58  ;;  %11581 = vmatprep.subr.bf16.mxu0 %v16802_v0  ;;  %v16851_v58 = vld [vmem:[%s19371_s23 + $0x1740] ss:$16 sps:$4 sm:$0xff]   ;;  %v16856_v0 = vld [vmem:[%s19371_s23 + $0x1524] ss:$16 sps:$4 sm:$0xff]  }
 0x1f2   : > { %11622 = vmatprep.subr.bf16.mxu1 %v16805_v62  ;;  %v16859_v62 = vld [vmem:[%s19371_s23 + $0x1724] ss:$16 sps:$4 sm:$0xff]  }
 0x1f4   : > { %11582 = vmatpush1.bf16.msra.mxu0 %v16800_v63  ;;  %v19931_v63 = vrot.slane %v19923_v36, %v19438_v50 }
 0x1f5   : > { %11623 = vmatpush1.bf16.msra.mxu1 %v16803_v2  ;;  %11583 = vmatprep.subr.bf16.mxu0 %v16808_v3  ;;  %v16854_v2 = vld [vmem:[%s19371_s23 + $0x1520] ss:$16 sps:$4 sm:$0xff]  }
 0x1f6   : > { %11624 = vmatprep.subr.bf16.mxu1 %v16811_v6  ;;  %v16857_v3 = vld [vmem:[%s19371_s23 + $0x1720] ss:$16 sps:$4 sm:$0xff]   ;;  %v16862_v6 = vld [vmem:[%s19371_s23 + $0x1504] ss:$16 sps:$4 sm:$0xff]  }
 0x1f8   : > { %11584 = vmatpush1.bf16.msra.mxu0 %v16806_v8  ;;  %v16865_v8 = vld [vmem:[%s19371_s23 + $0x1704] ss:$16 sps:$4 sm:$0xff]  }
 0x1f9   : > { %11625 = vmatpush1.bf16.msra.mxu1 %v16809_v9  ;;  %11585 = vmatprep.subr.bf16.mxu0 %v16814_v10  ;;  %v2288_v9 = vcombine.high %v19931_v63, %v19931_v63  ;;  %v19941_v10 = vrot.slane %v19833_v59, %v19438_v50 }
 0x1fa   : > { %11626 = vmatprep.subr.bf16.mxu1 %v16817_v11  ;;  %v16860_v11 = vld [vmem:[%s19371_s23 + $0x1500] ss:$16 sps:$4 sm:$0xff]  }
 0x1fb   : > { %v19954_v59 = vcombine.high %v19941_v10, %v19941_v10 }
 0x1fc   : > { %11586 = vmatpush1.bf16.msra.mxu0 %v16812_v12  ;;  %v16863_v12 = vld [vmem:[%s19371_s23 + $0x1700] ss:$16 sps:$4 sm:$0xff]  }
 0x1fd   : > { %11627 = vmatpush1.bf16.msra.mxu1 %v16815_v16  ;;  %11587 = vmatprep.subr.bf16.mxu0 %v16820_v17  ;;  %v16869_v16 = vld [vmem:[%s19371_s23 + $0x18e4] ss:$16 sps:$4 sm:$0xff]  }
 0x1fe   : > { %11628 = vmatprep.subr.bf16.mxu1 %v16823_v22  ;;  %v16872_v17 = vld [vmem:[%s19371_s23 + $0x1ae4] ss:$16 sps:$4 sm:$0xff]   ;;  %v16867_v22 = vld [vmem:[%s19371_s23 + $0x18e0] ss:$16 sps:$4 sm:$0xff]  }
 0x200   : > { %11588 = vmatpush2.bf16.msra.mxu0 %v16818_v41  ;;  %v16870_v41 = vld [vmem:[%s19371_s23 + $0x1ae0] ss:$16 sps:$4 sm:$0xff]  }
 0x201   : > { %11629 = vmatpush2.bf16.msra.mxu1 %v16821_v25  ;;  %11589 = vmatprep.subr.bf16.mxu0 %v16826_v28  ;;  %v19950_v25 = vrot.slane %v2288_v9, %v19438_v50  ;;  %v16875_v28 = vld [vmem:[%s19371_s23 + $0x18c4] ss:$16 sps:$4 sm:$0xff]   ;;  %v16894_v9 = vld [vmem:[%s19371_s23 + $0x1a60] ss:$16 sps:$4 sm:$0xff]  }
 0x202   : > { %11630 = vmatprep.subr.bf16.mxu1 %v16829_v29  ;;  %v16878_v29 = vld [vmem:[%s19371_s23 + $0x1ac4] ss:$16 sps:$4 sm:$0xff]  }
 0x204   : > { %11590 = vmatpush2.bf16.msra.mxu0 %v16824_v30  ;;  %v16873_v30 = vld [vmem:[%s19371_s23 + $0x18c0] ss:$16 sps:$4 sm:$0xff]  }
 0x205   : > { %11631 = vmatpush2.bf16.msra.mxu1 %v16827_v32  ;;  %11591 = vmatprep.subr.bf16.mxu0 %v16832_v34  ;;  %v16876_v32 = vld [vmem:[%s19371_s23 + $0x1ac0] ss:$16 sps:$4 sm:$0xff]   ;;  %v19962_v34 = vcombine.high %v19950_v25, %v19950_v25 }
 0x206   : > { %11632 = vmatprep.subr.bf16.mxu1 %v16835_v35 }
 0x208   : > { %11592 = vmatpush2.bf16.msra.mxu0 %v16830_v38 }
 0x209   : > { %11633 = vmatpush2.bf16.msra.mxu1 %v16833_v40  ;;  %11593 = vmatprep.subr.bf16.mxu0 %v16838_v33 }
 0x20a   : > { %11634 = vmatprep.subr.bf16.mxu1 %v16841_v7 }
 0x20c   : > { %11594 = vmatpush2.bf16.msra.mxu0 %v16836_v45  ;;  %v16881_v45 = vld [vmem:[%s19371_s23 + $0x18a4] ss:$16 sps:$4 sm:$0xff]  }
 0x20d   : > { %11635 = vmatpush2.bf16.msra.mxu1 %v16839_v47  ;;  %11595 = vmatprep.subr.bf16.mxu0 %v16844_v48  ;;  %v16884_v47 = vld [vmem:[%s19371_s23 + $0x1aa4] ss:$16 sps:$4 sm:$0xff]  }
 0x20e   : > { %11636 = vmatprep.subr.bf16.mxu1 %v16847_v39 }
 0x210   : > { %11596 = vmatpush2.bf16.msra.mxu0 %v16842_v51  ;;  %v16879_v51 = vld [vmem:[%s19371_s23 + $0x18a0] ss:$16 sps:$4 sm:$0xff]  }
 0x211   : > { %11637 = vmatpush2.bf16.msra.mxu1 %v16845_v52  ;;  %11597 = vmatprep.subr.bf16.mxu0 %v16850_v53  ;;  %v16882_v52 = vld [vmem:[%s19371_s23 + $0x1aa0] ss:$16 sps:$4 sm:$0xff]  }
 0x212   : > { %11638 = vmatprep.subr.bf16.mxu1 %v16853_v54 }
 0x214   : > { %11598 = vmatpush2.bf16.msra.mxu0 %v16848_v57 }
 0x215   : > { %11639 = vmatpush2.bf16.msra.mxu1 %v16851_v58  ;;  %11599 = vmatprep.subr.bf16.mxu0 %v16856_v0  ;;  %v16890_v0 = vld [vmem:[%s19371_s23 + $0x1a84] ss:$16 sps:$4 sm:$0xff]  }
 0x216   : > { %11640 = vmatprep.subr.bf16.mxu1 %v16859_v62  ;;  %v16885_v62 = vld [vmem:[%s19371_s23 + $0x1880] ss:$16 sps:$4 sm:$0xff]  }
 0x218   : > { %11600 = vmatpush2.bf16.msra.mxu0 %v16854_v2  ;;  %v16888_v2 = vld [vmem:[%s19371_s23 + $0x1a80] ss:$16 sps:$4 sm:$0xff]  }
 0x219   : > { %11641 = vmatpush2.bf16.msra.mxu1 %v16857_v3  ;;  %11601 = vmatprep.subr.bf16.mxu0 %v16862_v6  ;;  %v16893_v3 = vld [vmem:[%s19371_s23 + $0x1864] ss:$16 sps:$4 sm:$0xff]  }
 0x21a   : > { %11642 = vmatprep.subr.bf16.mxu1 %v16865_v8  ;;  %v16896_v6 = vld [vmem:[%s19371_s23 + $0x1a64] ss:$16 sps:$4 sm:$0xff]   ;;  %v16891_v8 = vld [vmem:[%s19371_s23 + $0x1860] ss:$16 sps:$4 sm:$0xff]  }
 0x21c   : > { %11602 = vmatpush2.bf16.msra.mxu0 %v16860_v11  ;;  %v16899_v11 = vld [vmem:[%s19371_s23 + $0x1844] ss:$16 sps:$4 sm:$0xff]  }
 0x21d   : > { %11643 = vmatpush2.bf16.msra.mxu1 %v16863_v12  ;;  %11653 = vmatprep.subr.bf16.mxu0 %v16869_v16  ;;  %v16902_v12 = vld [vmem:[%s19371_s23 + $0x1a44] ss:$16 sps:$4 sm:$0xff]   ;;  %v16897_v16 = vld [vmem:[%s19371_s23 + $0x1840] ss:$16 sps:$4 sm:$0xff]  }
 0x21e   : > { %11694 = vmatprep.subr.bf16.mxu1 %v16872_v17  ;;  %v16900_v17 = vld [vmem:[%s19371_s23 + $0x1a40] ss:$16 sps:$4 sm:$0xff]  }
 0x21f   : > { %v11359_v35 = vpop.f32.mrf.mxu0  ;;  %11604 = vmatmul.mubr.bf16.vlgmr.msra.gmra.mxu0 %v19941_v10 }
 0x220   : > { %v11400_v38 = vpop.f32.mrf.mxu1  ;;  %11645 = vmatmul.mubr.bf16.vlgmr.msra.gmra.mxu1 %v19954_v59  ;;  %v11360_v40 = vadd.f32 %v11359_v35, %v19871_v37  ;;  %11654 = vmatpush1.bf16.msra.mxu0 %v16867_v22  ;;  %v16905_v22 = vld [vmem:[%s19371_s23 + $0x1824] ss:$16 sps:$4 sm:$0xff]   ;;  %v16909_v35 = vld [vmem:[%s19371_s23 + $0x1800] ss:$16 sps:$4 sm:$0xff]  }
 0x221   : > { %11695 = vmatpush1.bf16.msra.mxu1 %v16870_v41  ;;  %v11361_v33 = vpop.f32.mrf.mxu0  ;;  %11655 = vmatprep.subr.bf16.mxu0 %v16875_v28  ;;  %v16908_v41 = vld [vmem:[%s19371_s23 + $0x1a24] ss:$16 sps:$4 sm:$0xff]   ;;  %v16903_v28 = vld [vmem:[%s19371_s23 + $0x1820] ss:$16 sps:$4 sm:$0xff]  }
 0x222   : > { %v11402_v7 = vpop.f32.mrf.mxu1  ;;  %11696 = vmatprep.subr.bf16.mxu1 %v16878_v29  ;;  %v19969_v48 = vadd.f32 %v11400_v38, %v11360_v40  ;;  %v11362_v39 = vadd.f32 %v11361_v33, %v19878_v46  ;;  %11685 = vmatprep.mubr.bf16.mxu0 %v19950_v25  ;;  %v16887_v46 = vld [vmem:[%s19371_s23 + $0x1884] ss:$16 sps:$4 sm:$0xff]   ;;  %v16906_v29 = vld [vmem:[%s19371_s23 + $0x1a20] ss:$16 sps:$4 sm:$0xff]  }
 0x223   : > { %11726 = vmatprep.mubr.bf16.mxu1 %v19962_v34  ;;  %v11363_v37 = vpop.f32.mrf.mxu0  ;;  %v16912_v38 = vld [vmem:[%s19371_s23 + $0x1a00] ss:$16 sps:$4 sm:$0xff]   ;;  %v16917_v40 = vld [vmem:[%s19371_s23 + $0x19e4] ss:$16 sps:$4 sm:$0xff]  }
 0x224   : > { %v11404_v53 = vpop.f32.mrf.mxu1  ;;  %v19976_v54 = vadd.f32 %v11402_v7, %v11362_v39  ;;  %11656 = vmatpush1.bf16.msra.mxu0 %v16873_v30  ;;  %v16911_v30 = vld [vmem:[%s19371_s23 + $0x1804] ss:$16 sps:$4 sm:$0xff]   ;;  %v16915_v7 = vld [vmem:[%s19371_s23 + $0x19e0] ss:$16 sps:$4 sm:$0xff]  }
 0x225   : > { %11697 = vmatpush1.bf16.msra.mxu1 %v16876_v32  ;;  %v11364_v57 = vpop.f32.mrf.mxu0  ;;  %11657 = vmatprep.subr.bf16.mxu0 %v16881_v45  ;;  %v16914_v32 = vld [vmem:[%s19371_s23 + $0x1a04] ss:$16 sps:$4 sm:$0xff]   ;;  %v16918_v45 = vld [vmem:[%s19371_s23 + $0x1be0] ss:$16 sps:$4 sm:$0xff]  }
 0x226   : > { %v11405_v58 = vpop.f32.mrf.mxu1  ;;  %11698 = vmatprep.subr.bf16.mxu1 %v16884_v47  ;;  %v16920_v33 = vld [vmem:[%s19371_s23 + $0x1be4] ss:$16 sps:$4 sm:$0xff]   ;;  %v16927_v57 = vld [vmem:[%s19371_s23 + $0x19a0] ss:$16 sps:$4 sm:$0xff]  }
 0x227   : > { %v16923_v47 = vld [vmem:[%s19371_s23 + $0x19c4] ss:$16 sps:$4 sm:$0xff]   ;;  %v16930_v58 = vld [vmem:[%s19371_s23 + $0x1ba0] ss:$16 sps:$4 sm:$0xff]  }
 0x228   : > { %11658 = vmatpush1.bf16.msra.mxu0 %v16879_v51  ;;  %v16926_v39 = vld [vmem:[%s19371_s23 + $0x1bc4] ss:$16 sps:$4 sm:$0xff]   ;;  %v16921_v51 = vld [vmem:[%s19371_s23 + $0x19c0] ss:$16 sps:$4 sm:$0xff]  }
 0x229   : > { %11699 = vmatpush1.bf16.msra.mxu1 %v16882_v52  ;;  %11659 = vmatprep.subr.bf16.mxu0 %v16887_v46  ;;  %v16924_v52 = vld [vmem:[%s19371_s23 + $0x1bc0] ss:$16 sps:$4 sm:$0xff]   ;;  %v16929_v37 = vld [vmem:[%s19371_s23 + $0x19a4] ss:$16 sps:$4 sm:$0xff]  }
 0x22a   : > { %11700 = vmatprep.subr.bf16.mxu1 %v16890_v0  ;;  %v16932_v53 = vld [vmem:[%s19371_s23 + $0x1ba4] ss:$16 sps:$4 sm:$0xff]  }
 0x22b   : > { %v16935_v46 = vld [vmem:[%s19371_s23 + $0x1984] ss:$16 sps:$4 sm:$0xff]  }
 0x22c   : > { %11660 = vmatpush1.bf16.msra.mxu0 %v16885_v62  ;;  %v16938_v0 = vld [vmem:[%s19371_s23 + $0x1b84] ss:$16 sps:$4 sm:$0xff]   ;;  %v16933_v62 = vld [vmem:[%s19371_s23 + $0x1980] ss:$16 sps:$4 sm:$0xff]  }
 0x22d   : > { %11701 = vmatpush1.bf16.msra.mxu1 %v16888_v2  ;;  %11661 = vmatprep.subr.bf16.mxu0 %v16893_v3  ;;  %v16936_v2 = vld [vmem:[%s19371_s23 + $0x1b80] ss:$16 sps:$4 sm:$0xff]   ;;  %v16941_v3 = vld [vmem:[%s19371_s23 + $0x1964] ss:$16 sps:$4 sm:$0xff]  }
 0x22e   : > { %11702 = vmatprep.subr.bf16.mxu1 %v16896_v6  ;;  %v16944_v6 = vld [vmem:[%s19371_s23 + $0x1b64] ss:$16 sps:$4 sm:$0xff]  }
 0x230   : > { %11662 = vmatpush1.bf16.msra.mxu0 %v16891_v8  ;;  %v16939_v8 = vld [vmem:[%s19371_s23 + $0x1960] ss:$16 sps:$4 sm:$0xff]  }
 0x231   : > { %11703 = vmatpush1.bf16.msra.mxu1 %v16894_v9  ;;  %11663 = vmatprep.subr.bf16.mxu0 %v16899_v11  ;;  %v16942_v9 = vld [vmem:[%s19371_s23 + $0x1b60] ss:$16 sps:$4 sm:$0xff]   ;;  %v16947_v11 = vld [vmem:[%s19371_s23 + $0x1944] ss:$16 sps:$4 sm:$0xff]  }
 0x232   : > { %11704 = vmatprep.subr.bf16.mxu1 %v16902_v12  ;;  %v16950_v12 = vld [vmem:[%s19371_s23 + $0x1b44] ss:$16 sps:$4 sm:$0xff]  }
 0x234   : > { %11664 = vmatpush1.bf16.msra.mxu0 %v16897_v16  ;;  %v2273_v16 = vcombine.high %v19923_v36, %v19923_v36  ;;  %v16951_v36 = vld [vmem:[%s19371_s23 + $0x1920] ss:$16 sps:$4 sm:$0xff]  }
 0x235   : > { %11705 = vmatpush1.bf16.msra.mxu1 %v16900_v17  ;;  %11665 = vmatprep.subr.bf16.mxu0 %v16905_v22  ;;  %v16945_v17 = vld [vmem:[%s19371_s23 + $0x1940] ss:$16 sps:$4 sm:$0xff]  }
 0x236   : > { %11706 = vmatprep.subr.bf16.mxu1 %v16908_v41  ;;  %v16948_v22 = vld [vmem:[%s19371_s23 + $0x1b40] ss:$16 sps:$4 sm:$0xff]   ;;  %v16953_v41 = vld [vmem:[%s19371_s23 + $0x1924] ss:$16 sps:$4 sm:$0xff]  }
 0x238   : > { %11666 = vmatpush1.bf16.msra.mxu0 %v16903_v28  ;;  %v16956_v28 = vld [vmem:[%s19371_s23 + $0x1b24] ss:$16 sps:$4 sm:$0xff]  }
 0x239   : > { %11707 = vmatpush1.bf16.msra.mxu1 %v16906_v29  ;;  %11667 = vmatprep.subr.bf16.mxu0 %v16911_v30  ;;  %v20027_v29 = vrot.slane %v2273_v16, %v19438_v50  ;;  %v16954_v30 = vld [vmem:[%s19371_s23 + $0x1b20] ss:$16 sps:$4 sm:$0xff]  }
 0x23a   : > { %11708 = vmatprep.subr.bf16.mxu1 %v16914_v32  ;;  %v16959_v32 = vld [vmem:[%s19371_s23 + $0x1904] ss:$16 sps:$4 sm:$0xff]   ;;  %v16975_v16 = vld [vmem:[%s19371_s23 + $0x1ca0] ss:$16 sps:$4 sm:$0xff]  }
 0x23c   : > { %11668 = vmatpush1.bf16.msra.mxu0 %v16909_v35  ;;  %v16962_v35 = vld [vmem:[%s19371_s23 + $0x1b04] ss:$16 sps:$4 sm:$0xff]  }
 0x23d   : > { %11709 = vmatpush1.bf16.msra.mxu1 %v16912_v38  ;;  %11669 = vmatprep.subr.bf16.mxu0 %v16917_v40  ;;  %v2289_v38 = vcombine.high %v20027_v29, %v20027_v29  ;;  %v20037_v40 = vrot.slane %v19931_v63, %v19438_v50 }
 0x23e   : > { %11710 = vmatprep.subr.bf16.mxu1 %v16920_v33  ;;  %v16957_v33 = vld [vmem:[%s19371_s23 + $0x1900] ss:$16 sps:$4 sm:$0xff]  }
 0x23f   : > { %v20050_v63 = vcombine.high %v20037_v40, %v20037_v40 }
 0x240   : > { %11670 = vmatpush2.bf16.msra.mxu0 %v16915_v7  ;;  %v16960_v7 = vld [vmem:[%s19371_s23 + $0x1b00] ss:$16 sps:$4 sm:$0xff]  }
 0x241   : > { %11711 = vmatpush2.bf16.msra.mxu1 %v16918_v45  ;;  %11671 = vmatprep.subr.bf16.mxu0 %v16923_v47  ;;  %v16965_v45 = vld [vmem:[%s19371_s23 + $0x1ce4] ss:$16 sps:$4 sm:$0xff]  }
 0x242   : > { %11712 = vmatprep.subr.bf16.mxu1 %v16926_v39  ;;  %v16968_v47 = vld [vmem:[%s19371_s23 + $0x1ee4] ss:$16 sps:$4 sm:$0xff]   ;;  %v16963_v39 = vld [vmem:[%s19371_s23 + $0x1ce0] ss:$16 sps:$4 sm:$0xff]  }
 0x244   : > { %11672 = vmatpush2.bf16.msra.mxu0 %v16921_v51  ;;  %v16966_v51 = vld [vmem:[%s19371_s23 + $0x1ee0] ss:$16 sps:$4 sm:$0xff]  }
 0x245   : > { %11713 = vmatpush2.bf16.msra.mxu1 %v16924_v52  ;;  %11673 = vmatprep.subr.bf16.mxu0 %v16929_v37  ;;  %v20046_v52 = vrot.slane %v2289_v38, %v19438_v50  ;;  %v16971_v37 = vld [vmem:[%s19371_s23 + $0x1cc4] ss:$16 sps:$4 sm:$0xff]  }
 0x246   : > { %11714 = vmatprep.subr.bf16.mxu1 %v16932_v53  ;;  %v16974_v53 = vld [vmem:[%s19371_s23 + $0x1ec4] ss:$16 sps:$4 sm:$0xff]  }
 0x247   : > { %v16989_v38 = vld [vmem:[%s19371_s23 + $0x1c64] ss:$16 sps:$4 sm:$0xff]  }
 0x248   : > { %11674 = vmatpush2.bf16.msra.mxu0 %v16927_v57  ;;  %v16969_v57 = vld [vmem:[%s19371_s23 + $0x1cc0] ss:$16 sps:$4 sm:$0xff]  }
 0x249   : > { %11715 = vmatpush2.bf16.msra.mxu1 %v16930_v58  ;;  %11675 = vmatprep.subr.bf16.mxu0 %v16935_v46  ;;  %v16972_v58 = vld [vmem:[%s19371_s23 + $0x1ec0] ss:$16 sps:$4 sm:$0xff]   ;;  %v20058_v46 = vcombine.high %v20046_v52, %v20046_v52 }
 0x24a   : > { %11716 = vmatprep.subr.bf16.mxu1 %v16938_v0 }
 0x24c   : > { %11676 = vmatpush2.bf16.msra.mxu0 %v16933_v62 }
 0x24d   : > { %11717 = vmatpush2.bf16.msra.mxu1 %v16936_v2  ;;  %11677 = vmatprep.subr.bf16.mxu0 %v16941_v3 }
 0x24e   : > { %11718 = vmatprep.subr.bf16.mxu1 %v16944_v6 }
 0x250   : > { %11678 = vmatpush2.bf16.msra.mxu0 %v16939_v8  ;;  %v16977_v8 = vld [vmem:[%s19371_s23 + $0x1ca4] ss:$16 sps:$4 sm:$0xff]  }
 0x251   : > { %11719 = vmatpush2.bf16.msra.mxu1 %v16942_v9  ;;  %11679 = vmatprep.subr.bf16.mxu0 %v16947_v11  ;;  %v16980_v9 = vld [vmem:[%s19371_s23 + $0x1ea4] ss:$16 sps:$4 sm:$0xff]  }
 0x252   : > { %11720 = vmatprep.subr.bf16.mxu1 %v16950_v12 }
 0x254   : > { %11680 = vmatpush2.bf16.msra.mxu0 %v16945_v17  ;;  %v16978_v17 = vld [vmem:[%s19371_s23 + $0x1ea0] ss:$16 sps:$4 sm:$0xff]  }
 0x255   : > { %11721 = vmatpush2.bf16.msra.mxu1 %v16948_v22  ;;  %11681 = vmatprep.subr.bf16.mxu0 %v16953_v41 }
 0x256   : > { %11722 = vmatprep.subr.bf16.mxu1 %v16956_v28 }
 0x258   : > { %11682 = vmatpush2.bf16.msra.mxu0 %v16951_v36 }
 0x259   : > { %11723 = vmatpush2.bf16.msra.mxu1 %v16954_v30  ;;  %11683 = vmatprep.subr.bf16.mxu0 %v16959_v32  ;;  %v16986_v30 = vld [vmem:[%s19371_s23 + $0x1e84] ss:$16 sps:$4 sm:$0xff]   ;;  %v16981_v32 = vld [vmem:[%s19371_s23 + $0x1c80] ss:$16 sps:$4 sm:$0xff]  }
 0x25a   : > { %11724 = vmatprep.subr.bf16.mxu1 %v16962_v35  ;;  %v16984_v35 = vld [vmem:[%s19371_s23 + $0x1e80] ss:$16 sps:$4 sm:$0xff]  }
 0x25c   : > { %11684 = vmatpush2.bf16.msra.mxu0 %v16957_v33  ;;  %v16992_v33 = vld [vmem:[%s19371_s23 + $0x1e64] ss:$16 sps:$4 sm:$0xff]  }
 0x25d   : > { %11725 = vmatpush2.bf16.msra.mxu1 %v16960_v7  ;;  %11735 = vmatprep.subr.bf16.mxu0 %v16965_v45  ;;  %v16987_v7 = vld [vmem:[%s19371_s23 + $0x1c60] ss:$16 sps:$4 sm:$0xff]  }
 0x25e   : > { %11776 = vmatprep.subr.bf16.mxu1 %v16968_v47  ;;  %v16990_v45 = vld [vmem:[%s19371_s23 + $0x1e60] ss:$16 sps:$4 sm:$0xff]   ;;  %v16995_v47 = vld [vmem:[%s19371_s23 + $0x1c44] ss:$16 sps:$4 sm:$0xff]  }
 0x25f   : > { %v11441_v0 = vpop.f32.mrf.mxu0  ;;  %11686 = vmatmul.mubr.bf16.vlgmr.msra.gmra.mxu0 %v20037_v40 }
 0x260   : > { %v11482_v62 = vpop.f32.mrf.mxu1  ;;  %11727 = vmatmul.mubr.bf16.vlgmr.msra.gmra.mxu1 %v20050_v63  ;;  %v11442_v2 = vadd.f32 %v11441_v0, %v19969_v48  ;;  %11736 = vmatpush1.bf16.msra.mxu0 %v16963_v39  ;;  %v16998_v39 = vld [vmem:[%s19371_s23 + $0x1e44] ss:$16 sps:$4 sm:$0xff]   ;;  %v17002_v0 = vld [vmem:[%s19371_s23 + $0x1e20] ss:$16 sps:$4 sm:$0xff]  }
 0x261   : > { %11777 = vmatpush1.bf16.msra.mxu1 %v16966_v51  ;;  %v11443_v3 = vpop.f32.mrf.mxu0  ;;  %11737 = vmatprep.subr.bf16.mxu0 %v16971_v37  ;;  %v16993_v51 = vld [vmem:[%s19371_s23 + $0x1c40] ss:$16 sps:$4 sm:$0xff]  }
 0x262   : > { %v11484_v6 = vpop.f32.mrf.mxu1  ;;  %11778 = vmatprep.subr.bf16.mxu1 %v16974_v53  ;;  %v20065_v11 = vadd.f32 %v11482_v62, %v11442_v2  ;;  %v11444_v12 = vadd.f32 %v11443_v3, %v19976_v54  ;;  %11767 = vmatprep.mubr.bf16.mxu0 %v20046_v52  ;;  %v16983_v54 = vld [vmem:[%s19371_s23 + $0x1c84] ss:$16 sps:$4 sm:$0xff]   ;;  %v16996_v37 = vld [vmem:[%s19371_s23 + $0x1e40] ss:$16 sps:$4 sm:$0xff]  }
 0x263   : > { %11808 = vmatprep.mubr.bf16.mxu1 %v20058_v46  ;;  %v11445_v48 = vpop.f32.mrf.mxu0  ;;  %v17001_v53 = vld [vmem:[%s19371_s23 + $0x1c24] ss:$16 sps:$4 sm:$0xff]   ;;  %v17005_v3 = vld [vmem:[%s19371_s23 + $0x1c00] ss:$16 sps:$4 sm:$0xff]  }
 0x264   : > { %v11486_v22 = vpop.f32.mrf.mxu1  ;;  %v20072_v41 = vadd.f32 %v11484_v6, %v11444_v12  ;;  %11738 = vmatpush1.bf16.msra.mxu0 %v16969_v57  ;;  %v17004_v57 = vld [vmem:[%s19371_s23 + $0x1e24] ss:$16 sps:$4 sm:$0xff]   ;;  %v17008_v6 = vld [vmem:[%s19371_s23 + $0x1e00] ss:$16 sps:$4 sm:$0xff]  }
 0x265   : > { %11779 = vmatpush1.bf16.msra.mxu1 %v16972_v58  ;;  %v11446_v28 = vpop.f32.mrf.mxu0  ;;  %11739 = vmatprep.subr.bf16.mxu0 %v16977_v8  ;;  %v16999_v58 = vld [vmem:[%s19371_s23 + $0x1c20] ss:$16 sps:$4 sm:$0xff]   ;;  %v17007_v62 = vld [vmem:[%s19371_s23 + $0x1c04] ss:$16 sps:$4 sm:$0xff]  }
 0x266   : > { %v11487_v36 = vpop.f32.mrf.mxu1  ;;  %11780 = vmatprep.subr.bf16.mxu1 %v16980_v9  ;;  %v17010_v2 = vld [vmem:[%s19371_s23 + $0x1e04] ss:$16 sps:$4 sm:$0xff]   ;;  %v17011_v12 = vld [vmem:[%s19371_s23 + $0x1de0] ss:$16 sps:$4 sm:$0xff]  }
 0x267   : > { %v17013_v8 = vld [vmem:[%s19371_s23 + $0x1de4] ss:$16 sps:$4 sm:$0xff]   ;;  %v17017_v22 = vld [vmem:[%s19371_s23 + $0x1dc0] ss:$16 sps:$4 sm:$0xff]  }
 0x268   : > { %11740 = vmatpush1.bf16.msra.mxu0 %v16975_v16  ;;  %v17016_v9 = vld [vmem:[%s19371_s23 + $0x1fe4] ss:$16 sps:$4 sm:$0xff]   ;;  %v17014_v16 = vld [vmem:[%s19371_s23 + $0x1fe0] ss:$16 sps:$4 sm:$0xff]  }
 0x269   : > { %11781 = vmatpush1.bf16.msra.mxu1 %v16978_v17  ;;  %11741 = vmatprep.subr.bf16.mxu0 %v16983_v54  ;;  %v17019_v17 = vld [vmem:[%s19371_s23 + $0x1dc4] ss:$16 sps:$4 sm:$0xff]   ;;  %v17020_v28 = vld [vmem:[%s19371_s23 + $0x1fc0] ss:$16 sps:$4 sm:$0xff]  }
 0x26a   : > { %11782 = vmatprep.subr.bf16.mxu1 %v16986_v30  ;;  %v17022_v48 = vld [vmem:[%s19371_s23 + $0x1fc4] ss:$16 sps:$4 sm:$0xff]   ;;  %v17023_v30 = vld [vmem:[%s19371_s23 + $0x1da0] ss:$16 sps:$4 sm:$0xff]  }
 0x26b   : > { %v17025_v36 = vld [vmem:[%s19371_s23 + $0x1da4] ss:$16 sps:$4 sm:$0xff]  }
 0x26c   : > { %11742 = vmatpush1.bf16.msra.mxu0 %v16981_v32  ;;  %v17028_v54 = vld [vmem:[%s19371_s23 + $0x1fa4] ss:$16 sps:$4 sm:$0xff]   ;;  %v17026_v32 = vld [vmem:[%s19371_s23 + $0x1fa0] ss:$16 sps:$4 sm:$0xff]  }
 0x26d   : > { %11783 = vmatpush1.bf16.msra.mxu1 %v16984_v35  ;;  %11743 = vmatprep.subr.bf16.mxu0 %v16989_v38  ;;  %v17031_v35 = vld [vmem:[%s19371_s23 + $0x1d84] ss:$16 sps:$4 sm:$0xff]  }
 0x26e   : > { %11784 = vmatprep.subr.bf16.mxu1 %v16992_v33  ;;  %v17034_v38 = vld [vmem:[%s19371_s23 + $0x1f84] ss:$16 sps:$4 sm:$0xff]   ;;  %v17029_v33 = vld [vmem:[%s19371_s23 + $0x1d80] ss:$16 sps:$4 sm:$0xff]  }
 0x270   : > { %11744 = vmatpush1.bf16.msra.mxu0 %v16987_v7  ;;  %v17032_v7 = vld [vmem:[%s19371_s23 + $0x1f80] ss:$16 sps:$4 sm:$0xff]  }
 0x271   : > { %11785 = vmatpush1.bf16.msra.mxu1 %v16990_v45  ;;  %11745 = vmatprep.subr.bf16.mxu0 %v16995_v47  ;;  %v17037_v45 = vld [vmem:[%s19371_s23 + $0x1d64] ss:$16 sps:$4 sm:$0xff]  }
 0x272   : > { %11786 = vmatprep.subr.bf16.mxu1 %v16998_v39  ;;  %v17040_v47 = vld [vmem:[%s19371_s23 + $0x1f64] ss:$16 sps:$4 sm:$0xff]   ;;  %v17035_v39 = vld [vmem:[%s19371_s23 + $0x1d60] ss:$16 sps:$4 sm:$0xff]  }
 0x274   : > { %11746 = vmatpush1.bf16.msra.mxu0 %v16993_v51  ;;  %v17038_v51 = vld [vmem:[%s19371_s23 + $0x1f60] ss:$16 sps:$4 sm:$0xff]  }
 0x275   : > { %11787 = vmatpush1.bf16.msra.mxu1 %v16996_v37  ;;  %11747 = vmatprep.subr.bf16.mxu0 %v17001_v53  ;;  %v17043_v37 = vld [vmem:[%s19371_s23 + $0x1d44] ss:$16 sps:$4 sm:$0xff]  }
 0x276   : > { %11788 = vmatprep.subr.bf16.mxu1 %v17004_v57  ;;  %v17046_v53 = vld [vmem:[%s19371_s23 + $0x1f44] ss:$16 sps:$4 sm:$0xff]  }
 0x277   : > { %v20117_v57 = vld [vmem:[%s19364_s27 + $0x20] sm:$0xff] }
 0x278   : > { %11748 = vmatpush1.bf16.msra.mxu0 %v16999_v58  ;;  %v17041_v58 = vld [vmem:[%s19371_s23 + $0x1d40] ss:$16 sps:$4 sm:$0xff]  }
 0x279   : > { %11789 = vmatpush1.bf16.msra.mxu1 %v17002_v0  ;;  %11749 = vmatprep.subr.bf16.mxu0 %v17007_v62  ;;  %v17044_v0 = vld [vmem:[%s19371_s23 + $0x1f40] ss:$16 sps:$4 sm:$0xff]   ;;  %v17049_v62 = vld [vmem:[%s19371_s23 + $0x1d24] ss:$16 sps:$4 sm:$0xff]  }
 0x27a   : > { %11790 = vmatprep.subr.bf16.mxu1 %v17010_v2  ;;  %v17052_v2 = vld [vmem:[%s19371_s23 + $0x1f24] ss:$16 sps:$4 sm:$0xff]  }
 0x27c   : > { %11750 = vmatpush1.bf16.msra.mxu0 %v17005_v3  ;;  %v20125_v3 = vrot.slane %v20117_v57, %v19438_v50 }
 0x27d   : > { %11791 = vmatpush1.bf16.msra.mxu1 %v17008_v6  ;;  %11751 = vmatprep.subr.bf16.mxu0 %v17013_v8  ;;  %v17047_v6 = vld [vmem:[%s19371_s23 + $0x1d20] ss:$16 sps:$4 sm:$0xff]  }
 0x27e   : > { %11792 = vmatprep.subr.bf16.mxu1 %v17016_v9  ;;  %v17050_v8 = vld [vmem:[%s19371_s23 + $0x1f20] ss:$16 sps:$4 sm:$0xff]   ;;  %v17055_v9 = vld [vmem:[%s19371_s23 + $0x1d04] ss:$16 sps:$4 sm:$0xff]  }
 0x280   : > { %11752 = vmatpush2.bf16.msra.mxu0 %v17011_v12  ;;  %v17058_v12 = vld [vmem:[%s19371_s23 + $0x1f04] ss:$16 sps:$4 sm:$0xff]  }
 0x281   : > { %11793 = vmatpush2.bf16.msra.mxu1 %v17014_v16  ;;  %11753 = vmatprep.subr.bf16.mxu0 %v17019_v17  ;;  %v2337_v16 = vcombine.high %v20125_v3, %v20125_v3  ;;  %v20135_v17 = vrot.slane %v20027_v29, %v19438_v50 }
 0x282   : > { %11794 = vmatprep.subr.bf16.mxu1 %v17022_v48  ;;  %v17053_v48 = vld [vmem:[%s19371_s23 + $0x1d00] ss:$16 sps:$4 sm:$0xff]  }
 0x283   : > { %v20148_v29 = vcombine.high %v20135_v17, %v20135_v17 }
 0x284   : > { %11754 = vmatpush2.bf16.msra.mxu0 %v17017_v22  ;;  %v17056_v22 = vld [vmem:[%s19371_s23 + $0x1f00] ss:$16 sps:$4 sm:$0xff]  }
 0x285   : > { %11795 = vmatpush2.bf16.msra.mxu1 %v17020_v28  ;;  %11755 = vmatprep.subr.bf16.mxu0 %v17025_v36  ;;  %v17062_v28 = vld [vmem:[%s19371_s23 + $0x20e4] ss:$16 sps:$4 sm:$0xff]  }
 0x286   : > { %11796 = vmatprep.subr.bf16.mxu1 %v17028_v54  ;;  %v17065_v36 = vld [vmem:[%s19371_s23 + $0x22e4] ss:$16 sps:$4 sm:$0xff]   ;;  %v17060_v54 = vld [vmem:[%s19371_s23 + $0x20e0] ss:$16 sps:$4 sm:$0xff]  }
 0x288   : > { %11756 = vmatpush2.bf16.msra.mxu0 %v17023_v30  ;;  %v17063_v30 = vld [vmem:[%s19371_s23 + $0x22e0] ss:$16 sps:$4 sm:$0xff]  }
 0x289   : > { %11797 = vmatpush2.bf16.msra.mxu1 %v17026_v32  ;;  %11757 = vmatprep.subr.bf16.mxu0 %v17031_v35  ;;  %v20144_v32 = vrot.slane %v2337_v16, %v19438_v50  ;;  %v17068_v35 = vld [vmem:[%s19371_s23 + $0x20c4] ss:$16 sps:$4 sm:$0xff]  }
 0x28a   : > { %11798 = vmatprep.subr.bf16.mxu1 %v17034_v38  ;;  %v17071_v38 = vld [vmem:[%s19371_s23 + $0x22c4] ss:$16 sps:$4 sm:$0xff]  }
 0x28c   : > { %11758 = vmatpush2.bf16.msra.mxu0 %v17029_v33  ;;  %v17066_v33 = vld [vmem:[%s19371_s23 + $0x20c0] ss:$16 sps:$4 sm:$0xff]  }
 0x28d   : > { %11799 = vmatpush2.bf16.msra.mxu1 %v17032_v7  ;;  %11759 = vmatprep.subr.bf16.mxu0 %v17037_v45  ;;  %v17069_v7 = vld [vmem:[%s19371_s23 + $0x22c0] ss:$16 sps:$4 sm:$0xff]   ;;  %v20156_v45 = vcombine.high %v20144_v32, %v20144_v32 }
 0x28e   : > { %11800 = vmatprep.subr.bf16.mxu1 %v17040_v47 }
 0x290   : > { %11760 = vmatpush2.bf16.msra.mxu0 %v17035_v39 }
 0x291   : > { %11801 = vmatpush2.bf16.msra.mxu1 %v17038_v51  ;;  %11761 = vmatprep.subr.bf16.mxu0 %v17043_v37 }
 0x292   : > { %11802 = vmatprep.subr.bf16.mxu1 %v17046_v53 }
 0x294   : > { %11762 = vmatpush2.bf16.msra.mxu0 %v17041_v58  ;;  %v17074_v58 = vld [vmem:[%s19371_s23 + $0x20a4] ss:$16 sps:$4 sm:$0xff]  }
 0x295   : > { %11803 = vmatpush2.bf16.msra.mxu1 %v17044_v0  ;;  %11763 = vmatprep.subr.bf16.mxu0 %v17049_v62  ;;  %v17077_v0 = vld [vmem:[%s19371_s23 + $0x22a4] ss:$16 sps:$4 sm:$0xff]  }
 0x296   : > { %11804 = vmatprep.subr.bf16.mxu1 %v17052_v2 }
 0x298   : > { %11764 = vmatpush2.bf16.msra.mxu0 %v17047_v6  ;;  %v17072_v6 = vld [vmem:[%s19371_s23 + $0x20a0] ss:$16 sps:$4 sm:$0xff]  }
 0x299   : > { %11805 = vmatpush2.bf16.msra.mxu1 %v17050_v8  ;;  %11765 = vmatprep.subr.bf16.mxu0 %v17055_v9  ;;  %v17075_v8 = vld [vmem:[%s19371_s23 + $0x22a0] ss:$16 sps:$4 sm:$0xff]  }
 0x29a   : > { %11806 = vmatprep.subr.bf16.mxu1 %v17058_v12 }
 0x29c   : > { %11766 = vmatpush2.bf16.msra.mxu0 %v17053_v48 }
 0x29d   : > { %11807 = vmatpush2.bf16.msra.mxu1 %v17056_v22  ;;  %11817 = vmatprep.subr.bf16.mxu0 %v17062_v28  ;;  %v17083_v22 = vld [vmem:[%s19371_s23 + $0x2284] ss:$16 sps:$4 sm:$0xff]   ;;  %v17078_v28 = vld [vmem:[%s19371_s23 + $0x2080] ss:$16 sps:$4 sm:$0xff]  }
 0x29e   : > { %11858 = vmatprep.subr.bf16.mxu1 %v17065_v36  ;;  %v17081_v36 = vld [vmem:[%s19371_s23 + $0x2280] ss:$16 sps:$4 sm:$0xff]  }
 0x29f   : > { %v11523_v47 = vpop.f32.mrf.mxu0  ;;  %11768 = vmatmul.mubr.bf16.vlgmr.msra.gmra.mxu0 %v20135_v17 }
 0x2a0   : > { %v11564_v39 = vpop.f32.mrf.mxu1  ;;  %11809 = vmatmul.mubr.bf16.vlgmr.msra.gmra.mxu1 %v20148_v29  ;;  %v11524_v51 = vadd.f32 %v11523_v47, %v20065_v11  ;;  %11818 = vmatpush1.bf16.msra.mxu0 %v17060_v54  ;;  %v17086_v54 = vld [vmem:[%s19371_s23 + $0x2064] ss:$16 sps:$4 sm:$0xff]   ;;  %v17090_v47 = vld [vmem:[%s19371_s23 + $0x2040] ss:$16 sps:$4 sm:$0xff]  }
 0x2a1   : > { %11859 = vmatpush1.bf16.msra.mxu1 %v17063_v30  ;;  %v11525_v37 = vpop.f32.mrf.mxu0  ;;  %11819 = vmatprep.subr.bf16.mxu0 %v17068_v35  ;;  %v17089_v30 = vld [vmem:[%s19371_s23 + $0x2264] ss:$16 sps:$4 sm:$0xff]   ;;  %v17084_v35 = vld [vmem:[%s19371_s23 + $0x2060] ss:$16 sps:$4 sm:$0xff]  }
 0x2a2   : > { %v11566_v53 = vpop.f32.mrf.mxu1  ;;  %11860 = vmatprep.subr.bf16.mxu1 %v17071_v38  ;;  %v20163_v62 = vadd.f32 %v11564_v39, %v11524_v51  ;;  %v11526_v2 = vadd.f32 %v11525_v37, %v20072_v41  ;;  %11849 = vmatprep.mubr.bf16.mxu0 %v20144_v32  ;;  %v17080_v41 = vld [vmem:[%s19371_s23 + $0x2084] ss:$16 sps:$4 sm:$0xff]   ;;  %v17087_v38 = vld [vmem:[%s19371_s23 + $0x2260] ss:$16 sps:$4 sm:$0xff]  }
 0x2a3   : > { %11890 = vmatprep.mubr.bf16.mxu1 %v20156_v45  ;;  %v11527_v11 = vpop.f32.mrf.mxu0  ;;  %v17093_v39 = vld [vmem:[%s19371_s23 + $0x2240] ss:$16 sps:$4 sm:$0xff]   ;;  %v17098_v51 = vld [vmem:[%s19371_s23 + $0x2024] ss:$16 sps:$4 sm:$0xff]  }
 0x2a4   : > { %v11568_v9 = vpop.f32.mrf.mxu1  ;;  %v20170_v12 = vadd.f32 %v11566_v53, %v11526_v2  ;;  %11820 = vmatpush1.bf16.msra.mxu0 %v17066_v33  ;;  %v17092_v33 = vld [vmem:[%s19371_s23 + $0x2044] ss:$16 sps:$4 sm:$0xff]   ;;  %v17096_v53 = vld [vmem:[%s19371_s23 + $0x2020] ss:$16 sps:$4 sm:$0xff]  }
 0x2a5   : > { %11861 = vmatpush1.bf16.msra.mxu1 %v17069_v7  ;;  %v11528_v16 = vpop.f32.mrf.mxu0  ;;  %11821 = vmatprep.subr.bf16.mxu0 %v17074_v58  ;;  %v17095_v7 = vld [vmem:[%s19371_s23 + $0x2244] ss:$16 sps:$4 sm:$0xff]   ;;  %v17099_v58 = vld [vmem:[%s19371_s23 + $0x2220] ss:$16 sps:$4 sm:$0xff]  }
 0x2a6   : > { %v11569_v48 = vpop.f32.mrf.mxu1  ;;  %11862 = vmatprep.subr.bf16.mxu1 %v17077_v0  ;;  %v17101_v37 = vld [vmem:[%s19371_s23 + $0x2224] ss:$16 sps:$4 sm:$0xff]   ;;  %v17108_v16 = vld [vmem:[%s19371_s23 + $0x21e0] ss:$16 sps:$4 sm:$0xff]  }
 0x2a7   : > { %v17104_v0 = vld [vmem:[%s19371_s23 + $0x2004] ss:$16 sps:$4 sm:$0xff]   ;;  %v17111_v48 = vld [vmem:[%s19371_s23 + $0x23e0] ss:$16 sps:$4 sm:$0xff]  }
 0x2a8   : > { %11822 = vmatpush1.bf16.msra.mxu0 %v17072_v6  ;;  %v17107_v2 = vld [vmem:[%s19371_s23 + $0x2204] ss:$16 sps:$4 sm:$0xff]   ;;  %v17102_v6 = vld [vmem:[%s19371_s23 + $0x2000] ss:$16 sps:$4 sm:$0xff]  }
 0x2a9   : > { %11863 = vmatpush1.bf16.msra.mxu1 %v17075_v8  ;;  %11823 = vmatprep.subr.bf16.mxu0 %v17080_v41  ;;  %v17105_v8 = vld [vmem:[%s19371_s23 + $0x2200] ss:$16 sps:$4 sm:$0xff]   ;;  %v17110_v11 = vld [vmem:[%s19371_s23 + $0x21e4] ss:$16 sps:$4 sm:$0xff]  }
 0x2aa   : > { %11864 = vmatprep.subr.bf16.mxu1 %v17083_v22  ;;  %v17113_v9 = vld [vmem:[%s19371_s23 + $0x23e4] ss:$16 sps:$4 sm:$0xff]  }
 0x2ab   : > { %v17116_v41 = vld [vmem:[%s19371_s23 + $0x21c4] ss:$16 sps:$4 sm:$0xff]  }
 0x2ac   : > { %11824 = vmatpush1.bf16.msra.mxu0 %v17078_v28  ;;  %v17119_v22 = vld [vmem:[%s19371_s23 + $0x23c4] ss:$16 sps:$4 sm:$0xff]   ;;  %v17114_v28 = vld [vmem:[%s19371_s23 + $0x21c0] ss:$16 sps:$4 sm:$0xff]  }
 0x2ad   : > { %11865 = vmatpush1.bf16.msra.mxu1 %v17081_v36  ;;  %11825 = vmatprep.subr.bf16.mxu0 %v17086_v54  ;;  %v17117_v36 = vld [vmem:[%s19371_s23 + $0x23c0] ss:$16 sps:$4 sm:$0xff]   ;;  %v17122_v54 = vld [vmem:[%s19371_s23 + $0x21a4] ss:$16 sps:$4 sm:$0xff]  }
 0x2ae   : > { %11866 = vmatprep.subr.bf16.mxu1 %v17089_v30  ;;  %v17125_v30 = vld [vmem:[%s19371_s23 + $0x23a4] ss:$16 sps:$4 sm:$0xff]  }
 0x2b0   : > { %11826 = vmatpush1.bf16.msra.mxu0 %v17084_v35  ;;  %v17120_v35 = vld [vmem:[%s19371_s23 + $0x21a0] ss:$16 sps:$4 sm:$0xff]  }
 0x2b1   : > { %11867 = vmatpush1.bf16.msra.mxu1 %v17087_v38  ;;  %11827 = vmatprep.subr.bf16.mxu0 %v17092_v33  ;;  %v17123_v38 = vld [vmem:[%s19371_s23 + $0x23a0] ss:$16 sps:$4 sm:$0xff]   ;;  %v17128_v33 = vld [vmem:[%s19371_s23 + $0x2184] ss:$16 sps:$4 sm:$0xff]  }
 0x2b2   : > { %11868 = vmatprep.subr.bf16.mxu1 %v17095_v7  ;;  %v17131_v7 = vld [vmem:[%s19371_s23 + $0x2384] ss:$16 sps:$4 sm:$0xff]  }
 0x2b4   : > { %11828 = vmatpush1.bf16.msra.mxu0 %v17090_v47  ;;  %v17126_v47 = vld [vmem:[%s19371_s23 + $0x2180] ss:$16 sps:$4 sm:$0xff]  }
 0x2b5   : > { %11869 = vmatpush1.bf16.msra.mxu1 %v17093_v39  ;;  %11829 = vmatprep.subr.bf16.mxu0 %v17098_v51  ;;  %v17129_v39 = vld [vmem:[%s19371_s23 + $0x2380] ss:$16 sps:$4 sm:$0xff]   ;;  %v17134_v51 = vld [vmem:[%s19371_s23 + $0x2164] ss:$16 sps:$4 sm:$0xff]  }
 0x2b6   : > { %11870 = vmatprep.subr.bf16.mxu1 %v17101_v37  ;;  %v17137_v37 = vld [vmem:[%s19371_s23 + $0x2364] ss:$16 sps:$4 sm:$0xff]  }
 0x2b8   : > { %11830 = vmatpush1.bf16.msra.mxu0 %v17096_v53  ;;  %v17132_v53 = vld [vmem:[%s19371_s23 + $0x2160] ss:$16 sps:$4 sm:$0xff]  }
 0x2b9   : > { %11871 = vmatpush1.bf16.msra.mxu1 %v17099_v58  ;;  %11831 = vmatprep.subr.bf16.mxu0 %v17104_v0  ;;  %v17135_v58 = vld [vmem:[%s19371_s23 + $0x2360] ss:$16 sps:$4 sm:$0xff]   ;;  %v17140_v0 = vld [vmem:[%s19371_s23 + $0x2144] ss:$16 sps:$4 sm:$0xff]  }
 0x2ba   : > { %11872 = vmatprep.subr.bf16.mxu1 %v17107_v2  ;;  %v17143_v2 = vld [vmem:[%s19371_s23 + $0x2344] ss:$16 sps:$4 sm:$0xff]  }
 0x2bc   : > { %11832 = vmatpush1.bf16.msra.mxu0 %v17102_v6  ;;  %v2322_v6 = vcombine.high %v20117_v57, %v20117_v57  ;;  %v17144_v57 = vld [vmem:[%s19371_s23 + $0x2120] ss:$16 sps:$4 sm:$0xff]  }
 0x2bd   : > { %11873 = vmatpush1.bf16.msra.mxu1 %v17105_v8  ;;  %11833 = vmatprep.subr.bf16.mxu0 %v17110_v11  ;;  %v17138_v8 = vld [vmem:[%s19371_s23 + $0x2140] ss:$16 sps:$4 sm:$0xff]  }
 0x2be   : > { %11874 = vmatprep.subr.bf16.mxu1 %v17113_v9  ;;  %v17141_v11 = vld [vmem:[%s19371_s23 + $0x2340] ss:$16 sps:$4 sm:$0xff]   ;;  %v17146_v9 = vld [vmem:[%s19371_s23 + $0x2124] ss:$16 sps:$4 sm:$0xff]  }
 0x2c0   : > { %11834 = vmatpush2.bf16.msra.mxu0 %v17108_v16  ;;  %v17149_v16 = vld [vmem:[%s19371_s23 + $0x2324] ss:$16 sps:$4 sm:$0xff]  }
 0x2c1   : > { %11875 = vmatpush2.bf16.msra.mxu1 %v17111_v48  ;;  %11835 = vmatprep.subr.bf16.mxu0 %v17116_v41  ;;  %v20221_v48 = vrot.slane %v2322_v6, %v19438_v50  ;;  %v17147_v41 = vld [vmem:[%s19371_s23 + $0x2320] ss:$16 sps:$4 sm:$0xff]  }
 0x2c2   : > { %11876 = vmatprep.subr.bf16.mxu1 %v17119_v22  ;;  %v17152_v22 = vld [vmem:[%s19371_s23 + $0x2104] ss:$16 sps:$4 sm:$0xff]  }
 0x2c4   : > { %11836 = vmatpush2.bf16.msra.mxu0 %v17114_v28  ;;  %v17155_v28 = vld [vmem:[%s19371_s23 + $0x2304] ss:$16 sps:$4 sm:$0xff]  }
 0x2c5   : > { %11877 = vmatpush2.bf16.msra.mxu1 %v17117_v36  ;;  %11837 = vmatprep.subr.bf16.mxu0 %v17122_v54  ;;  %v2338_v36 = vcombine.high %v20221_v48, %v20221_v48  ;;  %v20231_v54 = vrot.slane %v20125_v3, %v19438_v50 }
 0x2c6   : > { %11878 = vmatprep.subr.bf16.mxu1 %v17125_v30  ;;  %v17150_v30 = vld [vmem:[%s19371_s23 + $0x2100] ss:$16 sps:$4 sm:$0xff]  }
 0x2c7   : > { %v20244_v3 = vcombine.high %v20231_v54, %v20231_v54 }
 0x2c8   : > { %11838 = vmatpush2.bf16.msra.mxu0 %v17120_v35  ;;  %v17153_v35 = vld [vmem:[%s19371_s23 + $0x2300] ss:$16 sps:$4 sm:$0xff]  }
 0x2c9   : > { %11879 = vmatpush2.bf16.msra.mxu1 %v17123_v38  ;;  %11839 = vmatprep.subr.bf16.mxu0 %v17128_v33  ;;  %v17158_v38 = vld [vmem:[%s19371_s23 + $0x24e4] ss:$16 sps:$4 sm:$0xff]  }
 0x2ca   : > { %11880 = vmatprep.subr.bf16.mxu1 %v17131_v7  ;;  %v17161_v33 = vld [vmem:[%s19371_s23 + $0x26e4] ss:$16 sps:$4 sm:$0xff]   ;;  %v17156_v7 = vld [vmem:[%s19371_s23 + $0x24e0] ss:$16 sps:$4 sm:$0xff]  }
 0x2cc   : > { %11840 = vmatpush2.bf16.msra.mxu0 %v17126_v47  ;;  %v17159_v47 = vld [vmem:[%s19371_s23 + $0x26e0] ss:$16 sps:$4 sm:$0xff]  }
 0x2cd   : > { %11881 = vmatpush2.bf16.msra.mxu1 %v17129_v39  ;;  %11841 = vmatprep.subr.bf16.mxu0 %v17134_v51  ;;  %v20240_v39 = vrot.slane %v2338_v36, %v19438_v50  ;;  %v17164_v51 = vld [vmem:[%s19371_s23 + $0x24c4] ss:$16 sps:$4 sm:$0xff]   ;;  %v17171_v36 = vld [vmem:[%s19371_s23 + $0x26a0] ss:$16 sps:$4 sm:$0xff]  }
 0x2ce   : > { %11882 = vmatprep.subr.bf16.mxu1 %v17137_v37  ;;  %v17167_v37 = vld [vmem:[%s19371_s23 + $0x26c4] ss:$16 sps:$4 sm:$0xff]  }
 0x2d0   : > { %11842 = vmatpush2.bf16.msra.mxu0 %v17132_v53  ;;  %v17162_v53 = vld [vmem:[%s19371_s23 + $0x24c0] ss:$16 sps:$4 sm:$0xff]  }
 0x2d1   : > { %11883 = vmatpush2.bf16.msra.mxu1 %v17135_v58  ;;  %11843 = vmatprep.subr.bf16.mxu0 %v17140_v0  ;;  %v17165_v58 = vld [vmem:[%s19371_s23 + $0x26c0] ss:$16 sps:$4 sm:$0xff]   ;;  %v20252_v0 = vcombine.high %v20240_v39, %v20240_v39 }
 0x2d2   : > { %11884 = vmatprep.subr.bf16.mxu1 %v17143_v2 }
 0x2d4   : > { %11844 = vmatpush2.bf16.msra.mxu0 %v17138_v8 }
 0x2d5   : > { %11885 = vmatpush2.bf16.msra.mxu1 %v17141_v11  ;;  %11845 = vmatprep.subr.bf16.mxu0 %v17146_v9 }
 0x2d6   : > { %11886 = vmatprep.subr.bf16.mxu1 %v17149_v16  ;;  %v17170_v16 = vld [vmem:[%s19371_s23 + $0x24a4] ss:$16 sps:$4 sm:$0xff]  }
 0x2d8   : > { %11846 = vmatpush2.bf16.msra.mxu0 %v17144_v57  ;;  %v17173_v57 = vld [vmem:[%s19371_s23 + $0x26a4] ss:$16 sps:$4 sm:$0xff]  }
 0x2d9   : > { %11887 = vmatpush2.bf16.msra.mxu1 %v17147_v41  ;;  %11847 = vmatprep.subr.bf16.mxu0 %v17152_v22 }
 0x2da   : > { %11888 = vmatprep.subr.bf16.mxu1 %v17155_v28  ;;  %v17168_v28 = vld [vmem:[%s19371_s23 + $0x24a0] ss:$16 sps:$4 sm:$0xff]  }
 0x2dc   : > { %11848 = vmatpush2.bf16.msra.mxu0 %v17150_v30 }
 0x2dd   : > { %11889 = vmatpush2.bf16.msra.mxu1 %v17153_v35  ;;  %11899 = vmatprep.subr.bf16.mxu0 %v17158_v38 }
 0x2de   : > { %11940 = vmatprep.subr.bf16.mxu1 %v17161_v33 }
 0x2df   : > { %v11605_v2 = vpop.f32.mrf.mxu0  ;;  %11850 = vmatmul.mubr.bf16.vlgmr.msra.gmra.mxu0 %v20231_v54 }
 0x2e0   : > { %v11646_v6 = vpop.f32.mrf.mxu1  ;;  %11891 = vmatmul.mubr.bf16.vlgmr.msra.gmra.mxu1 %v20244_v3  ;;  %v11606_v8 = vadd.f32 %v11605_v2, %v20163_v62  ;;  %11900 = vmatpush1.bf16.msra.mxu0 %v17156_v7  ;;  %v17179_v7 = vld [vmem:[%s19371_s23 + $0x2684] ss:$16 sps:$4 sm:$0xff]   ;;  %v17183_v2 = vld [vmem:[%s19371_s23 + $0x2660] ss:$16 sps:$4 sm:$0xff]  }
 0x2e1   : > { %11941 = vmatpush1.bf16.msra.mxu1 %v17159_v47  ;;  %v11607_v11 = vpop.f32.mrf.mxu0  ;;  %11901 = vmatprep.subr.bf16.mxu0 %v17164_v51  ;;  %v17174_v47 = vld [vmem:[%s19371_s23 + $0x2480] ss:$16 sps:$4 sm:$0xff]  }
 0x2e2   : > { %v11648_v9 = vpop.f32.mrf.mxu1  ;;  %11942 = vmatprep.subr.bf16.mxu1 %v17167_v37  ;;  %v20259_v41 = vadd.f32 %v11646_v6, %v11606_v8  ;;  %v11608_v22 = vadd.f32 %v11607_v11, %v20170_v12  ;;  %11931 = vmatprep.mubr.bf16.mxu0 %v20240_v39  ;;  %v17176_v12 = vld [vmem:[%s19371_s23 + $0x2484] ss:$16 sps:$4 sm:$0xff]   ;;  %v17177_v51 = vld [vmem:[%s19371_s23 + $0x2680] ss:$16 sps:$4 sm:$0xff]  }
 0x2e3   : > { %11972 = vmatprep.mubr.bf16.mxu1 %v20252_v0  ;;  %v11609_v62 = vpop.f32.mrf.mxu0  ;;  %v17182_v37 = vld [vmem:[%s19371_s23 + $0x2464] ss:$16 sps:$4 sm:$0xff]   ;;  %v17186_v11 = vld [vmem:[%s19371_s23 + $0x2440] ss:$16 sps:$4 sm:$0xff]  }
 0x2e4   : > { %v11650_v30 = vpop.f32.mrf.mxu1  ;;  %v20266_v35 = vadd.f32 %v11648_v9, %v11608_v22  ;;  %11902 = vmatpush1.bf16.msra.mxu0 %v17162_v53  ;;  %v17185_v53 = vld [vmem:[%s19371_s23 + $0x2664] ss:$16 sps:$4 sm:$0xff]   ;;  %v17189_v9 = vld [vmem:[%s19371_s23 + $0x2640] ss:$16 sps:$4 sm:$0xff]  }
 0x2e5   : > { %11943 = vmatpush1.bf16.msra.mxu1 %v17165_v58  ;;  %v11610_v38 = vpop.f32.mrf.mxu0  ;;  %11903 = vmatprep.subr.bf16.mxu0 %v17170_v16  ;;  %v17180_v58 = vld [vmem:[%s19371_s23 + $0x2460] ss:$16 sps:$4 sm:$0xff]   ;;  %v17188_v6 = vld [vmem:[%s19371_s23 + $0x2444] ss:$16 sps:$4 sm:$0xff]  }
 0x2e6   : > { %v11651_v33 = vpop.f32.mrf.mxu1  ;;  %11944 = vmatprep.subr.bf16.mxu1 %v17173_v57  ;;  %v17191_v8 = vld [vmem:[%s19371_s23 + $0x2644] ss:$16 sps:$4 sm:$0xff]   ;;  %v17192_v22 = vld [vmem:[%s19371_s23 + $0x2420] ss:$16 sps:$4 sm:$0xff]  }
 0x2e7   : > { %v17194_v16 = vld [vmem:[%s19371_s23 + $0x2424] ss:$16 sps:$4 sm:$0xff]   ;;  %v17198_v30 = vld [vmem:[%s19371_s23 + $0x2400] ss:$16 sps:$4 sm:$0xff]  }
 0x2e8   : > { %11904 = vmatpush1.bf16.msra.mxu0 %v17168_v28  ;;  %v17197_v57 = vld [vmem:[%s19371_s23 + $0x2624] ss:$16 sps:$4 sm:$0xff]   ;;  %v17195_v28 = vld [vmem:[%s19371_s23 + $0x2620] ss:$16 sps:$4 sm:$0xff]  }
 0x2e9   : > { %11945 = vmatpush1.bf16.msra.mxu1 %v17171_v36  ;;  %11905 = vmatprep.subr.bf16.mxu0 %v17176_v12  ;;  %v17200_v36 = vld [vmem:[%s19371_s23 + $0x2404] ss:$16 sps:$4 sm:$0xff]   ;;  %v17201_v38 = vld [vmem:[%s19371_s23 + $0x2600] ss:$16 sps:$4 sm:$0xff]  }
 0x2ea   : > { %11946 = vmatprep.subr.bf16.mxu1 %v17179_v7  ;;  %v17203_v62 = vld [vmem:[%s19371_s23 + $0x2604] ss:$16 sps:$4 sm:$0xff]   ;;  %v17204_v7 = vld [vmem:[%s19371_s23 + $0x25e0] ss:$16 sps:$4 sm:$0xff]  }
 0x2eb   : > { %v17206_v33 = vld [vmem:[%s19371_s23 + $0x25e4] ss:$16 sps:$4 sm:$0xff]  }
 0x2ec   : > { %11906 = vmatpush1.bf16.msra.mxu0 %v17174_v47  ;;  %v17209_v12 = vld [vmem:[%s19371_s23 + $0x27e4] ss:$16 sps:$4 sm:$0xff]   ;;  %v17207_v47 = vld [vmem:[%s19371_s23 + $0x27e0] ss:$16 sps:$4 sm:$0xff]  }
 0x2ed   : > { %11947 = vmatpush1.bf16.msra.mxu1 %v17177_v51  ;;  %11907 = vmatprep.subr.bf16.mxu0 %v17182_v37  ;;  %v17212_v51 = vld [vmem:[%s19371_s23 + $0x25c4] ss:$16 sps:$4 sm:$0xff]  }
 0x2ee   : > { %11948 = vmatprep.subr.bf16.mxu1 %v17185_v53  ;;  %v17215_v37 = vld [vmem:[%s19371_s23 + $0x27c4] ss:$16 sps:$4 sm:$0xff]   ;;  %v17210_v53 = vld [vmem:[%s19371_s23 + $0x25c0] ss:$16 sps:$4 sm:$0xff]  }
 0x2f0   : > { %11908 = vmatpush1.bf16.msra.mxu0 %v17180_v58  ;;  %v17213_v58 = vld [vmem:[%s19371_s23 + $0x27c0] ss:$16 sps:$4 sm:$0xff]  }
 0x2f1   : > { %11949 = vmatpush1.bf16.msra.mxu1 %v17183_v2  ;;  %11909 = vmatprep.subr.bf16.mxu0 %v17188_v6  ;;  %v17218_v2 = vld [vmem:[%s19371_s23 + $0x25a4] ss:$16 sps:$4 sm:$0xff]  }
 0x2f2   : > { %11950 = vmatprep.subr.bf16.mxu1 %v17191_v8  ;;  %v17221_v6 = vld [vmem:[%s19371_s23 + $0x27a4] ss:$16 sps:$4 sm:$0xff]   ;;  %v17216_v8 = vld [vmem:[%s19371_s23 + $0x25a0] ss:$16 sps:$4 sm:$0xff]  }
 0x2f4   : > { %11910 = vmatpush1.bf16.msra.mxu0 %v17186_v11  ;;  %v17219_v11 = vld [vmem:[%s19371_s23 + $0x27a0] ss:$16 sps:$4 sm:$0xff]  }
 0x2f5   : > { %11951 = vmatpush1.bf16.msra.mxu1 %v17189_v9  ;;  %11911 = vmatprep.subr.bf16.mxu0 %v17194_v16  ;;  %v17224_v9 = vld [vmem:[%s19371_s23 + $0x2584] ss:$16 sps:$4 sm:$0xff]  }
 0x2f6   : > { %11952 = vmatprep.subr.bf16.mxu1 %v17197_v57  ;;  %v17227_v16 = vld [vmem:[%s19371_s23 + $0x2784] ss:$16 sps:$4 sm:$0xff]   ;;  %v17222_v57 = vld [vmem:[%s19371_s23 + $0x2580] ss:$16 sps:$4 sm:$0xff]  }
 0x2f8   : > { %11912 = vmatpush1.bf16.msra.mxu0 %v17192_v22  ;;  %v17225_v22 = vld [vmem:[%s19371_s23 + $0x2780] ss:$16 sps:$4 sm:$0xff]  }
 0x2f9   : > { %11953 = vmatpush1.bf16.msra.mxu1 %v17195_v28  ;;  %11913 = vmatprep.subr.bf16.mxu0 %v17200_v36  ;;  %v17230_v28 = vld [vmem:[%s19371_s23 + $0x2564] ss:$16 sps:$4 sm:$0xff]  }
 0x2fa   : > { %11954 = vmatprep.subr.bf16.mxu1 %v17203_v62  ;;  %v17233_v36 = vld [vmem:[%s19371_s23 + $0x2764] ss:$16 sps:$4 sm:$0xff]   ;;  %v17228_v62 = vld [vmem:[%s19371_s23 + $0x2560] ss:$16 sps:$4 sm:$0xff]  }
 0x2fc   : > { %11914 = vmatpush1.bf16.msra.mxu0 %v17198_v30  ;;  %v17231_v30 = vld [vmem:[%s19371_s23 + $0x2760] ss:$16 sps:$4 sm:$0xff]  }
 0x2fd   : > { %11955 = vmatpush1.bf16.msra.mxu1 %v17201_v38  ;;  %11915 = vmatprep.subr.bf16.mxu0 %v17206_v33  ;;  %v17236_v38 = vld [vmem:[%s19371_s23 + $0x2544] ss:$16 sps:$4 sm:$0xff]  }
 0x2fe   : > { %11956 = vmatprep.subr.bf16.mxu1 %v17209_v12  ;;  %v17239_v33 = vld [vmem:[%s19371_s23 + $0x2744] ss:$16 sps:$4 sm:$0xff]  }
 0x2ff   : > { %v20311_v12 = vld [vmem:[%s19364_s27 + $0x28] sm:$0xff] }
 0x300   : > { %11916 = vmatpush2.bf16.msra.mxu0 %v17204_v7  ;;  %v17234_v7 = vld [vmem:[%s19371_s23 + $0x2540] ss:$16 sps:$4 sm:$0xff]  }
 0x301   : > { %11957 = vmatpush2.bf16.msra.mxu1 %v17207_v47  ;;  %11917 = vmatprep.subr.bf16.mxu0 %v17212_v51  ;;  %v17237_v47 = vld [vmem:[%s19371_s23 + $0x2740] ss:$16 sps:$4 sm:$0xff]   ;;  %v17242_v51 = vld [vmem:[%s19371_s23 + $0x2524] ss:$16 sps:$4 sm:$0xff]  }
 0x302   : > { %11958 = vmatprep.subr.bf16.mxu1 %v17215_v37  ;;  %v17245_v37 = vld [vmem:[%s19371_s23 + $0x2724] ss:$16 sps:$4 sm:$0xff]  }
 0x304   : > { %11918 = vmatpush2.bf16.msra.mxu0 %v17210_v53  ;;  %v20319_v53 = vrot.slane %v20311_v12, %v19438_v50 }
 0x305   : > { %11959 = vmatpush2.bf16.msra.mxu1 %v17213_v58  ;;  %11919 = vmatprep.subr.bf16.mxu0 %v17218_v2  ;;  %v17240_v58 = vld [vmem:[%s19371_s23 + $0x2520] ss:$16 sps:$4 sm:$0xff]  }
 0x306   : > { %11960 = vmatprep.subr.bf16.mxu1 %v17221_v6  ;;  %v17243_v2 = vld [vmem:[%s19371_s23 + $0x2720] ss:$16 sps:$4 sm:$0xff]   ;;  %v17248_v6 = vld [vmem:[%s19371_s23 + $0x2504] ss:$16 sps:$4 sm:$0xff]  }
 0x308   : > { %11920 = vmatpush2.bf16.msra.mxu0 %v17216_v8  ;;  %v17251_v8 = vld [vmem:[%s19371_s23 + $0x2704] ss:$16 sps:$4 sm:$0xff]  }
 0x309   : > { %11961 = vmatpush2.bf16.msra.mxu1 %v17219_v11  ;;  %11921 = vmatprep.subr.bf16.mxu0 %v17224_v9  ;;  %v2386_v11 = vcombine.high %v20319_v53, %v20319_v53  ;;  %v20329_v9 = vrot.slane %v20221_v48, %v19438_v50 }
 0x30a   : > { %11962 = vmatprep.subr.bf16.mxu1 %v17227_v16  ;;  %v17246_v16 = vld [vmem:[%s19371_s23 + $0x2500] ss:$16 sps:$4 sm:$0xff]  }
 0x30b   : > { %v20342_v48 = vcombine.high %v20329_v9, %v20329_v9 }
 0x30c   : > { %11922 = vmatpush2.bf16.msra.mxu0 %v17222_v57  ;;  %v17249_v57 = vld [vmem:[%s19371_s23 + $0x2700] ss:$16 sps:$4 sm:$0xff]  }
 0x30d   : > { %11963 = vmatpush2.bf16.msra.mxu1 %v17225_v22  ;;  %11923 = vmatprep.subr.bf16.mxu0 %v17230_v28  ;;  %v17255_v22 = vld [vmem:[%s19371_s23 + $0x28e4] ss:$16 sps:$4 sm:$0xff]   ;;  %21988 = vst [vmem:[#allocation23_spill] sm:$0xff] %v20342_v48 }
 0x30e   : > { %11964 = vmatprep.subr.bf16.mxu1 %v17233_v36  ;;  %v17258_v28 = vld [vmem:[%s19371_s23 + $0x2ae4] ss:$16 sps:$4 sm:$0xff]   ;;  %v17253_v36 = vld [vmem:[%s19371_s23 + $0x28e0] ss:$16 sps:$4 sm:$0xff]  }
 0x310   : > { %11924 = vmatpush2.bf16.msra.mxu0 %v17228_v62  ;;  %v17256_v62 = vld [vmem:[%s19371_s23 + $0x2ae0] ss:$16 sps:$4 sm:$0xff]  }
 0x311   : > { %11965 = vmatpush2.bf16.msra.mxu1 %v17231_v30  ;;  %11925 = vmatprep.subr.bf16.mxu0 %v17236_v38  ;;  %v20338_v30 = vrot.slane %v2386_v11, %v19438_v50  ;;  %v17261_v38 = vld [vmem:[%s19371_s23 + $0x28c4] ss:$16 sps:$4 sm:$0xff]  }
 0x312   : > { %11966 = vmatprep.subr.bf16.mxu1 %v17239_v33  ;;  %v17264_v33 = vld [vmem:[%s19371_s23 + $0x2ac4] ss:$16 sps:$4 sm:$0xff]  }
 0x313   : > { %21987 = vst [vmem:[#allocation22_spill] sm:$0xff] %v20338_v30  ;;  %v17267_v11 = vld [vmem:[%s19371_s23 + $0x28a4] ss:$16 sps:$4 sm:$0xff]  }
 0x314   : > { %11926 = vmatpush2.bf16.msra.mxu0 %v17234_v7  ;;  %v17259_v7 = vld [vmem:[%s19371_s23 + $0x28c0] ss:$16 sps:$4 sm:$0xff]  }
 0x315   : > { %11967 = vmatpush2.bf16.msra.mxu1 %v17237_v47  ;;  %11927 = vmatprep.subr.bf16.mxu0 %v17242_v51  ;;  %v17262_v47 = vld [vmem:[%s19371_s23 + $0x2ac0] ss:$16 sps:$4 sm:$0xff]   ;;  %v20350_v51 = vcombine.high %v20338_v30, %v20338_v30 }
 0x316   : > { %11968 = vmatprep.subr.bf16.mxu1 %v17245_v37 }
 0x317   : > { %21989 = vst [vmem:[#allocation24_spill] sm:$0xff] %v20350_v51 }
 0x318   : > { %11928 = vmatpush2.bf16.msra.mxu0 %v17240_v58 }
 0x319   : > { %11969 = vmatpush2.bf16.msra.mxu1 %v17243_v2  ;;  %11929 = vmatprep.subr.bf16.mxu0 %v17248_v6 }
 0x31a   : > { %11970 = vmatprep.subr.bf16.mxu1 %v17251_v8 }
 0x31c   : > { %11930 = vmatpush2.bf16.msra.mxu0 %v17246_v16  ;;  %v17270_v16 = vld [vmem:[%s19371_s23 + $0x2aa4] ss:$16 sps:$4 sm:$0xff]  }
 0x31d   : > { %11971 = vmatpush2.bf16.msra.mxu1 %v17249_v57  ;;  %11981 = vmatprep.subr.bf16.mxu0 %v17255_v22 }
 0x31e   : > { %12022 = vmatprep.subr.bf16.mxu1 %v17258_v28  ;;  %v17265_v28 = vld [vmem:[%s19371_s23 + $0x28a0] ss:$16 sps:$4 sm:$0xff]  }
 0x31f   : > { %v11687_v37 = vpop.f32.mrf.mxu0  ;;  %11932 = vmatmul.mubr.bf16.vlgmr.msra.gmra.mxu0 %v20329_v9 }
 0x320   : > { %v11728_v58 = vpop.f32.mrf.mxu1  ;;  %11973 = vmatmul.mubr.bf16.vlgmr.msra.gmra.mxu1 %v20342_v48  ;;  %v11688_v2 = vadd.f32 %v11687_v37, %v20259_v41  ;;  %11982 = vmatpush1.bf16.msra.mxu0 %v17253_v36  ;;  %v17276_v37 = vld [vmem:[%s19371_s23 + $0x2a84] ss:$16 sps:$4 sm:$0xff]   ;;  %v17361_v48 = vld [vmem:[%s19371_s23 + $0x2ca0] ss:$16 sps:$4 sm:$0xff]  }
 0x321   : > { %12023 = vmatpush1.bf16.msra.mxu1 %v17256_v62  ;;  %v11689_v6 = vpop.f32.mrf.mxu0  ;;  %11983 = vmatprep.subr.bf16.mxu0 %v17261_v38 }
 0x322   : > { %v11730_v8 = vpop.f32.mrf.mxu1  ;;  %12024 = vmatprep.subr.bf16.mxu1 %v17264_v33  ;;  %v20357_v57 = vadd.f32 %v11728_v58, %v11688_v2  ;;  %v11690_v22 = vadd.f32 %v11689_v6, %v20266_v35  ;;  %12013 = vmatprep.mubr.bf16.mxu0 %v20338_v30  ;;  %v17273_v35 = vld [vmem:[%s19371_s23 + $0x2884] ss:$16 sps:$4 sm:$0xff]   ;;  %v17271_v58 = vld [vmem:[%s19371_s23 + $0x2880] ss:$16 sps:$4 sm:$0xff]  }
 0x323   : > { %12054 = vmatprep.mubr.bf16.mxu1 %v20350_v51  ;;  %v11691_v41 = vpop.f32.mrf.mxu0  ;;  %v17274_v2 = vld [vmem:[%s19371_s23 + $0x2a80] ss:$16 sps:$4 sm:$0xff]  }
 0x324   : > { %v11732_v36 = vpop.f32.mrf.mxu1  ;;  %v20364_v62 = vadd.f32 %v11730_v8, %v11690_v22  ;;  %11984 = vmatpush1.bf16.msra.mxu0 %v17259_v7  ;;  %v17279_v7 = vld [vmem:[%s19371_s23 + $0x2864] ss:$16 sps:$4 sm:$0xff]   ;;  %v17277_v6 = vld [vmem:[%s19371_s23 + $0x2860] ss:$16 sps:$4 sm:$0xff]  }
 0x325   : > { %12025 = vmatpush1.bf16.msra.mxu1 %v17262_v47  ;;  %v11692_v38 = vpop.f32.mrf.mxu0  ;;  %11985 = vmatprep.subr.bf16.mxu0 %v17267_v11  ;;  %v17282_v47 = vld [vmem:[%s19371_s23 + $0x2a64] ss:$16 sps:$4 sm:$0xff]   ;;  %v17280_v8 = vld [vmem:[%s19371_s23 + $0x2a60] ss:$16 sps:$4 sm:$0xff]  }
 0x326   : > { %v11733_v33 = vpop.f32.mrf.mxu1  ;;  %12026 = vmatprep.subr.bf16.mxu1 %v17270_v16  ;;  %v17285_v11 = vld [vmem:[%s19371_s23 + $0x2844] ss:$16 sps:$4 sm:$0xff]   ;;  %v17283_v16 = vld [vmem:[%s19371_s23 + $0x2840] ss:$16 sps:$4 sm:$0xff]  }
 0x327   : > { %v17286_v22 = vld [vmem:[%s19371_s23 + $0x2a40] ss:$16 sps:$4 sm:$0xff]   ;;  %v17294_v41 = vld [vmem:[%s19371_s23 + $0x2a24] ss:$16 sps:$4 sm:$0xff]  }
 0x328   : > { %11986 = vmatpush1.bf16.msra.mxu0 %v17265_v28  ;;  %v17291_v28 = vld [vmem:[%s19371_s23 + $0x2824] ss:$16 sps:$4 sm:$0xff]   ;;  %v17289_v36 = vld [vmem:[%s19371_s23 + $0x2820] ss:$16 sps:$4 sm:$0xff]  }
 0x329   : > { %12027 = vmatpush1.bf16.msra.mxu1 %v17268_v44  ;;  %11987 = vmatprep.subr.bf16.mxu0 %v17273_v35  ;;  %v17288_v44 = vld [vmem:[%s19371_s23 + $0x2a44] ss:$16 sps:$4 sm:$0xff]   ;;  %v17292_v38 = vld [vmem:[%s19371_s23 + $0x2a20] ss:$16 sps:$4 sm:$0xff]  }
 0x32a   : > { %12028 = vmatprep.subr.bf16.mxu1 %v17276_v37  ;;  %v17297_v33 = vld [vmem:[%s19371_s23 + $0x2804] ss:$16 sps:$4 sm:$0xff]   ;;  %v17295_v37 = vld [vmem:[%s19371_s23 + $0x2800] ss:$16 sps:$4 sm:$0xff]  }
 0x32b   : > { %v17300_v35 = vld [vmem:[%s19371_s23 + $0x2a04] ss:$16 sps:$4 sm:$0xff]   ;;  %v17458_v30 = vld [vmem:[%s19371_s23 + $0x30a0] ss:$16 sps:$4 sm:$0xff]  }
 0x32c   : > { %11988 = vmatpush1.bf16.msra.mxu0 %v17271_v58  ;;  %v17298_v58 = vld [vmem:[%s19371_s23 + $0x2a00] ss:$16 sps:$4 sm:$0xff]  }
 0x32d   : > { %12029 = vmatpush1.bf16.msra.mxu1 %v17274_v2  ;;  %11989 = vmatprep.subr.bf16.mxu0 %v17279_v7  ;;  %v17303_v2 = vld [vmem:[%s19371_s23 + $0x29e4] ss:$16 sps:$4 sm:$0xff]  }
 0x32e   : > { %12030 = vmatprep.subr.bf16.mxu1 %v17282_v47  ;;  %v17306_v7 = vld [vmem:[%s19371_s23 + $0x2be4] ss:$16 sps:$4 sm:$0xff]   ;;  %v17301_v47 = vld [vmem:[%s19371_s23 + $0x29e0] ss:$16 sps:$4 sm:$0xff]  }
 0x330   : > { %11990 = vmatpush1.bf16.msra.mxu0 %v17277_v6  ;;  %v17304_v6 = vld [vmem:[%s19371_s23 + $0x2be0] ss:$16 sps:$4 sm:$0xff]  }
 0x331   : > { %12031 = vmatpush1.bf16.msra.mxu1 %v17280_v8  ;;  %11991 = vmatprep.subr.bf16.mxu0 %v17285_v11  ;;  %v17309_v8 = vld [vmem:[%s19371_s23 + $0x29c4] ss:$16 sps:$4 sm:$0xff]  }
 0x332   : > { %12032 = vmatprep.subr.bf16.mxu1 %v17288_v44  ;;  %v17312_v11 = vld [vmem:[%s19371_s23 + $0x2bc4] ss:$16 sps:$4 sm:$0xff]   ;;  %v17307_v44 = vld [vmem:[%s19371_s23 + $0x29c0] ss:$16 sps:$4 sm:$0xff]  }
 0x334   : > { %11992 = vmatpush1.bf16.msra.mxu0 %v17283_v16  ;;  %v17310_v16 = vld [vmem:[%s19371_s23 + $0x2bc0] ss:$16 sps:$4 sm:$0xff]  }
 0x335   : > { %12033 = vmatpush1.bf16.msra.mxu1 %v17286_v22  ;;  %11993 = vmatprep.subr.bf16.mxu0 %v17291_v28  ;;  %v17315_v22 = vld [vmem:[%s19371_s23 + $0x29a4] ss:$16 sps:$4 sm:$0xff]  }
 0x336   : > { %12034 = vmatprep.subr.bf16.mxu1 %v17294_v41  ;;  %v17318_v28 = vld [vmem:[%s19371_s23 + $0x2ba4] ss:$16 sps:$4 sm:$0xff]   ;;  %v17313_v41 = vld [vmem:[%s19371_s23 + $0x29a0] ss:$16 sps:$4 sm:$0xff]  }
 0x338   : > { %11994 = vmatpush1.bf16.msra.mxu0 %v17289_v36  ;;  %v17316_v36 = vld [vmem:[%s19371_s23 + $0x2ba0] ss:$16 sps:$4 sm:$0xff]  }
 0x339   : > { %12035 = vmatpush1.bf16.msra.mxu1 %v17292_v38  ;;  %11995 = vmatprep.subr.bf16.mxu0 %v17297_v33  ;;  %v17321_v38 = vld [vmem:[%s19371_s23 + $0x2984] ss:$16 sps:$4 sm:$0xff]  }
 0x33a   : > { %12036 = vmatprep.subr.bf16.mxu1 %v17300_v35  ;;  %v17324_v33 = vld [vmem:[%s19371_s23 + $0x2b84] ss:$16 sps:$4 sm:$0xff]   ;;  %v17319_v35 = vld [vmem:[%s19371_s23 + $0x2980] ss:$16 sps:$4 sm:$0xff]  }
 0x33c   : > { %11996 = vmatpush1.bf16.msra.mxu0 %v17295_v37  ;;  %v17322_v37 = vld [vmem:[%s19371_s23 + $0x2b80] ss:$16 sps:$4 sm:$0xff]  }
 0x33d   : > { %12037 = vmatpush1.bf16.msra.mxu1 %v17298_v58  ;;  %11997 = vmatprep.subr.bf16.mxu0 %v17303_v2  ;;  %v17327_v58 = vld [vmem:[%s19371_s23 + $0x2964] ss:$16 sps:$4 sm:$0xff]  }
 0x33e   : > { %12038 = vmatprep.subr.bf16.mxu1 %v17306_v7  ;;  %v17330_v2 = vld [vmem:[%s19371_s23 + $0x2b64] ss:$16 sps:$4 sm:$0xff]   ;;  %v17325_v7 = vld [vmem:[%s19371_s23 + $0x2960] ss:$16 sps:$4 sm:$0xff]  }
 0x340   : > { %11998 = vmatpush2.bf16.msra.mxu0 %v17301_v47  ;;  %v17328_v47 = vld [vmem:[%s19371_s23 + $0x2b60] ss:$16 sps:$4 sm:$0xff]  }
 0x341   : > { %12039 = vmatpush2.bf16.msra.mxu1 %v17304_v6  ;;  %11999 = vmatprep.subr.bf16.mxu0 %v17309_v8  ;;  %v17333_v6 = vld [vmem:[%s19371_s23 + $0x2944] ss:$16 sps:$4 sm:$0xff]  }
 0x342   : > { %12040 = vmatprep.subr.bf16.mxu1 %v17312_v11  ;;  %v17336_v8 = vld [vmem:[%s19371_s23 + $0x2b44] ss:$16 sps:$4 sm:$0xff]   ;;  %v2371_v11 = vcombine.high %v20311_v12, %v20311_v12  ;;  %v17337_v12 = vld [vmem:[%s19371_s23 + $0x2920] ss:$16 sps:$4 sm:$0xff]  }
 0x344   : > { %12000 = vmatpush2.bf16.msra.mxu0 %v17307_v44  ;;  %v17331_v44 = vld [vmem:[%s19371_s23 + $0x2940] ss:$16 sps:$4 sm:$0xff]  }
 0x345   : > { %12041 = vmatpush2.bf16.msra.mxu1 %v17310_v16  ;;  %12001 = vmatprep.subr.bf16.mxu0 %v17315_v22  ;;  %v17334_v16 = vld [vmem:[%s19371_s23 + $0x2b40] ss:$16 sps:$4 sm:$0xff]   ;;  %v17339_v22 = vld [vmem:[%s19371_s23 + $0x2924] ss:$16 sps:$4 sm:$0xff]  }
 0x346   : > { %12042 = vmatprep.subr.bf16.mxu1 %v17318_v28  ;;  %v17342_v28 = vld [vmem:[%s19371_s23 + $0x2b24] ss:$16 sps:$4 sm:$0xff]  }
 0x348   : > { %12002 = vmatpush2.bf16.msra.mxu0 %v17313_v41  ;;  %v20415_v41 = vrot.slane %v2371_v11, %v19438_v50 }
 0x349   : > { %12043 = vmatpush2.bf16.msra.mxu1 %v17316_v36  ;;  %12003 = vmatprep.subr.bf16.mxu0 %v17321_v38  ;;  %v17340_v36 = vld [vmem:[%s19371_s23 + $0x2b20] ss:$16 sps:$4 sm:$0xff]   ;;  %v17345_v38 = vld [vmem:[%s19371_s23 + $0x2904] ss:$16 sps:$4 sm:$0xff]  }
 0x34a   : > { %12044 = vmatprep.subr.bf16.mxu1 %v17324_v33  ;;  %v17348_v33 = vld [vmem:[%s19371_s23 + $0x2b04] ss:$16 sps:$4 sm:$0xff]  }
 0x34c   : > { %12004 = vmatpush2.bf16.msra.mxu0 %v17319_v35  ;;  %v2387_v35 = vcombine.high %v20415_v41, %v20415_v41 }
 0x34d   : > { %12045 = vmatpush2.bf16.msra.mxu1 %v17322_v37  ;;  %12005 = vmatprep.subr.bf16.mxu0 %v17327_v58  ;;  %v20425_v37 = vrot.slane %v20319_v53, %v19438_v50  ;;  %v17343_v58 = vld [vmem:[%s19371_s23 + $0x2900] ss:$16 sps:$4 sm:$0xff]  }
 0x34e   : > { %12046 = vmatprep.subr.bf16.mxu1 %v17330_v2  ;;  %v17346_v2 = vld [vmem:[%s19371_s23 + $0x2b00] ss:$16 sps:$4 sm:$0xff]   ;;  %v20434_v11 = vrot.slane %v2387_v35, %v19438_v50 }
 0x34f   : > { %21990 = vst [vmem:[#allocation25_spill] sm:$0xff] %v20425_v37  ;;  %v20438_v53 = vcombine.high %v20425_v37, %v20425_v37 }
 0x350   : > { %12006 = vmatpush2.bf16.msra.mxu0 %v17325_v7  ;;  %v17351_v7 = vld [vmem:[%s19371_s23 + $0x2ce4] ss:$16 sps:$4 sm:$0xff]   ;;  %21991 = vst [vmem:[#allocation26_spill] sm:$0xff] %v20434_v11 }
 0x351   : > { %12047 = vmatpush2.bf16.msra.mxu1 %v17328_v47  ;;  %12007 = vmatprep.subr.bf16.mxu0 %v17333_v6  ;;  %v17354_v47 = vld [vmem:[%s19371_s23 + $0x2ee4] ss:$16 sps:$4 sm:$0xff]   ;;  %v17349_v6 = vld [vmem:[%s19371_s23 + $0x2ce0] ss:$16 sps:$4 sm:$0xff]   ;;  %21992 = vst [vmem:[#allocation27_spill] sm:$0xff] %v20438_v53 }
 0x352   : > { %12048 = vmatprep.subr.bf16.mxu1 %v17336_v8  ;;  %v17352_v8 = vld [vmem:[%s19371_s23 + $0x2ee0] ss:$16 sps:$4 sm:$0xff]  }
 0x354   : > { %12008 = vmatpush2.bf16.msra.mxu0 %v17331_v44  ;;  %v17357_v44 = vld [vmem:[%s19371_s23 + $0x2cc4] ss:$16 sps:$4 sm:$0xff]  }
 0x355   : > { %12049 = vmatpush2.bf16.msra.mxu1 %v17334_v16  ;;  %12009 = vmatprep.subr.bf16.mxu0 %v17339_v22  ;;  %v17360_v16 = vld [vmem:[%s19371_s23 + $0x2ec4] ss:$16 sps:$4 sm:$0xff]   ;;  %v17355_v22 = vld [vmem:[%s19371_s23 + $0x2cc0] ss:$16 sps:$4 sm:$0xff]  }
 0x356   : > { %12050 = vmatprep.subr.bf16.mxu1 %v17342_v28  ;;  %v17358_v28 = vld [vmem:[%s19371_s23 + $0x2ec0] ss:$16 sps:$4 sm:$0xff]  }
 0x358   : > { %12010 = vmatpush2.bf16.msra.mxu0 %v17337_v12  ;;  %v20446_v12 = vcombine.high %v20434_v11, %v20434_v11 }
 0x359   : > { %12051 = vmatpush2.bf16.msra.mxu1 %v17340_v36  ;;  %12011 = vmatprep.subr.bf16.mxu0 %v17345_v38 }
 0x35a   : > { %12052 = vmatprep.subr.bf16.mxu1 %v17348_v33  ;;  %21993 = vst [vmem:[#allocation28_spill] sm:$0xff] %v20446_v12 }
 0x35c   : > { %12012 = vmatpush2.bf16.msra.mxu0 %v17343_v58 }
 0x35d   : > { %12053 = vmatpush2.bf16.msra.mxu1 %v17346_v2  ;;  %12063 = vmatprep.subr.bf16.mxu0 %v17351_v7  ;;  %v17363_v2 = vld [vmem:[%s19371_s23 + $0x2ca4] ss:$16 sps:$4 sm:$0xff]  }
 0x35e   : > { %12104 = vmatprep.subr.bf16.mxu1 %v17354_v47  ;;  %v17366_v7 = vld [vmem:[%s19371_s23 + $0x2ea4] ss:$16 sps:$4 sm:$0xff]  }
 0x35f   : > { %v11769_v36 = vpop.f32.mrf.mxu0  ;;  %12014 = vmatmul.mubr.bf16.vlgmr.msra.gmra.mxu0 %v20425_v37  ;;  %v17364_v37 = vld [vmem:[%s19371_s23 + $0x2ea0] ss:$16 sps:$4 sm:$0xff]  }
 0x360   : > { %v11810_v38 = vpop.f32.mrf.mxu1  ;;  %12055 = vmatmul.mubr.bf16.vlgmr.msra.gmra.mxu1 %v20438_v53  ;;  %v11770_v33 = vadd.f32 %v11769_v36, %v20357_v57  ;;  %12064 = vmatpush1.bf16.msra.mxu0 %v17349_v6  ;;  %v17372_v36 = vld [vmem:[%s19371_s23 + $0x2e84] ss:$16 sps:$4 sm:$0xff]  }
 0x361   : > { %12105 = vmatpush1.bf16.msra.mxu1 %v17352_v8  ;;  %v11771_v35 = vpop.f32.mrf.mxu0  ;;  %12065 = vmatprep.subr.bf16.mxu0 %v17357_v44 }
 0x362   : > { %v11812_v58 = vpop.f32.mrf.mxu1  ;;  %12106 = vmatprep.subr.bf16.mxu1 %v17360_v16  ;;  %v20453_v47 = vadd.f32 %v11810_v38, %v11770_v33  ;;  %v11772_v51 = vadd.f32 %v11771_v35, %v20364_v62  ;;  %12095 = vmatprep.mubr.bf16.mxu0 %v20434_v11  ;;  %v17369_v62 = vld [vmem:[%s19371_s23 + $0x2c84] ss:$16 sps:$4 sm:$0xff]   ;;  %v17367_v38 = vld [vmem:[%s19371_s23 + $0x2c80] ss:$16 sps:$4 sm:$0xff]  }
 0x363   : > { %12136 = vmatprep.mubr.bf16.mxu1 %v20446_v12  ;;  %v11773_v57 = vpop.f32.mrf.mxu0  ;;  %v17370_v33 = vld [vmem:[%s19371_s23 + $0x2e80] ss:$16 sps:$4 sm:$0xff]   ;;  %v17463_v12 = vld [vmem:[%s19371_s23 + $0x32a4] ss:$16 sps:$4 sm:$0xff]  }
 0x364   : > { %v11814_v6 = vpop.f32.mrf.mxu1  ;;  %v20460_v8 = vadd.f32 %v11812_v58, %v11772_v51  ;;  %12066 = vmatpush1.bf16.msra.mxu0 %v17355_v22  ;;  %v17375_v51 = vld [vmem:[%s19371_s23 + $0x2c64] ss:$16 sps:$4 sm:$0xff]   ;;  %v17376_v35 = vld [vmem:[%s19371_s23 + $0x2e60] ss:$16 sps:$4 sm:$0xff]  }
 0x365   : > { %12107 = vmatpush1.bf16.msra.mxu1 %v17358_v28  ;;  %v11774_v44 = vpop.f32.mrf.mxu0  ;;  %12067 = vmatprep.subr.bf16.mxu0 %v17363_v2  ;;  %v17378_v22 = vld [vmem:[%s19371_s23 + $0x2e64] ss:$16 sps:$4 sm:$0xff]   ;;  %v17373_v28 = vld [vmem:[%s19371_s23 + $0x2c60] ss:$16 sps:$4 sm:$0xff]  }
 0x366   : > { %v11815_v16 = vpop.f32.mrf.mxu1  ;;  %12108 = vmatprep.subr.bf16.mxu1 %v17366_v7  ;;  %v17379_v58 = vld [vmem:[%s19371_s23 + $0x2c40] ss:$16 sps:$4 sm:$0xff]   ;;  %v17387_v7 = vld [vmem:[%s19371_s23 + $0x2c24] ss:$16 sps:$4 sm:$0xff]  }
 0x367   : > { %v17382_v2 = vld [vmem:[%s19371_s23 + $0x2e40] ss:$16 sps:$4 sm:$0xff]   ;;  %v17390_v57 = vld [vmem:[%s19371_s23 + $0x2e24] ss:$16 sps:$4 sm:$0xff]  }
 0x368   : > { %12068 = vmatpush1.bf16.msra.mxu0 %v17361_v48  ;;  %v17381_v48 = vld [vmem:[%s19371_s23 + $0x2c44] ss:$16 sps:$4 sm:$0xff]   ;;  %v17385_v6 = vld [vmem:[%s19371_s23 + $0x2c20] ss:$16 sps:$4 sm:$0xff]  }
 0x369   : > { %12109 = vmatpush1.bf16.msra.mxu1 %v17364_v37  ;;  %12069 = vmatprep.subr.bf16.mxu0 %v17369_v62  ;;  %v17384_v37 = vld [vmem:[%s19371_s23 + $0x2e44] ss:$16 sps:$4 sm:$0xff]   ;;  %v17388_v44 = vld [vmem:[%s19371_s23 + $0x2e20] ss:$16 sps:$4 sm:$0xff]  }
 0x36a   : > { %12110 = vmatprep.subr.bf16.mxu1 %v17372_v36  ;;  %v17393_v16 = vld [vmem:[%s19371_s23 + $0x2c04] ss:$16 sps:$4 sm:$0xff]   ;;  %v17391_v36 = vld [vmem:[%s19371_s23 + $0x2c00] ss:$16 sps:$4 sm:$0xff]  }
 0x36b   : > { %v17396_v62 = vld [vmem:[%s19371_s23 + $0x2e04] ss:$16 sps:$4 sm:$0xff]  }
 0x36c   : > { %12070 = vmatpush1.bf16.msra.mxu0 %v17367_v38  ;;  %v17394_v38 = vld [vmem:[%s19371_s23 + $0x2e00] ss:$16 sps:$4 sm:$0xff]  }
 0x36d   : > { %12111 = vmatpush1.bf16.msra.mxu1 %v17370_v33  ;;  %12071 = vmatprep.subr.bf16.mxu0 %v17375_v51  ;;  %v17399_v33 = vld [vmem:[%s19371_s23 + $0x2de4] ss:$16 sps:$4 sm:$0xff]  }
 0x36e   : > { %12112 = vmatprep.subr.bf16.mxu1 %v17378_v22  ;;  %v17402_v51 = vld [vmem:[%s19371_s23 + $0x2fe4] ss:$16 sps:$4 sm:$0xff]   ;;  %v17397_v22 = vld [vmem:[%s19371_s23 + $0x2de0] ss:$16 sps:$4 sm:$0xff]  }
 0x370   : > { %12072 = vmatpush1.bf16.msra.mxu0 %v17373_v28  ;;  %v17400_v28 = vld [vmem:[%s19371_s23 + $0x2fe0] ss:$16 sps:$4 sm:$0xff]  }
 0x371   : > { %12113 = vmatpush1.bf16.msra.mxu1 %v17376_v35  ;;  %12073 = vmatprep.subr.bf16.mxu0 %v17381_v48  ;;  %v17405_v35 = vld [vmem:[%s19371_s23 + $0x2dc4] ss:$16 sps:$4 sm:$0xff]  }
 0x372   : > { %12114 = vmatprep.subr.bf16.mxu1 %v17384_v37  ;;  %v17408_v48 = vld [vmem:[%s19371_s23 + $0x2fc4] ss:$16 sps:$4 sm:$0xff]   ;;  %v17403_v37 = vld [vmem:[%s19371_s23 + $0x2dc0] ss:$16 sps:$4 sm:$0xff]  }
 0x374   : > { %12074 = vmatpush1.bf16.msra.mxu0 %v17379_v58  ;;  %v17406_v58 = vld [vmem:[%s19371_s23 + $0x2fc0] ss:$16 sps:$4 sm:$0xff]  }
 0x375   : > { %12115 = vmatpush1.bf16.msra.mxu1 %v17382_v2  ;;  %12075 = vmatprep.subr.bf16.mxu0 %v17387_v7  ;;  %v17411_v2 = vld [vmem:[%s19371_s23 + $0x2da4] ss:$16 sps:$4 sm:$0xff]  }
 0x376   : > { %12116 = vmatprep.subr.bf16.mxu1 %v17390_v57  ;;  %v17414_v7 = vld [vmem:[%s19371_s23 + $0x2fa4] ss:$16 sps:$4 sm:$0xff]   ;;  %v17409_v57 = vld [vmem:[%s19371_s23 + $0x2da0] ss:$16 sps:$4 sm:$0xff]  }
 0x378   : > { %12076 = vmatpush1.bf16.msra.mxu0 %v17385_v6  ;;  %v17412_v6 = vld [vmem:[%s19371_s23 + $0x2fa0] ss:$16 sps:$4 sm:$0xff]  }
 0x379   : > { %12117 = vmatpush1.bf16.msra.mxu1 %v17388_v44  ;;  %12077 = vmatprep.subr.bf16.mxu0 %v17393_v16  ;;  %v17417_v44 = vld [vmem:[%s19371_s23 + $0x2d84] ss:$16 sps:$4 sm:$0xff]  }
 0x37a   : > { %12118 = vmatprep.subr.bf16.mxu1 %v17396_v62  ;;  %v17420_v16 = vld [vmem:[%s19371_s23 + $0x2f84] ss:$16 sps:$4 sm:$0xff]   ;;  %v17415_v62 = vld [vmem:[%s19371_s23 + $0x2d80] ss:$16 sps:$4 sm:$0xff]  }
 0x37c   : > { %12078 = vmatpush1.bf16.msra.mxu0 %v17391_v36  ;;  %v17418_v36 = vld [vmem:[%s19371_s23 + $0x2f80] ss:$16 sps:$4 sm:$0xff]  }
 0x37d   : > { %12119 = vmatpush1.bf16.msra.mxu1 %v17394_v38  ;;  %12079 = vmatprep.subr.bf16.mxu0 %v17399_v33  ;;  %v17423_v38 = vld [vmem:[%s19371_s23 + $0x2d64] ss:$16 sps:$4 sm:$0xff]  }
 0x37e   : > { %12120 = vmatprep.subr.bf16.mxu1 %v17402_v51  ;;  %v17426_v33 = vld [vmem:[%s19371_s23 + $0x2f64] ss:$16 sps:$4 sm:$0xff]   ;;  %v17421_v51 = vld [vmem:[%s19371_s23 + $0x2d60] ss:$16 sps:$4 sm:$0xff]  }
 0x380   : > { %12080 = vmatpush2.bf16.msra.mxu0 %v17397_v22  ;;  %v17424_v22 = vld [vmem:[%s19371_s23 + $0x2f60] ss:$16 sps:$4 sm:$0xff]  }
 0x381   : > { %12121 = vmatpush2.bf16.msra.mxu1 %v17400_v28  ;;  %12081 = vmatprep.subr.bf16.mxu0 %v17405_v35  ;;  %v17429_v28 = vld [vmem:[%s19371_s23 + $0x2d44] ss:$16 sps:$4 sm:$0xff]  }
 0x382   : > { %12122 = vmatprep.subr.bf16.mxu1 %v17408_v48  ;;  %v17432_v35 = vld [vmem:[%s19371_s23 + $0x2f44] ss:$16 sps:$4 sm:$0xff]  }
 0x383   : > { %v20505_v48 = vld [vmem:[%s19364_s27 + $0x30] sm:$0x3f] }
 0x384   : > { %12082 = vmatpush2.bf16.msra.mxu0 %v17403_v37  ;;  %v17427_v37 = vld [vmem:[%s19371_s23 + $0x2d40] ss:$16 sps:$4 sm:$0xff]  }
 0x385   : > { %12123 = vmatpush2.bf16.msra.mxu1 %v17406_v58  ;;  %12083 = vmatprep.subr.bf16.mxu0 %v17411_v2  ;;  %v17430_v58 = vld [vmem:[%s19371_s23 + $0x2f40] ss:$16 sps:$4 sm:$0xff]   ;;  %v17435_v2 = vld [vmem:[%s19371_s23 + $0x2d24] ss:$16 sps:$4 sm:$0xff]  }
 0x386   : > { %12124 = vmatprep.subr.bf16.mxu1 %v17414_v7  ;;  %v17438_v7 = vld [vmem:[%s19371_s23 + $0x2f24] ss:$16 sps:$4 sm:$0xff]  }
 0x388   : > { %12084 = vmatpush2.bf16.msra.mxu0 %v17409_v57  ;;  %v20513_v57 = vrot.slane %v20505_v48, %v19438_v50 }
 0x389   : > { %12125 = vmatpush2.bf16.msra.mxu1 %v17412_v6  ;;  %12085 = vmatprep.subr.bf16.mxu0 %v17417_v44  ;;  %v17433_v6 = vld [vmem:[%s19371_s23 + $0x2d20] ss:$16 sps:$4 sm:$0xff]  }
 0x38a   : > { %12126 = vmatprep.subr.bf16.mxu1 %v17420_v16  ;;  %v17436_v44 = vld [vmem:[%s19371_s23 + $0x2f20] ss:$16 sps:$4 sm:$0xff]   ;;  %v17441_v16 = vld [vmem:[%s19371_s23 + $0x2d04] ss:$16 sps:$4 sm:$0xff]  }
 0x38c   : > { %12086 = vmatpush2.bf16.msra.mxu0 %v17415_v62  ;;  %v17444_v62 = vld [vmem:[%s19371_s23 + $0x2f04] ss:$16 sps:$4 sm:$0xff]  }
 0x38d   : > { %12127 = vmatpush2.bf16.msra.mxu1 %v17418_v36  ;;  %12087 = vmatprep.subr.bf16.mxu0 %v17423_v38  ;;  %v2435_v36 = vcombine.high %v20513_v57, %v20513_v57  ;;  %v20523_v38 = vrot.slane %v20415_v41, %v19438_v50 }
 0x38e   : > { %12128 = vmatprep.subr.bf16.mxu1 %v17426_v33  ;;  %v17439_v33 = vld [vmem:[%s19371_s23 + $0x2d00] ss:$16 sps:$4 sm:$0xff]  }
 0x38f   : > { %21994 = vst [vmem:[#allocation29_spill] sm:$0xff] %v20523_v38  ;;  %v20536_v41 = vcombine.high %v20523_v38, %v20523_v38 }
 0x390   : > { %12088 = vmatpush2.bf16.msra.mxu0 %v17421_v51  ;;  %v17442_v51 = vld [vmem:[%s19371_s23 + $0x2f00] ss:$16 sps:$4 sm:$0xff]  }
 0x391   : > { %12129 = vmatpush2.bf16.msra.mxu1 %v17424_v22  ;;  %12089 = vmatprep.subr.bf16.mxu0 %v17429_v28  ;;  %v17448_v22 = vld [vmem:[%s19371_s23 + $0x30e4] ss:$16 sps:$4 sm:$0xff]  }
 0x392   : > { %12130 = vmatprep.subr.bf16.mxu1 %v17432_v35  ;;  %v17451_v28 = vld [vmem:[%s19371_s23 + $0x32e4] ss:$16 sps:$4 sm:$0xff]   ;;  %v17446_v35 = vld [vmem:[%s19371_s23 + $0x30e0] ss:$16 sps:$4 sm:$0xff]  }
 0x394   : > { %12090 = vmatpush2.bf16.msra.mxu0 %v17427_v37  ;;  %v17449_v37 = vld [vmem:[%s19371_s23 + $0x32e0] ss:$16 sps:$4 sm:$0xff]  }
 0x395   : > { %12131 = vmatpush2.bf16.msra.mxu1 %v17430_v58  ;;  %12091 = vmatprep.subr.bf16.mxu0 %v17435_v2  ;;  %v20532_v58 = vrot.slane %v2435_v36, %v19438_v50  ;;  %v17454_v2 = vld [vmem:[%s19371_s23 + $0x30c4] ss:$16 sps:$4 sm:$0xff]  }
 0x396   : > { %12132 = vmatprep.subr.bf16.mxu1 %v17438_v7  ;;  %v17457_v7 = vld [vmem:[%s19371_s23 + $0x32c4] ss:$16 sps:$4 sm:$0xff]  }
 0x398   : > { %12092 = vmatpush2.bf16.msra.mxu0 %v17433_v6  ;;  %v17452_v6 = vld [vmem:[%s19371_s23 + $0x30c0] ss:$16 sps:$4 sm:$0xff]  }
 0x399   : > { %12133 = vmatpush2.bf16.msra.mxu1 %v17436_v44  ;;  %12093 = vmatprep.subr.bf16.mxu0 %v17441_v16  ;;  %v17455_v44 = vld [vmem:[%s19371_s23 + $0x32c0] ss:$16 sps:$4 sm:$0xff]   ;;  %v20544_v16 = vcombine.high %v20532_v58, %v20532_v58 }
 0x39a   : > { %12134 = vmatprep.subr.bf16.mxu1 %v17444_v62 }
 0x39b   : > { %21995 = vst [vmem:[#allocation30_spill] sm:$0xff] %v20544_v16 }
 0x39c   : > { %12094 = vmatpush2.bf16.msra.mxu0 %v17439_v33 }
 0x39d   : > { %12135 = vmatpush2.bf16.msra.mxu1 %v17442_v51  ;;  %12145 = vmatprep.subr.bf16.mxu0 %v17448_v22 }
 0x39e   : > { %12186 = vmatprep.subr.bf16.mxu1 %v17451_v28  ;;  %v17460_v28 = vld [vmem:[%s19371_s23 + $0x30a4] ss:$16 sps:$4 sm:$0xff]  }
 0x39f   : > { %v11851_v62 = vpop.f32.mrf.mxu0  ;;  %12096 = vmatmul.mubr.bf16.vlgmr.msra.gmra.mxu0 %v20523_v38  ;;  %v17461_v38 = vld [vmem:[%s19371_s23 + $0x32a0] ss:$16 sps:$4 sm:$0xff]  }
 0x3a0   : > { %v11892_v36 = vpop.f32.mrf.mxu1  ;;  %12137 = vmatmul.mubr.bf16.vlgmr.msra.gmra.mxu1 %v20536_v41  ;;  %v11852_v33 = vadd.f32 %v11851_v62, %v20453_v47  ;;  %12146 = vmatpush1.bf16.msra.mxu0 %v17446_v35  ;;  %v17469_v62 = vld [vmem:[%s19371_s23 + $0x3284] ss:$16 sps:$4 sm:$0xff]  }
 0x3a1   : > { %12187 = vmatpush1.bf16.msra.mxu1 %v17449_v37  ;;  %v11853_v51 = vpop.f32.mrf.mxu0  ;;  %12147 = vmatprep.subr.bf16.mxu0 %v17454_v2 }
 0x3a2   : > { %v11894_v22 = vpop.f32.mrf.mxu1  ;;  %12188 = vmatprep.subr.bf16.mxu1 %v17457_v7  ;;  %v20551_v53 = vadd.f32 %v11892_v36, %v11852_v33  ;;  %v11854_v11 = vadd.f32 %v11853_v51, %v20460_v8  ;;  %12177 = vmatprep.mubr.bf16.mxu0 %v20532_v58  ;;  %v17466_v8 = vld [vmem:[%s19371_s23 + $0x3084] ss:$16 sps:$4 sm:$0xff]   ;;  %v17464_v36 = vld [vmem:[%s19371_s23 + $0x3080] ss:$16 sps:$4 sm:$0xff]  }
 0x3a3   : > { %12218 = vmatprep.mubr.bf16.mxu1 %v20544_v16  ;;  %v11855_v47 = vpop.f32.mrf.mxu0  ;;  %v17467_v33 = vld [vmem:[%s19371_s23 + $0x3280] ss:$16 sps:$4 sm:$0xff]  }
 0x3a4   : > { %v11896_v35 = vpop.f32.mrf.mxu1  ;;  %v20558_v37 = vadd.f32 %v11894_v22, %v11854_v11  ;;  %12148 = vmatpush1.bf16.msra.mxu0 %v17452_v6  ;;  %v17472_v11 = vld [vmem:[%s19371_s23 + $0x3064] ss:$16 sps:$4 sm:$0xff]   ;;  %v17476_v51 = vld [vmem:[%s19371_s23 + $0x3040] ss:$16 sps:$4 sm:$0xff]  }
 0x3a5   : > { %12189 = vmatpush1.bf16.msra.mxu1 %v17455_v44  ;;  %v11856_v2 = vpop.f32.mrf.mxu0  ;;  %12149 = vmatprep.subr.bf16.mxu0 %v17460_v28  ;;  %v17475_v6 = vld [vmem:[%s19371_s23 + $0x3264] ss:$16 sps:$4 sm:$0xff]   ;;  %v17470_v44 = vld [vmem:[%s19371_s23 + $0x3060] ss:$16 sps:$4 sm:$0xff]  }
 0x3a6   : > { %v11897_v7 = vpop.f32.mrf.mxu1  ;;  %12190 = vmatprep.subr.bf16.mxu1 %v17463_v12  ;;  %v17473_v12 = vld [vmem:[%s19371_s23 + $0x3260] ss:$16 sps:$4 sm:$0xff]   ;;  %v17484_v28 = vld [vmem:[%s19371_s23 + $0x3024] ss:$16 sps:$4 sm:$0xff]  }
 0x3a7   : > { %v17479_v22 = vld [vmem:[%s19371_s23 + $0x3240] ss:$16 sps:$4 sm:$0xff]   ;;  %v17487_v47 = vld [vmem:[%s19371_s23 + $0x3224] ss:$16 sps:$4 sm:$0xff]  }
 0x3a8   : > { %12150 = vmatpush1.bf16.msra.mxu0 %v17458_v30  ;;  %v17478_v30 = vld [vmem:[%s19371_s23 + $0x3044] ss:$16 sps:$4 sm:$0xff]   ;;  %v17482_v35 = vld [vmem:[%s19371_s23 + $0x3020] ss:$16 sps:$4 sm:$0xff]  }
 0x3a9   : > { %12191 = vmatpush1.bf16.msra.mxu1 %v17461_v38  ;;  %12151 = vmatprep.subr.bf16.mxu0 %v17466_v8  ;;  %v17481_v38 = vld [vmem:[%s19371_s23 + $0x3244] ss:$16 sps:$4 sm:$0xff]   ;;  %v17485_v2 = vld [vmem:[%s19371_s23 + $0x3220] ss:$16 sps:$4 sm:$0xff]  }
 0x3aa   : > { %12192 = vmatprep.subr.bf16.mxu1 %v17469_v62  ;;  %v17490_v7 = vld [vmem:[%s19371_s23 + $0x3004] ss:$16 sps:$4 sm:$0xff]   ;;  %v17488_v62 = vld [vmem:[%s19371_s23 + $0x3000] ss:$16 sps:$4 sm:$0xff]  }
 0x3ab   : > { %v17493_v8 = vld [vmem:[%s19371_s23 + $0x3204] ss:$16 sps:$4 sm:$0xff]   ;;  %v17554_v16 = vld [vmem:[%s19371_s23 + $0x34a0] ss:$16 sps:$4 sm:$0xff]  }
 0x3ac   : > { %12152 = vmatpush1.bf16.msra.mxu0 %v17464_v36  ;;  %v17491_v36 = vld [vmem:[%s19371_s23 + $0x3200] ss:$16 sps:$4 sm:$0xff]  }
 0x3ad   : > { %12193 = vmatpush1.bf16.msra.mxu1 %v17467_v33  ;;  %12153 = vmatprep.subr.bf16.mxu0 %v17472_v11  ;;  %v17496_v33 = vld [vmem:[%s19371_s23 + $0x31e4] ss:$16 sps:$4 sm:$0xff]  }
 0x3ae   : > { %12194 = vmatprep.subr.bf16.mxu1 %v17475_v6  ;;  %v17499_v11 = vld [vmem:[%s19371_s23 + $0x33e4] ss:$16 sps:$4 sm:$0xff]   ;;  %v17494_v6 = vld [vmem:[%s19371_s23 + $0x31e0] ss:$16 sps:$4 sm:$0xff]  }
 0x3b0   : > { %12154 = vmatpush1.bf16.msra.mxu0 %v17470_v44  ;;  %v17497_v44 = vld [vmem:[%s19371_s23 + $0x33e0] ss:$16 sps:$4 sm:$0xff]  }
 0x3b1   : > { %12195 = vmatpush1.bf16.msra.mxu1 %v17473_v12  ;;  %12155 = vmatprep.subr.bf16.mxu0 %v17478_v30  ;;  %v17502_v12 = vld [vmem:[%s19371_s23 + $0x31c4] ss:$16 sps:$4 sm:$0xff]  }
 0x3b2   : > { %12196 = vmatprep.subr.bf16.mxu1 %v17481_v38  ;;  %v17505_v30 = vld [vmem:[%s19371_s23 + $0x33c4] ss:$16 sps:$4 sm:$0xff]   ;;  %v17500_v38 = vld [vmem:[%s19371_s23 + $0x31c0] ss:$16 sps:$4 sm:$0xff]  }
 0x3b4   : > { %12156 = vmatpush1.bf16.msra.mxu0 %v17476_v51  ;;  %v17503_v51 = vld [vmem:[%s19371_s23 + $0x33c0] ss:$16 sps:$4 sm:$0xff]  }
 0x3b5   : > { %12197 = vmatpush1.bf16.msra.mxu1 %v17479_v22  ;;  %12157 = vmatprep.subr.bf16.mxu0 %v17484_v28  ;;  %v17508_v22 = vld [vmem:[%s19371_s23 + $0x31a4] ss:$16 sps:$4 sm:$0xff]  }
 0x3b6   : > { %12198 = vmatprep.subr.bf16.mxu1 %v17487_v47  ;;  %v17511_v28 = vld [vmem:[%s19371_s23 + $0x33a4] ss:$16 sps:$4 sm:$0xff]   ;;  %v17506_v47 = vld [vmem:[%s19371_s23 + $0x31a0] ss:$16 sps:$4 sm:$0xff]  }
 0x3b8   : > { %12158 = vmatpush1.bf16.msra.mxu0 %v17482_v35  ;;  %v17509_v35 = vld [vmem:[%s19371_s23 + $0x33a0] ss:$16 sps:$4 sm:$0xff]  }
 0x3b9   : > { %12199 = vmatpush1.bf16.msra.mxu1 %v17485_v2  ;;  %12159 = vmatprep.subr.bf16.mxu0 %v17490_v7  ;;  %v17514_v2 = vld [vmem:[%s19371_s23 + $0x3184] ss:$16 sps:$4 sm:$0xff]  }
 0x3ba   : > { %12200 = vmatprep.subr.bf16.mxu1 %v17493_v8  ;;  %v17517_v7 = vld [vmem:[%s19371_s23 + $0x3384] ss:$16 sps:$4 sm:$0xff]   ;;  %v17512_v8 = vld [vmem:[%s19371_s23 + $0x3180] ss:$16 sps:$4 sm:$0xff]  }
 0x3bc   : > { %12160 = vmatpush1.bf16.msra.mxu0 %v17488_v62  ;;  %v17515_v62 = vld [vmem:[%s19371_s23 + $0x3380] ss:$16 sps:$4 sm:$0xff]  }
 0x3bd   : > { %12201 = vmatpush1.bf16.msra.mxu1 %v17491_v36  ;;  %12161 = vmatprep.subr.bf16.mxu0 %v17496_v33  ;;  %v17520_v36 = vld [vmem:[%s19371_s23 + $0x3164] ss:$16 sps:$4 sm:$0xff]  }
 0x3be   : > { %12202 = vmatprep.subr.bf16.mxu1 %v17499_v11  ;;  %v17523_v33 = vld [vmem:[%s19371_s23 + $0x3364] ss:$16 sps:$4 sm:$0xff]   ;;  %v17518_v11 = vld [vmem:[%s19371_s23 + $0x3160] ss:$16 sps:$4 sm:$0xff]  }
 0x3c0   : > { %12162 = vmatpush2.bf16.msra.mxu0 %v17494_v6  ;;  %v17521_v6 = vld [vmem:[%s19371_s23 + $0x3360] ss:$16 sps:$4 sm:$0xff]  }
 0x3c1   : > { %12203 = vmatpush2.bf16.msra.mxu1 %v17497_v44  ;;  %12163 = vmatprep.subr.bf16.mxu0 %v17502_v12  ;;  %v17526_v44 = vld [vmem:[%s19371_s23 + $0x3144] ss:$16 sps:$4 sm:$0xff]  }
 0x3c2   : > { %12204 = vmatprep.subr.bf16.mxu1 %v17505_v30  ;;  %v17529_v12 = vld [vmem:[%s19371_s23 + $0x3344] ss:$16 sps:$4 sm:$0xff]   ;;  %v17524_v30 = vld [vmem:[%s19371_s23 + $0x3140] ss:$16 sps:$4 sm:$0xff]  }
 0x3c4   : > { %12164 = vmatpush2.bf16.msra.mxu0 %v17500_v38  ;;  %v17527_v38 = vld [vmem:[%s19371_s23 + $0x3340] ss:$16 sps:$4 sm:$0xff]  }
 0x3c5   : > { %12205 = vmatpush2.bf16.msra.mxu1 %v17503_v51  ;;  %12165 = vmatprep.subr.bf16.mxu0 %v17508_v22  ;;  %v17532_v51 = vld [vmem:[%s19371_s23 + $0x3124] ss:$16 sps:$4 sm:$0xff]  }
 0x3c6   : > { %12206 = vmatprep.subr.bf16.mxu1 %v17511_v28  ;;  %v17535_v22 = vld [vmem:[%s19371_s23 + $0x3324] ss:$16 sps:$4 sm:$0xff]   ;;  %v2420_v28 = vcombine.high %v20505_v48, %v20505_v48  ;;  %v17536_v48 = vld [vmem:[%s19371_s23 + $0x3100] ss:$16 sps:$4 sm:$0xff]  }
 0x3c8   : > { %12166 = vmatpush2.bf16.msra.mxu0 %v17506_v47  ;;  %v17530_v47 = vld [vmem:[%s19371_s23 + $0x3120] ss:$16 sps:$4 sm:$0xff]  }
 0x3c9   : > { %12207 = vmatpush2.bf16.msra.mxu1 %v17509_v35  ;;  %12167 = vmatprep.subr.bf16.mxu0 %v17514_v2  ;;  %v17533_v35 = vld [vmem:[%s19371_s23 + $0x3320] ss:$16 sps:$4 sm:$0xff]   ;;  %v17538_v2 = vld [vmem:[%s19371_s23 + $0x3104] ss:$16 sps:$4 sm:$0xff]  }
 0x3ca   : > { %12208 = vmatprep.subr.bf16.mxu1 %v17517_v7  ;;  %v17541_v7 = vld [vmem:[%s19371_s23 + $0x3304] ss:$16 sps:$4 sm:$0xff]  }
 0x3cc   : > { %12168 = vmatpush2.bf16.msra.mxu0 %v17512_v8  ;;  %v20613_v8 = vrot.slane %v2420_v28, %v19438_v50 }
 0x3cd   : > { %12209 = vmatpush2.bf16.msra.mxu1 %v17515_v62  ;;  %12169 = vmatprep.subr.bf16.mxu0 %v17520_v36  ;;  %v20617_v62 = vrot.slane %v20513_v57, %v19438_v50  ;;  %v17539_v36 = vld [vmem:[%s19371_s23 + $0x3300] ss:$16 sps:$4 sm:$0xff]  }
 0x3ce   : > { %12210 = vmatprep.subr.bf16.mxu1 %v17523_v33  ;;  %v17544_v33 = vld [vmem:[%s19371_s23 + $0x34e4] ss:$16 sps:$4 sm:$0xff]  }
 0x3cf   : > { %21996 = vst [vmem:[#allocation31_spill] sm:$0xff] %v20617_v62  ;;  %v20629_v57 = vcombine.high %v20617_v62, %v20617_v62 }
 0x3d0   : > { %12170 = vmatpush2.bf16.msra.mxu0 %v17518_v11  ;;  %v17547_v11 = vld [vmem:[%s19371_s23 + $0xec] ss:$16 sps:$4 sm:$0xff]  }
 0x3d1   : > { %12211 = vmatpush2.bf16.msra.mxu1 %v17521_v6  ;;  %12171 = vmatprep.subr.bf16.mxu0 %v17526_v44  ;;  %v17542_v6 = vld [vmem:[%s19371_s23 + $0x34e0] ss:$16 sps:$4 sm:$0xff]   ;;  %v17545_v44 = vld [vmem:[%s19371_s23 + $0xe8] ss:$16 sps:$4 sm:$0xff]  }
 0x3d2   : > { %12212 = vmatprep.subr.bf16.mxu1 %v17529_v12  ;;  %v2436_v12 = vcombine.high %v20613_v8, %v20613_v8 }
 0x3d4   : > { %12172 = vmatpush2.bf16.msra.mxu0 %v17524_v30  ;;  %v17550_v30 = vld [vmem:[%s19371_s23 + $0x34c4] ss:$16 sps:$4 sm:$0xff]   ;;  %v20636_v28 = vrot.slane %v2436_v12, %v19438_v50 }
 0x3d5   : > { %12213 = vmatpush2.bf16.msra.mxu1 %v17527_v38  ;;  %12173 = vmatprep.subr.bf16.mxu0 %v17532_v51  ;;  %v17553_v38 = vld [vmem:[%s19371_s23 + $0xcc] ss:$16 sps:$4 sm:$0xff]   ;;  %v17548_v51 = vld [vmem:[%s19371_s23 + $0x34c0] ss:$16 sps:$4 sm:$0xff]  }
 0x3d6   : > { %12214 = vmatprep.subr.bf16.mxu1 %v17535_v22  ;;  %v17551_v22 = vld [vmem:[%s19371_s23 + $0xc8] ss:$16 sps:$4 sm:$0xff]  }
 0x3d8   : > { %12174 = vmatpush2.bf16.msra.mxu0 %v17530_v47 }
 0x3d9   : > { %12215 = vmatpush2.bf16.msra.mxu1 %v17533_v35  ;;  %12175 = vmatprep.subr.bf16.mxu0 %v17538_v2 }
 0x3da   : > { %12216 = vmatprep.subr.bf16.mxu1 %v17541_v7 }
 0x3dc   : > { %12176 = vmatpush2.bf16.msra.mxu0 %v17536_v48 }
 0x3dd   : > { %12217 = vmatpush2.bf16.msra.mxu1 %v17539_v36  ;;  %12227 = vmatprep.subr.bf16.mxu0 %v17544_v33  ;;  %v17556_v36 = vld [vmem:[%s19371_s23 + $0x34a4] ss:$16 sps:$4 sm:$0xff]   ;;  %v17559_v33 = vld [vmem:[%s19371_s23 + $0xac] ss:$16 sps:$4 sm:$0xff]  }
 0x3de   : > { %12268 = vmatprep.subr.bf16.mxu1 %v17547_v11 }
 0x3df   : > { %v11933_v47 = vpop.f32.mrf.mxu0  ;;  %12178 = vmatmul.mubr.bf16.vlgmr.msra.gmra.mxu0 %v20617_v62  ;;  %v17557_v62 = vld [vmem:[%s19371_s23 + $0xa8] ss:$16 sps:$4 sm:$0xff]  }
 0x3e0   : > { %v11974_v35 = vpop.f32.mrf.mxu1  ;;  %12219 = vmatmul.mubr.bf16.vlgmr.msra.gmra.mxu1 %v20629_v57  ;;  %v11934_v2 = vadd.f32 %v11933_v47, %v20551_v53  ;;  %12228 = vmatpush1.bf16.msra.mxu0 %v17542_v6  ;;  %v17565_v47 = vld [vmem:[%s19371_s23 + $0x8c] ss:$16 sps:$4 sm:$0xff]  }
 0x3e1   : > { %12269 = vmatpush1.bf16.msra.mxu1 %v17545_v44  ;;  %v11935_v7 = vpop.f32.mrf.mxu0  ;;  %12229 = vmatprep.subr.bf16.mxu0 %v17550_v30 }
 0x3e2   : > { %v11976_v48 = vpop.f32.mrf.mxu1  ;;  %12270 = vmatprep.subr.bf16.mxu1 %v17553_v38  ;;  %v20643_v11 = vadd.f32 %v11974_v35, %v11934_v2  ;;  %v11936_v12 = vadd.f32 %v11935_v7, %v20558_v37  ;;  %12259 = vmatprep.mubr.bf16.mxu0 %v20636_v28  ;;  %v17562_v37 = vld [vmem:[%s19371_s23 + $0x3484] ss:$16 sps:$4 sm:$0xff]   ;;  %v17563_v35 = vld [vmem:[%s19371_s23 + $0x88] ss:$16 sps:$4 sm:$0xff]   ;;  %v17566_v2 = vld [vmem:[%s19371_s23 + $0x3460] ss:$16 sps:$4 sm:$0xff]  }
 0x3e3   : > { %12300 = vmatprep.mubr.bf16.mxu1 %v19450_v61  ;;  %v11937_v53 = vpop.f32.mrf.mxu0  ;;  %v17560_v61 = vld [vmem:[%s19371_s23 + $0x3480] ss:$16 sps:$4 sm:$0xff]   ;;  %v17569_v7 = vld [vmem:[%s19371_s23 + $0x68] ss:$16 sps:$4 sm:$0xff]  }
 0x3e4   : > { %v11978_v6 = vpop.f32.mrf.mxu1  ;;  %v20650_v44 = vadd.f32 %v11976_v48, %v11936_v12  ;;  %12230 = vmatpush1.bf16.msra.mxu0 %v17548_v51  ;;  %v17568_v51 = vld [vmem:[%s19371_s23 + $0x3464] ss:$16 sps:$4 sm:$0xff]   ;;  %v17572_v48 = vld [vmem:[%s19371_s23 + $0x3440] ss:$16 sps:$4 sm:$0xff]   ;;  %v17583_v12 = vld [vmem:[%s19371_s23 + $0x2c] ss:$16 sps:$4 sm:$0xff]  }
 0x3e5   : > { %12271 = vmatpush1.bf16.msra.mxu1 %v17551_v22  ;;  %v11938_v30 = vpop.f32.mrf.mxu0  ;;  %12231 = vmatprep.subr.bf16.mxu0 %v17556_v36  ;;  %v17571_v22 = vld [vmem:[%s19371_s23 + $0x6c] ss:$16 sps:$4 sm:$0xff]   ;;  %v17575_v36 = vld [vmem:[%s19371_s23 + $0x48] ss:$16 sps:$4 sm:$0xff]   ;;  %v17578_v53 = vld [vmem:[%s19371_s23 + $0x3420] ss:$16 sps:$4 sm:$0xff]  }
 0x3e6   : > { %v11979_v38 = vpop.f32.mrf.mxu1  ;;  %12272 = vmatprep.subr.bf16.mxu1 %v17559_v33  ;;  %v17580_v33 = vld [vmem:[%s19371_s23 + $0x3424] ss:$16 sps:$4 sm:$0xff]   ;;  %v17581_v6 = vld [vmem:[%s19371_s23 + $0x28] ss:$16 sps:$4 sm:$0xff]  }
 0x3e7   : > { %v17586_v30 = vld [vmem:[%s19371_s23 + $0x3404] ss:$16 sps:$4 sm:$0xff]   ;;  %v17589_v38 = vld [vmem:[%s19371_s23 + $0xc] ss:$16 sps:$4 sm:$0xff]  }
 0x3e8   : > { %12232 = vmatpush1.bf16.msra.mxu0 %v17554_v16  ;;  %v17574_v16 = vld [vmem:[%s19371_s23 + $0x3444] ss:$16 sps:$4 sm:$0xff]  }
 0x3e9   : > { %12273 = vmatpush1.bf16.msra.mxu1 %v17557_v62  ;;  %12233 = vmatprep.subr.bf16.mxu0 %v17562_v37  ;;  %v17577_v62 = vld [vmem:[%s19371_s23 + $0x4c] ss:$16 sps:$4 sm:$0xff]   ;;  %v17584_v37 = vld [vmem:[%s19371_s23 + $0x3400] ss:$16 sps:$4 sm:$0xff]  }
 0x3ea   : > { %12274 = vmatprep.subr.bf16.mxu1 %v17565_v47  ;;  %v17587_v47 = vld [vmem:[%s19371_s23 + $0x8] ss:$16 sps:$4 sm:$0xff]  }
 0x3ec   : > { %12234 = vmatpush1.bf16.msra.mxu0 %v17560_v61  ;;  %v17592_v61 = vld [vmem:[%s19371_s23 + $0x35e4] ss:$16 sps:$4 sm:$0xff]  }
 0x3ed   : > { %12275 = vmatpush1.bf16.msra.mxu1 %v17563_v35  ;;  %12235 = vmatprep.subr.bf16.mxu0 %v17568_v51  ;;  %v17595_v35 = vld [vmem:[%s19371_s23 + $0x1ec] ss:$16 sps:$4 sm:$0xff]   ;;  %v17590_v51 = vld [vmem:[%s19371_s23 + $0x35e0] ss:$16 sps:$4 sm:$0xff]  }
 0x3ee   : > { %12276 = vmatprep.subr.bf16.mxu1 %v17571_v22  ;;  %v17593_v22 = vld [vmem:[%s19371_s23 + $0x1e8] ss:$16 sps:$4 sm:$0xff]  }
 0x3f0   : > { %12236 = vmatpush1.bf16.msra.mxu0 %v17566_v2  ;;  %v17598_v2 = vld [vmem:[%s19371_s23 + $0x35c4] ss:$16 sps:$4 sm:$0xff]  }
 0x3f1   : > { %12277 = vmatpush1.bf16.msra.mxu1 %v17569_v7  ;;  %12237 = vmatprep.subr.bf16.mxu0 %v17574_v16  ;;  %v17601_v7 = vld [vmem:[%s19371_s23 + $0x1cc] ss:$16 sps:$4 sm:$0xff]   ;;  %v17596_v16 = vld [vmem:[%s19371_s23 + $0x35c0] ss:$16 sps:$4 sm:$0xff]  }
 0x3f2   : > { %12278 = vmatprep.subr.bf16.mxu1 %v17577_v62  ;;  %v17599_v62 = vld [vmem:[%s19371_s23 + $0x1c8] ss:$16 sps:$4 sm:$0xff]  }
 0x3f4   : > { %12238 = vmatpush1.bf16.msra.mxu0 %v17572_v48  ;;  %v17604_v48 = vld [vmem:[%s19371_s23 + $0x35a4] ss:$16 sps:$4 sm:$0xff]  }
 0x3f5   : > { %12279 = vmatpush1.bf16.msra.mxu1 %v17575_v36  ;;  %12239 = vmatprep.subr.bf16.mxu0 %v17580_v33  ;;  %v17607_v36 = vld [vmem:[%s19371_s23 + $0x1ac] ss:$16 sps:$4 sm:$0xff]   ;;  %v17602_v33 = vld [vmem:[%s19371_s23 + $0x35a0] ss:$16 sps:$4 sm:$0xff]  }
 0x3f6   : > { %12280 = vmatprep.subr.bf16.mxu1 %v17583_v12  ;;  %v17605_v12 = vld [vmem:[%s19371_s23 + $0x1a8] ss:$16 sps:$4 sm:$0xff]  }
 0x3f8   : > { %12240 = vmatpush1.bf16.msra.mxu0 %v17578_v53  ;;  %v17610_v53 = vld [vmem:[%s19371_s23 + $0x3584] ss:$16 sps:$4 sm:$0xff]  }
 0x3f9   : > { %12281 = vmatpush1.bf16.msra.mxu1 %v17581_v6  ;;  %12241 = vmatprep.subr.bf16.mxu0 %v17586_v30  ;;  %v17613_v6 = vld [vmem:[%s19371_s23 + $0x18c] ss:$16 sps:$4 sm:$0xff]   ;;  %v17608_v30 = vld [vmem:[%s19371_s23 + $0x3580] ss:$16 sps:$4 sm:$0xff]  }
 0x3fa   : > { %12282 = vmatprep.subr.bf16.mxu1 %v17589_v38  ;;  %v17611_v38 = vld [vmem:[%s19371_s23 + $0x188] ss:$16 sps:$4 sm:$0xff]  }
 0x3fc   : > { %12242 = vmatpush1.bf16.msra.mxu0 %v17584_v37  ;;  %v17616_v37 = vld [vmem:[%s19371_s23 + $0x3564] ss:$16 sps:$4 sm:$0xff]  }
 0x3fd   : > { %12283 = vmatpush1.bf16.msra.mxu1 %v17587_v47  ;;  %12243 = vmatprep.subr.bf16.mxu0 %v17592_v61  ;;  %v17619_v47 = vld [vmem:[%s19371_s23 + $0x16c] ss:$16 sps:$4 sm:$0xff]   ;;  %v17614_v61 = vld [vmem:[%s19371_s23 + $0x3560] ss:$16 sps:$4 sm:$0xff]  }
 0x3fe   : > { %12284 = vmatprep.subr.bf16.mxu1 %v17595_v35  ;;  %v17617_v35 = vld [vmem:[%s19371_s23 + $0x168] ss:$16 sps:$4 sm:$0xff]  }
 0x400   : > { %12244 = vmatpush2.bf16.msra.mxu0 %v17590_v51  ;;  %v17622_v51 = vld [vmem:[%s19371_s23 + $0x3544] ss:$16 sps:$4 sm:$0xff]  }
 0x401   : > { %12285 = vmatpush2.bf16.msra.mxu1 %v17593_v22  ;;  %12245 = vmatprep.subr.bf16.mxu0 %v17598_v2  ;;  %v17625_v22 = vld [vmem:[%s19371_s23 + $0x14c] ss:$16 sps:$4 sm:$0xff]   ;;  %v17620_v2 = vld [vmem:[%s19371_s23 + $0x3540] ss:$16 sps:$4 sm:$0xff]  }
 0x402   : > { %12286 = vmatprep.subr.bf16.mxu1 %v17601_v7  ;;  %v17623_v7 = vld [vmem:[%s19371_s23 + $0x148] ss:$16 sps:$4 sm:$0xff]  }
 0x404   : > { %12246 = vmatpush2.bf16.msra.mxu0 %v17596_v16  ;;  %v17628_v16 = vld [vmem:[%s19371_s23 + $0x3524] ss:$16 sps:$4 sm:$0xff]  }
 0x405   : > { %12287 = vmatpush2.bf16.msra.mxu1 %v17599_v62  ;;  %12247 = vmatprep.subr.bf16.mxu0 %v17604_v48  ;;  %v17631_v62 = vld [vmem:[%s19371_s23 + $0x12c] ss:$16 sps:$4 sm:$0xff]   ;;  %v17626_v48 = vld [vmem:[%s19371_s23 + $0x3520] ss:$16 sps:$4 sm:$0xff]  }
 0x406   : > { %12288 = vmatprep.subr.bf16.mxu1 %v17607_v36  ;;  %v17629_v36 = vld [vmem:[%s19371_s23 + $0x128] ss:$16 sps:$4 sm:$0xff]  }
 0x408   : > { %12248 = vmatpush2.bf16.msra.mxu0 %v17602_v33  ;;  %v17634_v33 = vld [vmem:[%s19371_s23 + $0x3504] ss:$16 sps:$4 sm:$0xff]  }
 0x409   : > { %12289 = vmatpush2.bf16.msra.mxu1 %v17605_v12  ;;  %12249 = vmatprep.subr.bf16.mxu0 %v17610_v53  ;;  %v17637_v12 = vld [vmem:[%s19371_s23 + $0x10c] ss:$16 sps:$4 sm:$0xff]   ;;  %v17632_v53 = vld [vmem:[%s19371_s23 + $0x3500] ss:$16 sps:$4 sm:$0xff]  }
 0x40a   : > { %12290 = vmatprep.subr.bf16.mxu1 %v17613_v6  ;;  %v17635_v6 = vld [vmem:[%s19371_s23 + $0x108] ss:$16 sps:$4 sm:$0xff]  }
 0x40c   : > { %12250 = vmatpush2.bf16.msra.mxu0 %v17608_v30  ;;  %v17641_v30 = vld [vmem:[%s19371_s23 + $0x2ec] ss:$16 sps:$4 sm:$0xff]  }
 0x40d   : > { %12291 = vmatpush2.bf16.msra.mxu1 %v17611_v38  ;;  %12251 = vmatprep.subr.bf16.mxu0 %v17616_v37  ;;  %v17644_v38 = vld [vmem:[%s19371_s23 + $0x4ec] ss:$16 sps:$4 sm:$0xff]   ;;  %v17639_v37 = vld [vmem:[%s19371_s23 + $0x2e8] ss:$16 sps:$4 sm:$0xff]  }
 0x40e   : > { %12292 = vmatprep.subr.bf16.mxu1 %v17619_v47  ;;  %v17642_v47 = vld [vmem:[%s19371_s23 + $0x4e8] ss:$16 sps:$4 sm:$0xff]  }
 0x410   : > { %12252 = vmatpush2.bf16.msra.mxu0 %v17614_v61  ;;  %v20710_v61 = vrot.slane %v20613_v8, %v19438_v50 }
 0x411   : > { %12293 = vmatpush2.bf16.msra.mxu1 %v17617_v35  ;;  %12253 = vmatprep.subr.bf16.mxu0 %v17622_v51  ;;  %v17647_v35 = vld [vmem:[%s19371_s23 + $0x2cc] ss:$16 sps:$4 sm:$0xff]  }
 0x412   : > { %12294 = vmatprep.subr.bf16.mxu1 %v17625_v22  ;;  %v17650_v51 = vld [vmem:[%s19371_s23 + $0x4cc] ss:$16 sps:$4 sm:$0xff]   ;;  %v17645_v22 = vld [vmem:[%s19371_s23 + $0x2c8] ss:$16 sps:$4 sm:$0xff]  }
 0x414   : > { %12254 = vmatpush2.bf16.msra.mxu0 %v17620_v2  ;;  %v17648_v2 = vld [vmem:[%s19371_s23 + $0x4c8] ss:$16 sps:$4 sm:$0xff]  }
 0x415   : > { %12295 = vmatpush2.bf16.msra.mxu1 %v17623_v7  ;;  %12255 = vmatprep.subr.bf16.mxu0 %v17628_v16 }
 0x416   : > { %12296 = vmatprep.subr.bf16.mxu1 %v17631_v62 }
 0x418   : > { %12256 = vmatpush2.bf16.msra.mxu0 %v17626_v48  ;;  %v17653_v48 = vld [vmem:[%s19371_s23 + $0x2ac] ss:$16 sps:$4 sm:$0xff]  }
 0x419   : > { %12297 = vmatpush2.bf16.msra.mxu1 %v17629_v36  ;;  %12257 = vmatprep.subr.bf16.mxu0 %v17634_v33  ;;  %v17656_v36 = vld [vmem:[%s19371_s23 + $0x4ac] ss:$16 sps:$4 sm:$0xff]  }
 0x41a   : > { %12298 = vmatprep.subr.bf16.mxu1 %v17637_v12 }
 0x41c   : > { %12258 = vmatpush2.bf16.msra.mxu0 %v17632_v53  ;;  %v17651_v53 = vld [vmem:[%s19371_s23 + $0x2a8] ss:$16 sps:$4 sm:$0xff]  }
 0x41d   : > { %12299 = vmatpush2.bf16.msra.mxu1 %v17635_v6  ;;  %12309 = vmatprep.subr.bf16.mxu0 %v17641_v30  ;;  %v17654_v6 = vld [vmem:[%s19371_s23 + $0x4a8] ss:$16 sps:$4 sm:$0xff]  }
 0x41e   : > { %12350 = vmatprep.subr.bf16.mxu1 %v17644_v38 }
 0x41f   : > { %v12015_v7 = vpop.f32.mrf.mxu0  ;;  %12260 = vmatmul.mubr.bf16.vlgmr.msra.gmra.mxu0 %v20710_v61 }
 0x420   : > { %v12056_v16 = vpop.f32.mrf.mxu1  ;;  %12301 = vmatmul.mubr.bf16.vlgmr.msra.gmra.mxu1 %v19476_v14  ;;  %v12016_v50 = vadd.f32 %v12015_v7, %v20643_v11  ;;  %12310 = vmatpush1.bf16.msra.mxu0 %v17639_v37  ;;  %v17671_v7 = vld [vmem:[%s19371_s23 + $0x24c] ss:$16 sps:$4 sm:$0xff]  }
 0x421   : > { %12351 = vmatpush1.bf16.msra.mxu1 %v17642_v47  ;;  %v12017_v8 = vpop.f32.mrf.mxu0  ;;  %12311 = vmatprep.subr.bf16.mxu0 %v17647_v35  ;;  %v17660_v47 = vld [vmem:[%s19371_s23 + $0x488] ss:$16 sps:$4 sm:$0xff]   ;;  %v17665_v35 = vld [vmem:[%s19371_s23 + $0x26c] ss:$16 sps:$4 sm:$0xff]  }
 0x422   : > { %v12058_v62 = vpop.f32.mrf.mxu1  ;;  %12352 = vmatprep.subr.bf16.mxu1 %v17650_v51  ;;  %v20721_v33 = vadd.f32 %v12056_v16, %v12016_v50  ;;  %v12018_v12 = vadd.f32 %v12017_v8, %v20650_v44  ;;  %12341 = vmatprep.mubr.bf16.mxu0 %v19457_v1  ;;  %v17659_v44 = vld [vmem:[%s19371_s23 + $0x28c] ss:$16 sps:$4 sm:$0xff]   ;;  %v17669_v50 = vld [vmem:[%s19371_s23 + $0x248] ss:$16 sps:$4 sm:$0xff]  }
 0x423   : > { %12382 = vmatprep.mubr.bf16.mxu1 %v19482_v18  ;;  %v12019_v14 = vpop.f32.mrf.mxu0  ;;  %v17662_v1 = vld [vmem:[%s19371_s23 + $0x48c] ss:$16 sps:$4 sm:$0xff]   ;;  %v17657_v18 = vld [vmem:[%s19371_s23 + $0x288] ss:$16 sps:$4 sm:$0xff]  }
 0x424   : > { %v12060_v11 = vpop.f32.mrf.mxu1  ;;  %v20728_v30 = vadd.f32 %v12058_v62, %v12018_v12  ;;  %12312 = vmatpush1.bf16.msra.mxu0 %v17645_v22  ;;  %v17668_v51 = vld [vmem:[%s19371_s23 + $0x46c] ss:$16 sps:$4 sm:$0xff]   ;;  %v17663_v22 = vld [vmem:[%s19371_s23 + $0x268] ss:$16 sps:$4 sm:$0xff]  }
 0x425   : > { %12353 = vmatpush1.bf16.msra.mxu1 %v17648_v2  ;;  %v12020_v38 = vpop.f32.mrf.mxu0  ;;  %12313 = vmatprep.subr.bf16.mxu0 %v17653_v48  ;;  %v17666_v2 = vld [vmem:[%s19371_s23 + $0x468] ss:$16 sps:$4 sm:$0xff]   ;;  %v17674_v16 = vld [vmem:[%s19371_s23 + $0x44c] ss:$16 sps:$4 sm:$0xff]  }
 0x426   : > { %v12061_v37 = vpop.f32.mrf.mxu1  ;;  %12354 = vmatprep.subr.bf16.mxu1 %v17656_v36  ;;  %v17672_v8 = vld [vmem:[%s19371_s23 + $0x448] ss:$16 sps:$4 sm:$0xff]   ;;  %v17677_v62 = vld [vmem:[%s19371_s23 + $0x22c] ss:$16 sps:$4 sm:$0xff]  }
 0x427   : > { %v17680_v48 = vld [vmem:[%s19371_s23 + $0x42c] ss:$16 sps:$4 sm:$0xff]   ;;  %v17675_v36 = vld [vmem:[%s19371_s23 + $0x228] ss:$16 sps:$4 sm:$0xff]  }
 0x428   : > { %12314 = vmatpush1.bf16.msra.mxu0 %v17651_v53  ;;  %v17678_v12 = vld [vmem:[%s19371_s23 + $0x428] ss:$16 sps:$4 sm:$0xff]   ;;  %v17683_v53 = vld [vmem:[%s19371_s23 + $0x20c] ss:$16 sps:$4 sm:$0xff]  }
 0x429   : > { %12355 = vmatpush1.bf16.msra.mxu1 %v17654_v6  ;;  %12315 = vmatprep.subr.bf16.mxu0 %v17659_v44  ;;  %v17686_v6 = vld [vmem:[%s19371_s23 + $0x40c] ss:$16 sps:$4 sm:$0xff]   ;;  %v17681_v14 = vld [vmem:[%s19371_s23 + $0x208] ss:$16 sps:$4 sm:$0xff]  }
 0x42a   : > { %12356 = vmatprep.subr.bf16.mxu1 %v17662_v1  ;;  %v17684_v11 = vld [vmem:[%s19371_s23 + $0x408] ss:$16 sps:$4 sm:$0xff]   ;;  %v17689_v38 = vld [vmem:[%s19371_s23 + $0x3ec] ss:$16 sps:$4 sm:$0xff]  }
 0x42b   : > { %v17692_v37 = vld [vmem:[%s19371_s23 + $0x5ec] ss:$16 sps:$4 sm:$0xff]   ;;  %v17687_v44 = vld [vmem:[%s19371_s23 + $0x3e8] ss:$16 sps:$4 sm:$0xff]  }
 0x42c   : > { %12316 = vmatpush1.bf16.msra.mxu0 %v17657_v18  ;;  %v17690_v1 = vld [vmem:[%s19371_s23 + $0x5e8] ss:$16 sps:$4 sm:$0xff]   ;;  %v17695_v18 = vld [vmem:[%s19371_s23 + $0x3cc] ss:$16 sps:$4 sm:$0xff]  }
 0x42d   : > { %12357 = vmatpush1.bf16.msra.mxu1 %v17660_v47  ;;  %12317 = vmatprep.subr.bf16.mxu0 %v17665_v35  ;;  %v17698_v47 = vld [vmem:[%s19371_s23 + $0x5cc] ss:$16 sps:$4 sm:$0xff]   ;;  %v17693_v35 = vld [vmem:[%s19371_s23 + $0x3c8] ss:$16 sps:$4 sm:$0xff]  }
 0x42e   : > { %12358 = vmatprep.subr.bf16.mxu1 %v17668_v51  ;;  %v17696_v51 = vld [vmem:[%s19371_s23 + $0x5c8] ss:$16 sps:$4 sm:$0xff]  }
 0x430   : > { %12318 = vmatpush1.bf16.msra.mxu0 %v17663_v22  ;;  %v17701_v22 = vld [vmem:[%s19371_s23 + $0x3ac] ss:$16 sps:$4 sm:$0xff]  }
 0x431   : > { %12359 = vmatpush1.bf16.msra.mxu1 %v17666_v2  ;;  %12319 = vmatprep.subr.bf16.mxu0 %v17671_v7  ;;  %v17704_v2 = vld [vmem:[%s19371_s23 + $0x5ac] ss:$16 sps:$4 sm:$0xff]   ;;  %v17699_v7 = vld [vmem:[%s19371_s23 + $0x3a8] ss:$16 sps:$4 sm:$0xff]  }
 0x432   : > { %12360 = vmatprep.subr.bf16.mxu1 %v17674_v16  ;;  %v17702_v16 = vld [vmem:[%s19371_s23 + $0x5a8] ss:$16 sps:$4 sm:$0xff]  }
 0x434   : > { %12320 = vmatpush1.bf16.msra.mxu0 %v17669_v50  ;;  %v17707_v50 = vld [vmem:[%s19371_s23 + $0x38c] ss:$16 sps:$4 sm:$0xff]  }
 0x435   : > { %12361 = vmatpush1.bf16.msra.mxu1 %v17672_v8  ;;  %12321 = vmatprep.subr.bf16.mxu0 %v17677_v62  ;;  %v17710_v8 = vld [vmem:[%s19371_s23 + $0x58c] ss:$16 sps:$4 sm:$0xff]   ;;  %v17705_v62 = vld [vmem:[%s19371_s23 + $0x388] ss:$16 sps:$4 sm:$0xff]  }
 0x436   : > { %12362 = vmatprep.subr.bf16.mxu1 %v17680_v48  ;;  %v17708_v48 = vld [vmem:[%s19371_s23 + $0x588] ss:$16 sps:$4 sm:$0xff]  }
 0x438   : > { %12322 = vmatpush1.bf16.msra.mxu0 %v17675_v36  ;;  %v17713_v36 = vld [vmem:[%s19371_s23 + $0x36c] ss:$16 sps:$4 sm:$0xff]  }
 0x439   : > { %12363 = vmatpush1.bf16.msra.mxu1 %v17678_v12  ;;  %12323 = vmatprep.subr.bf16.mxu0 %v17683_v53  ;;  %v17716_v12 = vld [vmem:[%s19371_s23 + $0x56c] ss:$16 sps:$4 sm:$0xff]   ;;  %v17711_v53 = vld [vmem:[%s19371_s23 + $0x368] ss:$16 sps:$4 sm:$0xff]  }
 0x43a   : > { %12364 = vmatprep.subr.bf16.mxu1 %v17686_v6  ;;  %v17714_v6 = vld [vmem:[%s19371_s23 + $0x568] ss:$16 sps:$4 sm:$0xff]  }
 0x43c   : > { %12324 = vmatpush1.bf16.msra.mxu0 %v17681_v14  ;;  %v17719_v14 = vld [vmem:[%s19371_s23 + $0x34c] ss:$16 sps:$4 sm:$0xff]  }
 0x43d   : > { %12365 = vmatpush1.bf16.msra.mxu1 %v17684_v11  ;;  %12325 = vmatprep.subr.bf16.mxu0 %v17689_v38  ;;  %v17722_v11 = vld [vmem:[%s19371_s23 + $0x54c] ss:$16 sps:$4 sm:$0xff]   ;;  %v17717_v38 = vld [vmem:[%s19371_s23 + $0x348] ss:$16 sps:$4 sm:$0xff]  }
 0x43e   : > { %12366 = vmatprep.subr.bf16.mxu1 %v17692_v37  ;;  %v17720_v37 = vld [vmem:[%s19371_s23 + $0x548] ss:$16 sps:$4 sm:$0xff]  }
 0x440   : > { %12326 = vmatpush2.bf16.msra.mxu0 %v17687_v44  ;;  %v17725_v44 = vld [vmem:[%s19371_s23 + $0x32c] ss:$16 sps:$4 sm:$0xff]  }
 0x441   : > { %12367 = vmatpush2.bf16.msra.mxu1 %v17690_v1  ;;  %12327 = vmatprep.subr.bf16.mxu0 %v17695_v18  ;;  %v17728_v1 = vld [vmem:[%s19371_s23 + $0x52c] ss:$16 sps:$4 sm:$0xff]   ;;  %v17723_v18 = vld [vmem:[%s19371_s23 + $0x328] ss:$16 sps:$4 sm:$0xff]  }
 0x442   : > { %12368 = vmatprep.subr.bf16.mxu1 %v17698_v47  ;;  %v17726_v47 = vld [vmem:[%s19371_s23 + $0x528] ss:$16 sps:$4 sm:$0xff]  }
 0x444   : > { %12328 = vmatpush2.bf16.msra.mxu0 %v17693_v35  ;;  %v17731_v35 = vld [vmem:[%s19371_s23 + $0x30c] ss:$16 sps:$4 sm:$0xff]  }
 0x445   : > { %12369 = vmatpush2.bf16.msra.mxu1 %v17696_v51  ;;  %12329 = vmatprep.subr.bf16.mxu0 %v17701_v22  ;;  %v17734_v51 = vld [vmem:[%s19371_s23 + $0x50c] ss:$16 sps:$4 sm:$0xff]   ;;  %v17729_v22 = vld [vmem:[%s19371_s23 + $0x308] ss:$16 sps:$4 sm:$0xff]  }
 0x446   : > { %12370 = vmatprep.subr.bf16.mxu1 %v17704_v2  ;;  %v17732_v2 = vld [vmem:[%s19371_s23 + $0x508] ss:$16 sps:$4 sm:$0xff]  }
 0x448   : > { %12330 = vmatpush2.bf16.msra.mxu0 %v17699_v7  ;;  %v17737_v7 = vld [vmem:[%s19371_s23 + $0x6ec] ss:$16 sps:$4 sm:$0xff]  }
 0x449   : > { %12371 = vmatpush2.bf16.msra.mxu1 %v17702_v16  ;;  %12331 = vmatprep.subr.bf16.mxu0 %v17707_v50  ;;  %v17740_v16 = vld [vmem:[%s19371_s23 + $0x8ec] ss:$16 sps:$4 sm:$0xff]   ;;  %v17735_v50 = vld [vmem:[%s19371_s23 + $0x6e8] ss:$16 sps:$4 sm:$0xff]  }
 0x44a   : > { %12372 = vmatprep.subr.bf16.mxu1 %v17710_v8  ;;  %v17738_v8 = vld [vmem:[%s19371_s23 + $0x8e8] ss:$16 sps:$4 sm:$0xff]  }
 0x44c   : > { %12332 = vmatpush2.bf16.msra.mxu0 %v17705_v62  ;;  %v17743_v62 = vld [vmem:[%s19371_s23 + $0x6cc] ss:$16 sps:$4 sm:$0xff]  }
 0x44d   : > { %12373 = vmatpush2.bf16.msra.mxu1 %v17708_v48  ;;  %12333 = vmatprep.subr.bf16.mxu0 %v17713_v36  ;;  %v17746_v48 = vld [vmem:[%s19371_s23 + $0x8cc] ss:$16 sps:$4 sm:$0xff]  }
 0x44e   : > { %12374 = vmatprep.subr.bf16.mxu1 %v17716_v12 }
 0x450   : > { %12334 = vmatpush2.bf16.msra.mxu0 %v17711_v53 }
 0x451   : > { %12375 = vmatpush2.bf16.msra.mxu1 %v17714_v6  ;;  %12335 = vmatprep.subr.bf16.mxu0 %v17719_v14  ;;  %v17741_v6 = vld [vmem:[%s19371_s23 + $0x6c8] ss:$16 sps:$4 sm:$0xff]  }
 0x452   : > { %12376 = vmatprep.subr.bf16.mxu1 %v17722_v11  ;;  %v17744_v14 = vld [vmem:[%s19371_s23 + $0x8c8] ss:$16 sps:$4 sm:$0xff]  }
 0x454   : > { %12336 = vmatpush2.bf16.msra.mxu0 %v17717_v38 }
 0x455   : > { %12377 = vmatpush2.bf16.msra.mxu1 %v17720_v37  ;;  %12337 = vmatprep.subr.bf16.mxu0 %v17725_v44  ;;  %v17749_v37 = vld [vmem:[%s19371_s23 + $0x6ac] ss:$16 sps:$4 sm:$0xff]  }
 0x456   : > { %12378 = vmatprep.subr.bf16.mxu1 %v17728_v1  ;;  %v17752_v44 = vld [vmem:[%s19371_s23 + $0x8ac] ss:$16 sps:$4 sm:$0xff]  }
 0x458   : > { %12338 = vmatpush2.bf16.msra.mxu0 %v17723_v18 }
 0x459   : > { %12379 = vmatpush2.bf16.msra.mxu1 %v17726_v47  ;;  %12339 = vmatprep.subr.bf16.mxu0 %v17731_v35  ;;  %v17747_v47 = vld [vmem:[%s19371_s23 + $0x6a8] ss:$16 sps:$4 sm:$0xff]  }
 0x45a   : > { %12380 = vmatprep.subr.bf16.mxu1 %v17734_v51  ;;  %v17750_v35 = vld [vmem:[%s19371_s23 + $0x8a8] ss:$16 sps:$4 sm:$0xff]  }
 0x45c   : > { %12340 = vmatpush2.bf16.msra.mxu0 %v17729_v22 }
 0x45d   : > { %12381 = vmatpush2.bf16.msra.mxu1 %v17732_v2  ;;  %12391 = vmatprep.subr.bf16.mxu0 %v17737_v7  ;;  %v17756_v2 = vld [vmem:[%s19371_s23 + $0x888] ss:$16 sps:$4 sm:$0xff]   ;;  %v17761_v7 = vld [vmem:[%s19371_s23 + $0x66c] ss:$16 sps:$4 sm:$0xff]  }
 0x45e   : > { %12432 = vmatprep.subr.bf16.mxu1 %v17740_v16  ;;  %v17764_v16 = vld [vmem:[%s19371_s23 + $0x86c] ss:$16 sps:$4 sm:$0xff]  }
 0x45f   : > { %v12097_v36 = vpop.f32.mrf.mxu0  ;;  %12342 = vmatmul.mubr.bf16.vlgmr.msra.gmra.mxu0 %v19486_v19 }
 0x460   : > { %v12138_v12 = vpop.f32.mrf.mxu1  ;;  %12383 = vmatmul.mubr.bf16.vlgmr.msra.gmra.mxu1 %v19559_v27  ;;  %v12098_v53 = vadd.f32 %v12097_v36, %v20721_v33  ;;  %12392 = vmatpush1.bf16.msra.mxu0 %v17735_v50  ;;  %v17759_v50 = vld [vmem:[%s19371_s23 + $0x668] ss:$16 sps:$4 sm:$0xff]  }
 0x461   : > { %12433 = vmatpush1.bf16.msra.mxu1 %v17738_v8  ;;  %v12099_v11 = vpop.f32.mrf.mxu0  ;;  %12393 = vmatprep.subr.bf16.mxu0 %v17743_v62  ;;  %v17762_v8 = vld [vmem:[%s19371_s23 + $0x868] ss:$16 sps:$4 sm:$0xff]   ;;  %v17767_v62 = vld [vmem:[%s19371_s23 + $0x64c] ss:$16 sps:$4 sm:$0xff]  }
 0x462   : > { %v12140_v38 = vpop.f32.mrf.mxu1  ;;  %12434 = vmatprep.subr.bf16.mxu1 %v17746_v48  ;;  %v20795_v1 = vadd.f32 %v12138_v12, %v12098_v53  ;;  %v12100_v19 = vadd.f32 %v12099_v11, %v20728_v30  ;;  %12423 = vmatprep.mubr.bf16.mxu0 %v19494_v24  ;;  %v17755_v24 = vld [vmem:[%s19371_s23 + $0x68c] ss:$16 sps:$4 sm:$0xff]   ;;  %v17753_v30 = vld [vmem:[%s19371_s23 + $0x688] ss:$16 sps:$4 sm:$0xff]  }
 0x463   : > { %12464 = vmatprep.mubr.bf16.mxu1 %v19588_v42  ;;  %v12101_v27 = vpop.f32.mrf.mxu0  ;;  %v17758_v42 = vld [vmem:[%s19371_s23 + $0x88c] ss:$16 sps:$4 sm:$0xff]   ;;  %v17765_v36 = vld [vmem:[%s19371_s23 + $0x648] ss:$16 sps:$4 sm:$0xff]  }
 0x464   : > { %v12142_v33 = vpop.f32.mrf.mxu1  ;;  %v20800_v18 = vadd.f32 %v12140_v38, %v12100_v19  ;;  %12394 = vmatpush1.bf16.msra.mxu0 %v17741_v6  ;;  %v17770_v48 = vld [vmem:[%s19371_s23 + $0x84c] ss:$16 sps:$4 sm:$0xff]   ;;  %v17768_v12 = vld [vmem:[%s19371_s23 + $0x848] ss:$16 sps:$4 sm:$0xff]  }
 0x465   : > { %12435 = vmatpush1.bf16.msra.mxu1 %v17744_v14  ;;  %v12102_v51 = vpop.f32.mrf.mxu0  ;;  %12395 = vmatprep.subr.bf16.mxu0 %v17749_v37  ;;  %v17773_v53 = vld [vmem:[%s19371_s23 + $0x62c] ss:$16 sps:$4 sm:$0xff]   ;;  %v17771_v14 = vld [vmem:[%s19371_s23 + $0x628] ss:$16 sps:$4 sm:$0xff]  }
 0x466   : > { %v12143_v22 = vpop.f32.mrf.mxu1  ;;  %12436 = vmatprep.subr.bf16.mxu1 %v17752_v44  ;;  %v17776_v6 = vld [vmem:[%s19371_s23 + $0x82c] ss:$16 sps:$4 sm:$0xff]   ;;  %v17774_v11 = vld [vmem:[%s19371_s23 + $0x828] ss:$16 sps:$4 sm:$0xff]  }
 0x467   : > { %v17779_v38 = vld [vmem:[%s19371_s23 + $0x60c] ss:$16 sps:$4 sm:$0xff]   ;;  %v17777_v44 = vld [vmem:[%s19371_s23 + $0x608] ss:$16 sps:$4 sm:$0xff]  }
 0x468   : > { %12396 = vmatpush1.bf16.msra.mxu0 %v17747_v47  ;;  %v17782_v37 = vld [vmem:[%s19371_s23 + $0x80c] ss:$16 sps:$4 sm:$0xff]   ;;  %v17780_v19 = vld [vmem:[%s19371_s23 + $0x808] ss:$16 sps:$4 sm:$0xff]  }
 0x469   : > { %12437 = vmatpush1.bf16.msra.mxu1 %v17750_v35  ;;  %12397 = vmatprep.subr.bf16.mxu0 %v17755_v24  ;;  %v17785_v27 = vld [vmem:[%s19371_s23 + $0x7ec] ss:$16 sps:$4 sm:$0xff]   ;;  %v17783_v47 = vld [vmem:[%s19371_s23 + $0x7e8] ss:$16 sps:$4 sm:$0xff]  }
 0x46a   : > { %12438 = vmatprep.subr.bf16.mxu1 %v17758_v42  ;;  %v17788_v33 = vld [vmem:[%s19371_s23 + $0x9ec] ss:$16 sps:$4 sm:$0xff]   ;;  %v17786_v35 = vld [vmem:[%s19371_s23 + $0x9e8] ss:$16 sps:$4 sm:$0xff]  }
 0x46b   : > { %v17791_v51 = vld [vmem:[%s19371_s23 + $0x7cc] ss:$16 sps:$4 sm:$0xff]   ;;  %v17789_v24 = vld [vmem:[%s19371_s23 + $0x7c8] ss:$16 sps:$4 sm:$0xff]  }
 0x46c   : > { %12398 = vmatpush1.bf16.msra.mxu0 %v17753_v30  ;;  %v17794_v22 = vld [vmem:[%s19371_s23 + $0x9cc] ss:$16 sps:$4 sm:$0xff]   ;;  %v17792_v42 = vld [vmem:[%s19371_s23 + $0x9c8] ss:$16 sps:$4 sm:$0xff]  }
 0x46d   : > { %12439 = vmatpush1.bf16.msra.mxu1 %v17756_v2  ;;  %12399 = vmatprep.subr.bf16.mxu0 %v17761_v7  ;;  %v17797_v30 = vld [vmem:[%s19371_s23 + $0x7ac] ss:$16 sps:$4 sm:$0xff]   ;;  %v17795_v7 = vld [vmem:[%s19371_s23 + $0x7a8] ss:$16 sps:$4 sm:$0xff]  }
 0x46e   : > { %12440 = vmatprep.subr.bf16.mxu1 %v17764_v16  ;;  %v17800_v2 = vld [vmem:[%s19371_s23 + $0x9ac] ss:$16 sps:$4 sm:$0xff]   ;;  %v17798_v16 = vld [vmem:[%s19371_s23 + $0x9a8] ss:$16 sps:$4 sm:$0xff]  }
 0x470   : > { %12400 = vmatpush1.bf16.msra.mxu0 %v17759_v50  ;;  %v17803_v50 = vld [vmem:[%s19371_s23 + $0x78c] ss:$16 sps:$4 sm:$0xff]  }
 0x471   : > { %12441 = vmatpush1.bf16.msra.mxu1 %v17762_v8  ;;  %12401 = vmatprep.subr.bf16.mxu0 %v17767_v62  ;;  %v17806_v8 = vld [vmem:[%s19371_s23 + $0x98c] ss:$16 sps:$4 sm:$0xff]   ;;  %v17801_v62 = vld [vmem:[%s19371_s23 + $0x788] ss:$16 sps:$4 sm:$0xff]  }
 0x472   : > { %12442 = vmatprep.subr.bf16.mxu1 %v17770_v48  ;;  %v17804_v48 = vld [vmem:[%s19371_s23 + $0x988] ss:$16 sps:$4 sm:$0xff]  }
 0x474   : > { %12402 = vmatpush1.bf16.msra.mxu0 %v17765_v36  ;;  %v17809_v36 = vld [vmem:[%s19371_s23 + $0x76c] ss:$16 sps:$4 sm:$0xff]  }
 0x475   : > { %12443 = vmatpush1.bf16.msra.mxu1 %v17768_v12  ;;  %12403 = vmatprep.subr.bf16.mxu0 %v17773_v53  ;;  %v17812_v12 = vld [vmem:[%s19371_s23 + $0x96c] ss:$16 sps:$4 sm:$0xff]   ;;  %v17807_v53 = vld [vmem:[%s19371_s23 + $0x768] ss:$16 sps:$4 sm:$0xff]  }
 0x476   : > { %12444 = vmatprep.subr.bf16.mxu1 %v17776_v6  ;;  %v17810_v6 = vld [vmem:[%s19371_s23 + $0x968] ss:$16 sps:$4 sm:$0xff]  }
 0x478   : > { %12404 = vmatpush1.bf16.msra.mxu0 %v17771_v14  ;;  %v17815_v14 = vld [vmem:[%s19371_s23 + $0x74c] ss:$16 sps:$4 sm:$0xff]  }
 0x479   : > { %12445 = vmatpush1.bf16.msra.mxu1 %v17774_v11  ;;  %12405 = vmatprep.subr.bf16.mxu0 %v17779_v38  ;;  %v17818_v11 = vld [vmem:[%s19371_s23 + $0x94c] ss:$16 sps:$4 sm:$0xff]   ;;  %v17813_v38 = vld [vmem:[%s19371_s23 + $0x748] ss:$16 sps:$4 sm:$0xff]  }
 0x47a   : > { %12446 = vmatprep.subr.bf16.mxu1 %v17782_v37  ;;  %v17816_v37 = vld [vmem:[%s19371_s23 + $0x948] ss:$16 sps:$4 sm:$0xff]  }
 0x47c   : > { %12406 = vmatpush1.bf16.msra.mxu0 %v17777_v44  ;;  %v17821_v44 = vld [vmem:[%s19371_s23 + $0x72c] ss:$16 sps:$4 sm:$0xff]  }
 0x47d   : > { %12447 = vmatpush1.bf16.msra.mxu1 %v17780_v19  ;;  %12407 = vmatprep.subr.bf16.mxu0 %v17785_v27  ;;  %v17824_v19 = vld [vmem:[%s19371_s23 + $0x92c] ss:$16 sps:$4 sm:$0xff]   ;;  %v17819_v27 = vld [vmem:[%s19371_s23 + $0x728] ss:$16 sps:$4 sm:$0xff]  }
 0x47e   : > { %12448 = vmatprep.subr.bf16.mxu1 %v17788_v33  ;;  %v17822_v33 = vld [vmem:[%s19371_s23 + $0x928] ss:$16 sps:$4 sm:$0xff]  }
 0x480   : > { %12408 = vmatpush2.bf16.msra.mxu0 %v17783_v47  ;;  %v17827_v47 = vld [vmem:[%s19371_s23 + $0x70c] ss:$16 sps:$4 sm:$0xff]  }
 0x481   : > { %12449 = vmatpush2.bf16.msra.mxu1 %v17786_v35  ;;  %12409 = vmatprep.subr.bf16.mxu0 %v17791_v51  ;;  %v17830_v35 = vld [vmem:[%s19371_s23 + $0x90c] ss:$16 sps:$4 sm:$0xff]   ;;  %v17825_v51 = vld [vmem:[%s19371_s23 + $0x708] ss:$16 sps:$4 sm:$0xff]  }
 0x482   : > { %12450 = vmatprep.subr.bf16.mxu1 %v17794_v22  ;;  %v17828_v22 = vld [vmem:[%s19371_s23 + $0x908] ss:$16 sps:$4 sm:$0xff]  }
 0x484   : > { %12410 = vmatpush2.bf16.msra.mxu0 %v17789_v24  ;;  %v17833_v24 = vld [vmem:[%s19371_s23 + $0xaec] ss:$16 sps:$4 sm:$0xff]  }
 0x485   : > { %12451 = vmatpush2.bf16.msra.mxu1 %v17792_v42  ;;  %12411 = vmatprep.subr.bf16.mxu0 %v17797_v30  ;;  %v17836_v42 = vld [vmem:[%s19371_s23 + $0xcec] ss:$16 sps:$4 sm:$0xff]   ;;  %v17831_v30 = vld [vmem:[%s19371_s23 + $0xae8] ss:$16 sps:$4 sm:$0xff]  }
 0x486   : > { %12452 = vmatprep.subr.bf16.mxu1 %v17800_v2  ;;  %v17834_v2 = vld [vmem:[%s19371_s23 + $0xce8] ss:$16 sps:$4 sm:$0xff]  }
 0x488   : > { %12412 = vmatpush2.bf16.msra.mxu0 %v17795_v7  ;;  %v17839_v7 = vld [vmem:[%s19371_s23 + $0xacc] ss:$16 sps:$4 sm:$0xff]  }
 0x489   : > { %12453 = vmatpush2.bf16.msra.mxu1 %v17798_v16  ;;  %12413 = vmatprep.subr.bf16.mxu0 %v17803_v50  ;;  %v17842_v16 = vld [vmem:[%s19371_s23 + $0xccc] ss:$16 sps:$4 sm:$0xff]  }
 0x48a   : > { %12454 = vmatprep.subr.bf16.mxu1 %v17806_v8 }
 0x48c   : > { %12414 = vmatpush2.bf16.msra.mxu0 %v17801_v62 }
 0x48d   : > { %12455 = vmatpush2.bf16.msra.mxu1 %v17804_v48  ;;  %12415 = vmatprep.subr.bf16.mxu0 %v17809_v36  ;;  %v17837_v48 = vld [vmem:[%s19371_s23 + $0xac8] ss:$16 sps:$4 sm:$0xff]  }
 0x48e   : > { %12456 = vmatprep.subr.bf16.mxu1 %v17812_v12  ;;  %v17840_v36 = vld [vmem:[%s19371_s23 + $0xcc8] ss:$16 sps:$4 sm:$0xff]  }
 0x490   : > { %12416 = vmatpush2.bf16.msra.mxu0 %v17807_v53 }
 0x491   : > { %12457 = vmatpush2.bf16.msra.mxu1 %v17810_v6  ;;  %12417 = vmatprep.subr.bf16.mxu0 %v17815_v14  ;;  %v17845_v6 = vld [vmem:[%s19371_s23 + $0xaac] ss:$16 sps:$4 sm:$0xff]  }
 0x492   : > { %12458 = vmatprep.subr.bf16.mxu1 %v17818_v11  ;;  %v17848_v14 = vld [vmem:[%s19371_s23 + $0xcac] ss:$16 sps:$4 sm:$0xff]  }
 0x494   : > { %12418 = vmatpush2.bf16.msra.mxu0 %v17813_v38 }
 0x495   : > { %12459 = vmatpush2.bf16.msra.mxu1 %v17816_v37  ;;  %12419 = vmatprep.subr.bf16.mxu0 %v17821_v44  ;;  %v17843_v37 = vld [vmem:[%s19371_s23 + $0xaa8] ss:$16 sps:$4 sm:$0xff]  }
 0x496   : > { %12460 = vmatprep.subr.bf16.mxu1 %v17824_v19  ;;  %v17846_v44 = vld [vmem:[%s19371_s23 + $0xca8] ss:$16 sps:$4 sm:$0xff]  }
 0x498   : > { %12420 = vmatpush2.bf16.msra.mxu0 %v17819_v27 }
 0x499   : > { %12461 = vmatpush2.bf16.msra.mxu1 %v17822_v33  ;;  %12421 = vmatprep.subr.bf16.mxu0 %v17827_v47  ;;  %v17852_v33 = vld [vmem:[%s19371_s23 + $0xc88] ss:$16 sps:$4 sm:$0xff]   ;;  %v17857_v47 = vld [vmem:[%s19371_s23 + $0xa6c] ss:$16 sps:$4 sm:$0xff]  }
 0x49a   : > { %12462 = vmatprep.subr.bf16.mxu1 %v17830_v35  ;;  %v17860_v35 = vld [vmem:[%s19371_s23 + $0xc6c] ss:$16 sps:$4 sm:$0xff]  }
 0x49c   : > { %12422 = vmatpush2.bf16.msra.mxu0 %v17825_v51  ;;  %v17855_v51 = vld [vmem:[%s19371_s23 + $0xa68] ss:$16 sps:$4 sm:$0xff]  }
 0x49d   : > { %12463 = vmatpush2.bf16.msra.mxu1 %v17828_v22  ;;  %12473 = vmatprep.subr.bf16.mxu0 %v17833_v24  ;;  %v17858_v22 = vld [vmem:[%s19371_s23 + $0xc68] ss:$16 sps:$4 sm:$0xff]   ;;  %v17863_v24 = vld [vmem:[%s19371_s23 + $0xa4c] ss:$16 sps:$4 sm:$0xff]  }
 0x49e   : > { %12514 = vmatprep.subr.bf16.mxu1 %v17836_v42  ;;  %v17866_v42 = vld [vmem:[%s19371_s23 + $0xc4c] ss:$16 sps:$4 sm:$0xff]  }
 0x49f   : > { %v12179_v50 = vpop.f32.mrf.mxu0  ;;  %12424 = vmatmul.mubr.bf16.vlgmr.msra.gmra.mxu0 %v19566_v31 }
 0x4a0   : > { %v12220_v8 = vpop.f32.mrf.mxu1  ;;  %12465 = vmatmul.mubr.bf16.vlgmr.msra.gmra.mxu1 %v19657_v49  ;;  %v12180_v62 = vadd.f32 %v12179_v50, %v20795_v1  ;;  %12474 = vmatpush1.bf16.msra.mxu0 %v17831_v30  ;;  %v17861_v30 = vld [vmem:[%s19371_s23 + $0xa48] ss:$16 sps:$4 sm:$0xff]  }
 0x4a1   : > { %12515 = vmatpush1.bf16.msra.mxu1 %v17834_v2  ;;  %v12181_v12 = vpop.f32.mrf.mxu0  ;;  %12475 = vmatprep.subr.bf16.mxu0 %v17839_v7  ;;  %v17864_v2 = vld [vmem:[%s19371_s23 + $0xc48] ss:$16 sps:$4 sm:$0xff]   ;;  %v17869_v7 = vld [vmem:[%s19371_s23 + $0xa2c] ss:$16 sps:$4 sm:$0xff]  }
 0x4a2   : > { %v12222_v53 = vpop.f32.mrf.mxu1  ;;  %12516 = vmatprep.subr.bf16.mxu1 %v17842_v16  ;;  %v20869_v11 = vadd.f32 %v12220_v8, %v12180_v62  ;;  %v12182_v31 = vadd.f32 %v12181_v12, %v20800_v18  ;;  %12505 = vmatprep.mubr.bf16.mxu0 %v19593_v43  ;;  %v17851_v43 = vld [vmem:[%s19371_s23 + $0xa8c] ss:$16 sps:$4 sm:$0xff]   ;;  %v17849_v18 = vld [vmem:[%s19371_s23 + $0xa88] ss:$16 sps:$4 sm:$0xff]  }
 0x4a3   : > { %12546 = vmatprep.mubr.bf16.mxu1 %v19664_v55  ;;  %v12183_v49 = vpop.f32.mrf.mxu0  ;;  %v17854_v55 = vld [vmem:[%s19371_s23 + $0xc8c] ss:$16 sps:$4 sm:$0xff]   ;;  %v17867_v50 = vld [vmem:[%s19371_s23 + $0xa28] ss:$16 sps:$4 sm:$0xff]  }
 0x4a4   : > { %v12224_v1 = vpop.f32.mrf.mxu1  ;;  %v20874_v38 = vadd.f32 %v12222_v53, %v12182_v31  ;;  %12476 = vmatpush1.bf16.msra.mxu0 %v17837_v48  ;;  %v17872_v16 = vld [vmem:[%s19371_s23 + $0xc2c] ss:$16 sps:$4 sm:$0xff]   ;;  %v17870_v8 = vld [vmem:[%s19371_s23 + $0xc28] ss:$16 sps:$4 sm:$0xff]  }
 0x4a5   : > { %12517 = vmatpush1.bf16.msra.mxu1 %v17840_v36  ;;  %v12184_v19 = vpop.f32.mrf.mxu0  ;;  %12477 = vmatprep.subr.bf16.mxu0 %v17845_v6  ;;  %v17875_v62 = vld [vmem:[%s19371_s23 + $0xa0c] ss:$16 sps:$4 sm:$0xff]   ;;  %v17873_v36 = vld [vmem:[%s19371_s23 + $0xa08] ss:$16 sps:$4 sm:$0xff]  }
 0x4a6   : > { %v12225_v27 = vpop.f32.mrf.mxu1  ;;  %12518 = vmatprep.subr.bf16.mxu1 %v17848_v14  ;;  %v17878_v48 = vld [vmem:[%s19371_s23 + $0xc0c] ss:$16 sps:$4 sm:$0xff]   ;;  %v17876_v12 = vld [vmem:[%s19371_s23 + $0xc08] ss:$16 sps:$4 sm:$0xff]  }
 0x4a7   : > { %v17881_v53 = vld [vmem:[%s19371_s23 + $0xbec] ss:$16 sps:$4 sm:$0xff]   ;;  %v17879_v14 = vld [vmem:[%s19371_s23 + $0xbe8] ss:$16 sps:$4 sm:$0xff]  }
 0x4a8   : > { %12478 = vmatpush1.bf16.msra.mxu0 %v17843_v37  ;;  %v17884_v6 = vld [vmem:[%s19371_s23 + $0xdec] ss:$16 sps:$4 sm:$0xff]   ;;  %v17882_v31 = vld [vmem:[%s19371_s23 + $0xde8] ss:$16 sps:$4 sm:$0xff]  }
 0x4a9   : > { %12519 = vmatpush1.bf16.msra.mxu1 %v17846_v44  ;;  %12479 = vmatprep.subr.bf16.mxu0 %v17851_v43  ;;  %v17887_v49 = vld [vmem:[%s19371_s23 + $0xbcc] ss:$16 sps:$4 sm:$0xff]   ;;  %v17885_v37 = vld [vmem:[%s19371_s23 + $0xbc8] ss:$16 sps:$4 sm:$0xff]  }
 0x4aa   : > { %12520 = vmatprep.subr.bf16.mxu1 %v17854_v55  ;;  %v17890_v1 = vld [vmem:[%s19371_s23 + $0xdcc] ss:$16 sps:$4 sm:$0xff]   ;;  %v17888_v44 = vld [vmem:[%s19371_s23 + $0xdc8] ss:$16 sps:$4 sm:$0xff]  }
 0x4ab   : > { %v17893_v19 = vld [vmem:[%s19371_s23 + $0xbac] ss:$16 sps:$4 sm:$0xff]   ;;  %v17891_v43 = vld [vmem:[%s19371_s23 + $0xba8] ss:$16 sps:$4 sm:$0xff]  }
 0x4ac   : > { %12480 = vmatpush1.bf16.msra.mxu0 %v17849_v18  ;;  %v17896_v27 = vld [vmem:[%s19371_s23 + $0xdac] ss:$16 sps:$4 sm:$0xff]   ;;  %v17894_v55 = vld [vmem:[%s19371_s23 + $0xda8] ss:$16 sps:$4 sm:$0xff]  }
 0x4ad   : > { %12521 = vmatpush1.bf16.msra.mxu1 %v17852_v33  ;;  %12481 = vmatprep.subr.bf16.mxu0 %v17857_v47  ;;  %v17899_v18 = vld [vmem:[%s19371_s23 + $0xb8c] ss:$16 sps:$4 sm:$0xff]   ;;  %v17897_v47 = vld [vmem:[%s19371_s23 + $0xb88] ss:$16 sps:$4 sm:$0xff]  }
 0x4ae   : > { %12522 = vmatprep.subr.bf16.mxu1 %v17860_v35  ;;  %v17902_v33 = vld [vmem:[%s19371_s23 + $0xd8c] ss:$16 sps:$4 sm:$0xff]   ;;  %v17900_v35 = vld [vmem:[%s19371_s23 + $0xd88] ss:$16 sps:$4 sm:$0xff]  }
 0x4b0   : > { %12482 = vmatpush1.bf16.msra.mxu0 %v17855_v51  ;;  %v17905_v51 = vld [vmem:[%s19371_s23 + $0xb6c] ss:$16 sps:$4 sm:$0xff]  }
 0x4b1   : > { %12523 = vmatpush1.bf16.msra.mxu1 %v17858_v22  ;;  %12483 = vmatprep.subr.bf16.mxu0 %v17863_v24  ;;  %v17908_v22 = vld [vmem:[%s19371_s23 + $0xd6c] ss:$16 sps:$4 sm:$0xff]   ;;  %v17903_v24 = vld [vmem:[%s19371_s23 + $0xb68] ss:$16 sps:$4 sm:$0xff]  }
 0x4b2   : > { %12524 = vmatprep.subr.bf16.mxu1 %v17866_v42  ;;  %v17906_v42 = vld [vmem:[%s19371_s23 + $0xd68] ss:$16 sps:$4 sm:$0xff]  }
 0x4b4   : > { %12484 = vmatpush1.bf16.msra.mxu0 %v17861_v30  ;;  %v17911_v30 = vld [vmem:[%s19371_s23 + $0xb4c] ss:$16 sps:$4 sm:$0xff]  }
 0x4b5   : > { %12525 = vmatpush1.bf16.msra.mxu1 %v17864_v2  ;;  %12485 = vmatprep.subr.bf16.mxu0 %v17869_v7  ;;  %v17914_v2 = vld [vmem:[%s19371_s23 + $0xd4c] ss:$16 sps:$4 sm:$0xff]   ;;  %v17909_v7 = vld [vmem:[%s19371_s23 + $0xb48] ss:$16 sps:$4 sm:$0xff]  }
 0x4b6   : > { %12526 = vmatprep.subr.bf16.mxu1 %v17872_v16  ;;  %v17912_v16 = vld [vmem:[%s19371_s23 + $0xd48] ss:$16 sps:$4 sm:$0xff]  }
 0x4b8   : > { %12486 = vmatpush1.bf16.msra.mxu0 %v17867_v50  ;;  %v17917_v50 = vld [vmem:[%s19371_s23 + $0xb2c] ss:$16 sps:$4 sm:$0xff]  }
 0x4b9   : > { %12527 = vmatpush1.bf16.msra.mxu1 %v17870_v8  ;;  %12487 = vmatprep.subr.bf16.mxu0 %v17875_v62  ;;  %v17920_v8 = vld [vmem:[%s19371_s23 + $0xd2c] ss:$16 sps:$4 sm:$0xff]   ;;  %v17915_v62 = vld [vmem:[%s19371_s23 + $0xb28] ss:$16 sps:$4 sm:$0xff]  }
 0x4ba   : > { %12528 = vmatprep.subr.bf16.mxu1 %v17878_v48  ;;  %v17918_v48 = vld [vmem:[%s19371_s23 + $0xd28] ss:$16 sps:$4 sm:$0xff]  }
 0x4bc   : > { %12488 = vmatpush1.bf16.msra.mxu0 %v17873_v36  ;;  %v17923_v36 = vld [vmem:[%s19371_s23 + $0xb0c] ss:$16 sps:$4 sm:$0xff]  }
 0x4bd   : > { %12529 = vmatpush1.bf16.msra.mxu1 %v17876_v12  ;;  %12489 = vmatprep.subr.bf16.mxu0 %v17881_v53  ;;  %v17926_v12 = vld [vmem:[%s19371_s23 + $0xd0c] ss:$16 sps:$4 sm:$0xff]   ;;  %v17921_v53 = vld [vmem:[%s19371_s23 + $0xb08] ss:$16 sps:$4 sm:$0xff]  }
 0x4be   : > { %12530 = vmatprep.subr.bf16.mxu1 %v17884_v6  ;;  %v17924_v6 = vld [vmem:[%s19371_s23 + $0xd08] ss:$16 sps:$4 sm:$0xff]  }
 0x4c0   : > { %12490 = vmatpush2.bf16.msra.mxu0 %v17879_v14  ;;  %v17929_v14 = vld [vmem:[%s19371_s23 + $0xeec] ss:$16 sps:$4 sm:$0xff]  }
 0x4c1   : > { %12531 = vmatpush2.bf16.msra.mxu1 %v17882_v31  ;;  %12491 = vmatprep.subr.bf16.mxu0 %v17887_v49  ;;  %v17932_v31 = vld [vmem:[%s19371_s23 + $0x10ec] ss:$16 sps:$4 sm:$0xff]   ;;  %v17927_v49 = vld [vmem:[%s19371_s23 + $0xee8] ss:$16 sps:$4 sm:$0xff]  }
 0x4c2   : > { %12532 = vmatprep.subr.bf16.mxu1 %v17890_v1  ;;  %v17930_v1 = vld [vmem:[%s19371_s23 + $0x10e8] ss:$16 sps:$4 sm:$0xff]  }
 0x4c4   : > { %12492 = vmatpush2.bf16.msra.mxu0 %v17885_v37  ;;  %v17935_v37 = vld [vmem:[%s19371_s23 + $0xecc] ss:$16 sps:$4 sm:$0xff]  }
 0x4c5   : > { %12533 = vmatpush2.bf16.msra.mxu1 %v17888_v44  ;;  %12493 = vmatprep.subr.bf16.mxu0 %v17893_v19  ;;  %v17938_v44 = vld [vmem:[%s19371_s23 + $0x10cc] ss:$16 sps:$4 sm:$0xff]  }
 0x4c6   : > { %12534 = vmatprep.subr.bf16.mxu1 %v17896_v27 }
 0x4c8   : > { %12494 = vmatpush2.bf16.msra.mxu0 %v17891_v43 }
 0x4c9   : > { %12535 = vmatpush2.bf16.msra.mxu1 %v17894_v55  ;;  %12495 = vmatprep.subr.bf16.mxu0 %v17899_v18  ;;  %v17933_v55 = vld [vmem:[%s19371_s23 + $0xec8] ss:$16 sps:$4 sm:$0xff]  }
 0x4ca   : > { %12536 = vmatprep.subr.bf16.mxu1 %v17902_v33  ;;  %v17936_v18 = vld [vmem:[%s19371_s23 + $0x10c8] ss:$16 sps:$4 sm:$0xff]  }
 0x4cc   : > { %12496 = vmatpush2.bf16.msra.mxu0 %v17897_v47 }
 0x4cd   : > { %12537 = vmatpush2.bf16.msra.mxu1 %v17900_v35  ;;  %12497 = vmatprep.subr.bf16.mxu0 %v17905_v51  ;;  %v17941_v35 = vld [vmem:[%s19371_s23 + $0xeac] ss:$16 sps:$4 sm:$0xff]  }
 0x4ce   : > { %12538 = vmatprep.subr.bf16.mxu1 %v17908_v22  ;;  %v17944_v51 = vld [vmem:[%s19371_s23 + $0x10ac] ss:$16 sps:$4 sm:$0xff]  }
 0x4d0   : > { %12498 = vmatpush2.bf16.msra.mxu0 %v17903_v24  ;;  %v17939_v24 = vld [vmem:[%s19371_s23 + $0xea8] ss:$16 sps:$4 sm:$0xff]  }
 0x4d1   : > { %12539 = vmatpush2.bf16.msra.mxu1 %v17906_v42  ;;  %12499 = vmatprep.subr.bf16.mxu0 %v17911_v30  ;;  %v17942_v42 = vld [vmem:[%s19371_s23 + $0x10a8] ss:$16 sps:$4 sm:$0xff]  }
 0x4d2   : > { %12540 = vmatprep.subr.bf16.mxu1 %v17914_v2  ;;  %v17945_v2 = vld [vmem:[%s19371_s23 + $0xe88] ss:$16 sps:$4 sm:$0xff]  }
 0x4d4   : > { %12500 = vmatpush2.bf16.msra.mxu0 %v17909_v7  ;;  %v17948_v7 = vld [vmem:[%s19371_s23 + $0x1088] ss:$16 sps:$4 sm:$0xff]  }
 0x4d5   : > { %12541 = vmatpush2.bf16.msra.mxu1 %v17912_v16  ;;  %12501 = vmatprep.subr.bf16.mxu0 %v17917_v50  ;;  %v17953_v16 = vld [vmem:[%s19371_s23 + $0xe6c] ss:$16 sps:$4 sm:$0xff]  }
 0x4d6   : > { %12542 = vmatprep.subr.bf16.mxu1 %v17920_v8  ;;  %v17956_v50 = vld [vmem:[%s19371_s23 + $0x106c] ss:$16 sps:$4 sm:$0xff]   ;;  %v17951_v8 = vld [vmem:[%s19371_s23 + $0xe68] ss:$16 sps:$4 sm:$0xff]  }
 0x4d8   : > { %12502 = vmatpush2.bf16.msra.mxu0 %v17915_v62  ;;  %v17954_v62 = vld [vmem:[%s19371_s23 + $0x1068] ss:$16 sps:$4 sm:$0xff]  }
 0x4d9   : > { %12543 = vmatpush2.bf16.msra.mxu1 %v17918_v48  ;;  %12503 = vmatprep.subr.bf16.mxu0 %v17923_v36  ;;  %v17959_v48 = vld [vmem:[%s19371_s23 + $0xe4c] ss:$16 sps:$4 sm:$0xff]  }
 0x4da   : > { %12544 = vmatprep.subr.bf16.mxu1 %v17926_v12  ;;  %v17962_v36 = vld [vmem:[%s19371_s23 + $0x104c] ss:$16 sps:$4 sm:$0xff]   ;;  %v17957_v12 = vld [vmem:[%s19371_s23 + $0xe48] ss:$16 sps:$4 sm:$0xff]  }
 0x4dc   : > { %12504 = vmatpush2.bf16.msra.mxu0 %v17921_v53  ;;  %v17960_v53 = vld [vmem:[%s19371_s23 + $0x1048] ss:$16 sps:$4 sm:$0xff]  }
 0x4dd   : > { %12545 = vmatpush2.bf16.msra.mxu1 %v17924_v6  ;;  %12555 = vmatprep.subr.bf16.mxu0 %v17929_v14  ;;  %v17965_v6 = vld [vmem:[%s19371_s23 + $0xe2c] ss:$16 sps:$4 sm:$0xff]  }
 0x4de   : > { %12596 = vmatprep.subr.bf16.mxu1 %v17932_v31  ;;  %v17968_v14 = vld [vmem:[%s19371_s23 + $0x102c] ss:$16 sps:$4 sm:$0xff]   ;;  %v17963_v31 = vld [vmem:[%s19371_s23 + $0xe28] ss:$16 sps:$4 sm:$0xff]  }
 0x4df   : > { %v12261_v19 = vpop.f32.mrf.mxu0  ;;  %12506 = vmatmul.mubr.bf16.vlgmr.msra.gmra.mxu0 %v19668_v56 }
 0x4e0   : > { %v20936_v27 = vpop.f32.mrf.mxu1  ;;  %12547 = vmatmul.mubr.bf16.vlgmr.msra.gmra.mxu1 %v19750_v13  ;;  %v20941_v43 = vadd.f32 %v12261_v19, %v20869_v11  ;;  %12556 = vmatpush1.bf16.msra.mxu0 %v17927_v49  ;;  %v17966_v49 = vld [vmem:[%s19371_s23 + $0x1028] ss:$16 sps:$4 sm:$0xff]  }
 0x4e1   : > { %12597 = vmatpush1.bf16.msra.mxu1 %v17930_v1  ;;  %v12263_v33 = vpop.f32.mrf.mxu0  ;;  %12557 = vmatprep.subr.bf16.mxu0 %v17935_v37  ;;  %v17971_v1 = vld [vmem:[%s19371_s23 + $0xe0c] ss:$16 sps:$4 sm:$0xff]   ;;  %v17972_v19 = vld [vmem:[%s19371_s23 + $0x1008] ss:$16 sps:$4 sm:$0xff]  }
 0x4e2   : > { %v20945_v47 = vpop.f32.mrf.mxu1  ;;  %12598 = vmatprep.subr.bf16.mxu1 %v17938_v44  ;;  %v20950_v56 = vadd.f32 %v12263_v33, %v20874_v38  ;;  %12587 = vmatprep.mubr.bf16.mxu0 %v19676_v60  ;;  %v17947_v60 = vld [vmem:[%s19371_s23 + $0xe8c] ss:$16 sps:$4 sm:$0xff]   ;;  %v17969_v44 = vld [vmem:[%s19371_s23 + $0xe08] ss:$16 sps:$4 sm:$0xff]  }
 0x4e3   : > { %12628 = vmatprep.mubr.bf16.mxu1 %v19756_v20  ;;  %v12265_v13 = vpop.f32.mrf.mxu0  ;;  %v17950_v20 = vld [vmem:[%s19371_s23 + $0x108c] ss:$16 sps:$4 sm:$0xff]   ;;  %v17975_v33 = vld [vmem:[%s19371_s23 + $0xfe8] ss:$16 sps:$4 sm:$0xff]  }
 0x4e4   : > { %v12306_v11 = vpop.f32.mrf.mxu1  ;;  %v13379_v22 = vcombine.low %v20941_v43, %v20950_v56  ;;  %12558 = vmatpush1.bf16.msra.mxu0 %v17933_v55  ;;  %v17974_v37 = vld [vmem:[%s19371_s23 + $0x100c] ss:$16 sps:$4 sm:$0xff]  }
 0x4e5   : > { %12599 = vmatpush1.bf16.msra.mxu1 %v17936_v18  ;;  %v12266_v30 = vpop.f32.mrf.mxu0  ;;  %12559 = vmatprep.subr.bf16.mxu0 %v17941_v35  ;;  %v17977_v55 = vld [vmem:[%s19371_s23 + $0xfec] ss:$16 sps:$4 sm:$0xff]   ;;  %v17978_v35 = vld [vmem:[%s19371_s23 + $0x11e8] ss:$16 sps:$4 sm:$0xff]  }
 0x4e6   : > { %v12307_v38 = vpop.f32.mrf.mxu1  ;;  %12600 = vmatprep.subr.bf16.mxu1 %v17944_v51  ;;  %v17980_v18 = vld [vmem:[%s19371_s23 + $0x11ec] ss:$16 sps:$4 sm:$0xff]   ;;  %v17981_v11 = vld [vmem:[%s19371_s23 + $0xfc8] ss:$16 sps:$4 sm:$0xff]  }
 0x4e7   : > { %v17983_v51 = vld [vmem:[%s19371_s23 + $0xfcc] ss:$16 sps:$4 sm:$0xff]   ;;  %v17987_v38 = vld [vmem:[%s19371_s23 + $0xfa8] ss:$16 sps:$4 sm:$0xff]  }
 0x4e8   : > { %12560 = vmatpush1.bf16.msra.mxu0 %v17939_v24  ;;  %v17986_v13 = vld [vmem:[%s19371_s23 + $0x11cc] ss:$16 sps:$4 sm:$0xff]   ;;  %v17984_v24 = vld [vmem:[%s19371_s23 + $0x11c8] ss:$16 sps:$4 sm:$0xff]  }
 0x4e9   : > { %12601 = vmatpush1.bf16.msra.mxu1 %v17942_v42  ;;  %12561 = vmatprep.subr.bf16.mxu0 %v17947_v60  ;;  %v17989_v42 = vld [vmem:[%s19371_s23 + $0xfac] ss:$16 sps:$4 sm:$0xff]   ;;  %v17990_v60 = vld [vmem:[%s19371_s23 + $0x11a8] ss:$16 sps:$4 sm:$0xff]  }
 0x4ea   : > { %12602 = vmatprep.subr.bf16.mxu1 %v17950_v20  ;;  %v17992_v30 = vld [vmem:[%s19371_s23 + $0x11ac] ss:$16 sps:$4 sm:$0xff]  }
 0x4eb   : > { %v17995_v20 = vld [vmem:[%s19371_s23 + $0xf8c] ss:$16 sps:$4 sm:$0xff]  }
 0x4ec   : > { %12562 = vmatpush1.bf16.msra.mxu0 %v17945_v2  ;;  %v17998_v2 = vld [vmem:[%s19371_s23 + $0x118c] ss:$16 sps:$4 sm:$0xff]  }
 0x4ed   : > { %12603 = vmatpush1.bf16.msra.mxu1 %v17948_v7  ;;  %12563 = vmatprep.subr.bf16.mxu0 %v17953_v16  ;;  %v17993_v7 = vld [vmem:[%s19371_s23 + $0xf88] ss:$16 sps:$4 sm:$0xff]  }
 0x4ee   : > { %12604 = vmatprep.subr.bf16.mxu1 %v17956_v50  ;;  %v17996_v16 = vld [vmem:[%s19371_s23 + $0x1188] ss:$16 sps:$4 sm:$0xff]   ;;  %v18001_v50 = vld [vmem:[%s19371_s23 + $0xf6c] ss:$16 sps:$4 sm:$0xff]  }
 0x4f0   : > { %12564 = vmatpush1.bf16.msra.mxu0 %v17951_v8  ;;  %v18004_v8 = vld [vmem:[%s19371_s23 + $0x116c] ss:$16 sps:$4 sm:$0xff]  }
 0x4f1   : > { %12605 = vmatpush1.bf16.msra.mxu1 %v17954_v62  ;;  %12565 = vmatprep.subr.bf16.mxu0 %v17959_v48  ;;  %v17999_v62 = vld [vmem:[%s19371_s23 + $0xf68] ss:$16 sps:$4 sm:$0xff]  }
 0x4f2   : > { %12606 = vmatprep.subr.bf16.mxu1 %v17962_v36  ;;  %v18002_v48 = vld [vmem:[%s19371_s23 + $0x1168] ss:$16 sps:$4 sm:$0xff]   ;;  %v18007_v36 = vld [vmem:[%s19371_s23 + $0xf4c] ss:$16 sps:$4 sm:$0xff]  }
 0x4f4   : > { %12566 = vmatpush1.bf16.msra.mxu0 %v17957_v12  ;;  %v18010_v12 = vld [vmem:[%s19371_s23 + $0x114c] ss:$16 sps:$4 sm:$0xff]  }
 0x4f5   : > { %12607 = vmatpush1.bf16.msra.mxu1 %v17960_v53  ;;  %12567 = vmatprep.subr.bf16.mxu0 %v17965_v6  ;;  %v18005_v53 = vld [vmem:[%s19371_s23 + $0xf48] ss:$16 sps:$4 sm:$0xff]  }
 0x4f6   : > { %12608 = vmatprep.subr.bf16.mxu1 %v17968_v14  ;;  %v18008_v6 = vld [vmem:[%s19371_s23 + $0x1148] ss:$16 sps:$4 sm:$0xff]   ;;  %v18013_v14 = vld [vmem:[%s19371_s23 + $0xf2c] ss:$16 sps:$4 sm:$0xff]  }
 0x4f8   : > { %12568 = vmatpush1.bf16.msra.mxu0 %v17963_v31  ;;  %v18016_v31 = vld [vmem:[%s19371_s23 + $0x112c] ss:$16 sps:$4 sm:$0xff]  }
 0x4f9   : > { %12609 = vmatpush1.bf16.msra.mxu1 %v17966_v49  ;;  %12569 = vmatprep.subr.bf16.mxu0 %v17971_v1  ;;  %v18011_v49 = vld [vmem:[%s19371_s23 + $0xf28] ss:$16 sps:$4 sm:$0xff]  }
 0x4fa   : > { %12610 = vmatprep.subr.bf16.mxu1 %v17974_v37  ;;  %v18014_v1 = vld [vmem:[%s19371_s23 + $0x1128] ss:$16 sps:$4 sm:$0xff]   ;;  %v18019_v37 = vld [vmem:[%s19371_s23 + $0xf0c] ss:$16 sps:$4 sm:$0xff]  }
 0x4fc   : > { %12570 = vmatpush1.bf16.msra.mxu0 %v17969_v44  ;;  %v18022_v44 = vld [vmem:[%s19371_s23 + $0x110c] ss:$16 sps:$4 sm:$0xff]  }
 0x4fd   : > { %12611 = vmatpush1.bf16.msra.mxu1 %v17972_v19  ;;  %12571 = vmatprep.subr.bf16.mxu0 %v17977_v55  ;;  %v18017_v19 = vld [vmem:[%s19371_s23 + $0xf08] ss:$16 sps:$4 sm:$0xff]  }
 0x4fe   : > { %12612 = vmatprep.subr.bf16.mxu1 %v17980_v18  ;;  %v18020_v55 = vld [vmem:[%s19371_s23 + $0x1108] ss:$16 sps:$4 sm:$0xff]   ;;  %v18025_v18 = vld [vmem:[%s19371_s23 + $0x12ec] ss:$16 sps:$4 sm:$0xff]  }
 0x500   : > { %12572 = vmatpush2.bf16.msra.mxu0 %v17975_v33  ;;  %v18028_v33 = vld [vmem:[%s19371_s23 + $0x14ec] ss:$16 sps:$4 sm:$0xff]  }
 0x501   : > { %12613 = vmatpush2.bf16.msra.mxu1 %v17978_v35  ;;  %12573 = vmatprep.subr.bf16.mxu0 %v17983_v51  ;;  %v18023_v35 = vld [vmem:[%s19371_s23 + $0x12e8] ss:$16 sps:$4 sm:$0xff]  }
 0x502   : > { %12614 = vmatprep.subr.bf16.mxu1 %v17986_v13  ;;  %v18026_v51 = vld [vmem:[%s19371_s23 + $0x14e8] ss:$16 sps:$4 sm:$0xff]   ;;  %v18031_v13 = vld [vmem:[%s19371_s23 + $0x12cc] ss:$16 sps:$4 sm:$0xff]  }
 0x504   : > { %12574 = vmatpush2.bf16.msra.mxu0 %v17981_v11  ;;  %v18034_v11 = vld [vmem:[%s19371_s23 + $0x14cc] ss:$16 sps:$4 sm:$0xff]  }
 0x505   : > { %12615 = vmatpush2.bf16.msra.mxu1 %v17984_v24  ;;  %12575 = vmatprep.subr.bf16.mxu0 %v17989_v42 }
 0x506   : > { %12616 = vmatprep.subr.bf16.mxu1 %v17992_v30 }
 0x508   : > { %12576 = vmatpush2.bf16.msra.mxu0 %v17987_v38  ;;  %v18029_v38 = vld [vmem:[%s19371_s23 + $0x12c8] ss:$16 sps:$4 sm:$0xff]  }
 0x509   : > { %12617 = vmatpush2.bf16.msra.mxu1 %v17990_v60  ;;  %12577 = vmatprep.subr.bf16.mxu0 %v17995_v20  ;;  %v18032_v60 = vld [vmem:[%s19371_s23 + $0x14c8] ss:$16 sps:$4 sm:$0xff]  }
 0x50a   : > { %12618 = vmatprep.subr.bf16.mxu1 %v17998_v2 }
 0x50c   : > { %12578 = vmatpush2.bf16.msra.mxu0 %v17993_v7  ;;  %v18037_v7 = vld [vmem:[%s19371_s23 + $0x12ac] ss:$16 sps:$4 sm:$0xff]  }
 0x50d   : > { %12619 = vmatpush2.bf16.msra.mxu1 %v17996_v16  ;;  %12579 = vmatprep.subr.bf16.mxu0 %v18001_v50  ;;  %v18040_v16 = vld [vmem:[%s19371_s23 + $0x14ac] ss:$16 sps:$4 sm:$0xff]  }
 0x50e   : > { %12620 = vmatprep.subr.bf16.mxu1 %v18004_v8 }
 0x510   : > { %12580 = vmatpush2.bf16.msra.mxu0 %v17999_v62  ;;  %v18035_v62 = vld [vmem:[%s19371_s23 + $0x12a8] ss:$16 sps:$4 sm:$0xff]  }
 0x511   : > { %12621 = vmatpush2.bf16.msra.mxu1 %v18002_v48  ;;  %12581 = vmatprep.subr.bf16.mxu0 %v18007_v36  ;;  %v18038_v48 = vld [vmem:[%s19371_s23 + $0x14a8] ss:$16 sps:$4 sm:$0xff]  }
 0x512   : > { %12622 = vmatprep.subr.bf16.mxu1 %v18010_v12 }
 0x514   : > { %12582 = vmatpush2.bf16.msra.mxu0 %v18005_v53  ;;  %v18044_v53 = vld [vmem:[%s19371_s23 + $0x1488] ss:$16 sps:$4 sm:$0xff]  }
 0x515   : > { %12623 = vmatpush2.bf16.msra.mxu1 %v18008_v6  ;;  %12583 = vmatprep.subr.bf16.mxu0 %v18013_v14  ;;  %v18049_v6 = vld [vmem:[%s19371_s23 + $0x126c] ss:$16 sps:$4 sm:$0xff]  }
 0x516   : > { %12624 = vmatprep.subr.bf16.mxu1 %v18016_v31  ;;  %v18052_v14 = vld [vmem:[%s19371_s23 + $0x146c] ss:$16 sps:$4 sm:$0xff]   ;;  %v18047_v31 = vld [vmem:[%s19371_s23 + $0x1268] ss:$16 sps:$4 sm:$0xff]  }
 0x518   : > { %12584 = vmatpush2.bf16.msra.mxu0 %v18011_v49  ;;  %v18050_v49 = vld [vmem:[%s19371_s23 + $0x1468] ss:$16 sps:$4 sm:$0xff]  }
 0x519   : > { %12625 = vmatpush2.bf16.msra.mxu1 %v18014_v1  ;;  %12585 = vmatprep.subr.bf16.mxu0 %v18019_v37  ;;  %v18055_v1 = vld [vmem:[%s19371_s23 + $0x124c] ss:$16 sps:$4 sm:$0xff]  }
 0x51a   : > { %12626 = vmatprep.subr.bf16.mxu1 %v18022_v44  ;;  %v18058_v37 = vld [vmem:[%s19371_s23 + $0x144c] ss:$16 sps:$4 sm:$0xff]   ;;  %v18053_v44 = vld [vmem:[%s19371_s23 + $0x1248] ss:$16 sps:$4 sm:$0xff]  }
 0x51c   : > { %12586 = vmatpush2.bf16.msra.mxu0 %v18017_v19  ;;  %v18056_v19 = vld [vmem:[%s19371_s23 + $0x1448] ss:$16 sps:$4 sm:$0xff]  }
 0x51d   : > { %12627 = vmatpush2.bf16.msra.mxu1 %v18020_v55  ;;  %12637 = vmatprep.subr.bf16.mxu0 %v18025_v18  ;;  %v18061_v55 = vld [vmem:[%s19371_s23 + $0x122c] ss:$16 sps:$4 sm:$0xff]  }
 0x51e   : > { %12678 = vmatprep.subr.bf16.mxu1 %v18028_v33  ;;  %v18064_v18 = vld [vmem:[%s19371_s23 + $0x142c] ss:$16 sps:$4 sm:$0xff]   ;;  %v18059_v33 = vld [vmem:[%s19371_s23 + $0x1228] ss:$16 sps:$4 sm:$0xff]  }
 0x51f   : > { %v12343_v24 = vpop.f32.mrf.mxu0  ;;  %12588 = vmatmul.mubr.bf16.vlgmr.msra.gmra.mxu0 %v19760_v21 }
 0x520   : > { %v12384_v42 = vpop.f32.mrf.mxu1  ;;  %12629 = vmatmul.mubr.bf16.vlgmr.msra.gmra.mxu1 %v19843_v4  ;;  %v12344_v30 = vadd.f32 %v12343_v24, %v20936_v27  ;;  %12638 = vmatpush1.bf16.msra.mxu0 %v18023_v35  ;;  %v18062_v35 = vld [vmem:[%s19371_s23 + $0x1428] ss:$16 sps:$4 sm:$0xff]  }
 0x521   : > { %12679 = vmatpush1.bf16.msra.mxu1 %v18026_v51  ;;  %v12345_v20 = vpop.f32.mrf.mxu0  ;;  %12639 = vmatprep.subr.bf16.mxu0 %v18031_v13  ;;  %v18067_v51 = vld [vmem:[%s19371_s23 + $0x120c] ss:$16 sps:$4 sm:$0xff]   ;;  %v18068_v24 = vld [vmem:[%s19371_s23 + $0x1408] ss:$16 sps:$4 sm:$0xff]  }
 0x522   : > { %v12386_v2 = vpop.f32.mrf.mxu1  ;;  %12680 = vmatprep.subr.bf16.mxu1 %v18034_v11  ;;  %v21023_v50 = vadd.f32 %v12384_v42, %v12344_v30  ;;  %v12346_v21 = vadd.f32 %v12345_v20, %v20945_v47  ;;  %12669 = vmatprep.mubr.bf16.mxu0 %v19768_v26  ;;  %v18043_v26 = vld [vmem:[%s19371_s23 + $0x128c] ss:$16 sps:$4 sm:$0xff]   ;;  %v18041_v47 = vld [vmem:[%s19371_s23 + $0x1288] ss:$16 sps:$4 sm:$0xff]  }
 0x523   : > { %12710 = vmatprep.mubr.bf16.mxu1 %v19852_v15  ;;  %v12347_v4 = vpop.f32.mrf.mxu0  ;;  %v18046_v15 = vld [vmem:[%s19371_s23 + $0x148c] ss:$16 sps:$4 sm:$0xff]   ;;  %v18065_v11 = vld [vmem:[%s19371_s23 + $0x1208] ss:$16 sps:$4 sm:$0xff]  }
 0x524   : > { %v12388_v27 = vpop.f32.mrf.mxu1  ;;  %v21028_v8 = vadd.f32 %v12386_v2, %v12346_v21  ;;  %12640 = vmatpush1.bf16.msra.mxu0 %v18029_v38  ;;  %v18070_v13 = vld [vmem:[%s19371_s23 + $0x140c] ss:$16 sps:$4 sm:$0xff]   ;;  %v18071_v38 = vld [vmem:[%s19371_s23 + $0x13e8] ss:$16 sps:$4 sm:$0xff]  }
 0x525   : > { %12681 = vmatpush1.bf16.msra.mxu1 %v18032_v60  ;;  %v12348_v36 = vpop.f32.mrf.mxu0  ;;  %12641 = vmatprep.subr.bf16.mxu0 %v18037_v7  ;;  %v18073_v42 = vld [vmem:[%s19371_s23 + $0x13ec] ss:$16 sps:$4 sm:$0xff]   ;;  %v18074_v60 = vld [vmem:[%s19371_s23 + $0x15e8] ss:$16 sps:$4 sm:$0xff]  }
 0x526   : > { %v12389_v12 = vpop.f32.mrf.mxu1  ;;  %12682 = vmatprep.subr.bf16.mxu1 %v18040_v16  ;;  %v18076_v30 = vld [vmem:[%s19371_s23 + $0x15ec] ss:$16 sps:$4 sm:$0xff]   ;;  %v18077_v7 = vld [vmem:[%s19371_s23 + $0x13c8] ss:$16 sps:$4 sm:$0xff]  }
 0x527   : > { %v18079_v20 = vld [vmem:[%s19371_s23 + $0x13cc] ss:$16 sps:$4 sm:$0xff]   ;;  %v18080_v16 = vld [vmem:[%s19371_s23 + $0x15c8] ss:$16 sps:$4 sm:$0xff]  }
 0x528   : > { %12642 = vmatpush1.bf16.msra.mxu0 %v18035_v62  ;;  %v18082_v2 = vld [vmem:[%s19371_s23 + $0x15cc] ss:$16 sps:$4 sm:$0xff]   ;;  %v18083_v27 = vld [vmem:[%s19371_s23 + $0x13a8] ss:$16 sps:$4 sm:$0xff]  }
 0x529   : > { %12683 = vmatpush1.bf16.msra.mxu1 %v18038_v48  ;;  %12643 = vmatprep.subr.bf16.mxu0 %v18043_v26  ;;  %v18085_v21 = vld [vmem:[%s19371_s23 + $0x13ac] ss:$16 sps:$4 sm:$0xff]   ;;  %v18086_v62 = vld [vmem:[%s19371_s23 + $0x15a8] ss:$16 sps:$4 sm:$0xff]  }
 0x52a   : > { %12684 = vmatprep.subr.bf16.mxu1 %v18046_v15  ;;  %v18088_v4 = vld [vmem:[%s19371_s23 + $0x15ac] ss:$16 sps:$4 sm:$0xff]   ;;  %v18089_v12 = vld [vmem:[%s19371_s23 + $0x1388] ss:$16 sps:$4 sm:$0xff]  }
 0x52b   : > { %v18091_v48 = vld [vmem:[%s19371_s23 + $0x138c] ss:$16 sps:$4 sm:$0xff]   ;;  %v18092_v26 = vld [vmem:[%s19371_s23 + $0x1588] ss:$16 sps:$4 sm:$0xff]  }
 0x52c   : > { %12644 = vmatpush1.bf16.msra.mxu0 %v18041_v47  ;;  %v18094_v36 = vld [vmem:[%s19371_s23 + $0x158c] ss:$16 sps:$4 sm:$0xff]  }
 0x52d   : > { %12685 = vmatpush1.bf16.msra.mxu1 %v18044_v53  ;;  %12645 = vmatprep.subr.bf16.mxu0 %v18049_v6  ;;  %v18097_v15 = vld [vmem:[%s19371_s23 + $0x136c] ss:$16 sps:$4 sm:$0xff]   ;;  %v18095_v53 = vld [vmem:[%s19371_s23 + $0x1368] ss:$16 sps:$4 sm:$0xff]  }
 0x52e   : > { %12686 = vmatprep.subr.bf16.mxu1 %v18052_v14  ;;  %v18100_v47 = vld [vmem:[%s19371_s23 + $0x156c] ss:$16 sps:$4 sm:$0xff]   ;;  %v18098_v6 = vld [vmem:[%s19371_s23 + $0x1568] ss:$16 sps:$4 sm:$0xff]  }
 0x52f   : > { %v18103_v14 = vld [vmem:[%s19371_s23 + $0x134c] ss:$16 sps:$4 sm:$0xff]  }
 0x530   : > { %12646 = vmatpush1.bf16.msra.mxu0 %v18047_v31  ;;  %v18106_v31 = vld [vmem:[%s19371_s23 + $0x154c] ss:$16 sps:$4 sm:$0xff]  }
 0x531   : > { %12687 = vmatpush1.bf16.msra.mxu1 %v18050_v49  ;;  %12647 = vmatprep.subr.bf16.mxu0 %v18055_v1  ;;  %v18101_v49 = vld [vmem:[%s19371_s23 + $0x1348] ss:$16 sps:$4 sm:$0xff]  }
 0x532   : > { %12688 = vmatprep.subr.bf16.mxu1 %v18058_v37  ;;  %v18104_v1 = vld [vmem:[%s19371_s23 + $0x1548] ss:$16 sps:$4 sm:$0xff]   ;;  %v18109_v37 = vld [vmem:[%s19371_s23 + $0x132c] ss:$16 sps:$4 sm:$0xff]  }
 0x534   : > { %12648 = vmatpush1.bf16.msra.mxu0 %v18053_v44  ;;  %v18112_v44 = vld [vmem:[%s19371_s23 + $0x152c] ss:$16 sps:$4 sm:$0xff]  }
 0x535   : > { %12689 = vmatpush1.bf16.msra.mxu1 %v18056_v19  ;;  %12649 = vmatprep.subr.bf16.mxu0 %v18061_v55  ;;  %v18107_v19 = vld [vmem:[%s19371_s23 + $0x1328] ss:$16 sps:$4 sm:$0xff]  }
 0x536   : > { %12690 = vmatprep.subr.bf16.mxu1 %v18064_v18  ;;  %v18110_v55 = vld [vmem:[%s19371_s23 + $0x1528] ss:$16 sps:$4 sm:$0xff]   ;;  %v18115_v18 = vld [vmem:[%s19371_s23 + $0x130c] ss:$16 sps:$4 sm:$0xff]  }
 0x538   : > { %12650 = vmatpush1.bf16.msra.mxu0 %v18059_v33  ;;  %v18118_v33 = vld [vmem:[%s19371_s23 + $0x150c] ss:$16 sps:$4 sm:$0xff]  }
 0x539   : > { %12691 = vmatpush1.bf16.msra.mxu1 %v18062_v35  ;;  %12651 = vmatprep.subr.bf16.mxu0 %v18067_v51  ;;  %v18113_v35 = vld [vmem:[%s19371_s23 + $0x1308] ss:$16 sps:$4 sm:$0xff]  }
 0x53a   : > { %12692 = vmatprep.subr.bf16.mxu1 %v18070_v13  ;;  %v18116_v51 = vld [vmem:[%s19371_s23 + $0x1508] ss:$16 sps:$4 sm:$0xff]   ;;  %v18121_v13 = vld [vmem:[%s19371_s23 + $0x16ec] ss:$16 sps:$4 sm:$0xff]  }
 0x53c   : > { %12652 = vmatpush1.bf16.msra.mxu0 %v18065_v11  ;;  %v18124_v11 = vld [vmem:[%s19371_s23 + $0x18ec] ss:$16 sps:$4 sm:$0xff]  }
 0x53d   : > { %12693 = vmatpush1.bf16.msra.mxu1 %v18068_v24  ;;  %12653 = vmatprep.subr.bf16.mxu0 %v18073_v42  ;;  %v18119_v24 = vld [vmem:[%s19371_s23 + $0x16e8] ss:$16 sps:$4 sm:$0xff]  }
 0x53e   : > { %12694 = vmatprep.subr.bf16.mxu1 %v18076_v30  ;;  %v18122_v42 = vld [vmem:[%s19371_s23 + $0x18e8] ss:$16 sps:$4 sm:$0xff]   ;;  %v18127_v30 = vld [vmem:[%s19371_s23 + $0x16cc] ss:$16 sps:$4 sm:$0xff]  }
 0x540   : > { %12654 = vmatpush2.bf16.msra.mxu0 %v18071_v38  ;;  %v18130_v38 = vld [vmem:[%s19371_s23 + $0x18cc] ss:$16 sps:$4 sm:$0xff]  }
 0x541   : > { %12695 = vmatpush2.bf16.msra.mxu1 %v18074_v60  ;;  %12655 = vmatprep.subr.bf16.mxu0 %v18079_v20 }
 0x542   : > { %12696 = vmatprep.subr.bf16.mxu1 %v18082_v2 }
 0x544   : > { %12656 = vmatpush2.bf16.msra.mxu0 %v18077_v7  ;;  %v18125_v7 = vld [vmem:[%s19371_s23 + $0x16c8] ss:$16 sps:$4 sm:$0xff]  }
 0x545   : > { %12697 = vmatpush2.bf16.msra.mxu1 %v18080_v16  ;;  %12657 = vmatprep.subr.bf16.mxu0 %v18085_v21  ;;  %v18128_v16 = vld [vmem:[%s19371_s23 + $0x18c8] ss:$16 sps:$4 sm:$0xff]  }
 0x546   : > { %12698 = vmatprep.subr.bf16.mxu1 %v18088_v4 }
 0x548   : > { %12658 = vmatpush2.bf16.msra.mxu0 %v18083_v27  ;;  %v18133_v27 = vld [vmem:[%s19371_s23 + $0x16ac] ss:$16 sps:$4 sm:$0xff]  }
 0x549   : > { %12699 = vmatpush2.bf16.msra.mxu1 %v18086_v62  ;;  %12659 = vmatprep.subr.bf16.mxu0 %v18091_v48  ;;  %v18136_v62 = vld [vmem:[%s19371_s23 + $0x18ac] ss:$16 sps:$4 sm:$0xff]  }
 0x54a   : > { %12700 = vmatprep.subr.bf16.mxu1 %v18094_v36 }
 0x54c   : > { %12660 = vmatpush2.bf16.msra.mxu0 %v18089_v12  ;;  %v18131_v12 = vld [vmem:[%s19371_s23 + $0x16a8] ss:$16 sps:$4 sm:$0xff]  }
 0x54d   : > { %12701 = vmatpush2.bf16.msra.mxu1 %v18092_v26  ;;  %12661 = vmatprep.subr.bf16.mxu0 %v18097_v15  ;;  %v18134_v26 = vld [vmem:[%s19371_s23 + $0x18a8] ss:$16 sps:$4 sm:$0xff]  }
 0x54e   : > { %12702 = vmatprep.subr.bf16.mxu1 %v18100_v47 }
 0x550   : > { %12662 = vmatpush2.bf16.msra.mxu0 %v18095_v53  ;;  %v18140_v53 = vld [vmem:[%s19371_s23 + $0x1888] ss:$16 sps:$4 sm:$0xff]  }
 0x551   : > { %12703 = vmatpush2.bf16.msra.mxu1 %v18098_v6  ;;  %12663 = vmatprep.subr.bf16.mxu0 %v18103_v14  ;;  %v18145_v6 = vld [vmem:[%s19371_s23 + $0x166c] ss:$16 sps:$4 sm:$0xff]  }
 0x552   : > { %12704 = vmatprep.subr.bf16.mxu1 %v18106_v31  ;;  %v18148_v14 = vld [vmem:[%s19371_s23 + $0x186c] ss:$16 sps:$4 sm:$0xff]   ;;  %v18143_v31 = vld [vmem:[%s19371_s23 + $0x1668] ss:$16 sps:$4 sm:$0xff]  }
 0x554   : > { %12664 = vmatpush2.bf16.msra.mxu0 %v18101_v49  ;;  %v18146_v49 = vld [vmem:[%s19371_s23 + $0x1868] ss:$16 sps:$4 sm:$0xff]  }
 0x555   : > { %12705 = vmatpush2.bf16.msra.mxu1 %v18104_v1  ;;  %12665 = vmatprep.subr.bf16.mxu0 %v18109_v37  ;;  %v18151_v1 = vld [vmem:[%s19371_s23 + $0x164c] ss:$16 sps:$4 sm:$0xff]  }
 0x556   : > { %12706 = vmatprep.subr.bf16.mxu1 %v18112_v44  ;;  %v18154_v37 = vld [vmem:[%s19371_s23 + $0x184c] ss:$16 sps:$4 sm:$0xff]   ;;  %v18149_v44 = vld [vmem:[%s19371_s23 + $0x1648] ss:$16 sps:$4 sm:$0xff]  }
 0x558   : > { %12666 = vmatpush2.bf16.msra.mxu0 %v18107_v19  ;;  %v18152_v19 = vld [vmem:[%s19371_s23 + $0x1848] ss:$16 sps:$4 sm:$0xff]  }
 0x559   : > { %12707 = vmatpush2.bf16.msra.mxu1 %v18110_v55  ;;  %12667 = vmatprep.subr.bf16.mxu0 %v18115_v18  ;;  %v18157_v55 = vld [vmem:[%s19371_s23 + $0x162c] ss:$16 sps:$4 sm:$0xff]  }
 0x55a   : > { %12708 = vmatprep.subr.bf16.mxu1 %v18118_v33  ;;  %v18160_v18 = vld [vmem:[%s19371_s23 + $0x182c] ss:$16 sps:$4 sm:$0xff]   ;;  %v18155_v33 = vld [vmem:[%s19371_s23 + $0x1628] ss:$16 sps:$4 sm:$0xff]  }
 0x55c   : > { %12668 = vmatpush2.bf16.msra.mxu0 %v18113_v35  ;;  %v18158_v35 = vld [vmem:[%s19371_s23 + $0x1828] ss:$16 sps:$4 sm:$0xff]  }
 0x55d   : > { %12709 = vmatpush2.bf16.msra.mxu1 %v18116_v51  ;;  %12719 = vmatprep.subr.bf16.mxu0 %v18121_v13  ;;  %v18163_v51 = vld [vmem:[%s19371_s23 + $0x160c] ss:$16 sps:$4 sm:$0xff]  }
 0x55e   : > { %12760 = vmatprep.subr.bf16.mxu1 %v18124_v11  ;;  %v18166_v13 = vld [vmem:[%s19371_s23 + $0x180c] ss:$16 sps:$4 sm:$0xff]   ;;  %v18161_v11 = vld [vmem:[%s19371_s23 + $0x1608] ss:$16 sps:$4 sm:$0xff]  }
 0x55f   : > { %v12425_v60 = vpop.f32.mrf.mxu0  ;;  %12670 = vmatmul.mubr.bf16.vlgmr.msra.gmra.mxu0 %v19856_v5 }
 0x560   : > { %v12466_v20 = vpop.f32.mrf.mxu1  ;;  %12711 = vmatmul.mubr.bf16.vlgmr.msra.gmra.mxu1 %v19941_v10  ;;  %v12426_v2 = vadd.f32 %v12425_v60, %v21023_v50  ;;  %12720 = vmatpush1.bf16.msra.mxu0 %v18119_v24  ;;  %v18164_v24 = vld [vmem:[%s19371_s23 + $0x1808] ss:$16 sps:$4 sm:$0xff]  }
 0x561   : > { %12761 = vmatpush1.bf16.msra.mxu1 %v18122_v42  ;;  %v12427_v21 = vpop.f32.mrf.mxu0  ;;  %12721 = vmatprep.subr.bf16.mxu0 %v18127_v30  ;;  %v18169_v42 = vld [vmem:[%s19371_s23 + $0x17ec] ss:$16 sps:$4 sm:$0xff]   ;;  %v18170_v60 = vld [vmem:[%s19371_s23 + $0x19e8] ss:$16 sps:$4 sm:$0xff]  }
 0x562   : > { %v12468_v4 = vpop.f32.mrf.mxu1  ;;  %12762 = vmatprep.subr.bf16.mxu1 %v18130_v38  ;;  %v21097_v48 = vadd.f32 %v12466_v20, %v12426_v2  ;;  %v12428_v5 = vadd.f32 %v12427_v21, %v21028_v8  ;;  %12751 = vmatprep.mubr.bf16.mxu0 %v19864_v23  ;;  %v18139_v23 = vld [vmem:[%s19371_s23 + $0x168c] ss:$16 sps:$4 sm:$0xff]   ;;  %v18137_v8 = vld [vmem:[%s19371_s23 + $0x1688] ss:$16 sps:$4 sm:$0xff]  }
 0x563   : > { %12792 = vmatprep.mubr.bf16.mxu1 %v19950_v25  ;;  %v12429_v10 = vpop.f32.mrf.mxu0  ;;  %v18142_v25 = vld [vmem:[%s19371_s23 + $0x188c] ss:$16 sps:$4 sm:$0xff]   ;;  %v18167_v38 = vld [vmem:[%s19371_s23 + $0x17e8] ss:$16 sps:$4 sm:$0xff]  }
 0x564   : > { %v12470_v50 = vpop.f32.mrf.mxu1  ;;  %v21102_v36 = vadd.f32 %v12468_v4, %v12428_v5  ;;  %12722 = vmatpush1.bf16.msra.mxu0 %v18125_v7  ;;  %v18172_v30 = vld [vmem:[%s19371_s23 + $0x19ec] ss:$16 sps:$4 sm:$0xff]   ;;  %v18173_v7 = vld [vmem:[%s19371_s23 + $0x17c8] ss:$16 sps:$4 sm:$0xff]  }
 0x565   : > { %12763 = vmatpush1.bf16.msra.mxu1 %v18128_v16  ;;  %v12430_v15 = vpop.f32.mrf.mxu0  ;;  %12723 = vmatprep.subr.bf16.mxu0 %v18133_v27  ;;  %v18175_v20 = vld [vmem:[%s19371_s23 + $0x17cc] ss:$16 sps:$4 sm:$0xff]   ;;  %v18176_v16 = vld [vmem:[%s19371_s23 + $0x19c8] ss:$16 sps:$4 sm:$0xff]  }
 0x566   : > { %v12471_v47 = vpop.f32.mrf.mxu1  ;;  %12764 = vmatprep.subr.bf16.mxu1 %v18136_v62  ;;  %v18178_v2 = vld [vmem:[%s19371_s23 + $0x19cc] ss:$16 sps:$4 sm:$0xff]   ;;  %v18179_v27 = vld [vmem:[%s19371_s23 + $0x17a8] ss:$16 sps:$4 sm:$0xff]  }
 0x567   : > { %v18181_v21 = vld [vmem:[%s19371_s23 + $0x17ac] ss:$16 sps:$4 sm:$0xff]   ;;  %v18182_v62 = vld [vmem:[%s19371_s23 + $0x19a8] ss:$16 sps:$4 sm:$0xff]  }
 0x568   : > { %12724 = vmatpush1.bf16.msra.mxu0 %v18131_v12  ;;  %v18184_v4 = vld [vmem:[%s19371_s23 + $0x19ac] ss:$16 sps:$4 sm:$0xff]   ;;  %v18185_v50 = vld [vmem:[%s19371_s23 + $0x1788] ss:$16 sps:$4 sm:$0xff]  }
 0x569   : > { %12765 = vmatpush1.bf16.msra.mxu1 %v18134_v26  ;;  %12725 = vmatprep.subr.bf16.mxu0 %v18139_v23  ;;  %v18187_v5 = vld [vmem:[%s19371_s23 + $0x178c] ss:$16 sps:$4 sm:$0xff]   ;;  %v18188_v12 = vld [vmem:[%s19371_s23 + $0x1988] ss:$16 sps:$4 sm:$0xff]  }
 0x56a   : > { %12766 = vmatprep.subr.bf16.mxu1 %v18142_v25  ;;  %v18190_v10 = vld [vmem:[%s19371_s23 + $0x198c] ss:$16 sps:$4 sm:$0xff]   ;;  %v18191_v47 = vld [vmem:[%s19371_s23 + $0x1768] ss:$16 sps:$4 sm:$0xff]  }
 0x56b   : > { %v18193_v26 = vld [vmem:[%s19371_s23 + $0x176c] ss:$16 sps:$4 sm:$0xff]   ;;  %v18194_v23 = vld [vmem:[%s19371_s23 + $0x1968] ss:$16 sps:$4 sm:$0xff]  }
 0x56c   : > { %12726 = vmatpush1.bf16.msra.mxu0 %v18137_v8  ;;  %v18196_v15 = vld [vmem:[%s19371_s23 + $0x196c] ss:$16 sps:$4 sm:$0xff]  }
 0x56d   : > { %12767 = vmatpush1.bf16.msra.mxu1 %v18140_v53  ;;  %12727 = vmatprep.subr.bf16.mxu0 %v18145_v6  ;;  %v18199_v25 = vld [vmem:[%s19371_s23 + $0x174c] ss:$16 sps:$4 sm:$0xff]   ;;  %v18197_v53 = vld [vmem:[%s19371_s23 + $0x1748] ss:$16 sps:$4 sm:$0xff]  }
 0x56e   : > { %12768 = vmatprep.subr.bf16.mxu1 %v18148_v14  ;;  %v18202_v8 = vld [vmem:[%s19371_s23 + $0x194c] ss:$16 sps:$4 sm:$0xff]   ;;  %v18200_v6 = vld [vmem:[%s19371_s23 + $0x1948] ss:$16 sps:$4 sm:$0xff]  }
 0x56f   : > { %v18205_v14 = vld [vmem:[%s19371_s23 + $0x172c] ss:$16 sps:$4 sm:$0xff]  }
 0x570   : > { %12728 = vmatpush1.bf16.msra.mxu0 %v18143_v31  ;;  %v18208_v31 = vld [vmem:[%s19371_s23 + $0x192c] ss:$16 sps:$4 sm:$0xff]  }
 0x571   : > { %12769 = vmatpush1.bf16.msra.mxu1 %v18146_v49  ;;  %12729 = vmatprep.subr.bf16.mxu0 %v18151_v1  ;;  %v18203_v49 = vld [vmem:[%s19371_s23 + $0x1728] ss:$16 sps:$4 sm:$0xff]  }
 0x572   : > { %12770 = vmatprep.subr.bf16.mxu1 %v18154_v37  ;;  %v18206_v1 = vld [vmem:[%s19371_s23 + $0x1928] ss:$16 sps:$4 sm:$0xff]   ;;  %v18211_v37 = vld [vmem:[%s19371_s23 + $0x170c] ss:$16 sps:$4 sm:$0xff]  }
 0x574   : > { %12730 = vmatpush1.bf16.msra.mxu0 %v18149_v44  ;;  %v18214_v44 = vld [vmem:[%s19371_s23 + $0x190c] ss:$16 sps:$4 sm:$0xff]  }
 0x575   : > { %12771 = vmatpush1.bf16.msra.mxu1 %v18152_v19  ;;  %12731 = vmatprep.subr.bf16.mxu0 %v18157_v55  ;;  %v18209_v19 = vld [vmem:[%s19371_s23 + $0x1708] ss:$16 sps:$4 sm:$0xff]  }
 0x576   : > { %12772 = vmatprep.subr.bf16.mxu1 %v18160_v18  ;;  %v18212_v55 = vld [vmem:[%s19371_s23 + $0x1908] ss:$16 sps:$4 sm:$0xff]   ;;  %v18217_v18 = vld [vmem:[%s19371_s23 + $0x1aec] ss:$16 sps:$4 sm:$0xff]  }
 0x578   : > { %12732 = vmatpush1.bf16.msra.mxu0 %v18155_v33  ;;  %v18220_v33 = vld [vmem:[%s19371_s23 + $0x1cec] ss:$16 sps:$4 sm:$0xff]  }
 0x579   : > { %12773 = vmatpush1.bf16.msra.mxu1 %v18158_v35  ;;  %12733 = vmatprep.subr.bf16.mxu0 %v18163_v51  ;;  %v18215_v35 = vld [vmem:[%s19371_s23 + $0x1ae8] ss:$16 sps:$4 sm:$0xff]  }
 0x57a   : > { %12774 = vmatprep.subr.bf16.mxu1 %v18166_v13  ;;  %v18218_v51 = vld [vmem:[%s19371_s23 + $0x1ce8] ss:$16 sps:$4 sm:$0xff]   ;;  %v18223_v13 = vld [vmem:[%s19371_s23 + $0x1acc] ss:$16 sps:$4 sm:$0xff]  }
 0x57c   : > { %12734 = vmatpush1.bf16.msra.mxu0 %v18161_v11  ;;  %v18226_v11 = vld [vmem:[%s19371_s23 + $0x1ccc] ss:$16 sps:$4 sm:$0xff]  }
 0x57d   : > { %12775 = vmatpush1.bf16.msra.mxu1 %v18164_v24  ;;  %12735 = vmatprep.subr.bf16.mxu0 %v18169_v42 }
 0x57e   : > { %12776 = vmatprep.subr.bf16.mxu1 %v18172_v30 }
 0x580   : > { %12736 = vmatpush2.bf16.msra.mxu0 %v18167_v38  ;;  %v18221_v38 = vld [vmem:[%s19371_s23 + $0x1ac8] ss:$16 sps:$4 sm:$0xff]  }
 0x581   : > { %12777 = vmatpush2.bf16.msra.mxu1 %v18170_v60  ;;  %12737 = vmatprep.subr.bf16.mxu0 %v18175_v20  ;;  %v18224_v60 = vld [vmem:[%s19371_s23 + $0x1cc8] ss:$16 sps:$4 sm:$0xff]  }
 0x582   : > { %12778 = vmatprep.subr.bf16.mxu1 %v18178_v2 }
 0x584   : > { %12738 = vmatpush2.bf16.msra.mxu0 %v18173_v7  ;;  %v18229_v7 = vld [vmem:[%s19371_s23 + $0x1aac] ss:$16 sps:$4 sm:$0xff]  }
 0x585   : > { %12779 = vmatpush2.bf16.msra.mxu1 %v18176_v16  ;;  %12739 = vmatprep.subr.bf16.mxu0 %v18181_v21  ;;  %v18232_v16 = vld [vmem:[%s19371_s23 + $0x1cac] ss:$16 sps:$4 sm:$0xff]  }
 0x586   : > { %12780 = vmatprep.subr.bf16.mxu1 %v18184_v4 }
 0x588   : > { %12740 = vmatpush2.bf16.msra.mxu0 %v18179_v27  ;;  %v18227_v27 = vld [vmem:[%s19371_s23 + $0x1aa8] ss:$16 sps:$4 sm:$0xff]  }
 0x589   : > { %12781 = vmatpush2.bf16.msra.mxu1 %v18182_v62  ;;  %12741 = vmatprep.subr.bf16.mxu0 %v18187_v5  ;;  %v18230_v62 = vld [vmem:[%s19371_s23 + $0x1ca8] ss:$16 sps:$4 sm:$0xff]  }
 0x58a   : > { %12782 = vmatprep.subr.bf16.mxu1 %v18190_v10 }
 0x58c   : > { %12742 = vmatpush2.bf16.msra.mxu0 %v18185_v50  ;;  %v18236_v50 = vld [vmem:[%s19371_s23 + $0x1c88] ss:$16 sps:$4 sm:$0xff]  }
 0x58d   : > { %12783 = vmatpush2.bf16.msra.mxu1 %v18188_v12  ;;  %12743 = vmatprep.subr.bf16.mxu0 %v18193_v26  ;;  %v18241_v12 = vld [vmem:[%s19371_s23 + $0x1a6c] ss:$16 sps:$4 sm:$0xff]  }
 0x58e   : > { %12784 = vmatprep.subr.bf16.mxu1 %v18196_v15  ;;  %v18244_v26 = vld [vmem:[%s19371_s23 + $0x1c6c] ss:$16 sps:$4 sm:$0xff]   ;;  %v18239_v15 = vld [vmem:[%s19371_s23 + $0x1a68] ss:$16 sps:$4 sm:$0xff]  }
 0x590   : > { %12744 = vmatpush2.bf16.msra.mxu0 %v18191_v47  ;;  %v18242_v47 = vld [vmem:[%s19371_s23 + $0x1c68] ss:$16 sps:$4 sm:$0xff]  }
 0x591   : > { %12785 = vmatpush2.bf16.msra.mxu1 %v18194_v23  ;;  %12745 = vmatprep.subr.bf16.mxu0 %v18199_v25  ;;  %v18247_v23 = vld [vmem:[%s19371_s23 + $0x1a4c] ss:$16 sps:$4 sm:$0xff]  }
 0x592   : > { %12786 = vmatprep.subr.bf16.mxu1 %v18202_v8  ;;  %v18250_v25 = vld [vmem:[%s19371_s23 + $0x1c4c] ss:$16 sps:$4 sm:$0xff]   ;;  %v18245_v8 = vld [vmem:[%s19371_s23 + $0x1a48] ss:$16 sps:$4 sm:$0xff]  }
 0x594   : > { %12746 = vmatpush2.bf16.msra.mxu0 %v18197_v53  ;;  %v18248_v53 = vld [vmem:[%s19371_s23 + $0x1c48] ss:$16 sps:$4 sm:$0xff]  }
 0x595   : > { %12787 = vmatpush2.bf16.msra.mxu1 %v18200_v6  ;;  %12747 = vmatprep.subr.bf16.mxu0 %v18205_v14  ;;  %v18253_v6 = vld [vmem:[%s19371_s23 + $0x1a2c] ss:$16 sps:$4 sm:$0xff]  }
 0x596   : > { %12788 = vmatprep.subr.bf16.mxu1 %v18208_v31  ;;  %v18256_v14 = vld [vmem:[%s19371_s23 + $0x1c2c] ss:$16 sps:$4 sm:$0xff]   ;;  %v18251_v31 = vld [vmem:[%s19371_s23 + $0x1a28] ss:$16 sps:$4 sm:$0xff]  }
 0x598   : > { %12748 = vmatpush2.bf16.msra.mxu0 %v18203_v49  ;;  %v18254_v49 = vld [vmem:[%s19371_s23 + $0x1c28] ss:$16 sps:$4 sm:$0xff]  }
 0x599   : > { %12789 = vmatpush2.bf16.msra.mxu1 %v18206_v1  ;;  %12749 = vmatprep.subr.bf16.mxu0 %v18211_v37  ;;  %v18259_v1 = vld [vmem:[%s19371_s23 + $0x1a0c] ss:$16 sps:$4 sm:$0xff]  }
 0x59a   : > { %12790 = vmatprep.subr.bf16.mxu1 %v18214_v44  ;;  %v18262_v37 = vld [vmem:[%s19371_s23 + $0x1c0c] ss:$16 sps:$4 sm:$0xff]   ;;  %v18257_v44 = vld [vmem:[%s19371_s23 + $0x1a08] ss:$16 sps:$4 sm:$0xff]  }
 0x59c   : > { %12750 = vmatpush2.bf16.msra.mxu0 %v18209_v19  ;;  %v18260_v19 = vld [vmem:[%s19371_s23 + $0x1c08] ss:$16 sps:$4 sm:$0xff]  }
 0x59d   : > { %12791 = vmatpush2.bf16.msra.mxu1 %v18212_v55  ;;  %12801 = vmatprep.subr.bf16.mxu0 %v18217_v18  ;;  %v18265_v55 = vld [vmem:[%s19371_s23 + $0x1bec] ss:$16 sps:$4 sm:$0xff]  }
 0x59e   : > { %12842 = vmatprep.subr.bf16.mxu1 %v18220_v33  ;;  %v18268_v18 = vld [vmem:[%s19371_s23 + $0x1dec] ss:$16 sps:$4 sm:$0xff]   ;;  %v18263_v33 = vld [vmem:[%s19371_s23 + $0x1be8] ss:$16 sps:$4 sm:$0xff]  }
 0x59f   : > { %v12507_v24 = vpop.f32.mrf.mxu0  ;;  %12752 = vmatmul.mubr.bf16.vlgmr.msra.gmra.mxu0 %v19954_v59 }
 0x5a0   : > { %v12548_v42 = vpop.f32.mrf.mxu1  ;;  %12793 = vmatmul.mubr.bf16.vlgmr.msra.gmra.mxu1 %v20037_v40  ;;  %v12508_v30 = vadd.f32 %v12507_v24, %v21097_v48  ;;  %12802 = vmatpush1.bf16.msra.mxu0 %v18215_v35  ;;  %v18266_v35 = vld [vmem:[%s19371_s23 + $0x1de8] ss:$16 sps:$4 sm:$0xff]  }
 0x5a1   : > { %12843 = vmatpush1.bf16.msra.mxu1 %v18218_v51  ;;  %v12509_v20 = vpop.f32.mrf.mxu0  ;;  %12803 = vmatprep.subr.bf16.mxu0 %v18223_v13  ;;  %v18271_v51 = vld [vmem:[%s19371_s23 + $0x1bcc] ss:$16 sps:$4 sm:$0xff]   ;;  %v18272_v24 = vld [vmem:[%s19371_s23 + $0x1dc8] ss:$16 sps:$4 sm:$0xff]  }
 0x5a2   : > { %v12550_v2 = vpop.f32.mrf.mxu1  ;;  %12844 = vmatprep.subr.bf16.mxu1 %v18226_v11  ;;  %v21171_v21 = vadd.f32 %v12548_v42, %v12508_v30  ;;  %v12510_v59 = vadd.f32 %v12509_v20, %v21102_v36  ;;  %12833 = vmatprep.mubr.bf16.mxu0 %v19962_v34  ;;  %v18235_v34 = vld [vmem:[%s19371_s23 + $0x1a8c] ss:$16 sps:$4 sm:$0xff]   ;;  %v18233_v36 = vld [vmem:[%s19371_s23 + $0x1a88] ss:$16 sps:$4 sm:$0xff]  }
 0x5a3   : > { %12874 = vmatprep.mubr.bf16.mxu1 %v20046_v52  ;;  %v12511_v40 = vpop.f32.mrf.mxu0  ;;  %v18238_v52 = vld [vmem:[%s19371_s23 + $0x1c8c] ss:$16 sps:$4 sm:$0xff]   ;;  %v18269_v11 = vld [vmem:[%s19371_s23 + $0x1bc8] ss:$16 sps:$4 sm:$0xff]  }
 0x5a4   : > { %v12552_v48 = vpop.f32.mrf.mxu1  ;;  %v21176_v4 = vadd.f32 %v12550_v2, %v12510_v59  ;;  %12804 = vmatpush1.bf16.msra.mxu0 %v18221_v38  ;;  %v18274_v13 = vld [vmem:[%s19371_s23 + $0x1dcc] ss:$16 sps:$4 sm:$0xff]   ;;  %v18275_v38 = vld [vmem:[%s19371_s23 + $0x1ba8] ss:$16 sps:$4 sm:$0xff]  }
 0x5a5   : > { %12845 = vmatpush1.bf16.msra.mxu1 %v18224_v60  ;;  %v12512_v5 = vpop.f32.mrf.mxu0  ;;  %12805 = vmatprep.subr.bf16.mxu0 %v18229_v7  ;;  %v18277_v42 = vld [vmem:[%s19371_s23 + $0x1bac] ss:$16 sps:$4 sm:$0xff]   ;;  %v18278_v60 = vld [vmem:[%s19371_s23 + $0x1da8] ss:$16 sps:$4 sm:$0xff]  }
 0x5a6   : > { %v12553_v10 = vpop.f32.mrf.mxu1  ;;  %12846 = vmatprep.subr.bf16.mxu1 %v18232_v16  ;;  %v18280_v30 = vld [vmem:[%s19371_s23 + $0x1dac] ss:$16 sps:$4 sm:$0xff]   ;;  %v18281_v7 = vld [vmem:[%s19371_s23 + $0x1b88] ss:$16 sps:$4 sm:$0xff]  }
 0x5a7   : > { %v18283_v20 = vld [vmem:[%s19371_s23 + $0x1b8c] ss:$16 sps:$4 sm:$0xff]   ;;  %v18284_v16 = vld [vmem:[%s19371_s23 + $0x1d88] ss:$16 sps:$4 sm:$0xff]  }
 0x5a8   : > { %12806 = vmatpush1.bf16.msra.mxu0 %v18227_v27  ;;  %v18286_v2 = vld [vmem:[%s19371_s23 + $0x1d8c] ss:$16 sps:$4 sm:$0xff]   ;;  %v18287_v48 = vld [vmem:[%s19371_s23 + $0x1b68] ss:$16 sps:$4 sm:$0xff]  }
 0x5a9   : > { %12847 = vmatpush1.bf16.msra.mxu1 %v18230_v62  ;;  %12807 = vmatprep.subr.bf16.mxu0 %v18235_v34  ;;  %v18289_v59 = vld [vmem:[%s19371_s23 + $0x1b6c] ss:$16 sps:$4 sm:$0xff]   ;;  %v18290_v27 = vld [vmem:[%s19371_s23 + $0x1d68] ss:$16 sps:$4 sm:$0xff]  }
 0x5aa   : > { %12848 = vmatprep.subr.bf16.mxu1 %v18238_v52  ;;  %v18292_v40 = vld [vmem:[%s19371_s23 + $0x1d6c] ss:$16 sps:$4 sm:$0xff]   ;;  %v18293_v10 = vld [vmem:[%s19371_s23 + $0x1b48] ss:$16 sps:$4 sm:$0xff]  }
 0x5ab   : > { %v18295_v62 = vld [vmem:[%s19371_s23 + $0x1b4c] ss:$16 sps:$4 sm:$0xff]   ;;  %v18296_v34 = vld [vmem:[%s19371_s23 + $0x1d48] ss:$16 sps:$4 sm:$0xff]  }
 0x5ac   : > { %12808 = vmatpush1.bf16.msra.mxu0 %v18233_v36  ;;  %v18298_v5 = vld [vmem:[%s19371_s23 + $0x1d4c] ss:$16 sps:$4 sm:$0xff]  }
 0x5ad   : > { %12849 = vmatpush1.bf16.msra.mxu1 %v18236_v50  ;;  %12809 = vmatprep.subr.bf16.mxu0 %v18241_v12  ;;  %v18301_v52 = vld [vmem:[%s19371_s23 + $0x1b2c] ss:$16 sps:$4 sm:$0xff]   ;;  %v18299_v50 = vld [vmem:[%s19371_s23 + $0x1b28] ss:$16 sps:$4 sm:$0xff]  }
 0x5ae   : > { %12850 = vmatprep.subr.bf16.mxu1 %v18244_v26  ;;  %v18304_v36 = vld [vmem:[%s19371_s23 + $0x1d2c] ss:$16 sps:$4 sm:$0xff]   ;;  %v18302_v12 = vld [vmem:[%s19371_s23 + $0x1d28] ss:$16 sps:$4 sm:$0xff]  }
 0x5af   : > { %v18307_v26 = vld [vmem:[%s19371_s23 + $0x1b0c] ss:$16 sps:$4 sm:$0xff]  }
 0x5b0   : > { %12810 = vmatpush1.bf16.msra.mxu0 %v18239_v15  ;;  %v18310_v15 = vld [vmem:[%s19371_s23 + $0x1d0c] ss:$16 sps:$4 sm:$0xff]  }
 0x5b1   : > { %12851 = vmatpush1.bf16.msra.mxu1 %v18242_v47  ;;  %12811 = vmatprep.subr.bf16.mxu0 %v18247_v23  ;;  %v18305_v47 = vld [vmem:[%s19371_s23 + $0x1b08] ss:$16 sps:$4 sm:$0xff]  }
 0x5b2   : > { %12852 = vmatprep.subr.bf16.mxu1 %v18250_v25  ;;  %v18308_v23 = vld [vmem:[%s19371_s23 + $0x1d08] ss:$16 sps:$4 sm:$0xff]   ;;  %v18313_v25 = vld [vmem:[%s19371_s23 + $0x1eec] ss:$16 sps:$4 sm:$0xff]  }
 0x5b4   : > { %12812 = vmatpush1.bf16.msra.mxu0 %v18245_v8  ;;  %v18316_v8 = vld [vmem:[%s19371_s23 + $0x20ec] ss:$16 sps:$4 sm:$0xff]  }
 0x5b5   : > { %12853 = vmatpush1.bf16.msra.mxu1 %v18248_v53  ;;  %12813 = vmatprep.subr.bf16.mxu0 %v18253_v6  ;;  %v18311_v53 = vld [vmem:[%s19371_s23 + $0x1ee8] ss:$16 sps:$4 sm:$0xff]  }
 0x5b6   : > { %12854 = vmatprep.subr.bf16.mxu1 %v18256_v14  ;;  %v18314_v6 = vld [vmem:[%s19371_s23 + $0x20e8] ss:$16 sps:$4 sm:$0xff]   ;;  %v18319_v14 = vld [vmem:[%s19371_s23 + $0x1ecc] ss:$16 sps:$4 sm:$0xff]  }
 0x5b8   : > { %12814 = vmatpush1.bf16.msra.mxu0 %v18251_v31  ;;  %v18322_v31 = vld [vmem:[%s19371_s23 + $0x20cc] ss:$16 sps:$4 sm:$0xff]  }
 0x5b9   : > { %12855 = vmatpush1.bf16.msra.mxu1 %v18254_v49  ;;  %12815 = vmatprep.subr.bf16.mxu0 %v18259_v1 }
 0x5ba   : > { %12856 = vmatprep.subr.bf16.mxu1 %v18262_v37 }
 0x5bc   : > { %12816 = vmatpush1.bf16.msra.mxu0 %v18257_v44  ;;  %v18317_v44 = vld [vmem:[%s19371_s23 + $0x1ec8] ss:$16 sps:$4 sm:$0xff]  }
 0x5bd   : > { %12857 = vmatpush1.bf16.msra.mxu1 %v18260_v19  ;;  %12817 = vmatprep.subr.bf16.mxu0 %v18265_v55  ;;  %v18320_v19 = vld [vmem:[%s19371_s23 + $0x20c8] ss:$16 sps:$4 sm:$0xff]  }
 0x5be   : > { %12858 = vmatprep.subr.bf16.mxu1 %v18268_v18 }
 0x5c0   : > { %12818 = vmatpush2.bf16.msra.mxu0 %v18263_v33  ;;  %v18325_v33 = vld [vmem:[%s19371_s23 + $0x1eac] ss:$16 sps:$4 sm:$0xff]  }
 0x5c1   : > { %12859 = vmatpush2.bf16.msra.mxu1 %v18266_v35  ;;  %12819 = vmatprep.subr.bf16.mxu0 %v18271_v51  ;;  %v18328_v35 = vld [vmem:[%s19371_s23 + $0x20ac] ss:$16 sps:$4 sm:$0xff]  }
 0x5c2   : > { %12860 = vmatprep.subr.bf16.mxu1 %v18274_v13 }
 0x5c4   : > { %12820 = vmatpush2.bf16.msra.mxu0 %v18269_v11  ;;  %v18323_v11 = vld [vmem:[%s19371_s23 + $0x1ea8] ss:$16 sps:$4 sm:$0xff]  }
 0x5c5   : > { %12861 = vmatpush2.bf16.msra.mxu1 %v18272_v24  ;;  %12821 = vmatprep.subr.bf16.mxu0 %v18277_v42  ;;  %v18326_v24 = vld [vmem:[%s19371_s23 + $0x20a8] ss:$16 sps:$4 sm:$0xff]  }
 0x5c6   : > { %12862 = vmatprep.subr.bf16.mxu1 %v18280_v30 }
 0x5c8   : > { %12822 = vmatpush2.bf16.msra.mxu0 %v18275_v38  ;;  %v18332_v38 = vld [vmem:[%s19371_s23 + $0x2088] ss:$16 sps:$4 sm:$0xff]  }
 0x5c9   : > { %12863 = vmatpush2.bf16.msra.mxu1 %v18278_v60  ;;  %12823 = vmatprep.subr.bf16.mxu0 %v18283_v20  ;;  %v18337_v60 = vld [vmem:[%s19371_s23 + $0x1e6c] ss:$16 sps:$4 sm:$0xff]  }
 0x5ca   : > { %12864 = vmatprep.subr.bf16.mxu1 %v18286_v2  ;;  %v18340_v20 = vld [vmem:[%s19371_s23 + $0x206c] ss:$16 sps:$4 sm:$0xff]   ;;  %v18335_v2 = vld [vmem:[%s19371_s23 + $0x1e68] ss:$16 sps:$4 sm:$0xff]  }
 0x5cc   : > { %12824 = vmatpush2.bf16.msra.mxu0 %v18281_v7  ;;  %v18338_v7 = vld [vmem:[%s19371_s23 + $0x2068] ss:$16 sps:$4 sm:$0xff]  }
 0x5cd   : > { %12865 = vmatpush2.bf16.msra.mxu1 %v18284_v16  ;;  %12825 = vmatprep.subr.bf16.mxu0 %v18289_v59  ;;  %v18343_v16 = vld [vmem:[%s19371_s23 + $0x1e4c] ss:$16 sps:$4 sm:$0xff]  }
 0x5ce   : > { %12866 = vmatprep.subr.bf16.mxu1 %v18292_v40  ;;  %v18346_v59 = vld [vmem:[%s19371_s23 + $0x204c] ss:$16 sps:$4 sm:$0xff]   ;;  %v18341_v40 = vld [vmem:[%s19371_s23 + $0x1e48] ss:$16 sps:$4 sm:$0xff]  }
 0x5d0   : > { %12826 = vmatpush2.bf16.msra.mxu0 %v18287_v48  ;;  %v18344_v48 = vld [vmem:[%s19371_s23 + $0x2048] ss:$16 sps:$4 sm:$0xff]  }
 0x5d1   : > { %12867 = vmatpush2.bf16.msra.mxu1 %v18290_v27  ;;  %12827 = vmatprep.subr.bf16.mxu0 %v18295_v62  ;;  %v18349_v27 = vld [vmem:[%s19371_s23 + $0x1e2c] ss:$16 sps:$4 sm:$0xff]  }
 0x5d2   : > { %12868 = vmatprep.subr.bf16.mxu1 %v18298_v5  ;;  %v18352_v62 = vld [vmem:[%s19371_s23 + $0x202c] ss:$16 sps:$4 sm:$0xff]   ;;  %v18347_v5 = vld [vmem:[%s19371_s23 + $0x1e28] ss:$16 sps:$4 sm:$0xff]  }
 0x5d4   : > { %12828 = vmatpush2.bf16.msra.mxu0 %v18293_v10  ;;  %v18350_v10 = vld [vmem:[%s19371_s23 + $0x2028] ss:$16 sps:$4 sm:$0xff]  }
 0x5d5   : > { %12869 = vmatpush2.bf16.msra.mxu1 %v18296_v34  ;;  %12829 = vmatprep.subr.bf16.mxu0 %v18301_v52  ;;  %v18355_v34 = vld [vmem:[%s19371_s23 + $0x1e0c] ss:$16 sps:$4 sm:$0xff]  }
 0x5d6   : > { %12870 = vmatprep.subr.bf16.mxu1 %v18304_v36  ;;  %v18358_v52 = vld [vmem:[%s19371_s23 + $0x200c] ss:$16 sps:$4 sm:$0xff]   ;;  %v18353_v36 = vld [vmem:[%s19371_s23 + $0x1e08] ss:$16 sps:$4 sm:$0xff]  }
 0x5d8   : > { %12830 = vmatpush2.bf16.msra.mxu0 %v18299_v50  ;;  %v18356_v50 = vld [vmem:[%s19371_s23 + $0x2008] ss:$16 sps:$4 sm:$0xff]  }
 0x5d9   : > { %12871 = vmatpush2.bf16.msra.mxu1 %v18302_v12  ;;  %12831 = vmatprep.subr.bf16.mxu0 %v18307_v26  ;;  %v18361_v12 = vld [vmem:[%s19371_s23 + $0x1fec] ss:$16 sps:$4 sm:$0xff]  }
 0x5da   : > { %12872 = vmatprep.subr.bf16.mxu1 %v18310_v15  ;;  %v18364_v26 = vld [vmem:[%s19371_s23 + $0x21ec] ss:$16 sps:$4 sm:$0xff]   ;;  %v18359_v15 = vld [vmem:[%s19371_s23 + $0x1fe8] ss:$16 sps:$4 sm:$0xff]  }
 0x5dc   : > { %12832 = vmatpush2.bf16.msra.mxu0 %v18305_v47  ;;  %v18362_v47 = vld [vmem:[%s19371_s23 + $0x21e8] ss:$16 sps:$4 sm:$0xff]  }
 0x5dd   : > { %12873 = vmatpush2.bf16.msra.mxu1 %v18308_v23  ;;  %12883 = vmatprep.subr.bf16.mxu0 %v18313_v25  ;;  %v18367_v23 = vld [vmem:[%s19371_s23 + $0x1fcc] ss:$16 sps:$4 sm:$0xff]  }
 0x5de   : > { %12924 = vmatprep.subr.bf16.mxu1 %v18316_v8  ;;  %v18370_v25 = vld [vmem:[%s19371_s23 + $0x21cc] ss:$16 sps:$4 sm:$0xff]   ;;  %v18365_v8 = vld [vmem:[%s19371_s23 + $0x1fc8] ss:$16 sps:$4 sm:$0xff]  }
 0x5df   : > { %v12589_v49 = vpop.f32.mrf.mxu0  ;;  %12834 = vmatmul.mubr.bf16.vlgmr.msra.gmra.mxu0 %v20050_v63 }
 0x5e0   : > { %v12630_v1 = vpop.f32.mrf.mxu1  ;;  %12875 = vmatmul.mubr.bf16.vlgmr.msra.gmra.mxu1 %v20135_v17  ;;  %v12590_v37 = vadd.f32 %v12589_v49, %v21171_v21  ;;  %12884 = vmatpush1.bf16.msra.mxu0 %v18311_v53  ;;  %v18368_v53 = vld [vmem:[%s19371_s23 + $0x21c8] ss:$16 sps:$4 sm:$0xff]  }
 0x5e1   : > { %12925 = vmatpush1.bf16.msra.mxu1 %v18314_v6  ;;  %v12591_v55 = vpop.f32.mrf.mxu0  ;;  %12885 = vmatprep.subr.bf16.mxu0 %v18319_v14  ;;  %v18373_v6 = vld [vmem:[%s19371_s23 + $0x1fac] ss:$16 sps:$4 sm:$0xff]   ;;  %v18374_v49 = vld [vmem:[%s19371_s23 + $0x21a8] ss:$16 sps:$4 sm:$0xff]  }
 0x5e2   : > { %v12632_v18 = vpop.f32.mrf.mxu1  ;;  %12926 = vmatprep.subr.bf16.mxu1 %v18322_v31  ;;  %v21245_v51 = vadd.f32 %v12630_v1, %v12590_v37  ;;  %v12592_v63 = vadd.f32 %v12591_v55, %v21176_v4  ;;  %12915 = vmatprep.mubr.bf16.mxu0 %v20058_v46  ;;  %v18331_v46 = vld [vmem:[%s19371_s23 + $0x1e8c] ss:$16 sps:$4 sm:$0xff]   ;;  %v18329_v4 = vld [vmem:[%s19371_s23 + $0x1e88] ss:$16 sps:$4 sm:$0xff]  }
 0x5e3   : > { %12956 = vmatprep.mubr.bf16.mxu1 %v20144_v32  ;;  %v12593_v17 = vpop.f32.mrf.mxu0  ;;  %v18334_v32 = vld [vmem:[%s19371_s23 + $0x208c] ss:$16 sps:$4 sm:$0xff]   ;;  %v18371_v31 = vld [vmem:[%s19371_s23 + $0x1fa8] ss:$16 sps:$4 sm:$0xff]  }
 0x5e4   : > { %v12634_v21 = vpop.f32.mrf.mxu1  ;;  %v21250_v13 = vadd.f32 %v12632_v18, %v12592_v63  ;;  %12886 = vmatpush1.bf16.msra.mxu0 %v18317_v44  ;;  %v18376_v14 = vld [vmem:[%s19371_s23 + $0x21ac] ss:$16 sps:$4 sm:$0xff]   ;;  %v18377_v44 = vld [vmem:[%s19371_s23 + $0x1f88] ss:$16 sps:$4 sm:$0xff]  }
 0x5e5   : > { %12927 = vmatpush1.bf16.msra.mxu1 %v18320_v19  ;;  %v12594_v42 = vpop.f32.mrf.mxu0  ;;  %12887 = vmatprep.subr.bf16.mxu0 %v18325_v33  ;;  %v18379_v1 = vld [vmem:[%s19371_s23 + $0x1f8c] ss:$16 sps:$4 sm:$0xff]   ;;  %v18380_v19 = vld [vmem:[%s19371_s23 + $0x2188] ss:$16 sps:$4 sm:$0xff]  }
 0x5e6   : > { %v12635_v30 = vpop.f32.mrf.mxu1  ;;  %12928 = vmatprep.subr.bf16.mxu1 %v18328_v35  ;;  %v18382_v37 = vld [vmem:[%s19371_s23 + $0x218c] ss:$16 sps:$4 sm:$0xff]   ;;  %v18383_v33 = vld [vmem:[%s19371_s23 + $0x1f68] ss:$16 sps:$4 sm:$0xff]  }
 0x5e7   : > { %v18385_v55 = vld [vmem:[%s19371_s23 + $0x1f6c] ss:$16 sps:$4 sm:$0xff]   ;;  %v18386_v35 = vld [vmem:[%s19371_s23 + $0x2168] ss:$16 sps:$4 sm:$0xff]  }
 0x5e8   : > { %12888 = vmatpush1.bf16.msra.mxu0 %v18323_v11  ;;  %v18388_v18 = vld [vmem:[%s19371_s23 + $0x216c] ss:$16 sps:$4 sm:$0xff]   ;;  %v18389_v21 = vld [vmem:[%s19371_s23 + $0x1f48] ss:$16 sps:$4 sm:$0xff]  }
 0x5e9   : > { %12929 = vmatpush1.bf16.msra.mxu1 %v18326_v24  ;;  %12889 = vmatprep.subr.bf16.mxu0 %v18331_v46  ;;  %v18391_v63 = vld [vmem:[%s19371_s23 + $0x1f4c] ss:$16 sps:$4 sm:$0xff]   ;;  %v18392_v11 = vld [vmem:[%s19371_s23 + $0x2148] ss:$16 sps:$4 sm:$0xff]  }
 0x5ea   : > { %12930 = vmatprep.subr.bf16.mxu1 %v18334_v32  ;;  %v18394_v17 = vld [vmem:[%s19371_s23 + $0x214c] ss:$16 sps:$4 sm:$0xff]   ;;  %v18395_v30 = vld [vmem:[%s19371_s23 + $0x1f28] ss:$16 sps:$4 sm:$0xff]  }
 0x5eb   : > { %v18397_v24 = vld [vmem:[%s19371_s23 + $0x1f2c] ss:$16 sps:$4 sm:$0xff]   ;;  %v18398_v46 = vld [vmem:[%s19371_s23 + $0x2128] ss:$16 sps:$4 sm:$0xff]  }
 0x5ec   : > { %12890 = vmatpush1.bf16.msra.mxu0 %v18329_v4  ;;  %v18400_v42 = vld [vmem:[%s19371_s23 + $0x212c] ss:$16 sps:$4 sm:$0xff]  }
 0x5ed   : > { %12931 = vmatpush1.bf16.msra.mxu1 %v18332_v38  ;;  %12891 = vmatprep.subr.bf16.mxu0 %v18337_v60  ;;  %v18403_v32 = vld [vmem:[%s19371_s23 + $0x1f0c] ss:$16 sps:$4 sm:$0xff]   ;;  %v18401_v38 = vld [vmem:[%s19371_s23 + $0x1f08] ss:$16 sps:$4 sm:$0xff]  }
 0x5ee   : > { %12932 = vmatprep.subr.bf16.mxu1 %v18340_v20  ;;  %v18406_v4 = vld [vmem:[%s19371_s23 + $0x210c] ss:$16 sps:$4 sm:$0xff]   ;;  %v18404_v60 = vld [vmem:[%s19371_s23 + $0x2108] ss:$16 sps:$4 sm:$0xff]  }
 0x5ef   : > { %v18409_v20 = vld [vmem:[%s19371_s23 + $0x22ec] ss:$16 sps:$4 sm:$0xff]  }
 0x5f0   : > { %12892 = vmatpush1.bf16.msra.mxu0 %v18335_v2  ;;  %v18412_v2 = vld [vmem:[%s19371_s23 + $0x24ec] ss:$16 sps:$4 sm:$0xff]  }
 0x5f1   : > { %12933 = vmatpush1.bf16.msra.mxu1 %v18338_v7  ;;  %12893 = vmatprep.subr.bf16.mxu0 %v18343_v16  ;;  %v18407_v7 = vld [vmem:[%s19371_s23 + $0x22e8] ss:$16 sps:$4 sm:$0xff]  }
 0x5f2   : > { %12934 = vmatprep.subr.bf16.mxu1 %v18346_v59  ;;  %v18410_v16 = vld [vmem:[%s19371_s23 + $0x24e8] ss:$16 sps:$4 sm:$0xff]   ;;  %v18415_v59 = vld [vmem:[%s19371_s23 + $0x22cc] ss:$16 sps:$4 sm:$0xff]  }
 0x5f4   : > { %12894 = vmatpush1.bf16.msra.mxu0 %v18341_v40  ;;  %v18418_v40 = vld [vmem:[%s19371_s23 + $0x24cc] ss:$16 sps:$4 sm:$0xff]  }
 0x5f5   : > { %12935 = vmatpush1.bf16.msra.mxu1 %v18344_v48  ;;  %12895 = vmatprep.subr.bf16.mxu0 %v18349_v27 }
 0x5f6   : > { %12936 = vmatprep.subr.bf16.mxu1 %v18352_v62 }
 0x5f8   : > { %12896 = vmatpush1.bf16.msra.mxu0 %v18347_v5  ;;  %v18413_v5 = vld [vmem:[%s19371_s23 + $0x22c8] ss:$16 sps:$4 sm:$0xff]  }
 0x5f9   : > { %12937 = vmatpush1.bf16.msra.mxu1 %v18350_v10  ;;  %12897 = vmatprep.subr.bf16.mxu0 %v18355_v34  ;;  %v18416_v10 = vld [vmem:[%s19371_s23 + $0x24c8] ss:$16 sps:$4 sm:$0xff]  }
 0x5fa   : > { %12938 = vmatprep.subr.bf16.mxu1 %v18358_v52 }
 0x5fc   : > { %12898 = vmatpush1.bf16.msra.mxu0 %v18353_v36  ;;  %v18421_v36 = vld [vmem:[%s19371_s23 + $0x22ac] ss:$16 sps:$4 sm:$0xff]  }
 0x5fd   : > { %12939 = vmatpush1.bf16.msra.mxu1 %v18356_v50  ;;  %12899 = vmatprep.subr.bf16.mxu0 %v18361_v12  ;;  %v18424_v50 = vld [vmem:[%s19371_s23 + $0x24ac] ss:$16 sps:$4 sm:$0xff]  }
 0x5fe   : > { %12940 = vmatprep.subr.bf16.mxu1 %v18364_v26 }
 0x600   : > { %12900 = vmatpush2.bf16.msra.mxu0 %v18359_v15  ;;  %v18419_v15 = vld [vmem:[%s19371_s23 + $0x22a8] ss:$16 sps:$4 sm:$0xff]  }
 0x601   : > { %12941 = vmatpush2.bf16.msra.mxu1 %v18362_v47  ;;  %12901 = vmatprep.subr.bf16.mxu0 %v18367_v23  ;;  %v18422_v47 = vld [vmem:[%s19371_s23 + $0x24a8] ss:$16 sps:$4 sm:$0xff]  }
 0x602   : > { %12942 = vmatprep.subr.bf16.mxu1 %v18370_v25 }
 0x604   : > { %12902 = vmatpush2.bf16.msra.mxu0 %v18365_v8  ;;  %v18428_v8 = vld [vmem:[%s19371_s23 + $0x2488] ss:$16 sps:$4 sm:$0xff]  }
 0x605   : > { %12943 = vmatpush2.bf16.msra.mxu1 %v18368_v53  ;;  %12903 = vmatprep.subr.bf16.mxu0 %v18373_v6  ;;  %v18433_v53 = vld [vmem:[%s19371_s23 + $0x226c] ss:$16 sps:$4 sm:$0xff]  }
 0x606   : > { %12944 = vmatprep.subr.bf16.mxu1 %v18376_v14  ;;  %v18436_v6 = vld [vmem:[%s19371_s23 + $0x246c] ss:$16 sps:$4 sm:$0xff]   ;;  %v18431_v14 = vld [vmem:[%s19371_s23 + $0x2268] ss:$16 sps:$4 sm:$0xff]  }
 0x608   : > { %12904 = vmatpush2.bf16.msra.mxu0 %v18371_v31  ;;  %v18434_v31 = vld [vmem:[%s19371_s23 + $0x2468] ss:$16 sps:$4 sm:$0xff]  }
 0x609   : > { %12945 = vmatpush2.bf16.msra.mxu1 %v18374_v49  ;;  %12905 = vmatprep.subr.bf16.mxu0 %v18379_v1  ;;  %v18439_v49 = vld [vmem:[%s19371_s23 + $0x224c] ss:$16 sps:$4 sm:$0xff]  }
 0x60a   : > { %12946 = vmatprep.subr.bf16.mxu1 %v18382_v37  ;;  %v18442_v1 = vld [vmem:[%s19371_s23 + $0x244c] ss:$16 sps:$4 sm:$0xff]   ;;  %v18437_v37 = vld [vmem:[%s19371_s23 + $0x2248] ss:$16 sps:$4 sm:$0xff]  }
 0x60c   : > { %12906 = vmatpush2.bf16.msra.mxu0 %v18377_v44  ;;  %v18440_v44 = vld [vmem:[%s19371_s23 + $0x2448] ss:$16 sps:$4 sm:$0xff]  }
 0x60d   : > { %12947 = vmatpush2.bf16.msra.mxu1 %v18380_v19  ;;  %12907 = vmatprep.subr.bf16.mxu0 %v18385_v55  ;;  %v18445_v19 = vld [vmem:[%s19371_s23 + $0x222c] ss:$16 sps:$4 sm:$0xff]  }
 0x60e   : > { %12948 = vmatprep.subr.bf16.mxu1 %v18388_v18  ;;  %v18448_v55 = vld [vmem:[%s19371_s23 + $0x242c] ss:$16 sps:$4 sm:$0xff]   ;;  %v18443_v18 = vld [vmem:[%s19371_s23 + $0x2228] ss:$16 sps:$4 sm:$0xff]  }
 0x610   : > { %12908 = vmatpush2.bf16.msra.mxu0 %v18383_v33  ;;  %v18446_v33 = vld [vmem:[%s19371_s23 + $0x2428] ss:$16 sps:$4 sm:$0xff]  }
 0x611   : > { %12949 = vmatpush2.bf16.msra.mxu1 %v18386_v35  ;;  %12909 = vmatprep.subr.bf16.mxu0 %v18391_v63  ;;  %v18451_v35 = vld [vmem:[%s19371_s23 + $0x220c] ss:$16 sps:$4 sm:$0xff]  }
 0x612   : > { %12950 = vmatprep.subr.bf16.mxu1 %v18394_v17  ;;  %v18454_v63 = vld [vmem:[%s19371_s23 + $0x240c] ss:$16 sps:$4 sm:$0xff]   ;;  %v18449_v17 = vld [vmem:[%s19371_s23 + $0x2208] ss:$16 sps:$4 sm:$0xff]  }
 0x614   : > { %12910 = vmatpush2.bf16.msra.mxu0 %v18389_v21  ;;  %v18452_v21 = vld [vmem:[%s19371_s23 + $0x2408] ss:$16 sps:$4 sm:$0xff]  }
 0x615   : > { %12951 = vmatpush2.bf16.msra.mxu1 %v18392_v11  ;;  %12911 = vmatprep.subr.bf16.mxu0 %v18397_v24  ;;  %v18457_v11 = vld [vmem:[%s19371_s23 + $0x23ec] ss:$16 sps:$4 sm:$0xff]  }
 0x616   : > { %12952 = vmatprep.subr.bf16.mxu1 %v18400_v42  ;;  %v18460_v24 = vld [vmem:[%s19371_s23 + $0x25ec] ss:$16 sps:$4 sm:$0xff]   ;;  %v18455_v42 = vld [vmem:[%s19371_s23 + $0x23e8] ss:$16 sps:$4 sm:$0xff]  }
 0x618   : > { %12912 = vmatpush2.bf16.msra.mxu0 %v18395_v30  ;;  %v18458_v30 = vld [vmem:[%s19371_s23 + $0x25e8] ss:$16 sps:$4 sm:$0xff]  }
 0x619   : > { %12953 = vmatpush2.bf16.msra.mxu1 %v18398_v46  ;;  %12913 = vmatprep.subr.bf16.mxu0 %v18403_v32  ;;  %v18463_v46 = vld [vmem:[%s19371_s23 + $0x23cc] ss:$16 sps:$4 sm:$0xff]  }
 0x61a   : > { %12954 = vmatprep.subr.bf16.mxu1 %v18406_v4  ;;  %v18466_v32 = vld [vmem:[%s19371_s23 + $0x25cc] ss:$16 sps:$4 sm:$0xff]   ;;  %v18461_v4 = vld [vmem:[%s19371_s23 + $0x23c8] ss:$16 sps:$4 sm:$0xff]  }
 0x61c   : > { %12914 = vmatpush2.bf16.msra.mxu0 %v18401_v38  ;;  %v18464_v38 = vld [vmem:[%s19371_s23 + $0x25c8] ss:$16 sps:$4 sm:$0xff]  }
 0x61d   : > { %12955 = vmatpush2.bf16.msra.mxu1 %v18404_v60  ;;  %12965 = vmatprep.subr.bf16.mxu0 %v18409_v20  ;;  %v18469_v60 = vld [vmem:[%s19371_s23 + $0x23ac] ss:$16 sps:$4 sm:$0xff]  }
 0x61e   : > { %13006 = vmatprep.subr.bf16.mxu1 %v18412_v2  ;;  %v18472_v20 = vld [vmem:[%s19371_s23 + $0x25ac] ss:$16 sps:$4 sm:$0xff]   ;;  %v18467_v2 = vld [vmem:[%s19371_s23 + $0x23a8] ss:$16 sps:$4 sm:$0xff]  }
 0x61f   : > { %v12671_v48 = vpop.f32.mrf.mxu0  ;;  %12916 = vmatmul.mubr.bf16.vlgmr.msra.gmra.mxu0 %v20148_v29 }
 0x620   : > { %v12712_v27 = vpop.f32.mrf.mxu1  ;;  %12957 = vmatmul.mubr.bf16.vlgmr.msra.gmra.mxu1 %v20231_v54  ;;  %v12672_v62 = vadd.f32 %v12671_v48, %v21245_v51  ;;  %12966 = vmatpush1.bf16.msra.mxu0 %v18407_v7  ;;  %v18470_v7 = vld [vmem:[%s19371_s23 + $0x25a8] ss:$16 sps:$4 sm:$0xff]  }
 0x621   : > { %13007 = vmatpush1.bf16.msra.mxu1 %v18410_v16  ;;  %v12673_v34 = vpop.f32.mrf.mxu0  ;;  %12967 = vmatprep.subr.bf16.mxu0 %v18415_v59  ;;  %v18475_v16 = vld [vmem:[%s19371_s23 + $0x238c] ss:$16 sps:$4 sm:$0xff]   ;;  %v18476_v48 = vld [vmem:[%s19371_s23 + $0x2588] ss:$16 sps:$4 sm:$0xff]  }
 0x622   : > { %v12714_v52 = vpop.f32.mrf.mxu1  ;;  %13008 = vmatprep.subr.bf16.mxu1 %v18418_v40  ;;  %v21319_v12 = vadd.f32 %v12712_v27, %v12672_v62  ;;  %v12674_v29 = vadd.f32 %v12673_v34, %v21250_v13  ;;  %12997 = vmatprep.mubr.bf16.mxu0 %v20156_v45  ;;  %v18427_v45 = vld [vmem:[%s19371_s23 + $0x228c] ss:$16 sps:$4 sm:$0xff]   ;;  %v18425_v13 = vld [vmem:[%s19371_s23 + $0x2288] ss:$16 sps:$4 sm:$0xff]  }
 0x623   : > { %13038 = vmatprep.mubr.bf16.mxu1 %v20240_v39  ;;  %v12675_v54 = vpop.f32.mrf.mxu0  ;;  %v18430_v39 = vld [vmem:[%s19371_s23 + $0x248c] ss:$16 sps:$4 sm:$0xff]   ;;  %v18473_v40 = vld [vmem:[%s19371_s23 + $0x2388] ss:$16 sps:$4 sm:$0xff]  }
 0x624   : > { %v12716_v51 = vpop.f32.mrf.mxu1  ;;  %v21324_v26 = vadd.f32 %v12714_v52, %v12674_v29  ;;  %12968 = vmatpush1.bf16.msra.mxu0 %v18413_v5  ;;  %v18478_v59 = vld [vmem:[%s19371_s23 + $0x258c] ss:$16 sps:$4 sm:$0xff]   ;;  %v18479_v5 = vld [vmem:[%s19371_s23 + $0x2368] ss:$16 sps:$4 sm:$0xff]  }
 0x625   : > { %13009 = vmatpush1.bf16.msra.mxu1 %v18416_v10  ;;  %v12676_v23 = vpop.f32.mrf.mxu0  ;;  %12969 = vmatprep.subr.bf16.mxu0 %v18421_v36  ;;  %v18481_v27 = vld [vmem:[%s19371_s23 + $0x236c] ss:$16 sps:$4 sm:$0xff]   ;;  %v18482_v10 = vld [vmem:[%s19371_s23 + $0x2568] ss:$16 sps:$4 sm:$0xff]  }
 0x626   : > { %v12717_v25 = vpop.f32.mrf.mxu1  ;;  %13010 = vmatprep.subr.bf16.mxu1 %v18424_v50  ;;  %v18484_v62 = vld [vmem:[%s19371_s23 + $0x256c] ss:$16 sps:$4 sm:$0xff]   ;;  %v18485_v36 = vld [vmem:[%s19371_s23 + $0x2348] ss:$16 sps:$4 sm:$0xff]  }
 0x627   : > { %v18487_v34 = vld [vmem:[%s19371_s23 + $0x234c] ss:$16 sps:$4 sm:$0xff]   ;;  %v18488_v50 = vld [vmem:[%s19371_s23 + $0x2548] ss:$16 sps:$4 sm:$0xff]  }
 0x628   : > { %12970 = vmatpush1.bf16.msra.mxu0 %v18419_v15  ;;  %v18490_v52 = vld [vmem:[%s19371_s23 + $0x254c] ss:$16 sps:$4 sm:$0xff]   ;;  %v18491_v51 = vld [vmem:[%s19371_s23 + $0x2328] ss:$16 sps:$4 sm:$0xff]  }
 0x629   : > { %13011 = vmatpush1.bf16.msra.mxu1 %v18422_v47  ;;  %12971 = vmatprep.subr.bf16.mxu0 %v18427_v45  ;;  %v18493_v29 = vld [vmem:[%s19371_s23 + $0x232c] ss:$16 sps:$4 sm:$0xff]   ;;  %v18494_v15 = vld [vmem:[%s19371_s23 + $0x2528] ss:$16 sps:$4 sm:$0xff]  }
 0x62a   : > { %13012 = vmatprep.subr.bf16.mxu1 %v18430_v39  ;;  %v18496_v54 = vld [vmem:[%s19371_s23 + $0x252c] ss:$16 sps:$4 sm:$0xff]   ;;  %v18497_v25 = vld [vmem:[%s19371_s23 + $0x2308] ss:$16 sps:$4 sm:$0xff]  }
 0x62b   : > { %v18499_v47 = vld [vmem:[%s19371_s23 + $0x230c] ss:$16 sps:$4 sm:$0xff]   ;;  %v18500_v45 = vld [vmem:[%s19371_s23 + $0x2508] ss:$16 sps:$4 sm:$0xff]  }
 0x62c   : > { %12972 = vmatpush1.bf16.msra.mxu0 %v18425_v13  ;;  %v18502_v23 = vld [vmem:[%s19371_s23 + $0x250c] ss:$16 sps:$4 sm:$0xff]  }
 0x62d   : > { %13013 = vmatpush1.bf16.msra.mxu1 %v18428_v8  ;;  %12973 = vmatprep.subr.bf16.mxu0 %v18433_v53  ;;  %v18505_v39 = vld [vmem:[%s19371_s23 + $0x26ec] ss:$16 sps:$4 sm:$0xff]   ;;  %v18503_v8 = vld [vmem:[%s19371_s23 + $0x26e8] ss:$16 sps:$4 sm:$0xff]  }
 0x62e   : > { %13014 = vmatprep.subr.bf16.mxu1 %v18436_v6  ;;  %v18508_v13 = vld [vmem:[%s19371_s23 + $0x28ec] ss:$16 sps:$4 sm:$0xff]   ;;  %v18506_v53 = vld [vmem:[%s19371_s23 + $0x28e8] ss:$16 sps:$4 sm:$0xff]  }
 0x62f   : > { %v18511_v6 = vld [vmem:[%s19371_s23 + $0x26cc] ss:$16 sps:$4 sm:$0xff]  }
 0x630   : > { %12974 = vmatpush1.bf16.msra.mxu0 %v18431_v14  ;;  %v18514_v14 = vld [vmem:[%s19371_s23 + $0x28cc] ss:$16 sps:$4 sm:$0xff]  }
 0x631   : > { %13015 = vmatpush1.bf16.msra.mxu1 %v18434_v31  ;;  %12975 = vmatprep.subr.bf16.mxu0 %v18439_v49 }
 0x632   : > { %13016 = vmatprep.subr.bf16.mxu1 %v18442_v1 }
 0x634   : > { %12976 = vmatpush1.bf16.msra.mxu0 %v18437_v37  ;;  %v18509_v37 = vld [vmem:[%s19371_s23 + $0x26c8] ss:$16 sps:$4 sm:$0xff]  }
 0x635   : > { %13017 = vmatpush1.bf16.msra.mxu1 %v18440_v44  ;;  %12977 = vmatprep.subr.bf16.mxu0 %v18445_v19  ;;  %v18512_v44 = vld [vmem:[%s19371_s23 + $0x28c8] ss:$16 sps:$4 sm:$0xff]  }
 0x636   : > { %13018 = vmatprep.subr.bf16.mxu1 %v18448_v55 }
 0x638   : > { %12978 = vmatpush1.bf16.msra.mxu0 %v18443_v18  ;;  %v18517_v18 = vld [vmem:[%s19371_s23 + $0x26ac] ss:$16 sps:$4 sm:$0xff]  }
 0x639   : > { %13019 = vmatpush1.bf16.msra.mxu1 %v18446_v33  ;;  %12979 = vmatprep.subr.bf16.mxu0 %v18451_v35  ;;  %v18520_v33 = vld [vmem:[%s19371_s23 + $0x28ac] ss:$16 sps:$4 sm:$0xff]  }
 0x63a   : > { %13020 = vmatprep.subr.bf16.mxu1 %v18454_v63 }
 0x63c   : > { %12980 = vmatpush1.bf16.msra.mxu0 %v18449_v17 }
 0x63d   : > { %13021 = vmatpush1.bf16.msra.mxu1 %v18452_v21  ;;  %12981 = vmatprep.subr.bf16.mxu0 %v18457_v11  ;;  %v18515_v21 = vld [vmem:[%s19371_s23 + $0x26a8] ss:$16 sps:$4 sm:$0xff]  }
 0x63e   : > { %13022 = vmatprep.subr.bf16.mxu1 %v18460_v24  ;;  %v18518_v11 = vld [vmem:[%s19371_s23 + $0x28a8] ss:$16 sps:$4 sm:$0xff]  }
 0x640   : > { %12982 = vmatpush2.bf16.msra.mxu0 %v18455_v42 }
 0x641   : > { %13023 = vmatpush2.bf16.msra.mxu1 %v18458_v30  ;;  %12983 = vmatprep.subr.bf16.mxu0 %v18463_v46  ;;  %v18521_v30 = vld [vmem:[%s19371_s23 + $0x2688] ss:$16 sps:$4 sm:$0xff]  }
 0x642   : > { %13024 = vmatprep.subr.bf16.mxu1 %v18466_v32  ;;  %v18524_v46 = vld [vmem:[%s19371_s23 + $0x2888] ss:$16 sps:$4 sm:$0xff]   ;;  %v18529_v32 = vld [vmem:[%s19371_s23 + $0x266c] ss:$16 sps:$4 sm:$0xff]  }
 0x644   : > { %12984 = vmatpush2.bf16.msra.mxu0 %v18461_v4  ;;  %v18532_v4 = vld [vmem:[%s19371_s23 + $0x286c] ss:$16 sps:$4 sm:$0xff]  }
 0x645   : > { %13025 = vmatpush2.bf16.msra.mxu1 %v18464_v38  ;;  %12985 = vmatprep.subr.bf16.mxu0 %v18469_v60  ;;  %v18527_v38 = vld [vmem:[%s19371_s23 + $0x2668] ss:$16 sps:$4 sm:$0xff]  }
 0x646   : > { %13026 = vmatprep.subr.bf16.mxu1 %v18472_v20  ;;  %v18530_v60 = vld [vmem:[%s19371_s23 + $0x2868] ss:$16 sps:$4 sm:$0xff]   ;;  %v18535_v20 = vld [vmem:[%s19371_s23 + $0x264c] ss:$16 sps:$4 sm:$0xff]  }
 0x648   : > { %12986 = vmatpush2.bf16.msra.mxu0 %v18467_v2  ;;  %v18538_v2 = vld [vmem:[%s19371_s23 + $0x284c] ss:$16 sps:$4 sm:$0xff]  }
 0x649   : > { %13027 = vmatpush2.bf16.msra.mxu1 %v18470_v7  ;;  %12987 = vmatprep.subr.bf16.mxu0 %v18475_v16  ;;  %v18533_v7 = vld [vmem:[%s19371_s23 + $0x2648] ss:$16 sps:$4 sm:$0xff]  }
 0x64a   : > { %13028 = vmatprep.subr.bf16.mxu1 %v18478_v59  ;;  %v18536_v16 = vld [vmem:[%s19371_s23 + $0x2848] ss:$16 sps:$4 sm:$0xff]   ;;  %v18541_v59 = vld [vmem:[%s19371_s23 + $0x262c] ss:$16 sps:$4 sm:$0xff]  }
 0x64c   : > { %12988 = vmatpush2.bf16.msra.mxu0 %v18473_v40  ;;  %v18544_v40 = vld [vmem:[%s19371_s23 + $0x282c] ss:$16 sps:$4 sm:$0xff]  }
 0x64d   : > { %13029 = vmatpush2.bf16.msra.mxu1 %v18476_v48  ;;  %12989 = vmatprep.subr.bf16.mxu0 %v18481_v27  ;;  %v18539_v48 = vld [vmem:[%s19371_s23 + $0x2628] ss:$16 sps:$4 sm:$0xff]  }
 0x64e   : > { %13030 = vmatprep.subr.bf16.mxu1 %v18484_v62  ;;  %v18542_v27 = vld [vmem:[%s19371_s23 + $0x2828] ss:$16 sps:$4 sm:$0xff]   ;;  %v18547_v62 = vld [vmem:[%s19371_s23 + $0x260c] ss:$16 sps:$4 sm:$0xff]  }
 0x650   : > { %12990 = vmatpush2.bf16.msra.mxu0 %v18479_v5  ;;  %v18550_v5 = vld [vmem:[%s19371_s23 + $0x280c] ss:$16 sps:$4 sm:$0xff]  }
 0x651   : > { %13031 = vmatpush2.bf16.msra.mxu1 %v18482_v10  ;;  %12991 = vmatprep.subr.bf16.mxu0 %v18487_v34  ;;  %v18545_v10 = vld [vmem:[%s19371_s23 + $0x2608] ss:$16 sps:$4 sm:$0xff]  }
 0x652   : > { %13032 = vmatprep.subr.bf16.mxu1 %v18490_v52  ;;  %v18548_v34 = vld [vmem:[%s19371_s23 + $0x2808] ss:$16 sps:$4 sm:$0xff]   ;;  %v18553_v52 = vld [vmem:[%s19371_s23 + $0x27ec] ss:$16 sps:$4 sm:$0xff]  }
 0x654   : > { %12992 = vmatpush2.bf16.msra.mxu0 %v18485_v36  ;;  %v18556_v36 = vld [vmem:[%s19371_s23 + $0x29ec] ss:$16 sps:$4 sm:$0xff]  }
 0x655   : > { %13033 = vmatpush2.bf16.msra.mxu1 %v18488_v50  ;;  %12993 = vmatprep.subr.bf16.mxu0 %v18493_v29  ;;  %v18551_v50 = vld [vmem:[%s19371_s23 + $0x27e8] ss:$16 sps:$4 sm:$0xff]  }
 0x656   : > { %13034 = vmatprep.subr.bf16.mxu1 %v18496_v54  ;;  %v18554_v29 = vld [vmem:[%s19371_s23 + $0x29e8] ss:$16 sps:$4 sm:$0xff]   ;;  %v18559_v54 = vld [vmem:[%s19371_s23 + $0x27cc] ss:$16 sps:$4 sm:$0xff]  }
 0x658   : > { %12994 = vmatpush2.bf16.msra.mxu0 %v18491_v51  ;;  %v18562_v51 = vld [vmem:[%s19371_s23 + $0x29cc] ss:$16 sps:$4 sm:$0xff]  }
 0x659   : > { %13035 = vmatpush2.bf16.msra.mxu1 %v18494_v15  ;;  %12995 = vmatprep.subr.bf16.mxu0 %v18499_v47  ;;  %v18557_v15 = vld [vmem:[%s19371_s23 + $0x27c8] ss:$16 sps:$4 sm:$0xff]  }
 0x65a   : > { %13036 = vmatprep.subr.bf16.mxu1 %v18502_v23  ;;  %v18560_v47 = vld [vmem:[%s19371_s23 + $0x29c8] ss:$16 sps:$4 sm:$0xff]   ;;  %v18565_v23 = vld [vmem:[%s19371_s23 + $0x27ac] ss:$16 sps:$4 sm:$0xff]  }
 0x65c   : > { %12996 = vmatpush2.bf16.msra.mxu0 %v18497_v25  ;;  %v18568_v25 = vld [vmem:[%s19371_s23 + $0x29ac] ss:$16 sps:$4 sm:$0xff]  }
 0x65d   : > { %13037 = vmatpush2.bf16.msra.mxu1 %v18500_v45  ;;  %13047 = vmatprep.subr.bf16.mxu0 %v18505_v39  ;;  %v18563_v45 = vld [vmem:[%s19371_s23 + $0x27a8] ss:$16 sps:$4 sm:$0xff]  }
 0x65e   : > { %13088 = vmatprep.subr.bf16.mxu1 %v18508_v13  ;;  %v18566_v39 = vld [vmem:[%s19371_s23 + $0x29a8] ss:$16 sps:$4 sm:$0xff]   ;;  %v18571_v13 = vld [vmem:[%s19371_s23 + $0x278c] ss:$16 sps:$4 sm:$0xff]  }
 0x65f   : > { %v12753_v31 = vpop.f32.mrf.mxu0  ;;  %12998 = vmatmul.mubr.bf16.vlgmr.msra.gmra.mxu0 %v20244_v3 }
 0x660   : > { %v12794_v49 = vpop.f32.mrf.mxu1  ;;  %13039 = vmatmul.mubr.bf16.vlgmr.msra.gmra.mxu1 %v20329_v9  ;;  %v12754_v1 = vadd.f32 %v12753_v31, %v21319_v12  ;;  %13048 = vmatpush1.bf16.msra.mxu0 %v18503_v8  ;;  %v21997_v9 = vld [vmem:[#allocation22_spill] sm:$0xff]  ;;  %v18574_v8 = vld [vmem:[%s19371_s23 + $0x298c] ss:$16 sps:$4 sm:$0xff]  }
 0x661   : > { %13089 = vmatpush1.bf16.msra.mxu1 %v18506_v53  ;;  %v12755_v19 = vpop.f32.mrf.mxu0  ;;  %13049 = vmatprep.subr.bf16.mxu0 %v18511_v6  ;;  %v18569_v53 = vld [vmem:[%s19371_s23 + $0x2788] ss:$16 sps:$4 sm:$0xff]   ;;  %v18580_v31 = vld [vmem:[%s19371_s23 + $0x296c] ss:$16 sps:$4 sm:$0xff]  }
 0x662   : > { %v12796_v55 = vpop.f32.mrf.mxu1  ;;  %13090 = vmatprep.subr.bf16.mxu1 %v18514_v14  ;;  %v21393_v35 = vadd.f32 %v12794_v49, %v12754_v1  ;;  %v12756_v3 = vadd.f32 %v12755_v19, %v21324_v26  ;;  %13079 = vmatprep.mubr.bf16.mxu0 %v20252_v0  ;;  %v18523_v0 = vld [vmem:[%s19371_s23 + $0x268c] ss:$16 sps:$4 sm:$0xff]   ;;  %v18572_v6 = vld [vmem:[%s19371_s23 + $0x2988] ss:$16 sps:$4 sm:$0xff]  }
 0x663   : > { %13120 = vmatprep.mubr.bf16.mxu1 %v21997_v9  ;;  %v12757_v12 = vpop.f32.mrf.mxu0  ;;  %v18526_v26 = vld [vmem:[%s19371_s23 + $0x288c] ss:$16 sps:$4 sm:$0xff]   ;;  %v18575_v49 = vld [vmem:[%s19371_s23 + $0x2768] ss:$16 sps:$4 sm:$0xff]  }
 0x664   : > { %v12798_v63 = vpop.f32.mrf.mxu1  ;;  %v21398_v17 = vadd.f32 %v12796_v55, %v12756_v3  ;;  %13050 = vmatpush1.bf16.msra.mxu0 %v18509_v37  ;;  %v18577_v14 = vld [vmem:[%s19371_s23 + $0x276c] ss:$16 sps:$4 sm:$0xff]   ;;  %v18578_v1 = vld [vmem:[%s19371_s23 + $0x2968] ss:$16 sps:$4 sm:$0xff]  }
 0x665   : > { %13091 = vmatpush1.bf16.msra.mxu1 %v18512_v44  ;;  %v12758_v24 = vpop.f32.mrf.mxu0  ;;  %13051 = vmatprep.subr.bf16.mxu0 %v18517_v18  ;;  %v18583_v37 = vld [vmem:[%s19371_s23 + $0x274c] ss:$16 sps:$4 sm:$0xff]   ;;  %v18581_v19 = vld [vmem:[%s19371_s23 + $0x2748] ss:$16 sps:$4 sm:$0xff]  }
 0x666   : > { %v12799_v42 = vpop.f32.mrf.mxu1  ;;  %13092 = vmatprep.subr.bf16.mxu1 %v18520_v33  ;;  %v18586_v44 = vld [vmem:[%s19371_s23 + $0x294c] ss:$16 sps:$4 sm:$0xff]   ;;  %v18584_v55 = vld [vmem:[%s19371_s23 + $0x2948] ss:$16 sps:$4 sm:$0xff]  }
 0x667   : > { %v18589_v18 = vld [vmem:[%s19371_s23 + $0x272c] ss:$16 sps:$4 sm:$0xff]   ;;  %v18587_v3 = vld [vmem:[%s19371_s23 + $0x2728] ss:$16 sps:$4 sm:$0xff]  }
 0x668   : > { %13052 = vmatpush1.bf16.msra.mxu0 %v18515_v21  ;;  %v18592_v33 = vld [vmem:[%s19371_s23 + $0x292c] ss:$16 sps:$4 sm:$0xff]   ;;  %v18590_v9 = vld [vmem:[%s19371_s23 + $0x2928] ss:$16 sps:$4 sm:$0xff]  }
 0x669   : > { %13093 = vmatpush1.bf16.msra.mxu1 %v18518_v11  ;;  %13053 = vmatprep.subr.bf16.mxu0 %v18523_v0  ;;  %v18595_v12 = vld [vmem:[%s19371_s23 + $0x270c] ss:$16 sps:$4 sm:$0xff]   ;;  %v18593_v21 = vld [vmem:[%s19371_s23 + $0x2708] ss:$16 sps:$4 sm:$0xff]  }
 0x66a   : > { %13094 = vmatprep.subr.bf16.mxu1 %v18526_v26  ;;  %v18598_v63 = vld [vmem:[%s19371_s23 + $0x290c] ss:$16 sps:$4 sm:$0xff]   ;;  %v18596_v11 = vld [vmem:[%s19371_s23 + $0x2908] ss:$16 sps:$4 sm:$0xff]  }
 0x66b   : > { %v18601_v24 = vld [vmem:[%s19371_s23 + $0x2aec] ss:$16 sps:$4 sm:$0xff]   ;;  %v18599_v0 = vld [vmem:[%s19371_s23 + $0x2ae8] ss:$16 sps:$4 sm:$0xff]  }
 0x66c   : > { %13054 = vmatpush1.bf16.msra.mxu0 %v18521_v30  ;;  %v18604_v42 = vld [vmem:[%s19371_s23 + $0x2cec] ss:$16 sps:$4 sm:$0xff]   ;;  %v18602_v26 = vld [vmem:[%s19371_s23 + $0x2ce8] ss:$16 sps:$4 sm:$0xff]  }
 0x66d   : > { %13095 = vmatpush1.bf16.msra.mxu1 %v18524_v46  ;;  %13055 = vmatprep.subr.bf16.mxu0 %v18529_v32  ;;  %v18607_v30 = vld [vmem:[%s19371_s23 + $0x2acc] ss:$16 sps:$4 sm:$0xff]  }
 0x66e   : > { %13096 = vmatprep.subr.bf16.mxu1 %v18532_v4  ;;  %v18610_v46 = vld [vmem:[%s19371_s23 + $0x2ccc] ss:$16 sps:$4 sm:$0xff]  }
 0x670   : > { %13056 = vmatpush1.bf16.msra.mxu0 %v18527_v38  ;;  %v21998_v38 = vld [vmem:[#allocation23_spill] sm:$0xff] }
 0x671   : > { %13097 = vmatpush1.bf16.msra.mxu1 %v18530_v60  ;;  %13057 = vmatprep.subr.bf16.mxu0 %v18535_v20  ;;  %v21999_v60 = vld [vmem:[#allocation25_spill] sm:$0xff] }
 0x672   : > { %13098 = vmatprep.subr.bf16.mxu1 %v18538_v2  ;;  %v18605_v2 = vld [vmem:[%s19371_s23 + $0x2ac8] ss:$16 sps:$4 sm:$0xff]  }
 0x674   : > { %13058 = vmatpush1.bf16.msra.mxu0 %v18533_v7  ;;  %v18608_v7 = vld [vmem:[%s19371_s23 + $0x2cc8] ss:$16 sps:$4 sm:$0xff]  }
 0x675   : > { %13099 = vmatpush1.bf16.msra.mxu1 %v18536_v16  ;;  %13059 = vmatprep.subr.bf16.mxu0 %v18541_v59 }
 0x676   : > { %13100 = vmatprep.subr.bf16.mxu1 %v18544_v40  ;;  %v18613_v40 = vld [vmem:[%s19371_s23 + $0x2aac] ss:$16 sps:$4 sm:$0xff]  }
 0x678   : > { %13060 = vmatpush1.bf16.msra.mxu0 %v18539_v48  ;;  %v18616_v48 = vld [vmem:[%s19371_s23 + $0x2cac] ss:$16 sps:$4 sm:$0xff]  }
 0x679   : > { %13101 = vmatpush1.bf16.msra.mxu1 %v18542_v27  ;;  %13061 = vmatprep.subr.bf16.mxu0 %v18547_v62 }
 0x67a   : > { %13102 = vmatprep.subr.bf16.mxu1 %v18550_v5  ;;  %v22000_v5 = vld [vmem:[#allocation24_spill] sm:$0xff] }
 0x67c   : > { %13062 = vmatpush1.bf16.msra.mxu0 %v18545_v10 }
 0x67d   : > { %13103 = vmatpush1.bf16.msra.mxu1 %v18548_v34  ;;  %13063 = vmatprep.subr.bf16.mxu0 %v18553_v52 }
 0x67e   : > { %13104 = vmatprep.subr.bf16.mxu1 %v18556_v36  ;;  %v18611_v36 = vld [vmem:[%s19371_s23 + $0x2aa8] ss:$16 sps:$4 sm:$0xff]  }
 0x680   : > { %13064 = vmatpush2.bf16.msra.mxu0 %v18551_v50  ;;  %v18614_v50 = vld [vmem:[%s19371_s23 + $0x2ca8] ss:$16 sps:$4 sm:$0xff]  }
 0x681   : > { %13105 = vmatpush2.bf16.msra.mxu1 %v18554_v29  ;;  %13065 = vmatprep.subr.bf16.mxu0 %v18559_v54 }
 0x682   : > { %13106 = vmatprep.subr.bf16.mxu1 %v18562_v51  ;;  %v18622_v51 = vld [vmem:[%s19371_s23 + $0x2c8c] ss:$16 sps:$4 sm:$0xff]  }
 0x684   : > { %13066 = vmatpush2.bf16.msra.mxu0 %v18557_v15  ;;  %v18617_v15 = vld [vmem:[%s19371_s23 + $0x2a88] ss:$16 sps:$4 sm:$0xff]  }
 0x685   : > { %13107 = vmatpush2.bf16.msra.mxu1 %v18560_v47  ;;  %13067 = vmatprep.subr.bf16.mxu0 %v18565_v23  ;;  %v18620_v47 = vld [vmem:[%s19371_s23 + $0x2c88] ss:$16 sps:$4 sm:$0xff]   ;;  %v18625_v23 = vld [vmem:[%s19371_s23 + $0x2a6c] ss:$16 sps:$4 sm:$0xff]  }
 0x686   : > { %13108 = vmatprep.subr.bf16.mxu1 %v18568_v25  ;;  %v18628_v25 = vld [vmem:[%s19371_s23 + $0x2c6c] ss:$16 sps:$4 sm:$0xff]  }
 0x688   : > { %13068 = vmatpush2.bf16.msra.mxu0 %v18563_v45  ;;  %v18623_v45 = vld [vmem:[%s19371_s23 + $0x2a68] ss:$16 sps:$4 sm:$0xff]  }
 0x689   : > { %13109 = vmatpush2.bf16.msra.mxu1 %v18566_v39  ;;  %13069 = vmatprep.subr.bf16.mxu0 %v18571_v13  ;;  %v18626_v39 = vld [vmem:[%s19371_s23 + $0x2c68] ss:$16 sps:$4 sm:$0xff]   ;;  %v18631_v13 = vld [vmem:[%s19371_s23 + $0x2a4c] ss:$16 sps:$4 sm:$0xff]  }
 0x68a   : > { %13110 = vmatprep.subr.bf16.mxu1 %v18574_v8  ;;  %v18634_v8 = vld [vmem:[%s19371_s23 + $0x2c4c] ss:$16 sps:$4 sm:$0xff]  }
 0x68c   : > { %13070 = vmatpush2.bf16.msra.mxu0 %v18569_v53  ;;  %v18629_v53 = vld [vmem:[%s19371_s23 + $0x2a48] ss:$16 sps:$4 sm:$0xff]  }
 0x68d   : > { %13111 = vmatpush2.bf16.msra.mxu1 %v18572_v6  ;;  %13071 = vmatprep.subr.bf16.mxu0 %v18577_v14  ;;  %v18632_v6 = vld [vmem:[%s19371_s23 + $0x2c48] ss:$16 sps:$4 sm:$0xff]   ;;  %v18637_v14 = vld [vmem:[%s19371_s23 + $0x2a2c] ss:$16 sps:$4 sm:$0xff]  }
 0x68e   : > { %13112 = vmatprep.subr.bf16.mxu1 %v18580_v31  ;;  %v18640_v31 = vld [vmem:[%s19371_s23 + $0x2c2c] ss:$16 sps:$4 sm:$0xff]  }
 0x690   : > { %13072 = vmatpush2.bf16.msra.mxu0 %v18575_v49  ;;  %v18635_v49 = vld [vmem:[%s19371_s23 + $0x2a28] ss:$16 sps:$4 sm:$0xff]  }
 0x691   : > { %13113 = vmatpush2.bf16.msra.mxu1 %v18578_v1  ;;  %13073 = vmatprep.subr.bf16.mxu0 %v18583_v37  ;;  %v18638_v1 = vld [vmem:[%s19371_s23 + $0x2c28] ss:$16 sps:$4 sm:$0xff]   ;;  %v18643_v37 = vld [vmem:[%s19371_s23 + $0x2a0c] ss:$16 sps:$4 sm:$0xff]  }
 0x692   : > { %13114 = vmatprep.subr.bf16.mxu1 %v18586_v44  ;;  %v18646_v44 = vld [vmem:[%s19371_s23 + $0x2c0c] ss:$16 sps:$4 sm:$0xff]  }
 0x694   : > { %13074 = vmatpush2.bf16.msra.mxu0 %v18581_v19  ;;  %v18641_v19 = vld [vmem:[%s19371_s23 + $0x2a08] ss:$16 sps:$4 sm:$0xff]  }
 0x695   : > { %13115 = vmatpush2.bf16.msra.mxu1 %v18584_v55  ;;  %13075 = vmatprep.subr.bf16.mxu0 %v18589_v18  ;;  %v18644_v55 = vld [vmem:[%s19371_s23 + $0x2c08] ss:$16 sps:$4 sm:$0xff]   ;;  %v18649_v18 = vld [vmem:[%s19371_s23 + $0x2bec] ss:$16 sps:$4 sm:$0xff]  }
 0x696   : > { %13116 = vmatprep.subr.bf16.mxu1 %v18592_v33  ;;  %v18652_v33 = vld [vmem:[%s19371_s23 + $0x2dec] ss:$16 sps:$4 sm:$0xff]  }
 0x698   : > { %13076 = vmatpush2.bf16.msra.mxu0 %v18587_v3  ;;  %v18647_v3 = vld [vmem:[%s19371_s23 + $0x2be8] ss:$16 sps:$4 sm:$0xff]  }
 0x699   : > { %13117 = vmatpush2.bf16.msra.mxu1 %v18590_v9  ;;  %13077 = vmatprep.subr.bf16.mxu0 %v18595_v12  ;;  %v18650_v9 = vld [vmem:[%s19371_s23 + $0x2de8] ss:$16 sps:$4 sm:$0xff]   ;;  %v18655_v12 = vld [vmem:[%s19371_s23 + $0x2bcc] ss:$16 sps:$4 sm:$0xff]  }
 0x69a   : > { %13118 = vmatprep.subr.bf16.mxu1 %v18598_v63  ;;  %v18658_v63 = vld [vmem:[%s19371_s23 + $0x2dcc] ss:$16 sps:$4 sm:$0xff]  }
 0x69c   : > { %13078 = vmatpush2.bf16.msra.mxu0 %v18593_v21  ;;  %v18653_v21 = vld [vmem:[%s19371_s23 + $0x2bc8] ss:$16 sps:$4 sm:$0xff]  }
 0x69d   : > { %13119 = vmatpush2.bf16.msra.mxu1 %v18596_v11  ;;  %13129 = vmatprep.subr.bf16.mxu0 %v18601_v24  ;;  %v18656_v11 = vld [vmem:[%s19371_s23 + $0x2dc8] ss:$16 sps:$4 sm:$0xff]   ;;  %v18661_v24 = vld [vmem:[%s19371_s23 + $0x2bac] ss:$16 sps:$4 sm:$0xff]  }
 0x69e   : > { %13170 = vmatprep.subr.bf16.mxu1 %v18604_v42  ;;  %v18664_v42 = vld [vmem:[%s19371_s23 + $0x2dac] ss:$16 sps:$4 sm:$0xff]  }
 0x69f   : > { %v12835_v32 = vpop.f32.mrf.mxu0  ;;  %13080 = vmatmul.mubr.bf16.vlgmr.msra.gmra.mxu0 %v21998_v38  ;;  %v18673_v38 = vld [vmem:[%s19371_s23 + $0x2b6c] ss:$16 sps:$4 sm:$0xff]  }
 0x6a0   : > { %v12876_v4 = vpop.f32.mrf.mxu1  ;;  %13121 = vmatmul.mubr.bf16.vlgmr.msra.gmra.mxu1 %v21999_v60  ;;  %v12836_v20 = vadd.f32 %v12835_v32, %v21393_v35  ;;  %13130 = vmatpush1.bf16.msra.mxu0 %v18599_v0  ;;  %v22001_v35 = vld [vmem:[#allocation26_spill] sm:$0xff]  ;;  %v18676_v60 = vld [vmem:[%s19371_s23 + $0x2d6c] ss:$16 sps:$4 sm:$0xff]  }
 0x6a1   : > { %13171 = vmatpush1.bf16.msra.mxu1 %v18602_v26  ;;  %v12837_v16 = vpop.f32.mrf.mxu0  ;;  %13131 = vmatprep.subr.bf16.mxu0 %v18607_v30  ;;  %v18659_v0 = vld [vmem:[%s19371_s23 + $0x2ba8] ss:$16 sps:$4 sm:$0xff]   ;;  %v18667_v30 = vld [vmem:[%s19371_s23 + $0x2b8c] ss:$16 sps:$4 sm:$0xff]  }
 0x6a2   : > { %v12878_v59 = vpop.f32.mrf.mxu1  ;;  %13172 = vmatprep.subr.bf16.mxu1 %v18610_v46  ;;  %v21467_v27 = vadd.f32 %v12876_v4, %v12836_v20  ;;  %v12838_v62 = vadd.f32 %v12837_v16, %v21398_v17  ;;  %13161 = vmatprep.mubr.bf16.mxu0 %v22000_v5  ;;  %v18619_v17 = vld [vmem:[%s19371_s23 + $0x2a8c] ss:$16 sps:$4 sm:$0xff]   ;;  %v18662_v26 = vld [vmem:[%s19371_s23 + $0x2da8] ss:$16 sps:$4 sm:$0xff]  }
 0x6a3   : > { %13202 = vmatprep.mubr.bf16.mxu1 %v22001_v35  ;;  %v12839_v10 = vpop.f32.mrf.mxu0  ;;  %v18670_v46 = vld [vmem:[%s19371_s23 + $0x2d8c] ss:$16 sps:$4 sm:$0xff]   ;;  %v18665_v32 = vld [vmem:[%s19371_s23 + $0x2b88] ss:$16 sps:$4 sm:$0xff]  }
 0x6a4   : > { %v12880_v34 = vpop.f32.mrf.mxu1  ;;  %v21472_v52 = vadd.f32 %v12878_v59, %v12838_v62  ;;  %13132 = vmatpush1.bf16.msra.mxu0 %v18605_v2  ;;  %v18668_v4 = vld [vmem:[%s19371_s23 + $0x2d88] ss:$16 sps:$4 sm:$0xff]   ;;  %v18682_v16 = vld [vmem:[%s19371_s23 + $0x2d4c] ss:$16 sps:$4 sm:$0xff]  }
 0x6a5   : > { %13173 = vmatpush1.bf16.msra.mxu1 %v18608_v7  ;;  %v12840_v29 = vpop.f32.mrf.mxu0  ;;  %13133 = vmatprep.subr.bf16.mxu0 %v18613_v40  ;;  %v18671_v20 = vld [vmem:[%s19371_s23 + $0x2b68] ss:$16 sps:$4 sm:$0xff]   ;;  %v18679_v7 = vld [vmem:[%s19371_s23 + $0x2b4c] ss:$16 sps:$4 sm:$0xff]  }
 0x6a6   : > { %v12881_v54 = vpop.f32.mrf.mxu1  ;;  %13174 = vmatprep.subr.bf16.mxu1 %v18616_v48  ;;  %v18674_v2 = vld [vmem:[%s19371_s23 + $0x2d68] ss:$16 sps:$4 sm:$0xff]   ;;  %v18685_v48 = vld [vmem:[%s19371_s23 + $0x2b2c] ss:$16 sps:$4 sm:$0xff]  }
 0x6a7   : > { %v18677_v59 = vld [vmem:[%s19371_s23 + $0x2b48] ss:$16 sps:$4 sm:$0xff]   ;;  %v18688_v62 = vld [vmem:[%s19371_s23 + $0x2d2c] ss:$16 sps:$4 sm:$0xff]  }
 0x6a8   : > { %13134 = vmatpush1.bf16.msra.mxu0 %v18611_v36  ;;  %v18680_v40 = vld [vmem:[%s19371_s23 + $0x2d48] ss:$16 sps:$4 sm:$0xff]   ;;  %v18691_v10 = vld [vmem:[%s19371_s23 + $0x2b0c] ss:$16 sps:$4 sm:$0xff]  }
 0x6a9   : > { %13175 = vmatpush1.bf16.msra.mxu1 %v18614_v50  ;;  %13135 = vmatprep.subr.bf16.mxu0 %v18619_v17  ;;  %v18683_v5 = vld [vmem:[%s19371_s23 + $0x2b28] ss:$16 sps:$4 sm:$0xff]   ;;  %v18694_v34 = vld [vmem:[%s19371_s23 + $0x2d0c] ss:$16 sps:$4 sm:$0xff]  }
 0x6aa   : > { %13176 = vmatprep.subr.bf16.mxu1 %v18622_v51  ;;  %v18686_v35 = vld [vmem:[%s19371_s23 + $0x2d28] ss:$16 sps:$4 sm:$0xff]   ;;  %v18697_v29 = vld [vmem:[%s19371_s23 + $0x2eec] ss:$16 sps:$4 sm:$0xff]  }
 0x6ab   : > { %v18689_v36 = vld [vmem:[%s19371_s23 + $0x2b08] ss:$16 sps:$4 sm:$0xff]   ;;  %v18700_v54 = vld [vmem:[%s19371_s23 + $0x30ec] ss:$16 sps:$4 sm:$0xff]  }
 0x6ac   : > { %13136 = vmatpush1.bf16.msra.mxu0 %v18617_v15  ;;  %v18692_v50 = vld [vmem:[%s19371_s23 + $0x2d08] ss:$16 sps:$4 sm:$0xff]   ;;  %v18703_v15 = vld [vmem:[%s19371_s23 + $0x2ecc] ss:$16 sps:$4 sm:$0xff]  }
 0x6ad   : > { %13177 = vmatpush1.bf16.msra.mxu1 %v18620_v47  ;;  %13137 = vmatprep.subr.bf16.mxu0 %v18625_v23  ;;  %v18695_v17 = vld [vmem:[%s19371_s23 + $0x2ee8] ss:$16 sps:$4 sm:$0xff]   ;;  %v18706_v47 = vld [vmem:[%s19371_s23 + $0x30cc] ss:$16 sps:$4 sm:$0xff]  }
 0x6ae   : > { %13178 = vmatprep.subr.bf16.mxu1 %v18628_v25  ;;  %v18698_v51 = vld [vmem:[%s19371_s23 + $0x30e8] ss:$16 sps:$4 sm:$0xff]  }
 0x6b0   : > { %13138 = vmatpush1.bf16.msra.mxu0 %v18623_v45  ;;  %v22002_v45 = vld [vmem:[#allocation27_spill] sm:$0xff] }
 0x6b1   : > { %13179 = vmatpush1.bf16.msra.mxu1 %v18626_v39  ;;  %13139 = vmatprep.subr.bf16.mxu0 %v18631_v13  ;;  %v22003_v39 = vld [vmem:[#allocation29_spill] sm:$0xff] }
 0x6b2   : > { %13180 = vmatprep.subr.bf16.mxu1 %v18634_v8  ;;  %v18701_v8 = vld [vmem:[%s19371_s23 + $0x2ec8] ss:$16 sps:$4 sm:$0xff]  }
 0x6b4   : > { %13140 = vmatpush1.bf16.msra.mxu0 %v18629_v53  ;;  %v18704_v53 = vld [vmem:[%s19371_s23 + $0x30c8] ss:$16 sps:$4 sm:$0xff]  }
 0x6b5   : > { %13181 = vmatpush1.bf16.msra.mxu1 %v18632_v6  ;;  %13141 = vmatprep.subr.bf16.mxu0 %v18637_v14 }
 0x6b6   : > { %13182 = vmatprep.subr.bf16.mxu1 %v18640_v31  ;;  %v18709_v31 = vld [vmem:[%s19371_s23 + $0x2eac] ss:$16 sps:$4 sm:$0xff]  }
 0x6b8   : > { %13142 = vmatpush1.bf16.msra.mxu0 %v18635_v49  ;;  %v18712_v49 = vld [vmem:[%s19371_s23 + $0x30ac] ss:$16 sps:$4 sm:$0xff]  }
 0x6b9   : > { %13183 = vmatpush1.bf16.msra.mxu1 %v18638_v1  ;;  %13143 = vmatprep.subr.bf16.mxu0 %v18643_v37 }
 0x6ba   : > { %13184 = vmatprep.subr.bf16.mxu1 %v18646_v44  ;;  %v22004_v44 = vld [vmem:[#allocation28_spill] sm:$0xff] }
 0x6bc   : > { %13144 = vmatpush1.bf16.msra.mxu0 %v18641_v19 }
 0x6bd   : > { %13185 = vmatpush1.bf16.msra.mxu1 %v18644_v55  ;;  %13145 = vmatprep.subr.bf16.mxu0 %v18649_v18  ;;  %v18707_v18 = vld [vmem:[%s19371_s23 + $0x2ea8] ss:$16 sps:$4 sm:$0xff]  }
 0x6be   : > { %13186 = vmatprep.subr.bf16.mxu1 %v18652_v33  ;;  %v18710_v33 = vld [vmem:[%s19371_s23 + $0x30a8] ss:$16 sps:$4 sm:$0xff]  }
 0x6c0   : > { %13146 = vmatpush2.bf16.msra.mxu0 %v18647_v3 }
 0x6c1   : > { %13187 = vmatpush2.bf16.msra.mxu1 %v18650_v9  ;;  %13147 = vmatprep.subr.bf16.mxu0 %v18655_v12  ;;  %v18713_v12 = vld [vmem:[%s19371_s23 + $0x2e88] ss:$16 sps:$4 sm:$0xff]  }
 0x6c2   : > { %13188 = vmatprep.subr.bf16.mxu1 %v18658_v63  ;;  %v18716_v63 = vld [vmem:[%s19371_s23 + $0x3088] ss:$16 sps:$4 sm:$0xff]  }
 0x6c4   : > { %13148 = vmatpush2.bf16.msra.mxu0 %v18653_v21  ;;  %v18721_v21 = vld [vmem:[%s19371_s23 + $0x2e6c] ss:$16 sps:$4 sm:$0xff]  }
 0x6c5   : > { %13189 = vmatpush2.bf16.msra.mxu1 %v18656_v11  ;;  %13149 = vmatprep.subr.bf16.mxu0 %v18661_v24  ;;  %v18724_v11 = vld [vmem:[%s19371_s23 + $0x306c] ss:$16 sps:$4 sm:$0xff]   ;;  %v18719_v24 = vld [vmem:[%s19371_s23 + $0x2e68] ss:$16 sps:$4 sm:$0xff]  }
 0x6c6   : > { %13190 = vmatprep.subr.bf16.mxu1 %v18664_v42  ;;  %v18722_v42 = vld [vmem:[%s19371_s23 + $0x3068] ss:$16 sps:$4 sm:$0xff]  }
 0x6c8   : > { %13150 = vmatpush2.bf16.msra.mxu0 %v18659_v0  ;;  %v18727_v0 = vld [vmem:[%s19371_s23 + $0x2e4c] ss:$16 sps:$4 sm:$0xff]  }
 0x6c9   : > { %13191 = vmatpush2.bf16.msra.mxu1 %v18662_v26  ;;  %13151 = vmatprep.subr.bf16.mxu0 %v18667_v30  ;;  %v18730_v26 = vld [vmem:[%s19371_s23 + $0x304c] ss:$16 sps:$4 sm:$0xff]   ;;  %v18725_v30 = vld [vmem:[%s19371_s23 + $0x2e48] ss:$16 sps:$4 sm:$0xff]  }
 0x6ca   : > { %13192 = vmatprep.subr.bf16.mxu1 %v18670_v46  ;;  %v18728_v46 = vld [vmem:[%s19371_s23 + $0x3048] ss:$16 sps:$4 sm:$0xff]  }
 0x6cc   : > { %13152 = vmatpush2.bf16.msra.mxu0 %v18665_v32  ;;  %v18733_v32 = vld [vmem:[%s19371_s23 + $0x2e2c] ss:$16 sps:$4 sm:$0xff]  }
 0x6cd   : > { %13193 = vmatpush2.bf16.msra.mxu1 %v18668_v4  ;;  %13153 = vmatprep.subr.bf16.mxu0 %v18673_v38  ;;  %v18736_v4 = vld [vmem:[%s19371_s23 + $0x302c] ss:$16 sps:$4 sm:$0xff]   ;;  %v18731_v38 = vld [vmem:[%s19371_s23 + $0x2e28] ss:$16 sps:$4 sm:$0xff]  }
 0x6ce   : > { %13194 = vmatprep.subr.bf16.mxu1 %v18676_v60  ;;  %v18734_v60 = vld [vmem:[%s19371_s23 + $0x3028] ss:$16 sps:$4 sm:$0xff]  }
 0x6d0   : > { %13154 = vmatpush2.bf16.msra.mxu0 %v18671_v20  ;;  %v18739_v20 = vld [vmem:[%s19371_s23 + $0x2e0c] ss:$16 sps:$4 sm:$0xff]  }
 0x6d1   : > { %13195 = vmatpush2.bf16.msra.mxu1 %v18674_v2  ;;  %13155 = vmatprep.subr.bf16.mxu0 %v18679_v7  ;;  %v18742_v2 = vld [vmem:[%s19371_s23 + $0x300c] ss:$16 sps:$4 sm:$0xff]   ;;  %v18737_v7 = vld [vmem:[%s19371_s23 + $0x2e08] ss:$16 sps:$4 sm:$0xff]  }
 0x6d2   : > { %13196 = vmatprep.subr.bf16.mxu1 %v18682_v16  ;;  %v18740_v16 = vld [vmem:[%s19371_s23 + $0x3008] ss:$16 sps:$4 sm:$0xff]  }
 0x6d4   : > { %13156 = vmatpush2.bf16.msra.mxu0 %v18677_v59  ;;  %v18745_v59 = vld [vmem:[%s19371_s23 + $0x2fec] ss:$16 sps:$4 sm:$0xff]  }
 0x6d5   : > { %13197 = vmatpush2.bf16.msra.mxu1 %v18680_v40  ;;  %13157 = vmatprep.subr.bf16.mxu0 %v18685_v48  ;;  %v18748_v40 = vld [vmem:[%s19371_s23 + $0x31ec] ss:$16 sps:$4 sm:$0xff]   ;;  %v18743_v48 = vld [vmem:[%s19371_s23 + $0x2fe8] ss:$16 sps:$4 sm:$0xff]  }
 0x6d6   : > { %13198 = vmatprep.subr.bf16.mxu1 %v18688_v62  ;;  %v18746_v62 = vld [vmem:[%s19371_s23 + $0x31e8] ss:$16 sps:$4 sm:$0xff]  }
 0x6d8   : > { %13158 = vmatpush2.bf16.msra.mxu0 %v18683_v5  ;;  %v18751_v5 = vld [vmem:[%s19371_s23 + $0x2fcc] ss:$16 sps:$4 sm:$0xff]  }
 0x6d9   : > { %13199 = vmatpush2.bf16.msra.mxu1 %v18686_v35  ;;  %13159 = vmatprep.subr.bf16.mxu0 %v18691_v10  ;;  %v18754_v35 = vld [vmem:[%s19371_s23 + $0x31cc] ss:$16 sps:$4 sm:$0xff]   ;;  %v18749_v10 = vld [vmem:[%s19371_s23 + $0x2fc8] ss:$16 sps:$4 sm:$0xff]  }
 0x6da   : > { %13200 = vmatprep.subr.bf16.mxu1 %v18694_v34  ;;  %v18752_v34 = vld [vmem:[%s19371_s23 + $0x31c8] ss:$16 sps:$4 sm:$0xff]  }
 0x6dc   : > { %13160 = vmatpush2.bf16.msra.mxu0 %v18689_v36  ;;  %v18757_v36 = vld [vmem:[%s19371_s23 + $0x2fac] ss:$16 sps:$4 sm:$0xff]  }
 0x6dd   : > { %13201 = vmatpush2.bf16.msra.mxu1 %v18692_v50  ;;  %13211 = vmatprep.subr.bf16.mxu0 %v18697_v29  ;;  %v18760_v50 = vld [vmem:[%s19371_s23 + $0x31ac] ss:$16 sps:$4 sm:$0xff]   ;;  %v18755_v29 = vld [vmem:[%s19371_s23 + $0x2fa8] ss:$16 sps:$4 sm:$0xff]  }
 0x6de   : > { %13252 = vmatprep.subr.bf16.mxu1 %v18700_v54  ;;  %v18758_v54 = vld [vmem:[%s19371_s23 + $0x31a8] ss:$16 sps:$4 sm:$0xff]  }
 0x6df   : > { %v12917_v23 = vpop.f32.mrf.mxu0  ;;  %13162 = vmatmul.mubr.bf16.vlgmr.msra.gmra.mxu0 %v22002_v45  ;;  %v18767_v45 = vld [vmem:[%s19371_s23 + $0x2f68] ss:$16 sps:$4 sm:$0xff]  }
 0x6e0   : > { %v12958_v25 = vpop.f32.mrf.mxu1  ;;  %13203 = vmatmul.mubr.bf16.vlgmr.msra.gmra.mxu1 %v22003_v39  ;;  %v12918_v13 = vadd.f32 %v12917_v23, %v21467_v27  ;;  %13212 = vmatpush1.bf16.msra.mxu0 %v18695_v17  ;;  %v18763_v17 = vld [vmem:[%s19371_s23 + $0x2f8c] ss:$16 sps:$4 sm:$0xff]   ;;  %v18770_v39 = vld [vmem:[%s19371_s23 + $0x3168] ss:$16 sps:$4 sm:$0xff]  }
 0x6e1   : > { %13253 = vmatpush1.bf16.msra.mxu1 %v18698_v51  ;;  %v12919_v6 = vpop.f32.mrf.mxu0  ;;  %13213 = vmatprep.subr.bf16.mxu0 %v18703_v15  ;;  %v18766_v51 = vld [vmem:[%s19371_s23 + $0x318c] ss:$16 sps:$4 sm:$0xff]   ;;  %v18761_v15 = vld [vmem:[%s19371_s23 + $0x2f88] ss:$16 sps:$4 sm:$0xff]  }
 0x6e2   : > { %v12960_v14 = vpop.f32.mrf.mxu1  ;;  %13254 = vmatprep.subr.bf16.mxu1 %v18706_v47  ;;  %v21541_v1 = vadd.f32 %v12958_v25, %v12918_v13  ;;  %v12920_v37 = vadd.f32 %v12919_v6, %v21472_v52  ;;  %13243 = vmatprep.mubr.bf16.mxu0 %v22004_v44  ;;  %v18715_v52 = vld [vmem:[%s19371_s23 + $0x2e8c] ss:$16 sps:$4 sm:$0xff]   ;;  %v18764_v47 = vld [vmem:[%s19371_s23 + $0x3188] ss:$16 sps:$4 sm:$0xff]  }
 0x6e3   : > { %13284 = vmatprep.mubr.bf16.mxu1 %v20532_v58  ;;  %v12921_v27 = vpop.f32.mrf.mxu0  ;;  %v18718_v58 = vld [vmem:[%s19371_s23 + $0x308c] ss:$16 sps:$4 sm:$0xff]   ;;  %v18776_v6 = vld [vmem:[%s19371_s23 + $0x3148] ss:$16 sps:$4 sm:$0xff]  }
 0x6e4   : > { %v12962_v19 = vpop.f32.mrf.mxu1  ;;  %v21546_v55 = vadd.f32 %v12960_v14, %v12920_v37  ;;  %13214 = vmatpush1.bf16.msra.mxu0 %v18701_v8  ;;  %v18769_v23 = vld [vmem:[%s19371_s23 + $0x2f6c] ss:$16 sps:$4 sm:$0xff]   ;;  %v18782_v37 = vld [vmem:[%s19371_s23 + $0x3128] ss:$16 sps:$4 sm:$0xff]  }
 0x6e5   : > { %13255 = vmatpush1.bf16.msra.mxu1 %v18704_v53  ;;  %v12922_v3 = vpop.f32.mrf.mxu0  ;;  %13215 = vmatprep.subr.bf16.mxu0 %v18709_v31  ;;  %v18772_v25 = vld [vmem:[%s19371_s23 + $0x316c] ss:$16 sps:$4 sm:$0xff]   ;;  %v18773_v53 = vld [vmem:[%s19371_s23 + $0x2f48] ss:$16 sps:$4 sm:$0xff]  }
 0x6e6   : > { %v12963_v9 = vpop.f32.mrf.mxu1  ;;  %13256 = vmatprep.subr.bf16.mxu1 %v18712_v49  ;;  %v18775_v13 = vld [vmem:[%s19371_s23 + $0x2f4c] ss:$16 sps:$4 sm:$0xff]   ;;  %v18779_v49 = vld [vmem:[%s19371_s23 + $0x2f28] ss:$16 sps:$4 sm:$0xff]  }
 0x6e7   : > { %v18778_v8 = vld [vmem:[%s19371_s23 + $0x314c] ss:$16 sps:$4 sm:$0xff]   ;;  %v18785_v19 = vld [vmem:[%s19371_s23 + $0x2f08] ss:$16 sps:$4 sm:$0xff]  }
 0x6e8   : > { %13216 = vmatpush1.bf16.msra.mxu0 %v18707_v18  ;;  %v18781_v14 = vld [vmem:[%s19371_s23 + $0x2f2c] ss:$16 sps:$4 sm:$0xff]   ;;  %v18788_v18 = vld [vmem:[%s19371_s23 + $0x3108] ss:$16 sps:$4 sm:$0xff]  }
 0x6e9   : > { %13257 = vmatpush1.bf16.msra.mxu1 %v18710_v33  ;;  %13217 = vmatprep.subr.bf16.mxu0 %v18715_v52  ;;  %v18784_v31 = vld [vmem:[%s19371_s23 + $0x312c] ss:$16 sps:$4 sm:$0xff]   ;;  %v18791_v9 = vld [vmem:[%s19371_s23 + $0x32e8] ss:$16 sps:$4 sm:$0xff]  }
 0x6ea   : > { %13258 = vmatprep.subr.bf16.mxu1 %v18718_v58  ;;  %v18787_v44 = vld [vmem:[%s19371_s23 + $0x2f0c] ss:$16 sps:$4 sm:$0xff]   ;;  %v18794_v52 = vld [vmem:[%s19371_s23 + $0x34e8] ss:$16 sps:$4 sm:$0xff]  }
 0x6eb   : > { %v18790_v27 = vld [vmem:[%s19371_s23 + $0x310c] ss:$16 sps:$4 sm:$0xff]  }
 0x6ec   : > { %13218 = vmatpush1.bf16.msra.mxu0 %v18713_v12  ;;  %v18793_v33 = vld [vmem:[%s19371_s23 + $0x32ec] ss:$16 sps:$4 sm:$0xff]  }
 0x6ed   : > { %13259 = vmatpush1.bf16.msra.mxu1 %v18716_v63  ;;  %13219 = vmatprep.subr.bf16.mxu0 %v18721_v21  ;;  %v18796_v3 = vld [vmem:[%s19371_s23 + $0x34ec] ss:$16 sps:$4 sm:$0xff]  }
 0x6ee   : > { %13260 = vmatprep.subr.bf16.mxu1 %v18724_v11  ;;  %v18799_v58 = vld [vmem:[%s19371_s23 + $0x32cc] ss:$16 sps:$4 sm:$0xff]  }
 0x6ef   : > { %v18802_v12 = vld [vmem:[%s19371_s23 + $0x34cc] ss:$16 sps:$4 sm:$0xff]  }
 0x6f0   : > { %13220 = vmatpush1.bf16.msra.mxu0 %v18719_v24  ;;  %v22005_v11 = vld [vmem:[#allocation31_spill] sm:$0xff] }
 0x6f1   : > { %13261 = vmatpush1.bf16.msra.mxu1 %v18722_v42  ;;  %13221 = vmatprep.subr.bf16.mxu0 %v18727_v0  ;;  %v18797_v42 = vld [vmem:[%s19371_s23 + $0x32c8] ss:$16 sps:$4 sm:$0xff]  }
 0x6f2   : > { %13262 = vmatprep.subr.bf16.mxu1 %v18730_v26  ;;  %v18800_v0 = vld [vmem:[%s19371_s23 + $0x34c8] ss:$16 sps:$4 sm:$0xff]  }
 0x6f4   : > { %13222 = vmatpush1.bf16.msra.mxu0 %v18725_v30 }
 0x6f5   : > { %13263 = vmatpush1.bf16.msra.mxu1 %v18728_v46  ;;  %13223 = vmatprep.subr.bf16.mxu0 %v18733_v32  ;;  %v18805_v46 = vld [vmem:[%s19371_s23 + $0x32ac] ss:$16 sps:$4 sm:$0xff]  }
 0x6f6   : > { %13264 = vmatprep.subr.bf16.mxu1 %v18736_v4  ;;  %v18808_v32 = vld [vmem:[%s19371_s23 + $0x34ac] ss:$16 sps:$4 sm:$0xff]  }
 0x6f8   : > { %13224 = vmatpush1.bf16.msra.mxu0 %v18731_v38  ;;  %v22006_v38 = vld [vmem:[#allocation30_spill] sm:$0xff] }
 0x6f9   : > { %13265 = vmatpush1.bf16.msra.mxu1 %v18734_v60  ;;  %13225 = vmatprep.subr.bf16.mxu0 %v18739_v20 }
 0x6fa   : > { %13266 = vmatprep.subr.bf16.mxu1 %v18742_v2  ;;  %v18803_v2 = vld [vmem:[%s19371_s23 + $0x32a8] ss:$16 sps:$4 sm:$0xff]  }
 0x6fc   : > { %13226 = vmatpush1.bf16.msra.mxu0 %v18737_v7  ;;  %v18806_v7 = vld [vmem:[%s19371_s23 + $0x34a8] ss:$16 sps:$4 sm:$0xff]  }
 0x6fd   : > { %13267 = vmatpush1.bf16.msra.mxu1 %v18740_v16  ;;  %13227 = vmatprep.subr.bf16.mxu0 %v18745_v59 }
 0x6fe   : > { %13268 = vmatprep.subr.bf16.mxu1 %v18748_v40  ;;  %v18809_v40 = vld [vmem:[%s19371_s23 + $0x3288] ss:$16 sps:$4 sm:$0xff]  }
 0x700   : > { %13228 = vmatpush2.bf16.msra.mxu0 %v18743_v48  ;;  %v18812_v48 = vld [vmem:[%s19371_s23 + $0x3488] ss:$16 sps:$4 sm:$0xff]  }
 0x701   : > { %13269 = vmatpush2.bf16.msra.mxu1 %v18746_v62  ;;  %13229 = vmatprep.subr.bf16.mxu0 %v18751_v5  ;;  %v18817_v62 = vld [vmem:[%s19371_s23 + $0x326c] ss:$16 sps:$4 sm:$0xff]  }
 0x702   : > { %13270 = vmatprep.subr.bf16.mxu1 %v18754_v35  ;;  %v18820_v5 = vld [vmem:[%s19371_s23 + $0x346c] ss:$16 sps:$4 sm:$0xff]   ;;  %v18815_v35 = vld [vmem:[%s19371_s23 + $0x3268] ss:$16 sps:$4 sm:$0xff]  }
 0x704   : > { %13230 = vmatpush2.bf16.msra.mxu0 %v18749_v10  ;;  %v18818_v10 = vld [vmem:[%s19371_s23 + $0x3468] ss:$16 sps:$4 sm:$0xff]  }
 0x705   : > { %13271 = vmatpush2.bf16.msra.mxu1 %v18752_v34  ;;  %13231 = vmatprep.subr.bf16.mxu0 %v18757_v36  ;;  %v18823_v34 = vld [vmem:[%s19371_s23 + $0x324c] ss:$16 sps:$4 sm:$0xff]  }
 0x706   : > { %13272 = vmatprep.subr.bf16.mxu1 %v18760_v50  ;;  %v18826_v36 = vld [vmem:[%s19371_s23 + $0x344c] ss:$16 sps:$4 sm:$0xff]   ;;  %v18821_v50 = vld [vmem:[%s19371_s23 + $0x3248] ss:$16 sps:$4 sm:$0xff]  }
 0x708   : > { %13232 = vmatpush2.bf16.msra.mxu0 %v18755_v29  ;;  %v18824_v29 = vld [vmem:[%s19371_s23 + $0x3448] ss:$16 sps:$4 sm:$0xff]  }
 0x709   : > { %13273 = vmatpush2.bf16.msra.mxu1 %v18758_v54  ;;  %13233 = vmatprep.subr.bf16.mxu0 %v18763_v17  ;;  %v18829_v54 = vld [vmem:[%s19371_s23 + $0x322c] ss:$16 sps:$4 sm:$0xff]  }
 0x70a   : > { %13274 = vmatprep.subr.bf16.mxu1 %v18766_v51  ;;  %v18832_v17 = vld [vmem:[%s19371_s23 + $0x342c] ss:$16 sps:$4 sm:$0xff]   ;;  %v18827_v51 = vld [vmem:[%s19371_s23 + $0x3228] ss:$16 sps:$4 sm:$0xff]  }
 0x70c   : > { %13234 = vmatpush2.bf16.msra.mxu0 %v18761_v15  ;;  %v18830_v15 = vld [vmem:[%s19371_s23 + $0x3428] ss:$16 sps:$4 sm:$0xff]  }
 0x70d   : > { %13275 = vmatpush2.bf16.msra.mxu1 %v18764_v47  ;;  %13235 = vmatprep.subr.bf16.mxu0 %v18769_v23  ;;  %v18835_v47 = vld [vmem:[%s19371_s23 + $0x320c] ss:$16 sps:$4 sm:$0xff]  }
 0x70e   : > { %13276 = vmatprep.subr.bf16.mxu1 %v18772_v25  ;;  %v18838_v23 = vld [vmem:[%s19371_s23 + $0x340c] ss:$16 sps:$4 sm:$0xff]   ;;  %v18833_v25 = vld [vmem:[%s19371_s23 + $0x3208] ss:$16 sps:$4 sm:$0xff]  }
 0x710   : > { %13236 = vmatpush2.bf16.msra.mxu0 %v18767_v45  ;;  %v18836_v45 = vld [vmem:[%s19371_s23 + $0x3408] ss:$16 sps:$4 sm:$0xff]  }
 0x711   : > { %13277 = vmatpush2.bf16.msra.mxu1 %v18770_v39  ;;  %13237 = vmatprep.subr.bf16.mxu0 %v18775_v13  ;;  %v18841_v39 = vld [vmem:[%s19371_s23 + $0x33ec] ss:$16 sps:$4 sm:$0xff]  }
 0x712   : > { %13278 = vmatprep.subr.bf16.mxu1 %v18778_v8  ;;  %v18844_v13 = vld [vmem:[%s19371_s23 + $0x35ec] ss:$16 sps:$4 sm:$0xff]   ;;  %v18839_v8 = vld [vmem:[%s19371_s23 + $0x33e8] ss:$16 sps:$4 sm:$0xff]  }
 0x714   : > { %13238 = vmatpush2.bf16.msra.mxu0 %v18773_v53  ;;  %v18842_v53 = vld [vmem:[%s19371_s23 + $0x35e8] ss:$16 sps:$4 sm:$0xff]  }
 0x715   : > { %13279 = vmatpush2.bf16.msra.mxu1 %v18776_v6  ;;  %13239 = vmatprep.subr.bf16.mxu0 %v18781_v14  ;;  %v18847_v6 = vld [vmem:[%s19371_s23 + $0x33cc] ss:$16 sps:$4 sm:$0xff]  }
 0x716   : > { %13280 = vmatprep.subr.bf16.mxu1 %v18784_v31  ;;  %v18850_v14 = vld [vmem:[%s19371_s23 + $0x35cc] ss:$16 sps:$4 sm:$0xff]   ;;  %v18845_v31 = vld [vmem:[%s19371_s23 + $0x33c8] ss:$16 sps:$4 sm:$0xff]  }
 0x718   : > { %13240 = vmatpush2.bf16.msra.mxu0 %v18779_v49  ;;  %v18848_v49 = vld [vmem:[%s19371_s23 + $0x35c8] ss:$16 sps:$4 sm:$0xff]  }
 0x719   : > { %13281 = vmatpush2.bf16.msra.mxu1 %v18782_v37  ;;  %13241 = vmatprep.subr.bf16.mxu0 %v18787_v44  ;;  %v18853_v37 = vld [vmem:[%s19371_s23 + $0x33ac] ss:$16 sps:$4 sm:$0xff]  }
 0x71a   : > { %13282 = vmatprep.subr.bf16.mxu1 %v18790_v27  ;;  %v18856_v44 = vld [vmem:[%s19371_s23 + $0x35ac] ss:$16 sps:$4 sm:$0xff]   ;;  %v18851_v27 = vld [vmem:[%s19371_s23 + $0x33a8] ss:$16 sps:$4 sm:$0xff]  }
 0x71c   : > { %13242 = vmatpush2.bf16.msra.mxu0 %v18785_v19  ;;  %v18854_v19 = vld [vmem:[%s19371_s23 + $0x35a8] ss:$16 sps:$4 sm:$0xff]  }
 0x71d   : > { %13283 = vmatpush2.bf16.msra.mxu1 %v18788_v18  ;;  %13293 = vmatprep.subr.bf16.mxu0 %v18793_v33  ;;  %v18859_v18 = vld [vmem:[%s19371_s23 + $0x338c] ss:$16 sps:$4 sm:$0xff]  }
 0x71e   : > { %13334 = vmatprep.subr.bf16.mxu1 %v18796_v3  ;;  %v18862_v33 = vld [vmem:[%s19371_s23 + $0x358c] ss:$16 sps:$4 sm:$0xff]   ;;  %v18857_v3 = vld [vmem:[%s19371_s23 + $0x3388] ss:$16 sps:$4 sm:$0xff]  }
 0x71f   : > { %v12999_v63 = vpop.f32.mrf.mxu0  ;;  %13244 = vmatmul.mubr.bf16.vlgmr.msra.gmra.mxu0 %v20536_v41 }
 0x720   : > { %v13040_v21 = vpop.f32.mrf.mxu1  ;;  %13285 = vmatmul.mubr.bf16.vlgmr.msra.gmra.mxu1 %v22005_v11  ;;  %v13000_v24 = vadd.f32 %v12999_v63, %v21541_v1  ;;  %13294 = vmatpush1.bf16.msra.mxu0 %v18791_v9  ;;  %v18860_v9 = vld [vmem:[%s19371_s23 + $0x3588] ss:$16 sps:$4 sm:$0xff]   ;;  %v18874_v11 = vld [vmem:[%s19371_s23 + $0x354c] ss:$16 sps:$4 sm:$0xff]  }
 0x721   : > { %13335 = vmatpush1.bf16.msra.mxu1 %v18794_v52  ;;  %v13001_v26 = vpop.f32.mrf.mxu0  ;;  %13295 = vmatprep.subr.bf16.mxu0 %v18799_v58  ;;  %v18865_v52 = vld [vmem:[%s19371_s23 + $0x336c] ss:$16 sps:$4 sm:$0xff]   ;;  %v18866_v63 = vld [vmem:[%s19371_s23 + $0x3568] ss:$16 sps:$4 sm:$0xff]  }
 0x722   : > { %v13042_v30 = vpop.f32.mrf.mxu1  ;;  %13336 = vmatprep.subr.bf16.mxu1 %v18802_v12  ;;  %v21615_v4 = vadd.f32 %v13040_v21, %v13000_v24  ;;  %v13002_v41 = vadd.f32 %v13001_v26, %v21546_v55  ;;  %13325 = vmatprep.mubr.bf16.mxu0 %v22006_v38  ;;  %v18811_v55 = vld [vmem:[%s19371_s23 + $0x328c] ss:$16 sps:$4 sm:$0xff]   ;;  %v18863_v12 = vld [vmem:[%s19371_s23 + $0x3368] ss:$16 sps:$4 sm:$0xff]  }
 0x723   : > { %13366 = vmatprep.mubr.bf16.mxu1 %v20636_v28  ;;  %v13003_v1 = vpop.f32.mrf.mxu0  ;;  %v18814_v28 = vld [vmem:[%s19371_s23 + $0x348c] ss:$16 sps:$4 sm:$0xff]   ;;  %v18869_v24 = vld [vmem:[%s19371_s23 + $0x3348] ss:$16 sps:$4 sm:$0xff]  }
 0x724   : > { %v13044_v60 = vpop.f32.mrf.mxu1  ;;  %v21620_v20 = vadd.f32 %v13042_v30, %v13002_v41  ;;  %13296 = vmatpush1.bf16.msra.mxu0 %v18797_v42  ;;  %v18868_v58 = vld [vmem:[%s19371_s23 + $0x356c] ss:$16 sps:$4 sm:$0xff]   ;;  %v18872_v42 = vld [vmem:[%s19371_s23 + $0x3548] ss:$16 sps:$4 sm:$0xff]  }
 0x725   : > { %13337 = vmatpush1.bf16.msra.mxu1 %v18800_v0  ;;  %v13004_v16 = vpop.f32.mrf.mxu0  ;;  %13297 = vmatprep.subr.bf16.mxu0 %v18805_v46  ;;  %v18871_v21 = vld [vmem:[%s19371_s23 + $0x334c] ss:$16 sps:$4 sm:$0xff]   ;;  %v18875_v30 = vld [vmem:[%s19371_s23 + $0x3328] ss:$16 sps:$4 sm:$0xff]  }
 0x726   : > { %v13045_v59 = vpop.f32.mrf.mxu1  ;;  %13338 = vmatprep.subr.bf16.mxu1 %v18808_v32  ;;  %v18877_v0 = vld [vmem:[%s19371_s23 + $0x332c] ss:$16 sps:$4 sm:$0xff]   ;;  %v18878_v46 = vld [vmem:[%s19371_s23 + $0x3528] ss:$16 sps:$4 sm:$0xff]  }
 0x727   : > { %v18880_v26 = vld [vmem:[%s19371_s23 + $0x352c] ss:$16 sps:$4 sm:$0xff]   ;;  %v18881_v38 = vld [vmem:[%s19371_s23 + $0x3308] ss:$16 sps:$4 sm:$0xff]  }
 0x728   : > { %13298 = vmatpush1.bf16.msra.mxu0 %v18803_v2  ;;  %v18883_v32 = vld [vmem:[%s19371_s23 + $0x330c] ss:$16 sps:$4 sm:$0xff]   ;;  %v18884_v1 = vld [vmem:[%s19371_s23 + $0x3508] ss:$16 sps:$4 sm:$0xff]  }
 0x729   : > { %13339 = vmatpush1.bf16.msra.mxu1 %v18806_v7  ;;  %13299 = vmatprep.subr.bf16.mxu0 %v18811_v55  ;;  %v18886_v41 = vld [vmem:[%s19371_s23 + $0x350c] ss:$16 sps:$4 sm:$0xff]  }
 0x72a   : > { %13340 = vmatprep.subr.bf16.mxu1 %v18814_v28 }
 0x72c   : > { %13300 = vmatpush1.bf16.msra.mxu0 %v18809_v40 }
 0x72d   : > { %13341 = vmatpush1.bf16.msra.mxu1 %v18812_v48  ;;  %13301 = vmatprep.subr.bf16.mxu0 %v18817_v62 }
 0x72e   : > { %13342 = vmatprep.subr.bf16.mxu1 %v18820_v5 }
 0x730   : > { %13302 = vmatpush1.bf16.msra.mxu0 %v18815_v35 }
 0x731   : > { %13343 = vmatpush1.bf16.msra.mxu1 %v18818_v10  ;;  %13303 = vmatprep.subr.bf16.mxu0 %v18823_v34 }
 0x732   : > { %13344 = vmatprep.subr.bf16.mxu1 %v18826_v36 }
 0x734   : > { %13304 = vmatpush1.bf16.msra.mxu0 %v18821_v50 }
 0x735   : > { %13345 = vmatpush1.bf16.msra.mxu1 %v18824_v29  ;;  %13305 = vmatprep.subr.bf16.mxu0 %v18829_v54 }
 0x736   : > { %13346 = vmatprep.subr.bf16.mxu1 %v18832_v17 }
 0x738   : > { %13306 = vmatpush1.bf16.msra.mxu0 %v18827_v51 }
 0x739   : > { %13347 = vmatpush1.bf16.msra.mxu1 %v18830_v15  ;;  %13307 = vmatprep.subr.bf16.mxu0 %v18835_v47 }
 0x73a   : > { %13348 = vmatprep.subr.bf16.mxu1 %v18838_v23 }
 0x73c   : > { %13308 = vmatpush1.bf16.msra.mxu0 %v18833_v25 }
 0x73d   : > { %13349 = vmatpush1.bf16.msra.mxu1 %v18836_v45  ;;  %13309 = vmatprep.subr.bf16.mxu0 %v18841_v39 }
 0x73e   : > { %13350 = vmatprep.subr.bf16.mxu1 %v18844_v13 }
 0x740   : > { %13310 = vmatpush2.bf16.msra.mxu0 %v18839_v8 }
 0x741   : > { %13351 = vmatpush2.bf16.msra.mxu1 %v18842_v53  ;;  %13311 = vmatprep.subr.bf16.mxu0 %v18847_v6 }
 0x742   : > { %13352 = vmatprep.subr.bf16.mxu1 %v18850_v14  ;;  %v19139_v14 = vmov 1983009808  }
 0x744   : > { %13312 = vmatpush2.bf16.msra.mxu0 %v18845_v31  ;;  %v13382_v31 = vunpack.c.l.s4 %v19139_v14 }
 0x745   : > { %13353 = vmatpush2.bf16.msra.mxu1 %v18848_v49  ;;  %13313 = vmatprep.subr.bf16.mxu0 %v18853_v37 }
 0x746   : > { %13354 = vmatprep.subr.bf16.mxu1 %v18856_v44 }
 0x748   : > { %13314 = vmatpush2.bf16.msra.mxu0 %v18851_v27  ;;  %v13383_v27 = vunpack.c.0.s8 %v13382_v31 }
 0x749   : > { %13355 = vmatpush2.bf16.msra.mxu1 %v18854_v19  ;;  %13315 = vmatprep.subr.bf16.mxu0 %v18859_v18 }
 0x74a   : > { %13356 = vmatprep.subr.bf16.mxu1 %v18862_v33 }
 0x74c   : > { %13316 = vmatpush2.bf16.msra.mxu0 %v18857_v3 }
 0x74d   : > { %13357 = vmatpush2.bf16.msra.mxu1 %v18860_v9  ;;  %13317 = vmatprep.subr.bf16.mxu0 %v18865_v52 }
 0x74e   : > { %13358 = vmatprep.subr.bf16.mxu1 %v18868_v58 }
 0x750   : > { %13318 = vmatpush2.bf16.msra.mxu0 %v18863_v12  ;;  %v22007_v12 = vld [vmem:[#allocation21_spill] sm:$0xff] }
 0x751   : > { %13359 = vmatpush2.bf16.msra.mxu1 %v18866_v63  ;;  %13319 = vmatprep.subr.bf16.mxu0 %v18871_v21  ;;  %v21681_v63 = vsub.s32 %v13383_v27, %v22007_v12 }
 0x752   : > { %13360 = vmatprep.subr.bf16.mxu1 %v18874_v11 }
 0x754   : > { %13320 = vmatpush2.bf16.msra.mxu0 %v18869_v24 }
 0x755   : > { %13361 = vmatpush2.bf16.msra.mxu1 %v18872_v42  ;;  %13321 = vmatprep.subr.bf16.mxu0 %v18877_v0 }
 0x756   : > { %13362 = vmatprep.subr.bf16.mxu1 %v18880_v26  ;;  %v13387_v26 = vrot.slane %v13379_v22, %v21681_v63 }
 0x758   : > { %13322 = vmatpush2.bf16.msra.mxu0 %v18875_v30 }
 0x759   : > { %13363 = vmatpush2.bf16.msra.mxu1 %v18878_v46  ;;  %13323 = vmatprep.subr.bf16.mxu0 %v18883_v32  ;;  %v383_v46 = vld [vmem:[#allocation2] sm:$0xff] }
 0x75a   : > { %13364 = vmatprep.subr.bf16.mxu1 %v18886_v41 }
 0x75c   : > { %13324 = vmatpush2.bf16.msra.mxu0 %v18881_v38 }
 0x75d   : > { %13365 = vmatpush2.bf16.msra.mxu1 %v18884_v1 }
 0x75f   : > { %v13081_v60 = vpop.f32.mrf.mxu0  ;;  %13326 = vmatmul.mubr.bf16.vlgmr.msra.gmra.mxu0 %v20629_v57 }
 0x760   : > { %v13122_v2 = vpop.f32.mrf.mxu1  ;;  %13367 = vmatmul.mubr.bf16.vlgmr.msra.gmra.mxu1 %v20710_v61  ;;  %v13082_v7 = vadd.f32 %v13081_v60, %v21615_v4 }
 0x761   : > { %v13083_v16 = vpop.f32.mrf.mxu0 }
 0x762   : > { %v13124_v59 = vpop.f32.mrf.mxu1  ;;  %v13123_v55 = vadd.f32 %v13122_v2, %v13082_v7  ;;  %v13084_v28 = vadd.f32 %v13083_v16, %v21620_v20 }
 0x763   : > { %v13085_v40 = vpop.f32.mrf.mxu0 }
 0x764   : > { %v13126_v48 = vpop.f32.mrf.mxu1  ;;  %v13125_v62 = vadd.f32 %v13124_v59, %v13084_v28 }
 0x765   : > { %v13086_v5 = vpop.f32.mrf.mxu0 }
 0x766   : > { %v13127_v35 = vpop.f32.mrf.mxu1 }
 0x79f   : > { %v13163_v10 = vpop.f32.mrf.mxu0 }
 0x7a0   : > { %v13204_v34 = vpop.f32.mrf.mxu1  ;;  %v13164_v36 = vadd.f32 %v13163_v10, %v13123_v55 }
 0x7a1   : > { %v13165_v50 = vpop.f32.mrf.mxu0 }
 0x7a2   : > { %v13206_v29 = vpop.f32.mrf.mxu1  ;;  %v13205_v57 = vadd.f32 %v13204_v34, %v13164_v36  ;;  %v13166_v54 = vadd.f32 %v13165_v50, %v13125_v62 }
 0x7a3   : > { %v13167_v61 = vpop.f32.mrf.mxu0 }
 0x7a4   : > { %v13208_v17 = vpop.f32.mrf.mxu1  ;;  %v13207_v4 = vadd.f32 %v13206_v29, %v13166_v54 }
 0x7a5   : > { %v13168_v51 = vpop.f32.mrf.mxu0 }
 0x7a6   : > { %v13209_v15 = vpop.f32.mrf.mxu1 }
 0x7df   : > { %v13245_v47 = vpop.f32.mrf.mxu0 }
 0x7e0   : > { %v13286_v23 = vpop.f32.mrf.mxu1  ;;  %v13246_v20 = vadd.f32 %v13245_v47, %v13205_v57 }
 0x7e1   : > { %v13247_v25 = vpop.f32.mrf.mxu0 }
 0x7e2   : > { %v13288_v45 = vpop.f32.mrf.mxu1  ;;  %v13287_v39 = vadd.f32 %v13286_v23, %v13246_v20  ;;  %v13248_v49 = vadd.f32 %v13247_v25, %v13207_v4 }
 0x7e3   : > { %v13249_v13 = vpop.f32.mrf.mxu0 }
 0x7e4   : > { %v13290_v8 = vpop.f32.mrf.mxu1  ;;  %v13289_v19 = vadd.f32 %v13288_v45, %v13248_v49 }
 0x7e5   : > { %v13250_v53 = vpop.f32.mrf.mxu0 }
 0x7e6   : > { %v13291_v6 = vpop.f32.mrf.mxu1 }
 0x81f   : > { %v13327_v37 = vpop.f32.mrf.mxu0 }
 0x820   : > { %v13368_v44 = vpop.f32.mrf.mxu1  ;;  %v13328_v18 = vadd.f32 %v13327_v37, %v13287_v39 }
 0x821   : > { %v13329_v33 = vpop.f32.mrf.mxu0 }
 0x822   : > { %v13370_v3 = vpop.f32.mrf.mxu1  ;;  %v13330_v9 = vadd.f32 %v13329_v33, %v13289_v19  ;;  %v13369_v21 = vadd.f32 %v13368_v44, %v13328_v18 }
 0x823   : > { %v13331_v52 = vpop.f32.mrf.mxu0 }
 0x824   : > { %v13372_v58 = vpop.f32.mrf.mxu1  ;;  %v13371_v11 = vadd.f32 %v13370_v3, %v13330_v9 }
 0x825   : > { %v13332_v24 = vpop.f32.mrf.mxu0 }
 0x826   : > { %v13373_v42 = vpop.f32.mrf.mxu1  ;;  %v13380_v0 = vcombine.low %v13369_v21, %v13371_v11 }
 0x828   : > { %v13394_v30 = vrot.slane %v13380_v0, %v21681_v63 }
 0x82a   : > { %v13395_v32 = vcombine.low %v13387_v26, %v13394_v30  ;;  %13402 = sbr.rel (%p16105_p13) target bundleno = 2631 (0xa47), region = 80 }
 0x82c   : > { %v13397_v41 = vadd.f32 %v13395_v32, %v383_v46 }
 0x82e   : > { %13398 = vst [vmem:[#allocation2] sm:$0xff] %v13397_v41 }
 0x82f   : > { %v13503_v38 = vld [vmem:[#allocation9 + $0x1e8] sm:$0xff]  ;;  %v13502_v60 = vld [vmem:[#allocation9 + $0x1e0] sm:$0xff]  ;;  %vm14241_vm0 = vcmask 25600  }
 0x830   : > { %v13631_v1 = vld [vmem:[#allocation9 + $0x5e8] sm:$0xff]  ;;  %13742 = vmatprep.subr.mxu0 %v13503_v38  ;;  %v13630_v2 = vld [vmem:[#allocation9 + $0x5e0] sm:$0xff] }
 0x831   : > { %13813 = vmatprep.subr.mxu1 %v13631_v1  ;;  %v13499_v7 = vld [vmem:[#allocation9 + $0x1c8] sm:$0xff]  ;;  %13743 = vmatpush1.msra.mxu0 %v13502_v60  ;;  %v13498_v43 = vld [vmem:[#allocation9 + $0x1c0] sm:$0xff] }
 0x832   : > { %v13627_v16 = vld [vmem:[#allocation9 + $0x5c8] sm:$0xff]  ;;  %13814 = vmatpush1.msra.mxu1 %v13630_v2  ;;  %v13626_v56 = vld [vmem:[#allocation9 + $0x5c0] sm:$0xff]  ;;  %13744 = vmatprep.subr.mxu0 %v13499_v7 }
 0x833   : > { %v13495_v22 = vld [vmem:[#allocation9 + $0x1a8] sm:$0xff]  ;;  %13815 = vmatprep.subr.mxu1 %v13627_v16  ;;  %v13494_v55 = vld [vmem:[#allocation9 + $0x1a0] sm:$0xff]  ;;  %13745 = vmatpush1.msra.mxu0 %v13498_v43 }
 0x834   : > { %v13623_v59 = vld [vmem:[#allocation9 + $0x5a8] sm:$0xff]  ;;  %v13622_v28 = vld [vmem:[#allocation9 + $0x5a0] sm:$0xff]  ;;  %13816 = vmatpush1.msra.mxu1 %v13626_v56  ;;  %13746 = vmatprep.subr.mxu0 %v13495_v22 }
 0x835   : > { %v13491_v40 = vld [vmem:[#allocation9 + $0x188] sm:$0xff]  ;;  %13817 = vmatprep.subr.mxu1 %v13623_v59  ;;  %v13490_v62 = vld [vmem:[#allocation9 + $0x180] sm:$0xff]  ;;  %13747 = vmatpush1.msra.mxu0 %v13494_v55 }
 0x836   : > { %v13619_v48 = vld [vmem:[#allocation9 + $0x588] sm:$0xff]  ;;  %v13618_v5 = vld [vmem:[#allocation9 + $0x580] sm:$0xff]  ;;  %13818 = vmatpush1.msra.mxu1 %v13622_v28  ;;  %13748 = vmatprep.subr.mxu0 %v13491_v40 }
 0x837   : > { %v13487_v35 = vld [vmem:[#allocation9 + $0x168] sm:$0xff]  ;;  %13819 = vmatprep.subr.mxu1 %v13619_v48  ;;  %v13486_v34 = vld [vmem:[#allocation9 + $0x160] sm:$0xff]  ;;  %13749 = vmatpush1.msra.mxu0 %v13490_v62 }
 0x838   : > { %v13615_v10 = vld [vmem:[#allocation9 + $0x568] sm:$0xff]  ;;  %v13614_v36 = vld [vmem:[#allocation9 + $0x560] sm:$0xff]  ;;  %13820 = vmatpush1.msra.mxu1 %v13618_v5  ;;  %13750 = vmatprep.subr.mxu0 %v13487_v35 }
 0x839   : > { %v13483_v50 = vld [vmem:[#allocation9 + $0x148] sm:$0xff]  ;;  %13821 = vmatprep.subr.mxu1 %v13615_v10  ;;  %v13482_v57 = vld [vmem:[#allocation9 + $0x140] sm:$0xff]  ;;  %13751 = vmatpush1.msra.mxu0 %v13486_v34 }
 0x83a   : > { %v13611_v29 = vld [vmem:[#allocation9 + $0x548] sm:$0xff]  ;;  %v13610_v54 = vld [vmem:[#allocation9 + $0x540] sm:$0xff]  ;;  %13822 = vmatpush1.msra.mxu1 %v13614_v36  ;;  %13752 = vmatprep.subr.mxu0 %v13483_v50 }
 0x83b   : > { %v13479_v61 = vld [vmem:[#allocation9 + $0x128] sm:$0xff]  ;;  %13823 = vmatprep.subr.mxu1 %v13611_v29  ;;  %v13478_v4 = vld [vmem:[#allocation9 + $0x120] sm:$0xff]  ;;  %13753 = vmatpush1.msra.mxu0 %v13482_v57 }
 0x83c   : > { %v13607_v17 = vld [vmem:[#allocation9 + $0x528] sm:$0xff]  ;;  %v13606_v51 = vld [vmem:[#allocation9 + $0x520] sm:$0xff]  ;;  %13824 = vmatpush1.msra.mxu1 %v13610_v54  ;;  %13754 = vmatprep.subr.mxu0 %v13479_v61 }
 0x83d   : > { %v13475_v15 = vld [vmem:[#allocation9 + $0x108] sm:$0xff]  ;;  %13825 = vmatprep.subr.mxu1 %v13607_v17  ;;  %v13474_v23 = vld [vmem:[#allocation9 + $0x100] sm:$0xff]  ;;  %13755 = vmatpush1.msra.mxu0 %v13478_v4 }
 0x83e   : > { %v13603_v47 = vld [vmem:[#allocation9 + $0x508] sm:$0xff]  ;;  %v13602_v20 = vld [vmem:[#allocation9 + $0x500] sm:$0xff]  ;;  %13826 = vmatpush1.msra.mxu1 %v13606_v51  ;;  %13756 = vmatprep.subr.mxu0 %v13475_v15 }
 0x83f   : > { %v13471_v25 = vld [vmem:[#allocation9 + $0xe8] sm:$0xff]  ;;  %13827 = vmatprep.subr.mxu1 %v13603_v47  ;;  %v13470_v39 = vld [vmem:[#allocation9 + $0xe0] sm:$0xff]  ;;  %13757 = vmatpush1.msra.mxu0 %v13474_v23 }
 0x840   : > { %v13599_v45 = vld [vmem:[#allocation9 + $0x4e8] sm:$0xff]  ;;  %v13598_v13 = vld [vmem:[#allocation9 + $0x4e0] sm:$0xff]  ;;  %13828 = vmatpush1.msra.mxu1 %v13602_v20  ;;  %13758 = vmatprep.subr.mxu0 %v13471_v25  ;;  %v13404_v25 = vld [vmem:[#allocation8] sm:$0xf] }
 0x841   : > { %v13467_v8 = vld [vmem:[#allocation9 + $0xc8] sm:$0xff]  ;;  %13829 = vmatprep.subr.mxu1 %v13599_v45  ;;  %v13466_v6 = vld [vmem:[#allocation9 + $0xc0] sm:$0xff]  ;;  %13759 = vmatpush1.msra.mxu0 %v13470_v39 }
 0x842   : > { %v13595_v53 = vld [vmem:[#allocation9 + $0x4c8] sm:$0xff]  ;;  %v13594_v14 = vld [vmem:[#allocation9 + $0x4c0] sm:$0xff]  ;;  %13830 = vmatpush1.msra.mxu1 %v13598_v13  ;;  %13760 = vmatprep.subr.mxu0 %v13467_v8 }
 0x843   : > { %v13463_v31 = vld [vmem:[#allocation9 + $0xa8] sm:$0xff]  ;;  %13831 = vmatprep.subr.mxu1 %v13595_v53  ;;  %v13462_v37 = vld [vmem:[#allocation9 + $0xa0] sm:$0xff]  ;;  %13761 = vmatpush1.msra.mxu0 %v13466_v6 }
 0x844   : > { %v13591_v49 = vld [vmem:[#allocation9 + $0x4a8] sm:$0xff]  ;;  %v13590_v44 = vld [vmem:[#allocation9 + $0x4a0] sm:$0xff]  ;;  %13832 = vmatpush1.msra.mxu1 %v13594_v14  ;;  %13762 = vmatprep.subr.mxu0 %v13463_v31 }
 0x845   : > { %v13459_v27 = vld [vmem:[#allocation9 + $0x88] sm:$0xff]  ;;  %13833 = vmatprep.subr.mxu1 %v13591_v49  ;;  %v13458_v18 = vld [vmem:[#allocation9 + $0x80] sm:$0xff]  ;;  %13763 = vmatpush1.msra.mxu0 %v13462_v37 }
 0x846   : > { %v13587_v19 = vld [vmem:[#allocation9 + $0x488] sm:$0xff]  ;;  %v13586_v33 = vld [vmem:[#allocation9 + $0x480] sm:$0xff]  ;;  %13834 = vmatpush1.msra.mxu1 %v13590_v44  ;;  %13764 = vmatprep.subr.mxu0 %v13459_v27 }
 0x847   : > { %v13455_v3 = vld [vmem:[#allocation9 + $0x68] sm:$0xff]  ;;  %13835 = vmatprep.subr.mxu1 %v13587_v19  ;;  %v13454_v52 = vld [vmem:[#allocation9 + $0x60] sm:$0xff]  ;;  %13765 = vmatpush1.msra.mxu0 %v13458_v18 }
 0x848   : > { %v13583_v9 = vld [vmem:[#allocation9 + $0x468] sm:$0xff]  ;;  %v13582_v58 = vld [vmem:[#allocation9 + $0x460] sm:$0xff]  ;;  %13836 = vmatpush1.msra.mxu1 %v13586_v33  ;;  %13766 = vmatprep.subr.mxu0 %v13455_v3 }
 0x849   : > { %v13451_v12 = vld [vmem:[#allocation9 + $0x48] sm:$0xff]  ;;  %13837 = vmatprep.subr.mxu1 %v13583_v9  ;;  %v13450_v11 = vld [vmem:[#allocation9 + $0x40] sm:$0xff]  ;;  %13767 = vmatpush1.msra.mxu0 %v13454_v52 }
 0x84a   : > { %v13579_v21 = vld [vmem:[#allocation9 + $0x448] sm:$0xff]  ;;  %v13578_v24 = vld [vmem:[#allocation9 + $0x440] sm:$0xff]  ;;  %13838 = vmatpush1.msra.mxu1 %v13582_v58  ;;  %13768 = vmatprep.subr.mxu0 %v13451_v12 }
 0x84b   : > { %v13447_v42 = vld [vmem:[#allocation9 + $0x28] sm:$0xff]  ;;  %13839 = vmatprep.subr.mxu1 %v13579_v21  ;;  %v13446_v26 = vld [vmem:[#allocation9 + $0x20] sm:$0xff]  ;;  %13769 = vmatpush1.msra.mxu0 %v13450_v11 }
 0x84c   : > { %v13575_v0 = vld [vmem:[#allocation9 + $0x428] sm:$0xff]  ;;  %v13574_v30 = vld [vmem:[#allocation9 + $0x420] sm:$0xff]  ;;  %13840 = vmatpush1.msra.mxu1 %v13578_v24  ;;  %13770 = vmatprep.subr.mxu0 %v13447_v42 }
 0x84d   : > { %v13443_v46 = vld [vmem:[#allocation9 + $0x8] sm:$0xff]  ;;  %13841 = vmatprep.subr.mxu1 %v13575_v0  ;;  %v13442_v41 = vld [vmem:[#allocation9] sm:$0xff]  ;;  %13771 = vmatpush1.msra.mxu0 %v13446_v26 }
 0x84e   : > { %v13571_v32 = vld [vmem:[#allocation9 + $0x408] sm:$0xff]  ;;  %v13570_v38 = vld [vmem:[#allocation9 + $0x400] sm:$0xff]  ;;  %13842 = vmatpush1.msra.mxu1 %v13574_v30  ;;  %13772 = vmatprep.subr.mxu0 %v13443_v46 }
 0x84f   : > { %v13567_v1 = vld [vmem:[#allocation9 + $0x3e8] sm:$0xff]  ;;  %13843 = vmatprep.subr.mxu1 %v13571_v32  ;;  %v13566_v2 = vld [vmem:[#allocation9 + $0x3e0] sm:$0xff]  ;;  %13773 = vmatpush1.msra.mxu0 %v13442_v41 }
 0x850   : > { %v13695_v60 = vld [vmem:[#allocation9 + $0x7e8] sm:$0xff]  ;;  %v13694_v7 = vld [vmem:[#allocation9 + $0x7e0] sm:$0xff]  ;;  %13844 = vmatpush1.msra.mxu1 %v13570_v38  ;;  %13774 = vmatprep.subr.mxu0 %v13567_v1 }
 0x851   : > { %v13563_v16 = vld [vmem:[#allocation9 + $0x3c8] sm:$0xff]  ;;  %13845 = vmatprep.subr.mxu1 %v13695_v60  ;;  %v13562_v56 = vld [vmem:[#allocation9 + $0x3c0] sm:$0xff]  ;;  %13775 = vmatpush2.msra.mxu0 %v13566_v2 }
 0x852   : > { %v13691_v43 = vld [vmem:[#allocation9 + $0x7c8] sm:$0xff]  ;;  %v13690_v22 = vld [vmem:[#allocation9 + $0x7c0] sm:$0xff]  ;;  %13846 = vmatpush2.msra.mxu1 %v13694_v7  ;;  %13776 = vmatprep.subr.mxu0 %v13563_v16 }
 0x853   : > { %v13559_v59 = vld [vmem:[#allocation9 + $0x3a8] sm:$0xff]  ;;  %13847 = vmatprep.subr.mxu1 %v13691_v43  ;;  %v13558_v28 = vld [vmem:[#allocation9 + $0x3a0] sm:$0xff]  ;;  %13777 = vmatpush2.msra.mxu0 %v13562_v56 }
 0x854   : > { %v13687_v55 = vld [vmem:[#allocation9 + $0x7a8] sm:$0xff]  ;;  %v13686_v40 = vld [vmem:[#allocation9 + $0x7a0] sm:$0xff]  ;;  %13848 = vmatpush2.msra.mxu1 %v13690_v22  ;;  %13778 = vmatprep.subr.mxu0 %v13559_v59 }
 0x855   : > { %v13555_v48 = vld [vmem:[#allocation9 + $0x388] sm:$0xff]  ;;  %13849 = vmatprep.subr.mxu1 %v13687_v55  ;;  %v13554_v5 = vld [vmem:[#allocation9 + $0x380] sm:$0xff]  ;;  %13779 = vmatpush2.msra.mxu0 %v13558_v28 }
 0x856   : > { %v13683_v62 = vld [vmem:[#allocation9 + $0x788] sm:$0xff]  ;;  %v13682_v35 = vld [vmem:[#allocation9 + $0x780] sm:$0xff]  ;;  %13850 = vmatpush2.msra.mxu1 %v13686_v40  ;;  %13780 = vmatprep.subr.mxu0 %v13555_v48 }
 0x857   : > { %v13551_v10 = vld [vmem:[#allocation9 + $0x368] sm:$0xff]  ;;  %13851 = vmatprep.subr.mxu1 %v13683_v62  ;;  %v13550_v36 = vld [vmem:[#allocation9 + $0x360] sm:$0xff]  ;;  %13781 = vmatpush2.msra.mxu0 %v13554_v5 }
 0x858   : > { %v13679_v34 = vld [vmem:[#allocation9 + $0x768] sm:$0xff]  ;;  %v13678_v50 = vld [vmem:[#allocation9 + $0x760] sm:$0xff]  ;;  %13852 = vmatpush2.msra.mxu1 %v13682_v35  ;;  %13782 = vmatprep.subr.mxu0 %v13551_v10 }
 0x859   : > { %v22008_v29 = vld [vmem:[#allocation21_spill] sm:$0xff]  ;;  %13853 = vmatprep.subr.mxu1 %v13679_v34  ;;  %v13546_v15 = vld [vmem:[#allocation9 + $0x340] sm:$0xff]  ;;  %13783 = vmatpush2.msra.mxu0 %v13550_v36 }
 0x85a   : > { %v13408_v57 = vsub.s32 0, %v22008_v29  ;;  %v13412_v54 = vsub.s32 1, %v22008_v29  ;;  %v13416_v61 = vsub.s32 2, %v22008_v29  ;;  %v13547_v17 = vld [vmem:[#allocation9 + $0x348] sm:$0xff]  ;;  %v13420_v51 = vsub.s32 3, %v22008_v29  ;;  %v13674_v47 = vld [vmem:[#allocation9 + $0x740] sm:$0xff]  ;;  %13854 = vmatpush2.msra.mxu1 %v13678_v50 }
 0x85b   : > { %v13675_v4 = vld [vmem:[#allocation9 + $0x748] sm:$0xff]  ;;  %13784 = vmatprep.subr.mxu0 %v13547_v17  ;;  %v13542_v45 = vld [vmem:[#allocation9 + $0x320] sm:$0xff] }
 0x85c   : > { %v13543_v23 = vld [vmem:[#allocation9 + $0x328] sm:$0xff]  ;;  %13855 = vmatprep.subr.mxu1 %v13675_v4  ;;  %v13670_v39 = vld [vmem:[#allocation9 + $0x720] sm:$0xff]  ;;  %v13409_v13 = vrot.slane %v13404_v25, %v13408_v57  ;;  %v13413_v8 = vrot.slane %v13404_v25, %v13412_v54  ;;  %v13417_v53 = vrot.slane %v13404_v25, %v13416_v61  ;;  %13785 = vmatpush2.msra.mxu0 %v13546_v15 }
 0x85d   : > { %v13671_v20 = vld [vmem:[#allocation9 + $0x728] sm:$0xff]  ;;  %13856 = vmatpush2.msra.mxu1 %v13674_v47  ;;  %v13421_v31 = vrot.slane %v13404_v25, %v13420_v51  ;;  %13786 = vmatprep.subr.mxu0 %v13543_v23  ;;  %v13538_v49 = vld [vmem:[#allocation9 + $0x300] sm:$0xff]  ;;  %v13505_v47 = vld [vmem:[#allocation9 + $0x1f8] sm:$0xff] }
 0x85e   : > { %v13539_v6 = vld [vmem:[#allocation9 + $0x308] sm:$0xff]  ;;  %13857 = vmatprep.subr.mxu1 %v13671_v20  ;;  %v13666_v37 = vld [vmem:[#allocation9 + $0x700] sm:$0xff]  ;;  %v13422_v44 = vcombine.low %v13409_v13, %v13413_v8  ;;  %13787 = vmatpush2.msra.mxu0 %v13542_v45  ;;  %v13633_v23 = vld [vmem:[#allocation9 + $0x5f8] sm:$0xff] }
 0x85f   : > { %v13667_v14 = vld [vmem:[#allocation9 + $0x708] sm:$0xff]  ;;  %13858 = vmatpush2.msra.mxu1 %v13670_v39  ;;  %v13423_v18 = vcombine.low %v13417_v53, %v13421_v31  ;;  %13788 = vmatprep.subr.mxu0 %v13539_v6  ;;  %v13534_v33 = vld [vmem:[#allocation9 + $0x2e0] sm:$0xff]  ;;  %v13504_v20 = vld [vmem:[#allocation9 + $0x1f0] sm:$0xff] }
 0x860   : > { %v13535_v27 = vld [vmem:[#allocation9 + $0x2e8] sm:$0xff]  ;;  %13859 = vmatprep.subr.mxu1 %v13667_v14  ;;  %v13662_v3 = vld [vmem:[#allocation9 + $0x6e0] sm:$0xff]  ;;  %v13430_v9 = vrot.slane %v13422_v44, %v21681_v63  ;;  %13789 = vmatpush2.msra.mxu0 %v13538_v49  ;;  %v13632_v25 = vld [vmem:[#allocation9 + $0x5f0] sm:$0xff] }
 0x861   : > { %v13663_v19 = vld [vmem:[#allocation9 + $0x6e8] sm:$0xff]  ;;  %13860 = vmatpush2.msra.mxu1 %v13666_v37  ;;  %v13437_v12 = vrot.slane %v13423_v18, %v21681_v63  ;;  %13790 = vmatprep.subr.mxu0 %v13535_v27  ;;  %v13530_v21 = vld [vmem:[#allocation9 + $0x2c0] sm:$0xff]  ;;  %v13501_v45 = vld [vmem:[#allocation9 + $0x1d8] sm:$0xff] }
 0x862   : > { %v13531_v52 = vld [vmem:[#allocation9 + $0x2c8] sm:$0xff]  ;;  %13861 = vmatprep.subr.mxu1 %v13663_v19  ;;  %v13658_v11 = vld [vmem:[#allocation9 + $0x6c0] sm:$0xff]  ;;  %13791 = vmatpush2.msra.mxu0 %v13534_v33  ;;  %v13629_v39 = vld [vmem:[#allocation9 + $0x5d8] sm:$0xff] }
 0x863   : > { %v13659_v58 = vld [vmem:[#allocation9 + $0x6c8] sm:$0xff]  ;;  %13862 = vmatpush2.msra.mxu1 %v13662_v3  ;;  %v13438_v26 = vcombine.low %v13430_v9, %v13437_v12  ;;  %13792 = vmatprep.subr.mxu0 %v13531_v52  ;;  %v13526_v30 = vld [vmem:[#allocation9 + $0x2a0] sm:$0xff]  ;;  %v13500_v13 = vld [vmem:[#allocation9 + $0x1d0] sm:$0xff] }
 0x864   : > { %v13403_v24 = vld [vmem:[#allocation2] sm:$0xff]  ;;  %13863 = vmatprep.subr.mxu1 %v13659_v58  ;;  %v13654_v46 = vld [vmem:[#allocation9 + $0x6a0] sm:$0xff]  ;;  %13793 = vmatpush2.msra.mxu0 %v13530_v21  ;;  %v13628_v8 = vld [vmem:[#allocation9 + $0x5d0] sm:$0xff] }
 0x865   : > { %v13527_v42 = vld [vmem:[#allocation9 + $0x2a8] sm:$0xff]  ;;  %13864 = vmatpush2.msra.mxu1 %v13658_v11  ;;  %v13440_v38 = vadd.f32 %v13438_v26, %v13403_v24  ;;  %v13522_v1 = vld [vmem:[#allocation9 + $0x280] sm:$0xff]  ;;  %v13497_v53 = vld [vmem:[#allocation9 + $0x1b8] sm:$0xff] }
 0x866   : > { %v13655_v0 = vld [vmem:[#allocation9 + $0x6a8] sm:$0xff]  ;;  %13794 = vmatprep.subr.mxu0 %v13527_v42  ;;  %v13650_v60 = vld [vmem:[#allocation9 + $0x680] sm:$0xff]  ;;  %v13625_v6 = vld [vmem:[#allocation9 + $0x5b8] sm:$0xff] }
 0x867   : > { %v13523_v32 = vld [vmem:[#allocation9 + $0x288] sm:$0xff]  ;;  %13865 = vmatprep.subr.mxu1 %v13655_v0  ;;  %13795 = vmatpush2.msra.mxu0 %v13526_v30  ;;  %v13441_v16 = vmax.f32 %v13440_v38, 0.0  ;;  %v13518_v43 = vld [vmem:[#allocation9 + $0x260] sm:$0xff]  ;;  %v13496_v14 = vld [vmem:[#allocation9 + $0x1b0] sm:$0xff] }
 0x868   : > { %v13651_v41 = vld [vmem:[#allocation9 + $0x688] sm:$0xff]  ;;  %13866 = vmatpush2.msra.mxu1 %v13654_v46  ;;  %13796 = vmatprep.subr.mxu0 %v13523_v32  ;;  %v13646_v56 = vld [vmem:[#allocation9 + $0x660] sm:$0xff]  ;;  %v13624_v31 = vld [vmem:[#allocation9 + $0x5b0] sm:$0xff] }
 0x869   : > { %v13519_v2 = vld [vmem:[#allocation9 + $0x268] sm:$0xff]  ;;  %13867 = vmatprep.subr.mxu1 %v13651_v41  ;;  %13797 = vmatpush2.msra.mxu0 %v13522_v1  ;;  %v21704_v55 = vrot.slane %v13441_v16, %v21681_v63  ;;  %v13721_v28 = vcombine.high %v13441_v16, %v13441_v16  ;;  %v13514_v40 = vld [vmem:[#allocation9 + $0x240] sm:$0xff]  ;;  %v13493_v49 = vld [vmem:[#allocation9 + $0x198] sm:$0xff] }
 0x86a   : > { %v13647_v7 = vld [vmem:[#allocation9 + $0x668] sm:$0xff]  ;;  %13868 = vmatpush2.msra.mxu1 %v13650_v60  ;;  %13798 = vmatprep.subr.mxu0 %v13519_v2  ;;  %v13642_v48 = vld [vmem:[#allocation9 + $0x640] sm:$0xff]  ;;  %v13621_v37 = vld [vmem:[#allocation9 + $0x598] sm:$0xff] }
 0x86b   : > { %v13515_v22 = vld [vmem:[#allocation9 + $0x248] sm:$0xff]  ;;  %13869 = vmatprep.subr.mxu1 %v13647_v7  ;;  %13799 = vmatpush2.msra.mxu0 %v13518_v43  ;;  %v21707_v35 = vrot.slane %v13721_v28, %v21681_v63  ;;  %v13510_v10 = vld [vmem:[#allocation9 + $0x220] sm:$0xff]  ;;  %v21711_v17 = vcombine.high %v21704_v55, %v21704_v55  ;;  %v13492_v44 = vld [vmem:[#allocation9 + $0x190] sm:$0xff] }
 0x86c   : > { %v13643_v59 = vld [vmem:[#allocation9 + $0x648] sm:$0xff]  ;;  %13870 = vmatpush2.msra.mxu1 %v13646_v56  ;;  %13800 = vmatprep.subr.mxu0 %v13515_v22  ;;  %v13638_v34 = vld [vmem:[#allocation9 + $0x620] sm:$0xff]  ;;  %v13620_v27 = vld [vmem:[#allocation9 + $0x590] sm:$0xff] }
 0x86d   : > { %v13511_v62 = vld [vmem:[#allocation9 + $0x228] sm:$0xff]  ;;  %13871 = vmatprep.subr.mxu1 %v13643_v59  ;;  %13801 = vmatpush2.msra.mxu0 %v13514_v40  ;;  %v13506_v4 = vld [vmem:[#allocation9 + $0x200] sm:$0xff]  ;;  %v21715_v63 = vcombine.high %v21707_v35, %v21707_v35  ;;  %v13489_v19 = vld [vmem:[#allocation9 + $0x178] sm:$0xff] }
 0x86e   : > { %v13639_v5 = vld [vmem:[#allocation9 + $0x628] sm:$0xff]  ;;  %13872 = vmatpush2.msra.mxu1 %v13642_v48  ;;  %13802 = vmatprep.subr.mxu0 %v13511_v62  ;;  %v13634_v15 = vld [vmem:[#allocation9 + $0x600] sm:$0xff]  ;;  %v13617_v18 = vld [vmem:[#allocation9 + $0x578] sm:$0xff] }
 0x86f   : > { %v13507_v36 = vld [vmem:[#allocation9 + $0x208] sm:$0xff]  ;;  %13873 = vmatprep.subr.mxu1 %v13639_v5  ;;  %13803 = vmatpush2.msra.mxu0 %v13510_v10  ;;  %v13488_v33 = vld [vmem:[#allocation9 + $0x170] sm:$0xff]  ;;  %v13485_v9 = vld [vmem:[#allocation9 + $0x158] sm:$0xff] }
 0x870   : > { %v13635_v50 = vld [vmem:[#allocation9 + $0x608] sm:$0xff]  ;;  %13874 = vmatpush2.msra.mxu1 %v13638_v34  ;;  %13804 = vmatprep.subr.mxu0 %v13507_v36  ;;  %v13616_v3 = vld [vmem:[#allocation9 + $0x570] sm:$0xff]  ;;  %v13613_v52 = vld [vmem:[#allocation9 + $0x558] sm:$0xff] }
 0x871   : > { %13875 = vmatprep.subr.mxu1 %v13635_v50  ;;  %13805 = vmatpush2.msra.mxu0 %v13506_v4  ;;  %v13484_v58 = vld [vmem:[#allocation9 + $0x150] sm:$0xff]  ;;  %v13481_v21 = vld [vmem:[#allocation9 + $0x138] sm:$0xff] }
 0x872   : > { %13806 = vmatprep.mubr.f32.mxu0 %v21711_v17  ;;  %13876 = vmatpush2.msra.mxu1 %v13634_v15  ;;  %v13612_v12 = vld [vmem:[#allocation9 + $0x550] sm:$0xff]  ;;  %v13609_v11 = vld [vmem:[#allocation9 + $0x538] sm:$0xff] }
 0x873   : > { %13807 = vmatmul.mubr.f32.vlgmr.msra.gmra.mxu0 %v21704_v55  ;;  %13877 = vmatprep.mubr.f32.mxu1 %v21715_v63  ;;  %v13480_v24 = vld [vmem:[#allocation9 + $0x130] sm:$0xff]  ;;  %v13477_v0 = vld [vmem:[#allocation9 + $0x118] sm:$0xff] }
 0x874   : > { %13884 = vmatprep.subr.mxu0 %v13505_v47  ;;  %13955 = vmatprep.subr.mxu1 %v13633_v23  ;;  %v13608_v42 = vld [vmem:[#allocation9 + $0x530] sm:$0xff]  ;;  %v13605_v26 = vld [vmem:[#allocation9 + $0x518] sm:$0xff] }
 0x875   : > { %13878 = vmatmul.mubr.f32.vlgmr.msra.gmra.mxu1 %v21707_v35  ;;  %13885 = vmatpush1.msra.mxu0 %v13504_v20  ;;  %v13476_v30 = vld [vmem:[#allocation9 + $0x110] sm:$0xff]  ;;  %v13473_v32 = vld [vmem:[#allocation9 + $0xf8] sm:$0xff] }
 0x876   : > { %13956 = vmatpush1.msra.mxu1 %v13632_v25  ;;  %13886 = vmatprep.subr.mxu0 %v13501_v45  ;;  %v13604_v46 = vld [vmem:[#allocation9 + $0x510] sm:$0xff]  ;;  %v13601_v41 = vld [vmem:[#allocation9 + $0x4f8] sm:$0xff] }
 0x877   : > { %13957 = vmatprep.subr.mxu1 %v13629_v39  ;;  %13887 = vmatpush1.msra.mxu0 %v13500_v13  ;;  %v13472_v38 = vld [vmem:[#allocation9 + $0xf0] sm:$0xff]  ;;  %v13469_v60 = vld [vmem:[#allocation9 + $0xd8] sm:$0xff] }
 0x878   : > { %13958 = vmatpush1.msra.mxu1 %v13628_v8  ;;  %13888 = vmatprep.subr.mxu0 %v13497_v53  ;;  %v13600_v1 = vld [vmem:[#allocation9 + $0x4f0] sm:$0xff]  ;;  %v13597_v2 = vld [vmem:[#allocation9 + $0x4d8] sm:$0xff] }
 0x879   : > { %13959 = vmatprep.subr.mxu1 %v13625_v6  ;;  %13889 = vmatpush1.msra.mxu0 %v13496_v14  ;;  %v13468_v7 = vld [vmem:[#allocation9 + $0xd0] sm:$0xff]  ;;  %v13465_v43 = vld [vmem:[#allocation9 + $0xb8] sm:$0xff] }
 0x87a   : > { %13960 = vmatpush1.msra.mxu1 %v13624_v31  ;;  %13890 = vmatprep.subr.mxu0 %v13493_v49  ;;  %v13596_v16 = vld [vmem:[#allocation9 + $0x4d0] sm:$0xff]  ;;  %v13593_v56 = vld [vmem:[#allocation9 + $0x4b8] sm:$0xff] }
 0x87b   : > { %13961 = vmatprep.subr.mxu1 %v13621_v37  ;;  %13891 = vmatpush1.msra.mxu0 %v13492_v44  ;;  %v13464_v22 = vld [vmem:[#allocation9 + $0xb0] sm:$0xff]  ;;  %v13461_v28 = vld [vmem:[#allocation9 + $0x98] sm:$0xff] }
 0x87c   : > { %13962 = vmatpush1.msra.mxu1 %v13620_v27  ;;  %13892 = vmatprep.subr.mxu0 %v13489_v19  ;;  %v13592_v59 = vld [vmem:[#allocation9 + $0x4b0] sm:$0xff]  ;;  %v13589_v40 = vld [vmem:[#allocation9 + $0x498] sm:$0xff] }
 0x87d   : > { %13963 = vmatprep.subr.mxu1 %v13617_v18  ;;  %13893 = vmatpush1.msra.mxu0 %v13488_v33  ;;  %v13460_v48 = vld [vmem:[#allocation9 + $0x90] sm:$0xff]  ;;  %v13457_v5 = vld [vmem:[#allocation9 + $0x78] sm:$0xff] }
 0x87e   : > { %13964 = vmatpush1.msra.mxu1 %v13616_v3  ;;  %13894 = vmatprep.subr.mxu0 %v13485_v9  ;;  %v13588_v62 = vld [vmem:[#allocation9 + $0x490] sm:$0xff]  ;;  %v13585_v10 = vld [vmem:[#allocation9 + $0x478] sm:$0xff] }
 0x87f   : > { %13965 = vmatprep.subr.mxu1 %v13613_v52  ;;  %13895 = vmatpush1.msra.mxu0 %v13484_v58  ;;  %v13456_v34 = vld [vmem:[#allocation9 + $0x70] sm:$0xff]  ;;  %v13453_v50 = vld [vmem:[#allocation9 + $0x58] sm:$0xff] }
 0x880   : > { %13966 = vmatpush1.msra.mxu1 %v13612_v12  ;;  %13896 = vmatprep.subr.mxu0 %v13481_v21  ;;  %v13584_v36 = vld [vmem:[#allocation9 + $0x470] sm:$0xff]  ;;  %v13581_v4 = vld [vmem:[#allocation9 + $0x458] sm:$0xff] }
 0x881   : > { %13967 = vmatprep.subr.mxu1 %v13609_v11  ;;  %13897 = vmatpush1.msra.mxu0 %v13480_v24  ;;  %v13452_v15 = vld [vmem:[#allocation9 + $0x50] sm:$0xff]  ;;  %v13449_v23 = vld [vmem:[#allocation9 + $0x38] sm:$0xff] }
 0x882   : > { %13968 = vmatpush1.msra.mxu1 %v13608_v42  ;;  %13898 = vmatprep.subr.mxu0 %v13477_v0  ;;  %v13580_v47 = vld [vmem:[#allocation9 + $0x450] sm:$0xff]  ;;  %v13577_v20 = vld [vmem:[#allocation9 + $0x438] sm:$0xff] }
 0x883   : > { %13969 = vmatprep.subr.mxu1 %v13605_v26  ;;  %13899 = vmatpush1.msra.mxu0 %v13476_v30  ;;  %v13448_v25 = vld [vmem:[#allocation9 + $0x30] sm:$0xff]  ;;  %v13445_v39 = vld [vmem:[#allocation9 + $0x18] sm:$0xff] }
 0x884   : > { %13970 = vmatpush1.msra.mxu1 %v13604_v46  ;;  %13900 = vmatprep.subr.mxu0 %v13473_v32  ;;  %v13576_v45 = vld [vmem:[#allocation9 + $0x430] sm:$0xff]  ;;  %v13573_v13 = vld [vmem:[#allocation9 + $0x418] sm:$0xff] }
 0x885   : > { %13971 = vmatprep.subr.mxu1 %v13601_v41  ;;  %13901 = vmatpush1.msra.mxu0 %v13472_v38  ;;  %v13444_v8 = vld [vmem:[#allocation9 + $0x10] sm:$0xff]  ;;  %v13569_v6 = vld [vmem:[#allocation9 + $0x3f8] sm:$0xff] }
 0x886   : > { %13972 = vmatpush1.msra.mxu1 %v13600_v1  ;;  %13902 = vmatprep.subr.mxu0 %v13469_v60  ;;  %v13572_v53 = vld [vmem:[#allocation9 + $0x410] sm:$0xff]  ;;  %v13697_v14 = vld [vmem:[#allocation9 + $0x7f8] sm:$0xff] }
 0x887   : > { %13973 = vmatprep.subr.mxu1 %v13597_v2  ;;  %13903 = vmatpush1.msra.mxu0 %v13468_v7  ;;  %v13568_v31 = vld [vmem:[#allocation9 + $0x3f0] sm:$0xff]  ;;  %v13565_v37 = vld [vmem:[#allocation9 + $0x3d8] sm:$0xff] }
 0x888   : > { %13974 = vmatpush1.msra.mxu1 %v13596_v16  ;;  %13904 = vmatprep.subr.mxu0 %v13465_v43  ;;  %v13696_v49 = vld [vmem:[#allocation9 + $0x7f0] sm:$0xff]  ;;  %v13693_v44 = vld [vmem:[#allocation9 + $0x7d8] sm:$0xff] }
 0x889   : > { %13975 = vmatprep.subr.mxu1 %v13593_v56  ;;  %13905 = vmatpush1.msra.mxu0 %v13464_v22  ;;  %v13564_v27 = vld [vmem:[#allocation9 + $0x3d0] sm:$0xff]  ;;  %v13561_v18 = vld [vmem:[#allocation9 + $0x3b8] sm:$0xff] }
 0x88a   : > { %13976 = vmatpush1.msra.mxu1 %v13592_v59  ;;  %13906 = vmatprep.subr.mxu0 %v13461_v28  ;;  %v13692_v19 = vld [vmem:[#allocation9 + $0x7d0] sm:$0xff]  ;;  %v13689_v33 = vld [vmem:[#allocation9 + $0x7b8] sm:$0xff] }
 0x88b   : > { %13977 = vmatprep.subr.mxu1 %v13589_v40  ;;  %13907 = vmatpush1.msra.mxu0 %v13460_v48  ;;  %v13560_v3 = vld [vmem:[#allocation9 + $0x3b0] sm:$0xff]  ;;  %v13557_v52 = vld [vmem:[#allocation9 + $0x398] sm:$0xff] }
 0x88c   : > { %13978 = vmatpush1.msra.mxu1 %v13588_v62  ;;  %13908 = vmatprep.subr.mxu0 %v13457_v5  ;;  %v13688_v9 = vld [vmem:[#allocation9 + $0x7b0] sm:$0xff]  ;;  %v13685_v58 = vld [vmem:[#allocation9 + $0x798] sm:$0xff] }
 0x88d   : > { %13979 = vmatprep.subr.mxu1 %v13585_v10  ;;  %13909 = vmatpush1.msra.mxu0 %v13456_v34  ;;  %v13556_v12 = vld [vmem:[#allocation9 + $0x390] sm:$0xff]  ;;  %v13553_v11 = vld [vmem:[#allocation9 + $0x378] sm:$0xff] }
 0x88e   : > { %13980 = vmatpush1.msra.mxu1 %v13584_v36  ;;  %13910 = vmatprep.subr.mxu0 %v13453_v50  ;;  %v13684_v21 = vld [vmem:[#allocation9 + $0x790] sm:$0xff]  ;;  %v13681_v24 = vld [vmem:[#allocation9 + $0x778] sm:$0xff] }
 0x88f   : > { %13981 = vmatprep.subr.mxu1 %v13581_v4  ;;  %13911 = vmatpush1.msra.mxu0 %v13452_v15  ;;  %v13552_v42 = vld [vmem:[#allocation9 + $0x370] sm:$0xff]  ;;  %v13549_v26 = vld [vmem:[#allocation9 + $0x358] sm:$0xff] }
 0x890   : > { %13982 = vmatpush1.msra.mxu1 %v13580_v47  ;;  %13912 = vmatprep.subr.mxu0 %v13449_v23  ;;  %v13680_v0 = vld [vmem:[#allocation9 + $0x770] sm:$0xff]  ;;  %v13677_v30 = vld [vmem:[#allocation9 + $0x758] sm:$0xff] }
 0x891   : > { %13983 = vmatprep.subr.mxu1 %v13577_v20  ;;  %13913 = vmatpush1.msra.mxu0 %v13448_v25  ;;  %v13548_v46 = vld [vmem:[#allocation9 + $0x350] sm:$0xff]  ;;  %v13545_v41 = vld [vmem:[#allocation9 + $0x338] sm:$0xff] }
 0x892   : > { %13984 = vmatpush1.msra.mxu1 %v13576_v45  ;;  %13914 = vmatprep.subr.mxu0 %v13445_v39  ;;  %v13676_v32 = vld [vmem:[#allocation9 + $0x750] sm:$0xff]  ;;  %v13673_v38 = vld [vmem:[#allocation9 + $0x738] sm:$0xff] }
 0x893   : > { %13985 = vmatprep.subr.mxu1 %v13573_v13  ;;  %13915 = vmatpush1.msra.mxu0 %v13444_v8  ;;  %v13544_v1 = vld [vmem:[#allocation9 + $0x330] sm:$0xff]  ;;  %v13541_v2 = vld [vmem:[#allocation9 + $0x318] sm:$0xff] }
 0x894   : > { %13986 = vmatpush1.msra.mxu1 %v13572_v53  ;;  %13916 = vmatprep.subr.mxu0 %v13569_v6  ;;  %v13672_v60 = vld [vmem:[#allocation9 + $0x730] sm:$0xff]  ;;  %v13669_v7 = vld [vmem:[#allocation9 + $0x718] sm:$0xff] }
 0x895   : > { %13987 = vmatprep.subr.mxu1 %v13697_v14  ;;  %13917 = vmatpush2.msra.mxu0 %v13568_v31  ;;  %v13540_v16 = vld [vmem:[#allocation9 + $0x310] sm:$0xff]  ;;  %v13537_v56 = vld [vmem:[#allocation9 + $0x2f8] sm:$0xff] }
 0x896   : > { %13988 = vmatpush2.msra.mxu1 %v13696_v49  ;;  %13918 = vmatprep.subr.mxu0 %v13565_v37  ;;  %v13668_v43 = vld [vmem:[#allocation9 + $0x710] sm:$0xff]  ;;  %v13665_v22 = vld [vmem:[#allocation9 + $0x6f8] sm:$0xff] }
 0x897   : > { %13989 = vmatprep.subr.mxu1 %v13693_v44  ;;  %13919 = vmatpush2.msra.mxu0 %v13564_v27  ;;  %v13536_v59 = vld [vmem:[#allocation9 + $0x2f0] sm:$0xff]  ;;  %v13533_v40 = vld [vmem:[#allocation9 + $0x2d8] sm:$0xff] }
 0x898   : > { %13990 = vmatpush2.msra.mxu1 %v13692_v19  ;;  %13920 = vmatprep.subr.mxu0 %v13561_v18  ;;  %v13664_v28 = vld [vmem:[#allocation9 + $0x6f0] sm:$0xff]  ;;  %v13661_v48 = vld [vmem:[#allocation9 + $0x6d8] sm:$0xff] }
 0x899   : > { %13991 = vmatprep.subr.mxu1 %v13689_v33  ;;  %13921 = vmatpush2.msra.mxu0 %v13560_v3  ;;  %v13532_v62 = vld [vmem:[#allocation9 + $0x2d0] sm:$0xff]  ;;  %v13529_v10 = vld [vmem:[#allocation9 + $0x2b8] sm:$0xff]  ;;  %v14061_v33 = vld [vmem:[%s21955_s5 + $0xf8] sm:$0xff] }
 0x89a   : > { %13992 = vmatpush2.msra.mxu1 %v13688_v9  ;;  %13922 = vmatprep.subr.mxu0 %v13557_v52  ;;  %v13660_v5 = vld [vmem:[#allocation9 + $0x6d0] sm:$0xff]  ;;  %v13657_v34 = vld [vmem:[#allocation9 + $0x6b8] sm:$0xff]  ;;  %v14045_v3 = vld [vmem:[%s21955_s5 + $0x78] sm:$0xff] }
 0x89b   : > { %13993 = vmatprep.subr.mxu1 %v13685_v58  ;;  %13923 = vmatpush2.msra.mxu0 %v13556_v12  ;;  %v13528_v36 = vld [vmem:[#allocation9 + $0x2b0] sm:$0xff]  ;;  %v13525_v4 = vld [vmem:[#allocation9 + $0x298] sm:$0xff]  ;;  %v14042_v52 = vld [vmem:[%s21955_s5 + $0x60] sm:$0xff] }
 0x89c   : > { %13994 = vmatpush2.msra.mxu1 %v13684_v21  ;;  %13924 = vmatprep.subr.mxu0 %v13553_v11  ;;  %v13656_v50 = vld [vmem:[#allocation9 + $0x6b0] sm:$0xff]  ;;  %v13653_v15 = vld [vmem:[#allocation9 + $0x698] sm:$0xff]  ;;  %v14057_v58 = vld [vmem:[%s21955_s5 + $0xd8] sm:$0xff] }
 0x89d   : > { %13995 = vmatprep.subr.mxu1 %v13681_v24  ;;  %13925 = vmatpush2.msra.mxu0 %v13552_v42  ;;  %v13524_v47 = vld [vmem:[#allocation9 + $0x290] sm:$0xff]  ;;  %v13521_v20 = vld [vmem:[#allocation9 + $0x278] sm:$0xff]  ;;  %v14041_v12 = vld [vmem:[%s21955_s5 + $0x58] sm:$0xff] }
 0x89e   : > { %13996 = vmatpush2.msra.mxu1 %v13680_v0  ;;  %13926 = vmatprep.subr.mxu0 %v13549_v26  ;;  %v13652_v23 = vld [vmem:[#allocation9 + $0x690] sm:$0xff]  ;;  %v13649_v25 = vld [vmem:[#allocation9 + $0x678] sm:$0xff]  ;;  %v14093_v21 = vld [vmem:[%s21955_s5 + $0x1f8] sm:$0xff] }
 0x89f   : > { %13997 = vmatprep.subr.mxu1 %v13677_v30  ;;  %13927 = vmatpush2.msra.mxu0 %v13548_v46  ;;  %v13520_v45 = vld [vmem:[#allocation9 + $0x270] sm:$0xff]  ;;  %v13517_v13 = vld [vmem:[#allocation9 + $0x258] sm:$0xff]  ;;  %v14077_v11 = vld [vmem:[%s21955_s5 + $0x178] sm:$0xff] }
 0x8a0   : > { %13998 = vmatpush2.msra.mxu1 %v13676_v32  ;;  %13928 = vmatprep.subr.mxu0 %v13545_v41  ;;  %v13648_v39 = vld [vmem:[#allocation9 + $0x670] sm:$0xff]  ;;  %v13645_v8 = vld [vmem:[#allocation9 + $0x658] sm:$0xff] }
 0x8a1   : > { %13999 = vmatprep.subr.mxu1 %v13673_v38  ;;  %13929 = vmatpush2.msra.mxu0 %v13544_v1  ;;  %v13516_v53 = vld [vmem:[#allocation9 + $0x250] sm:$0xff]  ;;  %v13513_v14 = vld [vmem:[#allocation9 + $0x238] sm:$0xff]  ;;  %v14090_v38 = vld [vmem:[%s21955_s5 + $0x1e0] sm:$0xff] }
 0x8a2   : > { %14000 = vmatpush2.msra.mxu1 %v13672_v60  ;;  %13930 = vmatprep.subr.mxu0 %v13541_v2  ;;  %v13644_v6 = vld [vmem:[#allocation9 + $0x650] sm:$0xff]  ;;  %v13641_v31 = vld [vmem:[#allocation9 + $0x638] sm:$0xff]  ;;  %v14054_v1 = vld [vmem:[%s21955_s5 + $0xc0] sm:$0xff] }
 0x8a3   : > { %14001 = vmatprep.subr.mxu1 %v13669_v7  ;;  %13931 = vmatpush2.msra.mxu0 %v13540_v16  ;;  %v13512_v49 = vld [vmem:[#allocation9 + $0x230] sm:$0xff]  ;;  %v13509_v44 = vld [vmem:[#allocation9 + $0x218] sm:$0xff]  ;;  %v14074_v60 = vld [vmem:[%s21955_s5 + $0x160] sm:$0xff] }
 0x8a4   : > { %14002 = vmatpush2.msra.mxu1 %v13668_v43  ;;  %13932 = vmatprep.subr.mxu0 %v13537_v56  ;;  %v13640_v37 = vld [vmem:[#allocation9 + $0x630] sm:$0xff]  ;;  %v13637_v27 = vld [vmem:[#allocation9 + $0x618] sm:$0xff]  ;;  %v14038_v2 = vld [vmem:[%s21955_s5 + $0x40] sm:$0xff] }
 0x8a5   : > { %14003 = vmatprep.subr.mxu1 %v13665_v22  ;;  %13933 = vmatpush2.msra.mxu0 %v13536_v59  ;;  %v13508_v19 = vld [vmem:[#allocation9 + $0x210] sm:$0xff]  ;;  %v14060_v9 = vld [vmem:[%s21955_s5 + $0xf0] sm:$0xff]  ;;  %v14089_v7 = vld [vmem:[%s21955_s5 + $0x1d8] sm:$0xff] }
 0x8a6   : > { %14004 = vmatpush2.msra.mxu1 %v13664_v28  ;;  %13934 = vmatprep.subr.mxu0 %v13533_v40  ;;  %v13636_v18 = vld [vmem:[#allocation9 + $0x610] sm:$0xff]  ;;  %v14092_v24 = vld [vmem:[%s21955_s5 + $0x1f0] sm:$0xff]  ;;  %v14053_v16 = vld [vmem:[%s21955_s5 + $0xb8] sm:$0xff] }
 0x8a7   : > { %14005 = vmatprep.subr.mxu1 %v13661_v48  ;;  %13935 = vmatpush2.msra.mxu0 %v13532_v62  ;;  %v14056_v42 = vld [vmem:[%s21955_s5 + $0xd0] sm:$0xff]  ;;  %v14091_v30 = vld [vmem:[%s21955_s5 + $0x1e8] sm:$0xff]  ;;  %v14073_v43 = vld [vmem:[%s21955_s5 + $0x158] sm:$0xff] }
 0x8a8   : > { %14006 = vmatpush2.msra.mxu1 %v13660_v5  ;;  %13936 = vmatprep.subr.mxu0 %v13529_v10  ;;  %v14076_v0 = vld [vmem:[%s21955_s5 + $0x170] sm:$0xff]  ;;  %v14055_v46 = vld [vmem:[%s21955_s5 + $0xc8] sm:$0xff]  ;;  %v14037_v56 = vld [vmem:[%s21955_s5 + $0x38] sm:$0xff] }
 0x8a9   : > { %14007 = vmatprep.subr.mxu1 %v13657_v34  ;;  %13937 = vmatpush2.msra.mxu0 %v13528_v36  ;;  %v14040_v26 = vld [vmem:[%s21955_s5 + $0x50] sm:$0xff]  ;;  %v14075_v32 = vld [vmem:[%s21955_s5 + $0x168] sm:$0xff]  ;;  %v14086_v34 = vld [vmem:[%s21955_s5 + $0x1c0] sm:$0xff] }
 0x8aa   : > { %14008 = vmatpush2.msra.mxu1 %v13656_v50  ;;  %13938 = vmatprep.subr.mxu0 %v13525_v4  ;;  %v14039_v41 = vld [vmem:[%s21955_s5 + $0x48] sm:$0xff]  ;;  %v14088_v22 = vld [vmem:[%s21955_s5 + $0x1d0] sm:$0xff]  ;;  %v14050_v36 = vld [vmem:[%s21955_s5 + $0xa0] sm:$0xff] }
 0x8ab   : > { %14009 = vmatprep.subr.mxu1 %v13653_v15  ;;  %13939 = vmatpush2.msra.mxu0 %v13524_v47  ;;  %v14052_v59 = vld [vmem:[%s21955_s5 + $0xb0] sm:$0xff]  ;;  %v14087_v48 = vld [vmem:[%s21955_s5 + $0x1c8] sm:$0xff]  ;;  %v14070_v50 = vld [vmem:[%s21955_s5 + $0x140] sm:$0xff] }
 0x8ac   : > { %14010 = vmatpush2.msra.mxu1 %v13652_v23  ;;  %13940 = vmatprep.subr.mxu0 %v13521_v20  ;;  %v14072_v28 = vld [vmem:[%s21955_s5 + $0x150] sm:$0xff]  ;;  %v14051_v62 = vld [vmem:[%s21955_s5 + $0xa8] sm:$0xff]  ;;  %v14034_v4 = vld [vmem:[%s21955_s5 + $0x20] sm:$0xff] }
 0x8ad   : > { %14011 = vmatprep.subr.mxu1 %v13649_v25  ;;  %13941 = vmatpush2.msra.mxu0 %v13520_v45  ;;  %v14036_v40 = vld [vmem:[%s21955_s5 + $0x30] sm:$0xff]  ;;  %v14071_v5 = vld [vmem:[%s21955_s5 + $0x148] sm:$0xff]  ;;  %v14085_v15 = vld [vmem:[%s21955_s5 + $0x1b8] sm:$0xff] }
 0x8ae   : > { %14012 = vmatpush2.msra.mxu1 %v13648_v39  ;;  %13942 = vmatprep.subr.mxu0 %v13517_v13  ;;  %v14035_v10 = vld [vmem:[%s21955_s5 + $0x28] sm:$0xff]  ;;  %v14049_v47 = vld [vmem:[%s21955_s5 + $0x98] sm:$0xff]  ;;  %v14084_v25 = vld [vmem:[%s21955_s5 + $0x1b0] sm:$0xff] }
 0x8af   : > { %14013 = vmatprep.subr.mxu1 %v13645_v8  ;;  %13943 = vmatpush2.msra.mxu0 %v13516_v53  ;;  %v14069_v23 = vld [vmem:[%s21955_s5 + $0x138] sm:$0xff]  ;;  %v14048_v45 = vld [vmem:[%s21955_s5 + $0x90] sm:$0xff]  ;;  %v14083_v8 = vld [vmem:[%s21955_s5 + $0x1a8] sm:$0xff] }
 0x8b0   : > { %14014 = vmatpush2.msra.mxu1 %v13644_v6  ;;  %13944 = vmatprep.subr.mxu0 %v13513_v14  ;;  %v14033_v20 = vld [vmem:[%s21955_s5 + $0x18] sm:$0xff]  ;;  %v14068_v39 = vld [vmem:[%s21955_s5 + $0x130] sm:$0xff]  ;;  %v14047_v53 = vld [vmem:[%s21955_s5 + $0x88] sm:$0xff] }
 0x8b1   : > { %14015 = vmatprep.subr.mxu1 %v13641_v31  ;;  %13945 = vmatpush2.msra.mxu0 %v13512_v49  ;;  %v14032_v13 = vld [vmem:[%s21955_s5 + $0x10] sm:$0xff]  ;;  %v14067_v6 = vld [vmem:[%s21955_s5 + $0x128] sm:$0xff]  ;;  %v14046_v31 = vld [vmem:[%s21955_s5 + $0x80] sm:$0xff] }
 0x8b2   : > { %14016 = vmatpush2.msra.mxu1 %v13640_v37  ;;  %13946 = vmatprep.subr.mxu0 %v13509_v44  ;;  %v14031_v14 = vld [vmem:[%s21955_s5 + $0x8] sm:$0xff]  ;;  %v14030_v49 = vld [vmem:[%s21955_s5] sm:$0xff] }
 0x8b3   : > { %14017 = vmatprep.subr.mxu1 %v13637_v27  ;;  %13947 = vmatpush2.msra.mxu0 %v13508_v19  ;;  %v14082_v37 = vld [vmem:[%s21955_s5 + $0x1a0] sm:$0xff]  ;;  %v14081_v27 = vld [vmem:[%s21955_s5 + $0x198] sm:$0xff] }
 0x8b4   : > { %13948 = vmatprep.mubr.f32.mxu0 %v21711_v17  ;;  %14018 = vmatpush2.msra.mxu1 %v13636_v18  ;;  %v14044_v17 = vld [vmem:[%s21955_s5 + $0x70] sm:$0xff]  ;;  %v14066_v44 = vld [vmem:[%s21955_s5 + $0x120] sm:$0xff]  ;;  %v14065_v19 = vld [vmem:[%s21955_s5 + $0x118] sm:$0xff] }
 0x8b5   : > { %14019 = vmatprep.mubr.f32.mxu1 %v21715_v63  ;;  %13949 = vmatmul.mubr.f32.vlgmr.msra.gmra.mxu0 %v21704_v55  ;;  %v14059_v63 = vld [vmem:[%s21955_s5 + $0xe8] sm:$0xff]  ;;  %v14080_v18 = vld [vmem:[%s21955_s5 + $0x190] sm:$0xff] }
 0x8b6   : > { %14020 = vmatmul.mubr.f32.vlgmr.msra.gmra.mxu1 %v21707_v35  ;;  %16115 = vmatprep.subr.mxu0 %v14061_v33  ;;  %v14043_v55 = vld [vmem:[%s21955_s5 + $0x68] sm:$0xff]  ;;  %v14058_v35 = vld [vmem:[%s21955_s5 + $0xe0] sm:$0xff]  ;;  %v14064_v33 = vld [vmem:[%s21955_s5 + $0x110] sm:$0xff] }
 0x8b7   : > { %16116 = vmatpush3.msra.mxu0 %v14045_v3  ;;  %16150 = vmatprep.subr.mxu1 %v14093_v21  ;;  %v14079_v3 = vld [vmem:[%s21955_s5 + $0x188] sm:$0xff] }
 0x8b8   : > { %16117 = vmatprep.subr.mxu0 %v14060_v9  ;;  %16151 = vmatpush3.msra.mxu1 %v14077_v11  ;;  %v14063_v9 = vld [vmem:[%s21955_s5 + $0x108] sm:$0xff] }
 0x8b9   : > { %16118 = vmatpush3.msra.mxu0 %v14044_v17  ;;  %16152 = vmatprep.subr.mxu1 %v14092_v24  ;;  %v14078_v17 = vld [vmem:[%s21955_s5 + $0x180] sm:$0xff] }
 0x8ba   : > { %16119 = vmatprep.subr.mxu0 %v14059_v63  ;;  %16153 = vmatpush3.msra.mxu1 %v14076_v0  ;;  %v14062_v63 = vld [vmem:[%s21955_s5 + $0x100] sm:$0xff] }
 0x8bb   : > { %16120 = vmatpush3.msra.mxu0 %v14043_v55  ;;  %16154 = vmatprep.subr.mxu1 %v14091_v30  ;;  %v13698_v55 = vld [vmem:[#allocation11] sm:$0xf] }
 0x8bc   : > { %16121 = vmatprep.subr.mxu0 %v14058_v35  ;;  %16155 = vmatpush3.msra.mxu1 %v14075_v32  ;;  %v13703_v35 = vrot.slane %v13698_v55, %v13408_v57  ;;  %v13711_v32 = vrot.slane %v13698_v55, %v13416_v61  ;;  %v13715_v57 = vrot.slane %v13698_v55, %v13420_v51 }
 0x8bd   : > { %16122 = vmatpush3.msra.mxu0 %v14042_v52  ;;  %16156 = vmatprep.subr.mxu1 %v14090_v38  ;;  %v13707_v52 = vrot.slane %v13698_v55, %v13412_v54 }
 0x8be   : > { %16123 = vmatprep.subr.mxu0 %v14057_v58  ;;  %16157 = vmatpush3.msra.mxu1 %v14074_v60 }
 0x8bf   : > { %16124 = vmatpush3.msra.mxu0 %v14041_v12  ;;  %16158 = vmatprep.subr.mxu1 %v14089_v7 }
 0x8c0   : > { %16125 = vmatprep.subr.mxu0 %v14056_v42  ;;  %16159 = vmatpush3.msra.mxu1 %v14073_v43 }
 0x8c1   : > { %16126 = vmatpush3.msra.mxu0 %v14040_v26  ;;  %16160 = vmatprep.subr.mxu1 %v14088_v22 }
 0x8c2   : > { %16127 = vmatprep.subr.mxu0 %v14055_v46  ;;  %16161 = vmatpush3.msra.mxu1 %v14072_v28 }
 0x8c3   : > { %16128 = vmatpush3.msra.mxu0 %v14039_v41  ;;  %16162 = vmatprep.subr.mxu1 %v14087_v48 }
 0x8c4   : > { %16129 = vmatprep.subr.mxu0 %v14054_v1  ;;  %16163 = vmatpush3.msra.mxu1 %v14071_v5 }
 0x8c5   : > { %16130 = vmatpush3.msra.mxu0 %v14038_v2  ;;  %16164 = vmatprep.subr.mxu1 %v14086_v34 }
 0x8c6   : > { %16131 = vmatprep.subr.mxu0 %v14053_v16  ;;  %16165 = vmatpush3.msra.mxu1 %v14070_v50 }
 0x8c7   : > { %16132 = vmatpush3.msra.mxu0 %v14037_v56  ;;  %16166 = vmatprep.subr.mxu1 %v14085_v15 }
 0x8c8   : > { %16133 = vmatprep.subr.mxu0 %v14052_v59  ;;  %16167 = vmatpush3.msra.mxu1 %v14069_v23 }
 0x8c9   : > { %16134 = vmatpush3.msra.mxu0 %v14036_v40  ;;  %16168 = vmatprep.subr.mxu1 %v14084_v25  ;;  %v16106_v40 = vld [vmem:[#allocation12] ss:$0 sm:$0xff] }
 0x8ca   : > { %16135 = vmatprep.subr.mxu0 %v14051_v62  ;;  %16169 = vmatpush3.msra.mxu1 %v14068_v39 }
 0x8cb   : > { %16136 = vmatpush3.msra.mxu0 %v14035_v10  ;;  %16170 = vmatprep.subr.mxu1 %v14083_v8 }
 0x8cc   : > { %16137 = vmatprep.subr.mxu0 %v14050_v36  ;;  %16171 = vmatpush3.msra.mxu1 %v14067_v6 }
 0x8cd   : > { %16138 = vmatpush3.msra.mxu0 %v14034_v4  ;;  %16172 = vmatprep.subr.mxu1 %v14082_v37 }
 0x8ce   : > { %16139 = vmatprep.subr.mxu0 %v14049_v47  ;;  %16173 = vmatpush3.msra.mxu1 %v14066_v44 }
 0x8cf   : > { %16140 = vmatpush3.msra.mxu0 %v14033_v20  ;;  %16174 = vmatprep.subr.mxu1 %v14081_v27 }
 0x8d0   : > { %16141 = vmatprep.subr.mxu0 %v14048_v45  ;;  %16175 = vmatpush3.msra.mxu1 %v14065_v19 }
 0x8d1   : > { %16142 = vmatpush3.msra.mxu0 %v14032_v13  ;;  %16176 = vmatprep.subr.mxu1 %v14080_v18 }
 0x8d2   : > { %16143 = vmatprep.subr.mxu0 %v14047_v53  ;;  %16177 = vmatpush3.msra.mxu1 %v14064_v33 }
 0x8d3   : > { %16144 = vmatpush3.msra.mxu0 %v14031_v14  ;;  %16178 = vmatprep.subr.mxu1 %v14079_v3 }
 0x8d4   : > { %16145 = vmatprep.subr.mxu0 %v14046_v31  ;;  %16179 = vmatpush3.msra.mxu1 %v14063_v9 }
 0x8d5   : > { %16146 = vmatpush3.msra.mxu0 %v14030_v49  ;;  %16180 = vmatprep.subr.mxu1 %v14078_v17 }
 0x8d6   : > { %16181 = vmatpush3.msra.mxu1 %v14062_v63 }
 0x933   : > { %v13808_v58 = vpop.f32.mrf.mxu0 }
 0x934   : > { %v13809_v12 = vadd.f32 %v13808_v58, %v13703_v35 }
 0x935   : > { %v13879_v21 = vpop.f32.mrf.mxu1  ;;  %v13810_v11 = vpop.f32.mrf.mxu0 }
 0x936   : > { %v13811_v24 = vadd.f32 %v13810_v11, %v13707_v52  ;;  %v13880_v42 = vadd.f32 %v13879_v21, %v13809_v12 }
 0x937   : > { %v13881_v0 = vpop.f32.mrf.mxu1 }
 0x938   : > { %v13882_v26 = vadd.f32 %v13881_v0, %v13811_v24  ;;  %v14026_v46 = vmax.f32 %v13880_v42, 0.0 }
 0x93a   : > { %v14027_v30 = vmax.f32 %v13882_v26, 0.0 }
 0x93c   : > { %14165 = vmatprep.mubr.f32.mxu0 %v14027_v30 }
 0x93d   : > { %14166 = vmatmul.mubr.f32.vlgmr.msra.gmra.mxu0 %v14026_v46 }
 0x975   : > { %v13950_v41 = vpop.f32.mrf.mxu0 }
 0x976   : > { %v14021_v54 = vpop.f32.mrf.mxu1  ;;  %v13951_v38 = vadd.f32 %v13950_v41, %v13711_v32 }
 0x977   : > { %v13952_v1 = vpop.f32.mrf.mxu0 }
 0x978   : > { %v13953_v60 = vadd.f32 %v13952_v1, %v13715_v57  ;;  %v14022_v2 = vadd.f32 %v14021_v54, %v13951_v38  ;;  %v14023_v7 = vpop.f32.mrf.mxu1 }
 0x97a   : > { %v14024_v16 = vadd.f32 %v14023_v7, %v13953_v60  ;;  %v14028_v56 = vmax.f32 %v14022_v2, 0.0 }
 0x97c   : > { %v14029_v43 = vmax.f32 %v14024_v16, 0.0 }
 0x97e   : > { %14235 = vmatprep.mubr.f32.mxu1 %v14029_v43 }
 0x97f   : > { %14236 = vmatmul.mubr.f32.vlgmr.msra.gmra.mxu1 %v14028_v56 }
 0x9fd   : > { %v16147_v22 = vpop.f32.mrf.mxu0 }
 0x9ff   : > { %v16148_v59 = vpop.f32.mrf.mxu0 }
 0xa00   : > { %v16149_v28 = vadd.f32 %v16148_v59, %v16147_v22 }
 0xa02   : > { %v14168_v29 = vadd.f32 %v16149_v28, %v16106_v40 }
 0xa3f   : > { %v16182_v61 = vpop.f32.mrf.mxu1 }
 0xa41   : > { %v16183_v48 = vpop.f32.mrf.mxu1 }
 0xa42   : > { %v16184_v51 = vadd.f32 %v16183_v48, %v16182_v61 }
 0xa44   : > { %v14238_v62 = vadd.f32 %v16184_v51, %v14168_v29 }
 0xa46   : > { %14242 = vst.msk [vmem:[#allocation14] sm:$0x3] %vm14241_vm0, %v14238_v62 }
 0xa47 PF: > { %p16242_p2 = scmp.eq.s32.totalorder %s19202_s30, 3  ;;  %s19140_s9 = smov [#allocation14]  }
 0xa48   : > { %s14250_s10 = sshll.u32 %s19140_s9, 4  ;;  %s14251_s10 = int_to_ptr.vmem [resolvable:$true] %s14250_s10 }
 0xa49   : > { %s19047_s12 = scalar_lea.vmem %s14251_s10, 32  ;;  %p19054_p5 = scmp.lt.s32.totalorder %s14251_s10, %s14251_s10 }
 0xa4a   : > { %p19048_p8 = scmp.ne.s32.totalorder %s14251_s10, %s19047_s12  ;;  %p19055_p4 = scmp.lt.s32.totalorder %s19047_s12, %s19047_s12 }
 0xa4c   : > { %p19049_p1 = pnand %p19048_p8, %p16242_p2  ;;  %p19056_p6 = por %p19055_p4, %p19054_p5 }
 0xa4e   : > { %p19050_p3 = pneg %p19049_p1 }
 0xa50   : > { %p19057_p0 = pnand %p19056_p6, %p19050_p3 }
 0xa52   : > { %19060 = shalt.err (!%p19057_p0)
}
 0xa53   : > { %16210 = dma.vmem_to_hbm [thread:$0]  (%p16242_p2), %s14251_s10, 32, %s21957_s7, [#allocation5]  }
 0xa54   : > { %19108 = dma.done.wait (%p16242_p2), [#allocation5], 32  }
 0xa55   : > { %19110 = vsyncadd (%p16242_p2), [#allocation5], 4294967264 }
 0xa56 PF: > { %p23_p7 = scmp.ge.s32.totalorder %s19269_s13, 6   ;;  %s22009_s24 = smov %s19117_s25 }
 0xa57   : > { %s22010_s25 = smov %s19121_s26  ;;  %s22011_s26 = smov %s19281_s17 }
 0xa58   : > { %s22012_s27 = smov %s19269_s13  ;;  %25 = sbr.rel (!%p23_p7) target bundleno = 8 (0x8), region = 122 }
 0xa5d   :  { %14263 = vsyncpa [#allocation4], 1 }
 0xa5e   :  { %14265 = vsyncpa [#allocation4 + $0x1], 1 }
 0xa5f   :  { %14266 = vsyncpa [#allocation7], 1 }
 0xa60   :  { %14268 = vsyncpa [#allocation7 + $0x1], 1 }
 0xa61   :  { %14269 = vsyncpa [#allocation10], 1 }
 0xa62   :  { %14270 = vsyncpa [#allocation13], 1 }
 0xa63   :  { %14271 = vsyncpa [#allocation5], 1 }
 0xa64   :  { %14273 = vsyncpa [#allocation5 + $0x1], 1 }

</bundles_post_ra>
